<compile_context>
chip_gen: v6e
topology: v6e:2x2x1
jax: 0.10.0
libtpu: 0.0.40
codegen_flags: <defaults>
</compile_context>

<pallas_src>
import functools

import jax
import jax.numpy as jnp
from jax.experimental import pallas as pl
from jax.experimental.pallas import tpu as pltpu


def _round_up(x, m):
    return (x + m - 1) // m * m


# --------------------------------------------------------------------------
# Pallas kernels: tiled matmul with fused bias + activation epilogue (MXU)
# --------------------------------------------------------------------------
def _apply_act_f32(out, activation):
    if activation == "relu":
        return jnp.maximum(out, 0.0)
    if activation == "sigmoid":
        return 1.0 / (1.0 + jnp.exp(-out))
    return out


def _matmul_single_kernel(a_ref, b_ref, bias_ref, o_ref, *, activation):
    # Whole K reduction fits in a single grid step: no scratch accumulator.
    out = jnp.dot(a_ref[...], b_ref[...], preferred_element_type=jnp.float32)
    out = out + bias_ref[...]
    o_ref[...] = _apply_act_f32(out, activation).astype(o_ref.dtype)


def _matmul_acc_kernel(a_ref, b_ref, bias_ref, o_ref, acc_ref, *, activation):
    @pl.when(pl.program_id(2) == 0)
    def _():
        acc_ref[...] = jnp.zeros_like(acc_ref)

    acc_ref[...] += jnp.dot(a_ref[...], b_ref[...],
                            preferred_element_type=jnp.float32)

    @pl.when(pl.program_id(2) == pl.num_programs(2) - 1)
    def _():
        out = acc_ref[...] + bias_ref[...]
        o_ref[...] = _apply_act_f32(out, activation).astype(o_ref.dtype)


def matmul_bias_act(a, b, bias=None, activation="none",
                    tm=256, tn=128, tk_max=1024):
    """out = act(a @ b + bias); a:[M,K], b:[K,N], bias:[N] or None."""
    M, K = a.shape
    Kb, N = b.shape
    assert K == Kb
    tm = min(tm, _round_up(M, 8))
    tn = min(tn, _round_up(N, 128))
    tk = min(tk_max, _round_up(K, 128))
    Mp, Kp, Np = _round_up(M, tm), _round_up(K, tk), _round_up(N, tn)

    if bias is None:
        bias2d = jnp.zeros((1, Np), jnp.float32)
    else:
        bias2d = bias.reshape(1, N).astype(jnp.float32)
        if Np != N:
            bias2d = jnp.pad(bias2d, ((0, 0), (0, Np - N)))

    a_p = a if (Mp == M and Kp == K) else jnp.pad(a, ((0, Mp - M), (0, Kp - K)))
    b_p = b if (Kp == K and Np == N) else jnp.pad(b, ((0, Kp - K), (0, Np - N)))

    nk = Kp // tk
    if nk == 1:
        grid = (Mp // tm, Np // tn)
        kernel = functools.partial(_matmul_single_kernel, activation=activation)
        in_specs = [
            pl.BlockSpec((tm, Kp), lambda i, j: (i, 0)),
            pl.BlockSpec((Kp, tn), lambda i, j: (0, j)),
            pl.BlockSpec((1, tn), lambda i, j: (0, j)),
        ]
        out_specs = pl.BlockSpec((tm, tn), lambda i, j: (i, j))
        scratch = []
        dims = ("parallel", "parallel")
    else:
        grid = (Mp // tm, Np // tn, nk)
        kernel = functools.partial(_matmul_acc_kernel, activation=activation)
        in_specs = [
            pl.BlockSpec((tm, tk), lambda i, j, k: (i, k)),
            pl.BlockSpec((tk, tn), lambda i, j, k: (k, j)),
            pl.BlockSpec((1, tn), lambda i, j, k: (0, j)),
        ]
        out_specs = pl.BlockSpec((tm, tn), lambda i, j, k: (i, j))
        scratch = [pltpu.VMEM((tm, tn), jnp.float32)]
        dims = ("parallel", "parallel", "arbitrary")

    out = pl.pallas_call(
        kernel,
        out_shape=jax.ShapeDtypeStruct((Mp, Np), jnp.float32),
        grid_spec=pltpu.PrefetchScalarGridSpec(
            num_scalar_prefetch=0,
            grid=grid,
            in_specs=in_specs,
            out_specs=out_specs,
            scratch_shapes=scratch,
        ),
        compiler_params=pltpu.CompilerParams(dimension_semantics=dims),
    )(a_p, b_p, bias2d)

    if Mp != M or Np != N:
        out = out[:M, :N]
    return out


# --------------------------------------------------------------------------
# Pallas kernel: fused per-channel scale/shift + ReLU (BatchNorm apply)
# --------------------------------------------------------------------------
def _scale_shift_relu_kernel(x_ref, scale_ref, shift_ref, o_ref):
    o_ref[...] = jnp.maximum(x_ref[...] * scale_ref[...] + shift_ref[...], 0.0)


def scale_shift_relu(x2d, scale, shift, tm=1024):
    M, C = x2d.shape
    tm = min(tm, _round_up(M, 8))
    Mp = _round_up(M, tm)
    x_p = x2d if Mp == M else jnp.pad(x2d, ((0, Mp - M), (0, 0)))
    out = pl.pallas_call(
        _scale_shift_relu_kernel,
        out_shape=jax.ShapeDtypeStruct((Mp, C), x2d.dtype),
        grid_spec=pltpu.PrefetchScalarGridSpec(
            num_scalar_prefetch=0,
            grid=(Mp // tm,),
            in_specs=[
                pl.BlockSpec((tm, C), lambda i: (i, 0)),
                pl.BlockSpec((1, C), lambda i: (0, 0)),
                pl.BlockSpec((1, C), lambda i: (0, 0)),
            ],
            out_specs=pl.BlockSpec((tm, C), lambda i: (i, 0)),
        ),
        compiler_params=pltpu.CompilerParams(dimension_semantics=("parallel",)),
    )(x_p, scale.reshape(1, C), shift.reshape(1, C))
    return out if Mp == M else out[:M]


# --------------------------------------------------------------------------
# Layer helpers
# --------------------------------------------------------------------------
def _im2col_3x3(x_nhwc):
    N, H, W, C = x_nhwc.shape
    xp = jnp.pad(x_nhwc, ((0, 0), (1, 1), (1, 1), (0, 0)))
    cols = []
    for dh in range(3):
        for dw in range(3):
            cols.append(xp[:, dh:dh + H, dw:dw + W, :])
    return jnp.concatenate(cols, axis=-1)  # [N, H, W, 9*C]


def _apply_act(y, activation):
    if activation == "relu":
        return jnp.maximum(y, 0.0)
    if activation == "sigmoid":
        return 1.0 / (1.0 + jnp.exp(-y))
    return y


class _PallasOps:
    @staticmethod
    def conv3x3(x, w, b, activation):
        N, H, W, Cin = x.shape
        kh, kw, _, Cout = w.shape
        patches = _im2col_3x3(x).reshape(N * H * W, kh * kw * Cin)
        out = matmul_bias_act(patches, w.reshape(kh * kw * Cin, Cout), b, activation)
        return out.reshape(N, H, W, Cout)

    @staticmethod
    def conv1x1(x, w, activation):
        N, H, W, Cin = x.shape
        out = matmul_bias_act(x.reshape(N * H * W, Cin), w, None, activation)
        return out.reshape(N, H, W, -1)

    @staticmethod
    def linear(x2d, w, activation):
        return matmul_bias_act(x2d, w, None, activation)

    @staticmethod
    def bn_relu(x, gamma, beta, eps=1e-5):
        # training-mode BatchNorm: batch statistics over (N, H, W)
        N, H, W, C = x.shape
        x2d = x.reshape(N * H * W, C)
        mean = jnp.mean(x2d, axis=0)
        var = jnp.var(x2d, axis=0)
        scale = gamma * jax.lax.rsqrt(var + eps)
        shift = beta - mean * scale
        return scale_shift_relu(x2d, scale, shift).reshape(N, H, W, C)


class _RefOps:  # pure-JAX reference (for verification)
    @staticmethod
    def conv3x3(x, w, b, activation):
        out = jax.lax.conv_general_dilated(
            x, w, window_strides=(1, 1), padding="SAME",
            dimension_numbers=("NHWC", "HWIO", "NHWC"),
            precision=jax.lax.Precision.HIGHEST)
        if b is not None:
            out = out + b
        return _apply_act(out, activation)

    @staticmethod
    def conv1x1(x, w, activation):
        out = jnp.einsum("nhwc,cd->nhwd", x, w,
                         precision=jax.lax.Precision.HIGHEST)
        return _apply_act(out, activation)

    @staticmethod
    def linear(x2d, w, activation):
        return _apply_act(
            jnp.dot(x2d, w, precision=jax.lax.Precision.HIGHEST), activation)

    @staticmethod
    def bn_relu(x, gamma, beta, eps=1e-5):
        mean = jnp.mean(x, axis=(0, 1, 2))
        var = jnp.var(x, axis=(0, 1, 2))
        y = (x - mean) * jax.lax.rsqrt(var + eps) * gamma + beta
        return jnp.maximum(y, 0.0)


# --------------------------------------------------------------------------
# Model forward (shared structure, NHWC)
# --------------------------------------------------------------------------
def scam_forward(x, p, ops):
    # spatial attention: concat(channel-max, channel-mean) -> conv3x3 -> sigmoid
    mx = jnp.max(x, axis=-1, keepdims=True)
    me = jnp.mean(x, axis=-1, keepdims=True)
    compress = jnp.concatenate([mx, me], axis=-1)        # [N,H,W,2]
    scale = ops.conv3x3(compress, p["sa_w"], None, "sigmoid")
    sa = x * scale
    # channel attention: global avg pool -> 1x1 -> ReLU -> 1x1 -> sigmoid
    y = jnp.mean(x, axis=(1, 2))                         # [N, C]
    y = ops.linear(y, p["ca_w1"], "relu")
    y = ops.linear(y, p["ca_w2"], "sigmoid")
    ca = x * y[:, None, None, :]
    # fuse branches: conv1x1 on concat, residual add
    res = ops.conv1x1(jnp.concatenate([sa, ca], axis=-1), p["w1x1"], "none")
    return res + x


def drb_forward(x, p, ops):
    inputs = x
    out = x
    for bp in p["blocks"]:
        out = ops.conv3x3(inputs, bp["w"], bp["b"], "none")
        out = ops.bn_relu(out, bp["gamma"], bp["beta"])
        inputs = jnp.concatenate([inputs, out], axis=-1)
    return scam_forward(out, p["dua_in"], ops) + scam_forward(x, p["dua_res"], ops)


def rrdb_forward(x, p, ops):
    out = x
    for dp in p["drbs"]:
        out = drb_forward(out, dp, ops)
    return scam_forward(out, p["dua_in"], ops) + scam_forward(x, p["dua_res"], ops)


# --------------------------------------------------------------------------
# Parameter init (deterministic, matches module's shapes; act = ReLU default)
# --------------------------------------------------------------------------
def init_scam_params(key, nf, reduction=24):
    k = jax.random.split(key, 4)
    nf_r = max(nf // reduction, 1)   # nf=24, reduction=24 -> 1 (same as PyTorch)
    return dict(
        sa_w=jax.random.normal(k[0], (3, 3, 2, 1), jnp.float32) * (1.0 / 18.0 ** 0.5),
        ca_w1=jax.random.normal(k[1], (nf, nf_r), jnp.float32) * (1.0 / nf ** 0.5),
        ca_w2=jax.random.normal(k[2], (nf_r, nf), jnp.float32) * (1.0 / nf_r ** 0.5),
        w1x1=jax.random.normal(k[3], (2 * nf, nf), jnp.float32) * (1.0 / (2 * nf) ** 0.5),
    )


def init_block_params(key, in_nf, nf):
    k = jax.random.split(key, 4)
    fan_in = 9 * in_nf
    return dict(
        w=jax.random.normal(k[0], (3, 3, in_nf, nf), jnp.float32) * (1.0 / fan_in ** 0.5),
        b=0.1 * jax.random.normal(k[1], (nf,), jnp.float32),
        gamma=1.0 + 0.1 * jax.random.normal(k[2], (nf,), jnp.float32),
        beta=0.1 * jax.random.normal(k[3], (nf,), jnp.float32),
    )


def init_drb_params(key, nf):
    k = jax.random.split(key, 6)
    return dict(
        blocks=[init_block_params(k[i], (i + 1) * nf, nf) for i in range(4)],
        dua_in=init_scam_params(k[4], nf),
        dua_res=init_scam_params(k[5], nf),
    )


def init_rrdb_params(key, nf):
    k = jax.random.split(key, 5)
    return dict(
        drbs=[init_drb_params(k[i], nf) for i in range(3)],
        dua_in=init_scam_params(k[3], nf),
        dua_res=init_scam_params(k[4], nf),
    )


# --------------------------------------------------------------------------
if __name__ == "__main__":
    key = jax.random.PRNGKey(0)
    kx, kp = jax.random.split(key)

    # nf must be >= reduction (24) for the channel-attention bottleneck,
    # exactly as in the PyTorch module.  Small shapes: N=2, nf=24, 16x16.
    N, nf, H, W = 2, 24, 16, 16
    x_nchw = jax.random.normal(kx, (N, nf, H, W), jnp.float32)
    params = init_rrdb_params(kp, nf)

    @jax.jit
    def run_pallas(x_nchw, params):
        x = jnp.transpose(x_nchw, (0, 2, 3, 1))          # NCHW -> NHWC
        y = rrdb_forward(x, params, _PallasOps)
        return jnp.transpose(y, (0, 3, 1, 2))            # NHWC -> NCHW

    @jax.jit
    def run_ref(x_nchw, params):
        x = jnp.transpose(x_nchw, (0, 2, 3, 1))
        y = rrdb_forward(x, params, _RefOps)
        return jnp.transpose(y, (0, 3, 1, 2))

    y = jax.block_until_ready(run_pallas(x_nchw, params))
    y_ref = jax.block_until_ready(run_ref(x_nchw, params))

    assert y.shape == x_nchw.shape and y.dtype == x_nchw.dtype
    max_err = float(jnp.max(jnp.abs(y - y_ref)))
    assert jnp.allclose(y, y_ref, atol=1e-2, rtol=1e-2), \
        f"mismatch vs reference (max abs err {max_err})"

    # TODO(synk): BatchNorm uses training-mode batch statistics (PyTorch default
    # for a freshly constructed module); eval-mode running stats not modeled.
    print("KERNEL_OK")
</pallas_src>

<mosaic_0001>
module attributes {stable_mosaic.version = 11 : i64} {
  func.func @_matmul_single_kernel(%arg0: i32, %arg1: i32, %arg2: memref<256x128xf32, #tpu.memory_space<vmem>>, %arg3: memref<128x128xf32, #tpu.memory_space<vmem>>, %arg4: memref<1x128xf32, #tpu.memory_space<vmem>>, %arg5: memref<256x128xf32, #tpu.memory_space<vmem>>) attributes {dimension_semantics = [#tpu.dimension_semantics<parallel>, #tpu.dimension_semantics<parallel>], iteration_bounds = array<i64: 2, 1>, scalar_prefetch = 0 : i64, scratch_operands = 0 : i64, tpu.core_type = #tpu.core_type<tc>, window_params = [{transform_indices = @transform_0, window_bounds = array<i64: 256, 128>}, {transform_indices = @transform_1, window_bounds = array<i64: 128, 128>}, {transform_indices = @transform_2, window_bounds = array<i64: 1, 128>}, {transform_indices = @transform_3, window_bounds = array<i64: 256, 128>}]} {
    %c0 = arith.constant 0 : index
    %c0_0 = arith.constant 0 : index
    %0 = vector.load %arg2[%c0, %c0_0] : memref<256x128xf32, #tpu.memory_space<vmem>>, vector<256x128xf32>
    %c0_1 = arith.constant 0 : index
    %c0_2 = arith.constant 0 : index
    %1 = vector.load %arg3[%c0_1, %c0_2] : memref<128x128xf32, #tpu.memory_space<vmem>>, vector<128x128xf32>
    %cst = arith.constant dense<0.000000e+00> : vector<256x128xf32>
    %2 = tpu.matmul %0, %1, %cst {dimension_numbers = #tpu.dot_dimension_numbers<[1], [0], [0], [1], [0, 0, 1, 1], [], []>} : vector<256x128xf32>, vector<128x128xf32>, vector<256x128xf32> -> vector<256x128xf32>
    %c0_3 = arith.constant 0 : index
    %c0_4 = arith.constant 0 : index
    %3 = vector.load %arg4[%c0_3, %c0_4] : memref<1x128xf32, #tpu.memory_space<vmem>>, vector<1x128xf32>
    %4 = vector.broadcast %3 : vector<1x128xf32> to vector<256x128xf32>
    %5 = arith.addf %2, %4 : vector<256x128xf32>
    %cst_5 = arith.constant 0.000000e+00 : f32
    %6 = vector.broadcast %cst_5 : f32 to vector<256x128xf32>
    %7 = arith.subf %6, %5 : vector<256x128xf32>
    %8 = math.exp %7 : vector<256x128xf32>
    %cst_6 = arith.constant 1.000000e+00 : f32
    %9 = vector.broadcast %cst_6 : f32 to vector<256x128xf32>
    %10 = arith.addf %9, %8 : vector<256x128xf32>
    %cst_7 = arith.constant 1.000000e+00 : f32
    %11 = vector.broadcast %cst_7 : f32 to vector<256x128xf32>
    %12 = arith.divf %11, %10 : vector<256x128xf32>
    %c0_8 = arith.constant 0 : index
    %c0_9 = arith.constant 0 : index
    %13 = vector.load %arg5[%c0_8, %c0_9] : memref<256x128xf32, #tpu.memory_space<vmem>>, vector<256x128xf32>
    tpu.vector_store %arg5[%c0_8, %c0_9], %12 {strides = array<i32>} : memref<256x128xf32, #tpu.memory_space<vmem>>, vector<256x128xf32>,
    return
  }
  func.func @transform_0(%arg0: i32, %arg1: i32) -> (i32, i32) {
    %c0_i32 = arith.constant 0 : i32
    %c0_i32_0 = arith.constant 0 : i32
    return %arg0, %c0_i32 : i32, i32
  }
  func.func @transform_1(%arg0: i32, %arg1: i32) -> (i32, i32) {
    %c0_i32 = arith.constant 0 : i32
    %c0_i32_0 = arith.constant 0 : i32
    return %c0_i32, %arg1 : i32, i32
  }
  func.func @transform_2(%arg0: i32, %arg1: i32) -> (i32, i32) {
    %c0_i32 = arith.constant 0 : i32
    %c0_i32_0 = arith.constant 0 : i32
    return %c0_i32, %arg1 : i32, i32
  }
  func.func @transform_3(%arg0: i32, %arg1: i32) -> (i32, i32) {
    %c0_i32 = arith.constant 0 : i32
    return %arg0, %arg1 : i32, i32
  }
}

module attributes {stable_mosaic.version = 11 : i64} {
  func.func @_matmul_single_kernel(%arg0: i32, %arg1: i32, %arg2: memref<8x128xf32, #tpu.memory_space<vmem>>, %arg3: memref<128x128xf32, #tpu.memory_space<vmem>>, %arg4: memref<1x128xf32, #tpu.memory_space<vmem>>, %arg5: memref<8x128xf32, #tpu.memory_space<vmem>>) attributes {dimension_semantics = [#tpu.dimension_semantics<parallel>, #tpu.dimension_semantics<parallel>], iteration_bounds = array<i64: 1, 1>, scalar_prefetch = 0 : i64, scratch_operands = 0 : i64, tpu.core_type = #tpu.core_type<tc>, window_params = [{transform_indices = @transform_0, window_bounds = array<i64: 8, 128>}, {transform_indices = @transform_1, window_bounds = array<i64: 128, 128>}, {transform_indices = @transform_2, window_bounds = array<i64: 1, 128>}, {transform_indices = @transform_3, window_bounds = array<i64: 8, 128>}]} {
    %c0 = arith.constant 0 : index
    %c0_0 = arith.constant 0 : index
    %0 = vector.load %arg2[%c0, %c0_0] : memref<8x128xf32, #tpu.memory_space<vmem>>, vector<8x128xf32>
    %c0_1 = arith.constant 0 : index
    %c0_2 = arith.constant 0 : index
    %1 = vector.load %arg3[%c0_1, %c0_2] : memref<128x128xf32, #tpu.memory_space<vmem>>, vector<128x128xf32>
    %cst = arith.constant dense<0.000000e+00> : vector<8x128xf32>
    %2 = tpu.matmul %0, %1, %cst {dimension_numbers = #tpu.dot_dimension_numbers<[1], [0], [0], [1], [0, 0, 1, 1], [], []>} : vector<8x128xf32>, vector<128x128xf32>, vector<8x128xf32> -> vector<8x128xf32>
    %c0_3 = arith.constant 0 : index
    %c0_4 = arith.constant 0 : index
    %3 = vector.load %arg4[%c0_3, %c0_4] : memref<1x128xf32, #tpu.memory_space<vmem>>, vector<1x128xf32>
    %4 = vector.broadcast %3 : vector<1x128xf32> to vector<8x128xf32>
    %5 = arith.addf %2, %4 : vector<8x128xf32>
    %cst_5 = arith.constant 0.000000e+00 : f32
    %6 = vector.broadcast %cst_5 : f32 to vector<8x128xf32>
    %7 = arith.subf %6, %5 : vector<8x128xf32>
    %8 = math.exp %7 : vector<8x128xf32>
    %cst_6 = arith.constant 1.000000e+00 : f32
    %9 = vector.broadcast %cst_6 : f32 to vector<8x128xf32>
    %10 = arith.addf %9, %8 : vector<8x128xf32>
    %cst_7 = arith.constant 1.000000e+00 : f32
    %11 = vector.broadcast %cst_7 : f32 to vector<8x128xf32>
    %12 = arith.divf %11, %10 : vector<8x128xf32>
    %c0_8 = arith.constant 0 : index
    %c0_9 = arith.constant 0 : index
    %13 = vector.load %arg5[%c0_8, %c0_9] : memref<8x128xf32, #tpu.memory_space<vmem>>, vector<8x128xf32>
    tpu.vector_store %arg5[%c0_8, %c0_9], %12 {strides = array<i32>} : memref<8x128xf32, #tpu.memory_space<vmem>>, vector<8x128xf32>,
    return
  }
  func.func @transform_0(%arg0: i32, %arg1: i32) -> (i32, i32) {
    %c0_i32 = arith.constant 0 : i32
    %c0_i32_0 = arith.constant 0 : i32
    return %arg0, %c0_i32 : i32, i32
  }
  func.func @transform_1(%arg0: i32, %arg1: i32) -> (i32, i32) {
    %c0_i32 = arith.constant 0 : i32
    %c0_i32_0 = arith.constant 0 : i32
    return %c0_i32, %arg1 : i32, i32
  }
  func.func @transform_2(%arg0: i32, %arg1: i32) -> (i32, i32) {
    %c0_i32 = arith.constant 0 : i32
    %c0_i32_0 = arith.constant 0 : i32
    return %c0_i32, %arg1 : i32, i32
  }
  func.func @transform_3(%arg0: i32, %arg1: i32) -> (i32, i32) {
    %c0_i32 = arith.constant 0 : i32
    return %arg0, %arg1 : i32, i32
  }
}

module attributes {stable_mosaic.version = 11 : i64} {
  func.func @_matmul_single_kernel(%arg0: i32, %arg1: i32, %arg2: memref<8x128xf32, #tpu.memory_space<vmem>>, %arg3: memref<128x128xf32, #tpu.memory_space<vmem>>, %arg4: memref<1x128xf32, #tpu.memory_space<vmem>>, %arg5: memref<8x128xf32, #tpu.memory_space<vmem>>) attributes {dimension_semantics = [#tpu.dimension_semantics<parallel>, #tpu.dimension_semantics<parallel>], iteration_bounds = array<i64: 1, 1>, scalar_prefetch = 0 : i64, scratch_operands = 0 : i64, tpu.core_type = #tpu.core_type<tc>, window_params = [{transform_indices = @transform_0, window_bounds = array<i64: 8, 128>}, {transform_indices = @transform_1, window_bounds = array<i64: 128, 128>}, {transform_indices = @transform_2, window_bounds = array<i64: 1, 128>}, {transform_indices = @transform_3, window_bounds = array<i64: 8, 128>}]} {
    %c0 = arith.constant 0 : index
    %c0_0 = arith.constant 0 : index
    %0 = vector.load %arg2[%c0, %c0_0] : memref<8x128xf32, #tpu.memory_space<vmem>>, vector<8x128xf32>
    %c0_1 = arith.constant 0 : index
    %c0_2 = arith.constant 0 : index
    %1 = vector.load %arg3[%c0_1, %c0_2] : memref<128x128xf32, #tpu.memory_space<vmem>>, vector<128x128xf32>
    %cst = arith.constant dense<0.000000e+00> : vector<8x128xf32>
    %2 = tpu.matmul %0, %1, %cst {dimension_numbers = #tpu.dot_dimension_numbers<[1], [0], [0], [1], [0, 0, 1, 1], [], []>} : vector<8x128xf32>, vector<128x128xf32>, vector<8x128xf32> -> vector<8x128xf32>
    %c0_3 = arith.constant 0 : index
    %c0_4 = arith.constant 0 : index
    %3 = vector.load %arg4[%c0_3, %c0_4] : memref<1x128xf32, #tpu.memory_space<vmem>>, vector<1x128xf32>
    %4 = vector.broadcast %3 : vector<1x128xf32> to vector<8x128xf32>
    %5 = arith.addf %2, %4 : vector<8x128xf32>
    %cst_5 = arith.constant 0.000000e+00 : f32
    %6 = vector.broadcast %cst_5 : f32 to vector<8x128xf32>
    %7 = arith.maximumf %5, %6 : vector<8x128xf32>
    %c0_6 = arith.constant 0 : index
    %c0_7 = arith.constant 0 : index
    %8 = vector.load %arg5[%c0_6, %c0_7] : memref<8x128xf32, #tpu.memory_space<vmem>>, vector<8x128xf32>
    tpu.vector_store %arg5[%c0_6, %c0_7], %7 {strides = array<i32>} : memref<8x128xf32, #tpu.memory_space<vmem>>, vector<8x128xf32>,
    return
  }
  func.func @transform_0(%arg0: i32, %arg1: i32) -> (i32, i32) {
    %c0_i32 = arith.constant 0 : i32
    %c0_i32_0 = arith.constant 0 : i32
    return %arg0, %c0_i32 : i32, i32
  }
  func.func @transform_1(%arg0: i32, %arg1: i32) -> (i32, i32) {
    %c0_i32 = arith.constant 0 : i32
    %c0_i32_0 = arith.constant 0 : i32
    return %c0_i32, %arg1 : i32, i32
  }
  func.func @transform_2(%arg0: i32, %arg1: i32) -> (i32, i32) {
    %c0_i32 = arith.constant 0 : i32
    %c0_i32_0 = arith.constant 0 : i32
    return %c0_i32, %arg1 : i32, i32
  }
  func.func @transform_3(%arg0: i32, %arg1: i32) -> (i32, i32) {
    %c0_i32 = arith.constant 0 : i32
    return %arg0, %arg1 : i32, i32
  }
}

module attributes {stable_mosaic.version = 11 : i64} {
  func.func @_matmul_single_kernel(%arg0: i32, %arg1: i32, %arg2: memref<256x128xf32, #tpu.memory_space<vmem>>, %arg3: memref<128x128xf32, #tpu.memory_space<vmem>>, %arg4: memref<1x128xf32, #tpu.memory_space<vmem>>, %arg5: memref<256x128xf32, #tpu.memory_space<vmem>>) attributes {dimension_semantics = [#tpu.dimension_semantics<parallel>, #tpu.dimension_semantics<parallel>], iteration_bounds = array<i64: 2, 1>, scalar_prefetch = 0 : i64, scratch_operands = 0 : i64, tpu.core_type = #tpu.core_type<tc>, window_params = [{transform_indices = @transform_0, window_bounds = array<i64: 256, 128>}, {transform_indices = @transform_1, window_bounds = array<i64: 128, 128>}, {transform_indices = @transform_2, window_bounds = array<i64: 1, 128>}, {transform_indices = @transform_3, window_bounds = array<i64: 256, 128>}]} {
    %c0 = arith.constant 0 : index
    %c0_0 = arith.constant 0 : index
    %0 = vector.load %arg2[%c0, %c0_0] : memref<256x128xf32, #tpu.memory_space<vmem>>, vector<256x128xf32>
    %c0_1 = arith.constant 0 : index
    %c0_2 = arith.constant 0 : index
    %1 = vector.load %arg3[%c0_1, %c0_2] : memref<128x128xf32, #tpu.memory_space<vmem>>, vector<128x128xf32>
    %cst = arith.constant dense<0.000000e+00> : vector<256x128xf32>
    %2 = tpu.matmul %0, %1, %cst {dimension_numbers = #tpu.dot_dimension_numbers<[1], [0], [0], [1], [0, 0, 1, 1], [], []>} : vector<256x128xf32>, vector<128x128xf32>, vector<256x128xf32> -> vector<256x128xf32>
    %c0_3 = arith.constant 0 : index
    %c0_4 = arith.constant 0 : index
    %3 = vector.load %arg4[%c0_3, %c0_4] : memref<1x128xf32, #tpu.memory_space<vmem>>, vector<1x128xf32>
    %4 = vector.broadcast %3 : vector<1x128xf32> to vector<256x128xf32>
    %5 = arith.addf %2, %4 : vector<256x128xf32>
    %c0_5 = arith.constant 0 : index
    %c0_6 = arith.constant 0 : index
    %6 = vector.load %arg5[%c0_5, %c0_6] : memref<256x128xf32, #tpu.memory_space<vmem>>, vector<256x128xf32>
    tpu.vector_store %arg5[%c0_5, %c0_6], %5 {strides = array<i32>} : memref<256x128xf32, #tpu.memory_space<vmem>>, vector<256x128xf32>,
    return
  }
  func.func @transform_0(%arg0: i32, %arg1: i32) -> (i32, i32) {
    %c0_i32 = arith.constant 0 : i32
    %c0_i32_0 = arith.constant 0 : i32
    return %arg0, %c0_i32 : i32, i32
  }
  func.func @transform_1(%arg0: i32, %arg1: i32) -> (i32, i32) {
    %c0_i32 = arith.constant 0 : i32
    %c0_i32_0 = arith.constant 0 : i32
    return %c0_i32, %arg1 : i32, i32
  }
  func.func @transform_2(%arg0: i32, %arg1: i32) -> (i32, i32) {
    %c0_i32 = arith.constant 0 : i32
    %c0_i32_0 = arith.constant 0 : i32
    return %c0_i32, %arg1 : i32, i32
  }
  func.func @transform_3(%arg0: i32, %arg1: i32) -> (i32, i32) {
    %c0_i32 = arith.constant 0 : i32
    return %arg0, %arg1 : i32, i32
  }
}

module attributes {stable_mosaic.version = 11 : i64} {
  func.func @_matmul_single_kernel(%arg0: i32, %arg1: i32, %arg2: memref<256x256xf32, #tpu.memory_space<vmem>>, %arg3: memref<256x128xf32, #tpu.memory_space<vmem>>, %arg4: memref<1x128xf32, #tpu.memory_space<vmem>>, %arg5: memref<256x128xf32, #tpu.memory_space<vmem>>) attributes {dimension_semantics = [#tpu.dimension_semantics<parallel>, #tpu.dimension_semantics<parallel>], iteration_bounds = array<i64: 2, 1>, scalar_prefetch = 0 : i64, scratch_operands = 0 : i64, tpu.core_type = #tpu.core_type<tc>, window_params = [{transform_indices = @transform_0, window_bounds = array<i64: 256, 256>}, {transform_indices = @transform_1, window_bounds = array<i64: 256, 128>}, {transform_indices = @transform_2, window_bounds = array<i64: 1, 128>}, {transform_indices = @transform_3, window_bounds = array<i64: 256, 128>}]} {
    %c0 = arith.constant 0 : index
    %c0_0 = arith.constant 0 : index
    %0 = vector.load %arg2[%c0, %c0_0] : memref<256x256xf32, #tpu.memory_space<vmem>>, vector<256x256xf32>
    %c0_1 = arith.constant 0 : index
    %c0_2 = arith.constant 0 : index
    %1 = vector.load %arg3[%c0_1, %c0_2] : memref<256x128xf32, #tpu.memory_space<vmem>>, vector<256x128xf32>
    %cst = arith.constant dense<0.000000e+00> : vector<256x128xf32>
    %2 = tpu.matmul %0, %1, %cst {dimension_numbers = #tpu.dot_dimension_numbers<[1], [0], [0], [1], [0, 0, 1, 1], [], []>} : vector<256x256xf32>, vector<256x128xf32>, vector<256x128xf32> -> vector<256x128xf32>
    %c0_3 = arith.constant 0 : index
    %c0_4 = arith.constant 0 : index
    %3 = vector.load %arg4[%c0_3, %c0_4] : memref<1x128xf32, #tpu.memory_space<vmem>>, vector<1x128xf32>
    %4 = vector.broadcast %3 : vector<1x128xf32> to vector<256x128xf32>
    %5 = arith.addf %2, %4 : vector<256x128xf32>
    %c0_5 = arith.constant 0 : index
    %c0_6 = arith.constant 0 : index
    %6 = vector.load %arg5[%c0_5, %c0_6] : memref<256x128xf32, #tpu.memory_space<vmem>>, vector<256x128xf32>
    tpu.vector_store %arg5[%c0_5, %c0_6], %5 {strides = array<i32>} : memref<256x128xf32, #tpu.memory_space<vmem>>, vector<256x128xf32>,
    return
  }
  func.func @transform_0(%arg0: i32, %arg1: i32) -> (i32, i32) {
    %c0_i32 = arith.constant 0 : i32
    %c0_i32_0 = arith.constant 0 : i32
    return %arg0, %c0_i32 : i32, i32
  }
  func.func @transform_1(%arg0: i32, %arg1: i32) -> (i32, i32) {
    %c0_i32 = arith.constant 0 : i32
    %c0_i32_0 = arith.constant 0 : i32
    return %c0_i32, %arg1 : i32, i32
  }
  func.func @transform_2(%arg0: i32, %arg1: i32) -> (i32, i32) {
    %c0_i32 = arith.constant 0 : i32
    %c0_i32_0 = arith.constant 0 : i32
    return %c0_i32, %arg1 : i32, i32
  }
  func.func @transform_3(%arg0: i32, %arg1: i32) -> (i32, i32) {
    %c0_i32 = arith.constant 0 : i32
    return %arg0, %arg1 : i32, i32
  }
}

module attributes {stable_mosaic.version = 11 : i64} {
  func.func @_scale_shift_relu_kernel(%arg0: i32, %arg1: memref<512x24xf32, #tpu.memory_space<vmem>>, %arg2: memref<1x24xf32, #tpu.memory_space<vmem>>, %arg3: memref<1x24xf32, #tpu.memory_space<vmem>>, %arg4: memref<512x24xf32, #tpu.memory_space<vmem>>) attributes {dimension_semantics = [#tpu.dimension_semantics<parallel>], iteration_bounds = array<i64: 1>, scalar_prefetch = 0 : i64, scratch_operands = 0 : i64, tpu.core_type = #tpu.core_type<tc>, window_params = [{transform_indices = @transform_0, window_bounds = array<i64: 512, 24>}, {pipeline_mode = #tpu.pipeline_mode<synchronous>, transform_indices = @transform_1, window_bounds = array<i64: 1, 24>}, {pipeline_mode = #tpu.pipeline_mode<synchronous>, transform_indices = @transform_2, window_bounds = array<i64: 1, 24>}, {transform_indices = @transform_3, window_bounds = array<i64: 512, 24>}]} {
    %c0 = arith.constant 0 : index
    %c0_0 = arith.constant 0 : index
    %0 = vector.load %arg1[%c0, %c0_0] : memref<512x24xf32, #tpu.memory_space<vmem>>, vector<512x24xf32>
    %c0_1 = arith.constant 0 : index
    %c0_2 = arith.constant 0 : index
    %1 = vector.load %arg2[%c0_1, %c0_2] : memref<1x24xf32, #tpu.memory_space<vmem>>, vector<1x24xf32>
    %2 = vector.broadcast %1 : vector<1x24xf32> to vector<512x24xf32>
    %3 = arith.mulf %0, %2 : vector<512x24xf32>
    %c0_3 = arith.constant 0 : index
    %c0_4 = arith.constant 0 : index
    %4 = vector.load %arg3[%c0_3, %c0_4] : memref<1x24xf32, #tpu.memory_space<vmem>>, vector<1x24xf32>
    %5 = vector.broadcast %4 : vector<1x24xf32> to vector<512x24xf32>
    %6 = arith.addf %3, %5 : vector<512x24xf32>
    %cst = arith.constant 0.000000e+00 : f32
    %7 = vector.broadcast %cst : f32 to vector<512x24xf32>
    %8 = arith.maximumf %6, %7 : vector<512x24xf32>
    %c0_5 = arith.constant 0 : index
    %c0_6 = arith.constant 0 : index
    %9 = vector.load %arg4[%c0_5, %c0_6] : memref<512x24xf32, #tpu.memory_space<vmem>>, vector<512x24xf32>
    tpu.vector_store %arg4[%c0_5, %c0_6], %8 {strides = array<i32>} : memref<512x24xf32, #tpu.memory_space<vmem>>, vector<512x24xf32>,
    return
  }
  func.func @transform_0(%arg0: i32) -> (i32, i32) {
    %c0_i32 = arith.constant 0 : i32
    %c0_i32_0 = arith.constant 0 : i32
    return %arg0, %c0_i32 : i32, i32
  }
  func.func @transform_1(%arg0: i32) -> (i32, i32) {
    %c0_i32 = arith.constant 0 : i32
    %c0_i32_0 = arith.constant 0 : i32
    %c0_i32_1 = arith.constant 0 : i32
    return %c0_i32, %c0_i32_0 : i32, i32
  }
  func.func @transform_2(%arg0: i32) -> (i32, i32) {
    %c0_i32 = arith.constant 0 : i32
    %c0_i32_0 = arith.constant 0 : i32
    %c0_i32_1 = arith.constant 0 : i32
    return %c0_i32, %c0_i32_0 : i32, i32
  }
  func.func @transform_3(%arg0: i32) -> (i32, i32) {
    %c0_i32 = arith.constant 0 : i32
    %c0_i32_0 = arith.constant 0 : i32
    return %arg0, %c0_i32 : i32, i32
  }
}

module attributes {stable_mosaic.version = 11 : i64} {
  func.func @_matmul_single_kernel(%arg0: i32, %arg1: i32, %arg2: memref<256x512xf32, #tpu.memory_space<vmem>>, %arg3: memref<512x128xf32, #tpu.memory_space<vmem>>, %arg4: memref<1x128xf32, #tpu.memory_space<vmem>>, %arg5: memref<256x128xf32, #tpu.memory_space<vmem>>) attributes {dimension_semantics = [#tpu.dimension_semantics<parallel>, #tpu.dimension_semantics<parallel>], iteration_bounds = array<i64: 2, 1>, scalar_prefetch = 0 : i64, scratch_operands = 0 : i64, tpu.core_type = #tpu.core_type<tc>, window_params = [{transform_indices = @transform_0, window_bounds = array<i64: 256, 512>}, {transform_indices = @transform_1, window_bounds = array<i64: 512, 128>}, {transform_indices = @transform_2, window_bounds = array<i64: 1, 128>}, {transform_indices = @transform_3, window_bounds = array<i64: 256, 128>}]} {
    %c0 = arith.constant 0 : index
    %c0_0 = arith.constant 0 : index
    %0 = vector.load %arg2[%c0, %c0_0] : memref<256x512xf32, #tpu.memory_space<vmem>>, vector<256x512xf32>
    %c0_1 = arith.constant 0 : index
    %c0_2 = arith.constant 0 : index
    %1 = vector.load %arg3[%c0_1, %c0_2] : memref<512x128xf32, #tpu.memory_space<vmem>>, vector<512x128xf32>
    %cst = arith.constant dense<0.000000e+00> : vector<256x128xf32>
    %2 = tpu.matmul %0, %1, %cst {dimension_numbers = #tpu.dot_dimension_numbers<[1], [0], [0], [1], [0, 0, 1, 1], [], []>} : vector<256x512xf32>, vector<512x128xf32>, vector<256x128xf32> -> vector<256x128xf32>
    %c0_3 = arith.constant 0 : index
    %c0_4 = arith.constant 0 : index
    %3 = vector.load %arg4[%c0_3, %c0_4] : memref<1x128xf32, #tpu.memory_space<vmem>>, vector<1x128xf32>
    %4 = vector.broadcast %3 : vector<1x128xf32> to vector<256x128xf32>
    %5 = arith.addf %2, %4 : vector<256x128xf32>
    %c0_5 = arith.constant 0 : index
    %c0_6 = arith.constant 0 : index
    %6 = vector.load %arg5[%c0_5, %c0_6] : memref<256x128xf32, #tpu.memory_space<vmem>>, vector<256x128xf32>
    tpu.vector_store %arg5[%c0_5, %c0_6], %5 {strides = array<i32>} : memref<256x128xf32, #tpu.memory_space<vmem>>, vector<256x128xf32>,
    return
  }
  func.func @transform_0(%arg0: i32, %arg1: i32) -> (i32, i32) {
    %c0_i32 = arith.constant 0 : i32
    %c0_i32_0 = arith.constant 0 : i32
    return %arg0, %c0_i32 : i32, i32
  }
  func.func @transform_1(%arg0: i32, %arg1: i32) -> (i32, i32) {
    %c0_i32 = arith.constant 0 : i32
    %c0_i32_0 = arith.constant 0 : i32
    return %c0_i32, %arg1 : i32, i32
  }
  func.func @transform_2(%arg0: i32, %arg1: i32) -> (i32, i32) {
    %c0_i32 = arith.constant 0 : i32
    %c0_i32_0 = arith.constant 0 : i32
    return %c0_i32, %arg1 : i32, i32
  }
  func.func @transform_3(%arg0: i32, %arg1: i32) -> (i32, i32) {
    %c0_i32 = arith.constant 0 : i32
    return %arg0, %arg1 : i32, i32
  }
}

module attributes {stable_mosaic.version = 11 : i64} {
  func.func @_matmul_single_kernel(%arg0: i32, %arg1: i32, %arg2: memref<256x768xf32, #tpu.memory_space<vmem>>, %arg3: memref<768x128xf32, #tpu.memory_space<vmem>>, %arg4: memref<1x128xf32, #tpu.memory_space<vmem>>, %arg5: memref<256x128xf32, #tpu.memory_space<vmem>>) attributes {dimension_semantics = [#tpu.dimension_semantics<parallel>, #tpu.dimension_semantics<parallel>], iteration_bounds = array<i64: 2, 1>, scalar_prefetch = 0 : i64, scratch_operands = 0 : i64, tpu.core_type = #tpu.core_type<tc>, window_params = [{transform_indices = @transform_0, window_bounds = array<i64: 256, 768>}, {transform_indices = @transform_1, window_bounds = array<i64: 768, 128>}, {transform_indices = @transform_2, window_bounds = array<i64: 1, 128>}, {transform_indices = @transform_3, window_bounds = array<i64: 256, 128>}]} {
    %c0 = arith.constant 0 : index
    %c0_0 = arith.constant 0 : index
    %0 = vector.load %arg2[%c0, %c0_0] : memref<256x768xf32, #tpu.memory_space<vmem>>, vector<256x768xf32>
    %c0_1 = arith.constant 0 : index
    %c0_2 = arith.constant 0 : index
    %1 = vector.load %arg3[%c0_1, %c0_2] : memref<768x128xf32, #tpu.memory_space<vmem>>, vector<768x128xf32>
    %cst = arith.constant dense<0.000000e+00> : vector<256x128xf32>
    %2 = tpu.matmul %0, %1, %cst {dimension_numbers = #tpu.dot_dimension_numbers<[1], [0], [0], [1], [0, 0, 1, 1], [], []>} : vector<256x768xf32>, vector<768x128xf32>, vector<256x128xf32> -> vector<256x128xf32>
    %c0_3 = arith.constant 0 : index
    %c0_4 = arith.constant 0 : index
    %3 = vector.load %arg4[%c0_3, %c0_4] : memref<1x128xf32, #tpu.memory_space<vmem>>, vector<1x128xf32>
    %4 = vector.broadcast %3 : vector<1x128xf32> to vector<256x128xf32>
    %5 = arith.addf %2, %4 : vector<256x128xf32>
    %c0_5 = arith.constant 0 : index
    %c0_6 = arith.constant 0 : index
    %6 = vector.load %arg5[%c0_5, %c0_6] : memref<256x128xf32, #tpu.memory_space<vmem>>, vector<256x128xf32>
    tpu.vector_store %arg5[%c0_5, %c0_6], %5 {strides = array<i32>} : memref<256x128xf32, #tpu.memory_space<vmem>>, vector<256x128xf32>,
    return
  }
  func.func @transform_0(%arg0: i32, %arg1: i32) -> (i32, i32) {
    %c0_i32 = arith.constant 0 : i32
    %c0_i32_0 = arith.constant 0 : i32
    return %arg0, %c0_i32 : i32, i32
  }
  func.func @transform_1(%arg0: i32, %arg1: i32) -> (i32, i32) {
    %c0_i32 = arith.constant 0 : i32
    %c0_i32_0 = arith.constant 0 : i32
    return %c0_i32, %arg1 : i32, i32
  }
  func.func @transform_2(%arg0: i32, %arg1: i32) -> (i32, i32) {
    %c0_i32 = arith.constant 0 : i32
    %c0_i32_0 = arith.constant 0 : i32
    return %c0_i32, %arg1 : i32, i32
  }
  func.func @transform_3(%arg0: i32, %arg1: i32) -> (i32, i32) {
    %c0_i32 = arith.constant 0 : i32
    return %arg0, %arg1 : i32, i32
  }
}

module attributes {stable_mosaic.version = 11 : i64} {
  func.func @_matmul_single_kernel(%arg0: i32, %arg1: i32, %arg2: memref<256x896xf32, #tpu.memory_space<vmem>>, %arg3: memref<896x128xf32, #tpu.memory_space<vmem>>, %arg4: memref<1x128xf32, #tpu.memory_space<vmem>>, %arg5: memref<256x128xf32, #tpu.memory_space<vmem>>) attributes {dimension_semantics = [#tpu.dimension_semantics<parallel>, #tpu.dimension_semantics<parallel>], iteration_bounds = array<i64: 2, 1>, scalar_prefetch = 0 : i64, scratch_operands = 0 : i64, tpu.core_type = #tpu.core_type<tc>, window_params = [{transform_indices = @transform_0, window_bounds = array<i64: 256, 896>}, {transform_indices = @transform_1, window_bounds = array<i64: 896, 128>}, {transform_indices = @transform_2, window_bounds = array<i64: 1, 128>}, {transform_indices = @transform_3, window_bounds = array<i64: 256, 128>}]} {
    %c0 = arith.constant 0 : index
    %c0_0 = arith.constant 0 : index
    %0 = vector.load %arg2[%c0, %c0_0] : memref<256x896xf32, #tpu.memory_space<vmem>>, vector<256x896xf32>
    %c0_1 = arith.constant 0 : index
    %c0_2 = arith.constant 0 : index
    %1 = vector.load %arg3[%c0_1, %c0_2] : memref<896x128xf32, #tpu.memory_space<vmem>>, vector<896x128xf32>
    %cst = arith.constant dense<0.000000e+00> : vector<256x128xf32>
    %2 = tpu.matmul %0, %1, %cst {dimension_numbers = #tpu.dot_dimension_numbers<[1], [0], [0], [1], [0, 0, 1, 1], [], []>} : vector<256x896xf32>, vector<896x128xf32>, vector<256x128xf32> -> vector<256x128xf32>
    %c0_3 = arith.constant 0 : index
    %c0_4 = arith.constant 0 : index
    %3 = vector.load %arg4[%c0_3, %c0_4] : memref<1x128xf32, #tpu.memory_space<vmem>>, vector<1x128xf32>
    %4 = vector.broadcast %3 : vector<1x128xf32> to vector<256x128xf32>
    %5 = arith.addf %2, %4 : vector<256x128xf32>
    %c0_5 = arith.constant 0 : index
    %c0_6 = arith.constant 0 : index
    %6 = vector.load %arg5[%c0_5, %c0_6] : memref<256x128xf32, #tpu.memory_space<vmem>>, vector<256x128xf32>
    tpu.vector_store %arg5[%c0_5, %c0_6], %5 {strides = array<i32>} : memref<256x128xf32, #tpu.memory_space<vmem>>, vector<256x128xf32>,
    return
  }
  func.func @transform_0(%arg0: i32, %arg1: i32) -> (i32, i32) {
    %c0_i32 = arith.constant 0 : i32
    %c0_i32_0 = arith.constant 0 : i32
    return %arg0, %c0_i32 : i32, i32
  }
  func.func @transform_1(%arg0: i32, %arg1: i32) -> (i32, i32) {
    %c0_i32 = arith.constant 0 : i32
    %c0_i32_0 = arith.constant 0 : i32
    return %c0_i32, %arg1 : i32, i32
  }
  func.func @transform_2(%arg0: i32, %arg1: i32) -> (i32, i32) {
    %c0_i32 = arith.constant 0 : i32
    %c0_i32_0 = arith.constant 0 : i32
    return %c0_i32, %arg1 : i32, i32
  }
  func.func @transform_3(%arg0: i32, %arg1: i32) -> (i32, i32) {
    %c0_i32 = arith.constant 0 : i32
    return %arg0, %arg1 : i32, i32
  }
}

</mosaic_0001>

<bundles_post_ra>
// kernel: mul.105
= control target key start
LH: loop header
LB: loop body
LE: loop exit
PB: predicated region body
PF: predicated region fallthrough
CT: control target
= control target key end

     0   :  { %s67_s8 = smov 80   ;;  %vm8_vm0 = vcmask 130048   ;;  %s68_s11 = smov 96   ;;  %s118_s0 = inlined_call_operand.vmem [shape: f32[512], index: 0, kind: input, shape index: {}]   ;;  %s119_s1 = inlined_call_operand.vmem [shape: f32[2,16,16], index: 1, kind: output, shape index: {}]  }
   0x1   :  { %v5_v0 = vld [vmem:[%s118_s0] sm:$0xf]  ;;  %s66_s0 = smov 112   ;;  %s69_s12 = smov 64  }
   0x2   :  { %6 = vst [vmem:[#allocation0] sm:$0xf] %v5_v0  ;;  %s70_s13 = smov 48   ;;  %s71_s14 = smov 32  }
   0x3   :  { %s72_s15 = smov 16  }
   0x9   :  { %v10_v1 = vld [vmem:[#allocation0] sm:$0xf]  }
   0xa   :  { %v22_v2 = vld [vmem:[#allocation0] sm:$0xf]   ;;  %11 = vrot.lane.b32.xlu0 %v10_v1, %s66_s0 }
   0xb   :  { %23 = vrot.lane.b32.xlu1 %v22_v2, %s67_s8  ;;  %v16_v3 = vld [vmem:[#allocation0] sm:$0xf]  }
   0xc   :  { %v28_v4 = vld [vmem:[#allocation0] sm:$0xf]  }
   0xd   :  { %v7_v5 = vld [vmem:[#allocation0] sm:$0xf]  }
   0xe   :  { %9 = vst.msk [vmem:[%s119_s1] ss:$8 sm:$0xf] %vm8_vm0, %v7_v5   ;;  %17 = vrot.lane.b32.xlu0 %v16_v3, %s68_s11  ;;  %v34_v6 = vld [vmem:[#allocation0] sm:$0xf]  }
   0xf   :  { %29 = vrot.lane.b32.xlu1 %v28_v4, %s69_s12  ;;  %v40_v7 = vld [vmem:[#allocation0] sm:$0xf]  }
  0x10   :  { %v46_v8 = vld [vmem:[#allocation0] sm:$0xf]  }
  0x12   :  { %35 = vrot.lane.b32.xlu0 %v34_v6, %s70_s13 }
  0x13   :  { %41 = vrot.lane.b32.xlu1 %v40_v7, %s71_s14 }
  0x16   :  { %47 = vrot.lane.b32.xlu0 %v46_v8, %s72_s15 }
  0x7c   :  { %v12_v9 = vpop.permute.xlu0 %11  }
  0x7d   :  { %v24_v10 = vpop.permute.xlu1 %23   ;;  %52 = vst.msk [vmem:[%s119_s1 + $0x1] ss:$8 sm:$0xf] %vm8_vm0, %v12_v9  }
  0x7e   :  { %54 = vst.msk [vmem:[%s119_s1 + $0x3] ss:$8 sm:$0xf] %vm8_vm0, %v24_v10  }
  0x80   :  { %v18_v11 = vpop.permute.xlu0 %17  }
  0x81   :  { %v30_v12 = vpop.permute.xlu1 %29   ;;  %53 = vst.msk [vmem:[%s119_s1 + $0x2] ss:$8 sm:$0xf] %vm8_vm0, %v18_v11  }
  0x82   :  { %55 = vst.msk [vmem:[%s119_s1 + $0x4] ss:$8 sm:$0xf] %vm8_vm0, %v30_v12  }
  0x84   :  { %v36_v13 = vpop.permute.xlu0 %35  }
  0x85   :  { %v42_v14 = vpop.permute.xlu1 %41   ;;  %56 = vst.msk [vmem:[%s119_s1 + $0x5] ss:$8 sm:$0xf] %vm8_vm0, %v36_v13  }
  0x86   :  { %57 = vst.msk [vmem:[%s119_s1 + $0x6] ss:$8 sm:$0xf] %vm8_vm0, %v42_v14  }
  0x88   :  { %v48_v15 = vpop.permute.xlu0 %47  }
  0x89   :  { %58 = vst.msk [vmem:[%s119_s1 + $0x7] ss:$8 sm:$0xf] %vm8_vm0, %v48_v15  }

// kernel: run_pallas.70
= control target key start
LH: loop header
LB: loop body
LE: loop exit
PB: predicated region body
PF: predicated region fallthrough
CT: control target
= control target key end

     0   :  { %v178_v0 = vmov 0.0   ;;  %vm179_vm0 = vmmov 0   ;;  %s257_s1 = inlined_call_operand.vmem [shape: f32[128,128], index: 1, kind: input, shape index: {}]   ;;  %s258_s0 = inlined_call_operand.vmem [shape: f32[8,128], index: 0, kind: input, shape index: {}]   ;;  %s259_s2 = inlined_call_operand.vmem [shape: f32[1,128], index: 2, kind: input, shape index: {}]   ;;  %s260_s3 = inlined_call_operand.vmem [shape: f32[8,128], index: 3, kind: output, shape index: {}]  }
   0x1   :  { %137 = vmatprep.subr.mxu0 %v178_v0  ;;  %v30_v1 = vld [vmem:[%s257_s1 + $0x78] sm:$0xff]  ;;  %v29_v2 = vld [vmem:[%s257_s1 + $0x70] sm:$0xff]  ;;  %169 = vmatprep.mubr.msk.f32.mxu0 %vm179_vm0, %v178_v0  ;;  %v28_v3 = vld [vmem:[%s257_s1 + $0x68] sm:$0xff] }
   0x2   :  { %138 = vmatpush3.msra.mxu0 %v30_v1  ;;  %v27_v4 = vld [vmem:[%s257_s1 + $0x60] sm:$0xff]  ;;  %v26_v5 = vld [vmem:[%s257_s1 + $0x58] sm:$0xff]  ;;  %v25_v6 = vld [vmem:[%s257_s1 + $0x50] sm:$0xff] }
   0x3   :  { %139 = vmatprep.subr.mxu0 %v178_v0  ;;  %v24_v7 = vld [vmem:[%s257_s1 + $0x48] sm:$0xff]  ;;  %v23_v8 = vld [vmem:[%s257_s1 + $0x40] sm:$0xff]  ;;  %v22_v9 = vld [vmem:[%s257_s1 + $0x38] sm:$0xff] }
   0x4   :  { %140 = vmatpush3.msra.mxu0 %v29_v2  ;;  %v21_v10 = vld [vmem:[%s257_s1 + $0x30] sm:$0xff]  ;;  %v20_v11 = vld [vmem:[%s257_s1 + $0x28] sm:$0xff]  ;;  %v19_v12 = vld [vmem:[%s257_s1 + $0x20] sm:$0xff] }
   0x5   :  { %141 = vmatprep.subr.mxu0 %v178_v0  ;;  %v18_v13 = vld [vmem:[%s257_s1 + $0x18] sm:$0xff]  ;;  %v17_v14 = vld [vmem:[%s257_s1 + $0x10] sm:$0xff]  ;;  %v16_v15 = vld [vmem:[%s257_s1 + $0x8] sm:$0xff] }
   0x6   :  { %142 = vmatpush3.msra.mxu0 %v28_v3  ;;  %v15_v16 = vld [vmem:[%s257_s1] sm:$0xff] }
   0x7   :  { %143 = vmatprep.subr.mxu0 %v178_v0  ;;  %v14_v17 = vld [vmem:[%s258_s0] sm:$0xff] }
   0x8   :  { %144 = vmatpush3.msra.mxu0 %v27_v4  ;;  %v119_v18 = vld [vmem:[%s259_s2] ss:$0 sm:$0xff] }
   0x9   :  { %145 = vmatprep.subr.mxu0 %v178_v0 }
   0xa   :  { %146 = vmatpush3.msra.mxu0 %v26_v5 }
   0xb   :  { %147 = vmatprep.subr.mxu0 %v178_v0 }
   0xc   :  { %148 = vmatpush3.msra.mxu0 %v25_v6 }
   0xd   :  { %149 = vmatprep.subr.mxu0 %v178_v0 }
   0xe   :  { %150 = vmatpush3.msra.mxu0 %v24_v7 }
   0xf   :  { %151 = vmatprep.subr.mxu0 %v178_v0 }
  0x10   :  { %152 = vmatpush3.msra.mxu0 %v23_v8 }
  0x11   :  { %153 = vmatprep.subr.mxu0 %v178_v0 }
  0x12   :  { %154 = vmatpush3.msra.mxu0 %v22_v9 }
  0x13   :  { %155 = vmatprep.subr.mxu0 %v178_v0 }
  0x14   :  { %156 = vmatpush3.msra.mxu0 %v21_v10 }
  0x15   :  { %157 = vmatprep.subr.mxu0 %v178_v0 }
  0x16   :  { %158 = vmatpush3.msra.mxu0 %v20_v11 }
  0x17   :  { %159 = vmatprep.subr.mxu0 %v178_v0 }
  0x18   :  { %160 = vmatpush3.msra.mxu0 %v19_v12 }
  0x19   :  { %161 = vmatprep.subr.mxu0 %v178_v0 }
  0x1a   :  { %162 = vmatpush3.msra.mxu0 %v18_v13 }
  0x1b   :  { %163 = vmatprep.subr.mxu0 %v178_v0 }
  0x1c   :  { %164 = vmatpush3.msra.mxu0 %v17_v14 }
  0x1d   :  { %165 = vmatprep.subr.mxu0 %v178_v0 }
  0x1e   :  { %166 = vmatpush3.msra.mxu0 %v16_v15 }
  0x1f   :  { %167 = vmatprep.subr.mxu0 %v178_v0 }
  0x20   :  { %168 = vmatpush3.msra.mxu0 %v15_v16 }
  0x21   :  { %170 = vmatmul.mubr.f32.vlgmr.msra.gmra.mxu0 %v14_v17 }
  0xe1   :  { %v104_v19 = vpop.f32.mrf.mxu0 }
  0xe2   :  { %v105_v20 = vadd.f32 %v119_v18, %v104_v19 }
  0xe3   :  { %v171_v21 = vpop.f32.mrf.mxu0 }
  0xe4   :  { %v108_v22 = vsub.f32 0.0, %v105_v20 }
  0xe6   :  { %v109_v23 = vmul.f32 1.442695, %v108_v22 }
  0xe8   :  { %174 = vpow2.f32 %v109_v23 }
  0xf5   :  { %v175_v24 = vpop.eup %174 }
  0xf6   :  { %v111_v25 = vadd.f32 1.0, %v175_v24 }
  0xf8   :  { %176 = vrcp.f32 %v111_v25 }
 0x105   :  { %v177_v26 = vpop.eup %176 }
 0x106   :  { %114 = vst [vmem:[%s260_s3] sm:$0xff] %v177_v26 }

// kernel: run_pallas.69
= control target key start
LH: loop header
LB: loop body
LE: loop exit
PB: predicated region body
PF: predicated region fallthrough
CT: control target
= control target key end

     0   :  { %v169_v0 = vmov 0.0   ;;  %vm170_vm0 = vmmov 0   ;;  %s248_s1 = inlined_call_operand.vmem [shape: f32[128,128], index: 1, kind: input, shape index: {}]   ;;  %s249_s0 = inlined_call_operand.vmem [shape: f32[8,128], index: 0, kind: input, shape index: {}]   ;;  %s250_s2 = inlined_call_operand.vmem [shape: f32[1,128], index: 2, kind: input, shape index: {}]   ;;  %s251_s3 = inlined_call_operand.vmem [shape: f32[8,128], index: 3, kind: output, shape index: {}]  }
   0x1   :  { %132 = vmatprep.subr.mxu0 %v169_v0  ;;  %v30_v1 = vld [vmem:[%s248_s1 + $0x78] sm:$0xff]  ;;  %v29_v2 = vld [vmem:[%s248_s1 + $0x70] sm:$0xff]  ;;  %164 = vmatprep.mubr.msk.f32.mxu0 %vm170_vm0, %v169_v0  ;;  %v28_v3 = vld [vmem:[%s248_s1 + $0x68] sm:$0xff] }
   0x2   :  { %133 = vmatpush3.msra.mxu0 %v30_v1  ;;  %v27_v4 = vld [vmem:[%s248_s1 + $0x60] sm:$0xff]  ;;  %v26_v5 = vld [vmem:[%s248_s1 + $0x58] sm:$0xff]  ;;  %v25_v6 = vld [vmem:[%s248_s1 + $0x50] sm:$0xff] }
   0x3   :  { %134 = vmatprep.subr.mxu0 %v169_v0  ;;  %v24_v7 = vld [vmem:[%s248_s1 + $0x48] sm:$0xff]  ;;  %v23_v8 = vld [vmem:[%s248_s1 + $0x40] sm:$0xff]  ;;  %v22_v9 = vld [vmem:[%s248_s1 + $0x38] sm:$0xff] }
   0x4   :  { %135 = vmatpush3.msra.mxu0 %v29_v2  ;;  %v21_v10 = vld [vmem:[%s248_s1 + $0x30] sm:$0xff]  ;;  %v20_v11 = vld [vmem:[%s248_s1 + $0x28] sm:$0xff]  ;;  %v19_v12 = vld [vmem:[%s248_s1 + $0x20] sm:$0xff] }
   0x5   :  { %136 = vmatprep.subr.mxu0 %v169_v0  ;;  %v18_v13 = vld [vmem:[%s248_s1 + $0x18] sm:$0xff]  ;;  %v17_v14 = vld [vmem:[%s248_s1 + $0x10] sm:$0xff]  ;;  %v16_v15 = vld [vmem:[%s248_s1 + $0x8] sm:$0xff] }
   0x6   :  { %137 = vmatpush3.msra.mxu0 %v28_v3  ;;  %v15_v16 = vld [vmem:[%s248_s1] sm:$0xff] }
   0x7   :  { %138 = vmatprep.subr.mxu0 %v169_v0  ;;  %v14_v17 = vld [vmem:[%s249_s0] sm:$0xff] }
   0x8   :  { %139 = vmatpush3.msra.mxu0 %v27_v4  ;;  %v114_v18 = vld [vmem:[%s250_s2] ss:$0 sm:$0xff] }
   0x9   :  { %140 = vmatprep.subr.mxu0 %v169_v0 }
   0xa   :  { %141 = vmatpush3.msra.mxu0 %v26_v5 }
   0xb   :  { %142 = vmatprep.subr.mxu0 %v169_v0 }
   0xc   :  { %143 = vmatpush3.msra.mxu0 %v25_v6 }
   0xd   :  { %144 = vmatprep.subr.mxu0 %v169_v0 }
   0xe   :  { %145 = vmatpush3.msra.mxu0 %v24_v7 }
   0xf   :  { %146 = vmatprep.subr.mxu0 %v169_v0 }
  0x10   :  { %147 = vmatpush3.msra.mxu0 %v23_v8 }
  0x11   :  { %148 = vmatprep.subr.mxu0 %v169_v0 }
  0x12   :  { %149 = vmatpush3.msra.mxu0 %v22_v9 }
  0x13   :  { %150 = vmatprep.subr.mxu0 %v169_v0 }
  0x14   :  { %151 = vmatpush3.msra.mxu0 %v21_v10 }
  0x15   :  { %152 = vmatprep.subr.mxu0 %v169_v0 }
  0x16   :  { %153 = vmatpush3.msra.mxu0 %v20_v11 }
  0x17   :  { %154 = vmatprep.subr.mxu0 %v169_v0 }
  0x18   :  { %155 = vmatpush3.msra.mxu0 %v19_v12 }
  0x19   :  { %156 = vmatprep.subr.mxu0 %v169_v0 }
  0x1a   :  { %157 = vmatpush3.msra.mxu0 %v18_v13 }
  0x1b   :  { %158 = vmatprep.subr.mxu0 %v169_v0 }
  0x1c   :  { %159 = vmatpush3.msra.mxu0 %v17_v14 }
  0x1d   :  { %160 = vmatprep.subr.mxu0 %v169_v0 }
  0x1e   :  { %161 = vmatpush3.msra.mxu0 %v16_v15 }
  0x1f   :  { %162 = vmatprep.subr.mxu0 %v169_v0 }
  0x20   :  { %163 = vmatpush3.msra.mxu0 %v15_v16 }
  0x21   :  { %165 = vmatmul.mubr.f32.vlgmr.msra.gmra.mxu0 %v14_v17 }
  0xe1   :  { %v104_v19 = vpop.f32.mrf.mxu0 }
  0xe2   :  { %v105_v20 = vadd.f32 %v114_v18, %v104_v19 }
  0xe3   :  { %v166_v21 = vpop.f32.mrf.mxu0 }
  0xe4   :  { %v108_v22 = vmax.f32 %v105_v20, 0.0 }
  0xe6   :  { %109 = vst [vmem:[%s251_s3] sm:$0xff] %v108_v22 }

// kernel: run_pallas.68
= control target key start
LH: loop header
LB: loop body
LE: loop exit
PB: predicated region body
PF: predicated region fallthrough
CT: control target
= control target key end

     0   :  { %s1201_s12 = smov 0   ;;  %s1203_s13 = smov 0   ;;  %s1397_s0 = inlined_call_operand.vmem [shape: f32[512,128], index: 0, kind: input, shape index: {}]   ;;  %s1398_s1 = inlined_call_operand.vmem [shape: f32[128,128], index: 1, kind: input, shape index: {}]   ;;  %s1399_s2 = inlined_call_operand.vmem [shape: f32[1,128], index: 2, kind: input, shape index: {}]   ;;  %s1400_s3 = inlined_call_operand.vmem [shape: f32[512,128], index: 3, kind: output, shape index: {}]  }
   0x1   :  { %s1205_s14 = smov 0  }
   0x2 LB: > { %s25_s15 = sadd.s32 1, %s1175_s13  ;;  %p837_p0 = scmp.ge.s32.totalorder %s1179_s14, 1  ;;  %s1179_s14 = sphi %s1205_s14, %s13_s14   ;;  %s1175_s13 = sphi %s1203_s13, %s1402_s13   ;;  %s1171_s12 = sphi %s1201_s12, %s1401_s12  }
   0x3   : > { %p27_p1 = scmp.ge.s32.totalorder %s25_s15, 2  ;;  %p169_p2 = scmp.lt.s32.totalorder %s1179_s14, 3 }
   0x5   : > { %s1404_s15 = smov (%p27_p1, %s25_s15), 0  ;;  %p170_p3 = pnand %p837_p0, %p169_p2 }
   0x6   : > { %s838_s5 = sshll.u32 (!%p170_p3), %s1171_s12, 5 }
   0x7   : > { %173 = sbr.rel (%p170_p3) target bundleno = 328 (0x148), region = 32  ;;  %p204_p4 = scmp.lt.s32.totalorder (!%p170_p3), %s838_s5, 63 }
   0xc   : > { %v272_v0 = vld [vmem:[%s1398_s1 + $0x78] sm:$0xff]  ;;  %v271_v1 = vld [vmem:[%s1398_s1 + $0x70] sm:$0xff]  ;;  %v270_v2 = vld [vmem:[%s1398_s1 + $0x68] sm:$0xff]  ;;  %s1406_s5 = smov (!%p204_p4, %s838_s5), 63 }
   0xd   : > { %893 = vmatprep.subr.mxu0 %v272_v0  ;;  %973 = vmatprep.subr.mxu1 %v272_v0  ;;  %v269_v3 = vld [vmem:[%s1398_s1 + $0x60] sm:$0xff]  ;;  %v268_v4 = vld [vmem:[%s1398_s1 + $0x58] sm:$0xff]  ;;  %v267_v5 = vld [vmem:[%s1398_s1 + $0x50] sm:$0xff]  ;;  %s839_s21 = sshll.u32 %s1406_s5, 3 }
   0xe   : > { %894 = vmatpush3.msra.mxu0 %v272_v0  ;;  %989 = vmatpush3.msra.mxu1 %v272_v0  ;;  %v266_v6 = vld [vmem:[%s1398_s1 + $0x48] sm:$0xff]  ;;  %v265_v7 = vld [vmem:[%s1398_s1 + $0x40] sm:$0xff]  ;;  %v264_v8 = vld [vmem:[%s1398_s1 + $0x38] sm:$0xff]  ;;  %s1275_s26 = scalar_lea.vmem %s1397_s0, %s839_s21  ;;  %s1344_s7 = scalar_lea.vmem %s1400_s3, %s839_s21 }
   0xf   : > { %895 = vmatprep.subr.mxu0 %v271_v1  ;;  %974 = vmatprep.subr.mxu1 %v271_v1  ;;  %v263_v9 = vld [vmem:[%s1398_s1 + $0x30] sm:$0xff]  ;;  %v262_v10 = vld [vmem:[%s1398_s1 + $0x28] sm:$0xff]  ;;  %v261_v11 = vld [vmem:[%s1398_s1 + $0x20] sm:$0xff] }
  0x10   : > { %896 = vmatpush3.msra.mxu0 %v271_v1  ;;  %990 = vmatpush3.msra.mxu1 %v271_v1  ;;  %v260_v12 = vld [vmem:[%s1398_s1 + $0x18] sm:$0xff]  ;;  %v259_v13 = vld [vmem:[%s1398_s1 + $0x10] sm:$0xff]  ;;  %v258_v14 = vld [vmem:[%s1398_s1 + $0x8] sm:$0xff] }
  0x11   : > { %897 = vmatprep.subr.mxu0 %v270_v2  ;;  %975 = vmatprep.subr.mxu1 %v270_v2  ;;  %v257_v15 = vld [vmem:[%s1398_s1] sm:$0xff]  ;;  %v226_v18 = vld [vmem:[%s1275_s26 + $0x8] sm:$0xff]  ;;  %v227_v20 = vld [vmem:[%s1275_s26 + $0x10] sm:$0xff] }
  0x12   : > { %898 = vmatpush3.msra.mxu0 %v270_v2  ;;  %991 = vmatpush3.msra.mxu1 %v270_v2  ;;  %v225_v16 = vld [vmem:[%s1275_s26] sm:$0xff]  ;;  %v242_v19 = vld [vmem:[%s1275_s26 + $0x88] sm:$0xff]  ;;  %v243_v21 = vld [vmem:[%s1275_s26 + $0x90] sm:$0xff] }
  0x13   : > { %899 = vmatprep.subr.mxu0 %v269_v3  ;;  %976 = vmatprep.subr.mxu1 %v269_v3  ;;  %v241_v17 = vld [vmem:[%s1275_s26 + $0x80] sm:$0xff]  ;;  %v228_v22 = vld [vmem:[%s1275_s26 + $0x18] sm:$0xff]  ;;  %v230_v26 = vld [vmem:[%s1275_s26 + $0x28] sm:$0xff] }
  0x14   : > { %900 = vmatpush3.msra.mxu0 %v269_v3  ;;  %992 = vmatpush3.msra.mxu1 %v269_v3  ;;  %v244_v23 = vld [vmem:[%s1275_s26 + $0x98] sm:$0xff]  ;;  %v229_v24 = vld [vmem:[%s1275_s26 + $0x20] sm:$0xff]  ;;  %v246_v27 = vld [vmem:[%s1275_s26 + $0xa8] sm:$0xff] }
  0x15   : > { %901 = vmatprep.subr.mxu0 %v268_v4  ;;  %977 = vmatprep.subr.mxu1 %v268_v4  ;;  %v245_v25 = vld [vmem:[%s1275_s26 + $0xa0] sm:$0xff]  ;;  %v231_v28 = vld [vmem:[%s1275_s26 + $0x30] sm:$0xff]  ;;  %v232_v30 = vld [vmem:[%s1275_s26 + $0x38] sm:$0xff] }
  0x16   : > { %902 = vmatpush3.msra.mxu0 %v268_v4  ;;  %993 = vmatpush3.msra.mxu1 %v268_v4  ;;  %v247_v29 = vld [vmem:[%s1275_s26 + $0xb0] sm:$0xff]  ;;  %v248_v31 = vld [vmem:[%s1275_s26 + $0xb8] sm:$0xff]  ;;  %v233_v32 = vld [vmem:[%s1275_s26 + $0x40] sm:$0xff] }
  0x17   : > { %903 = vmatprep.subr.mxu0 %v267_v5  ;;  %978 = vmatprep.subr.mxu1 %v267_v5  ;;  %v249_v33 = vld [vmem:[%s1275_s26 + $0xc0] sm:$0xff]  ;;  %v234_v34 = vld [vmem:[%s1275_s26 + $0x48] sm:$0xff]  ;;  %v235_v36 = vld [vmem:[%s1275_s26 + $0x50] sm:$0xff] }
  0x18   : > { %904 = vmatpush3.msra.mxu0 %v267_v5  ;;  %994 = vmatpush3.msra.mxu1 %v267_v5  ;;  %v250_v35 = vld [vmem:[%s1275_s26 + $0xc8] sm:$0xff]  ;;  %v251_v37 = vld [vmem:[%s1275_s26 + $0xd0] sm:$0xff]  ;;  %v236_v38 = vld [vmem:[%s1275_s26 + $0x58] sm:$0xff] }
  0x19   : > { %905 = vmatprep.subr.mxu0 %v266_v6  ;;  %979 = vmatprep.subr.mxu1 %v266_v6  ;;  %v252_v39 = vld [vmem:[%s1275_s26 + $0xd8] sm:$0xff]  ;;  %v237_v40 = vld [vmem:[%s1275_s26 + $0x60] sm:$0xff]  ;;  %v238_v42 = vld [vmem:[%s1275_s26 + $0x68] sm:$0xff] }
  0x1a   : > { %906 = vmatpush3.msra.mxu0 %v266_v6  ;;  %995 = vmatpush3.msra.mxu1 %v266_v6  ;;  %v253_v41 = vld [vmem:[%s1275_s26 + $0xe0] sm:$0xff]  ;;  %v254_v43 = vld [vmem:[%s1275_s26 + $0xe8] sm:$0xff]  ;;  %v239_v44 = vld [vmem:[%s1275_s26 + $0x70] sm:$0xff] }
  0x1b   : > { %907 = vmatprep.subr.mxu0 %v265_v7  ;;  %980 = vmatprep.subr.mxu1 %v265_v7  ;;  %v255_v45 = vld [vmem:[%s1275_s26 + $0xf0] sm:$0xff]  ;;  %v240_v46 = vld [vmem:[%s1275_s26 + $0x78] sm:$0xff]  ;;  %v1315_v48 = vld [vmem:[%s1399_s2] ss:$0 sm:$0xff] }
  0x1c   : > { %908 = vmatpush3.msra.mxu0 %v265_v7  ;;  %996 = vmatpush3.msra.mxu1 %v265_v7  ;;  %v256_v47 = vld [vmem:[%s1275_s26 + $0xf8] sm:$0xff] }
  0x1d   : > { %909 = vmatprep.subr.mxu0 %v264_v8  ;;  %981 = vmatprep.subr.mxu1 %v264_v8 }
  0x1e   : > { %910 = vmatpush3.msra.mxu0 %v264_v8  ;;  %997 = vmatpush3.msra.mxu1 %v264_v8 }
  0x1f   : > { %911 = vmatprep.subr.mxu0 %v263_v9  ;;  %982 = vmatprep.subr.mxu1 %v263_v9 }
  0x20   : > { %912 = vmatpush3.msra.mxu0 %v263_v9  ;;  %998 = vmatpush3.msra.mxu1 %v263_v9 }
  0x21   : > { %913 = vmatprep.subr.mxu0 %v262_v10  ;;  %983 = vmatprep.subr.mxu1 %v262_v10 }
  0x22   : > { %914 = vmatpush3.msra.mxu0 %v262_v10  ;;  %999 = vmatpush3.msra.mxu1 %v262_v10 }
  0x23   : > { %915 = vmatprep.subr.mxu0 %v261_v11  ;;  %984 = vmatprep.subr.mxu1 %v261_v11 }
  0x24   : > { %916 = vmatpush3.msra.mxu0 %v261_v11  ;;  %1000 = vmatpush3.msra.mxu1 %v261_v11 }
  0x25   : > { %917 = vmatprep.subr.mxu0 %v260_v12  ;;  %985 = vmatprep.subr.mxu1 %v260_v12 }
  0x26   : > { %918 = vmatpush3.msra.mxu0 %v260_v12  ;;  %1001 = vmatpush3.msra.mxu1 %v260_v12 }
  0x27   : > { %919 = vmatprep.subr.mxu0 %v259_v13  ;;  %986 = vmatprep.subr.mxu1 %v259_v13 }
  0x28   : > { %920 = vmatpush3.msra.mxu0 %v259_v13  ;;  %1002 = vmatpush3.msra.mxu1 %v259_v13 }
  0x29   : > { %921 = vmatprep.subr.mxu0 %v258_v14  ;;  %987 = vmatprep.subr.mxu1 %v258_v14 }
  0x2a   : > { %922 = vmatpush3.msra.mxu0 %v258_v14  ;;  %1003 = vmatpush3.msra.mxu1 %v258_v14 }
  0x2b   : > { %923 = vmatprep.subr.mxu0 %v257_v15  ;;  %988 = vmatprep.subr.mxu1 %v257_v15 }
  0x2c   : > { %924 = vmatpush3.msra.mxu0 %v257_v15  ;;  %1004 = vmatpush3.msra.mxu1 %v257_v15 }
  0x2d   : > { %925 = vmatprep.mubr.f32.mxu0 %v225_v16  ;;  %949 = vmatprep.mubr.f32.mxu1 %v241_v17 }
  0x2e   : > { %926 = vmatmul.mubr.f32.vlgmr.msra.gmra.mxu0 %v226_v18  ;;  %950 = vmatmul.mubr.f32.vlgmr.msra.gmra.mxu1 %v242_v19 }
  0x2f   : > { %928 = vmatprep.mubr.f32.mxu0 %v227_v20  ;;  %952 = vmatprep.mubr.f32.mxu1 %v243_v21 }
  0x32   : > { %929 = vmatmul.mubr.f32.gmra.mxu0 %v228_v22  ;;  %953 = vmatmul.mubr.f32.gmra.mxu1 %v244_v23 }
  0x33   : > { %931 = vmatprep.mubr.f32.mxu0 %v229_v24  ;;  %955 = vmatprep.mubr.f32.mxu1 %v245_v25 }
  0x36   : > { %932 = vmatmul.mubr.f32.gmra.mxu0 %v230_v26  ;;  %956 = vmatmul.mubr.f32.gmra.mxu1 %v246_v27 }
  0x37   : > { %934 = vmatprep.mubr.f32.mxu0 %v231_v28  ;;  %958 = vmatprep.mubr.f32.mxu1 %v247_v29 }
  0x3a   : > { %935 = vmatmul.mubr.f32.gmra.mxu0 %v232_v30  ;;  %959 = vmatmul.mubr.f32.gmra.mxu1 %v248_v31 }
  0x3b   : > { %937 = vmatprep.mubr.f32.mxu0 %v233_v32  ;;  %961 = vmatprep.mubr.f32.mxu1 %v249_v33 }
  0x3e   : > { %938 = vmatmul.mubr.f32.gmra.mxu0 %v234_v34  ;;  %962 = vmatmul.mubr.f32.gmra.mxu1 %v250_v35 }
  0x3f   : > { %940 = vmatprep.mubr.f32.mxu0 %v235_v36  ;;  %964 = vmatprep.mubr.f32.mxu1 %v251_v37 }
  0x42   : > { %941 = vmatmul.mubr.f32.gmra.mxu0 %v236_v38  ;;  %965 = vmatmul.mubr.f32.gmra.mxu1 %v252_v39 }
  0x43   : > { %943 = vmatprep.mubr.f32.mxu0 %v237_v40  ;;  %967 = vmatprep.mubr.f32.mxu1 %v253_v41 }
  0x46   : > { %944 = vmatmul.mubr.f32.gmra.mxu0 %v238_v42  ;;  %968 = vmatmul.mubr.f32.gmra.mxu1 %v254_v43 }
  0x47   : > { %946 = vmatprep.mubr.f32.mxu0 %v239_v44  ;;  %970 = vmatprep.mubr.f32.mxu1 %v255_v45 }
  0x4a   : > { %947 = vmatmul.mubr.f32.gmra.mxu0 %v240_v46  ;;  %971 = vmatmul.mubr.f32.gmra.mxu1 %v256_v47 }
  0xee   : > { %v927_v49 = vpop.f32.mrf.mxu0  ;;  %v951_v50 = vpop.f32.mrf.mxu1 }
  0xef   : > { %v352_v51 = vadd.f32 %v927_v49, %v1315_v48  ;;  %v432_v52 = vadd.f32 %v951_v50, %v1315_v48 }
  0xf0   : > { %v346_v53 = vpop.f32.mrf.mxu0  ;;  %v426_v54 = vpop.f32.mrf.mxu1 }
  0xf1   : > { %v506_v55 = vsub.f32 0.0, %v352_v51  ;;  %v522_v56 = vsub.f32 0.0, %v432_v52  ;;  %v347_v57 = vadd.f32 %v1315_v48, %v346_v53  ;;  %v427_v58 = vadd.f32 %v1315_v48, %v426_v54 }
  0xf2   : > { %v930_v59 = vpop.f32.mrf.mxu0  ;;  %v954_v60 = vpop.f32.mrf.mxu1 }
  0xf3   : > { %v539_v61 = vmul.f32 1.442695, %v506_v55  ;;  %v571_v62 = vmul.f32 1.442695, %v522_v56  ;;  %v505_v63 = vsub.f32 0.0, %v347_v57  ;;  %v521_v0 = vsub.f32 0.0, %v427_v58 }
  0xf4   : > { %v362_v1 = vadd.f32 %v930_v59, %v1315_v48  ;;  %v442_v2 = vadd.f32 %v954_v60, %v1315_v48  ;;  %v356_v3 = vpop.f32.mrf.mxu0  ;;  %v436_v4 = vpop.f32.mrf.mxu1 }
  0xf5   : > { %1029 = vpow2.f32 %v539_v61  ;;  %v537_v5 = vmul.f32 1.442695, %v505_v63  ;;  %v569_v6 = vmul.f32 1.442695, %v521_v0  ;;  %v357_v7 = vadd.f32 %v1315_v48, %v356_v3 }
  0xf6   : > { %1031 = vpow2.f32 %v571_v62  ;;  %v508_v8 = vsub.f32 0.0, %v362_v1  ;;  %v524_v9 = vsub.f32 0.0, %v442_v2  ;;  %v437_v10 = vadd.f32 %v1315_v48, %v436_v4  ;;  %v933_v11 = vpop.f32.mrf.mxu0  ;;  %v957_v12 = vpop.f32.mrf.mxu1 }
  0xf7   : > { %1033 = vpow2.f32 %v537_v5  ;;  %v507_v13 = vsub.f32 0.0, %v357_v7  ;;  %v372_v14 = vadd.f32 %v933_v11, %v1315_v48  ;;  %v452_v15 = vadd.f32 %v957_v12, %v1315_v48 }
  0xf8   : > { %1035 = vpow2.f32 %v569_v6  ;;  %v543_v16 = vmul.f32 1.442695, %v508_v8  ;;  %v575_v17 = vmul.f32 1.442695, %v524_v9  ;;  %v523_v18 = vsub.f32 0.0, %v437_v10  ;;  %v366_v19 = vpop.f32.mrf.mxu0  ;;  %v446_v20 = vpop.f32.mrf.mxu1 }
  0xf9   : > { %v541_v21 = vmul.f32 1.442695, %v507_v13  ;;  %v510_v22 = vsub.f32 0.0, %v372_v14  ;;  %v526_v23 = vsub.f32 0.0, %v452_v15  ;;  %v367_v24 = vadd.f32 %v1315_v48, %v366_v19 }
  0xfa   : > { %1037 = vpow2.f32 %v543_v16  ;;  %v573_v25 = vmul.f32 1.442695, %v523_v18  ;;  %v447_v26 = vadd.f32 %v1315_v48, %v446_v20  ;;  %v936_v27 = vpop.f32.mrf.mxu0  ;;  %v960_v28 = vpop.f32.mrf.mxu1 }
  0xfb   : > { %1039 = vpow2.f32 %v575_v17  ;;  %v547_v29 = vmul.f32 1.442695, %v510_v22  ;;  %v579_v30 = vmul.f32 1.442695, %v526_v23  ;;  %v509_v31 = vsub.f32 0.0, %v367_v24 }
  0xfc   : > { %1041 = vpow2.f32 %v541_v21  ;;  %v525_v32 = vsub.f32 0.0, %v447_v26  ;;  %v382_v33 = vadd.f32 %v936_v27, %v1315_v48  ;;  %v462_v34 = vadd.f32 %v960_v28, %v1315_v48  ;;  %v376_v35 = vpop.f32.mrf.mxu0  ;;  %v456_v36 = vpop.f32.mrf.mxu1 }
  0xfd   : > { %1043 = vpow2.f32 %v573_v25  ;;  %v545_v37 = vmul.f32 1.442695, %v509_v31  ;;  %v377_v38 = vadd.f32 %v1315_v48, %v376_v35  ;;  %v457_v39 = vadd.f32 %v1315_v48, %v456_v36 }
  0xfe   : > { %1045 = vpow2.f32 %v547_v29  ;;  %v577_v40 = vmul.f32 1.442695, %v525_v32  ;;  %v512_v41 = vsub.f32 0.0, %v382_v33  ;;  %v528_v42 = vsub.f32 0.0, %v462_v34  ;;  %v939_v43 = vpop.f32.mrf.mxu0  ;;  %v963_v44 = vpop.f32.mrf.mxu1 }
  0xff   : > { %1047 = vpow2.f32 %v579_v30  ;;  %v511_v45 = vsub.f32 0.0, %v377_v38  ;;  %v527_v52 = vsub.f32 0.0, %v457_v39  ;;  %v392_v1 = vadd.f32 %v939_v43, %v1315_v48 }
 0x100   : > { %1049 = vpow2.f32 %v545_v37  ;;  %v551_v46 = vmul.f32 1.442695, %v512_v41  ;;  %v583_v47 = vmul.f32 1.442695, %v528_v42  ;;  %v386_v49 = vpop.f32.mrf.mxu0  ;;  %v466_v50 = vpop.f32.mrf.mxu1  ;;  %v472_v3 = vadd.f32 %v963_v44, %v1315_v48 }
 0x101   : > { %1051 = vpow2.f32 %v577_v40  ;;  %v549_v51 = vmul.f32 1.442695, %v511_v45  ;;  %v581_v62 = vmul.f32 1.442695, %v527_v52  ;;  %v514_v12 = vsub.f32 0.0, %v392_v1 }
 0x102   : > { %v1030_v53 = vpop.eup %1029  ;;  %1053 = vpow2.f32 %v551_v46  ;;  %v942_v54 = vpop.f32.mrf.mxu0  ;;  %v530_v15 = vsub.f32 0.0, %v472_v3  ;;  %v387_v16 = vadd.f32 %v1315_v48, %v386_v49  ;;  %v467_v19 = vadd.f32 %v1315_v48, %v466_v50 }
 0x103   : > { %v1032_v55 = vpop.eup %1031  ;;  %v602_v56 = vadd.f32 1.0, %v1030_v53  ;;  %1055 = vpow2.f32 %v583_v47  ;;  %v966_v59 = vpop.f32.mrf.mxu1  ;;  %v402_v23 = vadd.f32 %v942_v54, %v1315_v48  ;;  %v555_v27 = vmul.f32 1.442695, %v514_v12 }
 0x104   : > { %v1034_v57 = vpop.eup %1033  ;;  %v618_v58 = vadd.f32 1.0, %v1032_v55  ;;  %1057 = vpow2.f32 %v549_v51  ;;  %v396_v63 = vpop.f32.mrf.mxu0  ;;  %v482_v28 = vadd.f32 %v966_v59, %v1315_v48  ;;  %v587_v31 = vmul.f32 1.442695, %v530_v15 }
 0x105   : > { %v1036_v60 = vpop.eup %1035  ;;  %1059 = vrcp.f32 %v602_v56  ;;  %v601_v61 = vadd.f32 1.0, %v1034_v57  ;;  %v476_v6 = vpop.f32.mrf.mxu1  ;;  %v513_v32 = vsub.f32 0.0, %v387_v16  ;;  %v529_v35 = vsub.f32 0.0, %v467_v19 }
 0x106   : > { %1061 = vrcp.f32 %v618_v58  ;;  %v617_v0 = vadd.f32 1.0, %v1036_v60  ;;  %v945_v9 = vpop.f32.mrf.mxu0  ;;  %v397_v36 = vadd.f32 %v1315_v48, %v396_v63  ;;  %v516_v40 = vsub.f32 0.0, %v402_v23 }
 0x107   : > { %v1038_v2 = vpop.eup %1037  ;;  %1063 = vrcp.f32 %v601_v61  ;;  %v969_v20 = vpop.f32.mrf.mxu1  ;;  %v477_v41 = vadd.f32 %v1315_v48, %v476_v6  ;;  %v532_v45 = vsub.f32 0.0, %v482_v28  ;;  %v412_v46 = vadd.f32 %v945_v9, %v1315_v48 }
 0x108   : > { %v1040_v4 = vpop.eup %1039  ;;  %1065 = vrcp.f32 %v617_v0  ;;  %v604_v5 = vadd.f32 1.0, %v1038_v2  ;;  %v406_v24 = vpop.f32.mrf.mxu0  ;;  %v553_v49 = vmul.f32 1.442695, %v513_v32  ;;  %v492_v50 = vadd.f32 %v969_v20, %v1315_v48 }
 0x109   : > { %v1042_v7 = vpop.eup %1041  ;;  %v620_v8 = vadd.f32 1.0, %v1040_v4  ;;  %1067 = vpow2.f32 %v581_v62  ;;  %v486_v37 = vpop.f32.mrf.mxu1  ;;  %v585_v52 = vmul.f32 1.442695, %v529_v35  ;;  %v515_v53 = vsub.f32 0.0, %v397_v36 }
 0x10a   : > { %v1044_v10 = vpop.eup %1043  ;;  %1069 = vrcp.f32 %v604_v5  ;;  %v603_v11 = vadd.f32 1.0, %v1042_v7  ;;  %v948_v42 = vpop.f32.mrf.mxu0  ;;  %v407_v54 = vadd.f32 %v1315_v48, %v406_v24  ;;  %v559_v57 = vmul.f32 1.442695, %v516_v40 }
 0x10b   : > { %v1046_v13 = vpop.eup %1045  ;;  %1071 = vrcp.f32 %v620_v8  ;;  %v619_v14 = vadd.f32 1.0, %v1044_v10  ;;  %v972_v55 = vpop.f32.mrf.mxu1  ;;  %v531_v58 = vsub.f32 0.0, %v477_v41  ;;  %v487_v59 = vadd.f32 %v1315_v48, %v486_v37 }
 0x10c   : > { %v1048_v17 = vpop.eup %1047  ;;  %1073 = vrcp.f32 %v603_v11  ;;  %v606_v18 = vadd.f32 1.0, %v1046_v13  ;;  %v416_v60 = vpop.f32.mrf.mxu0  ;;  %v591_v62 = vmul.f32 1.442695, %v532_v45  ;;  %v518_v63 = vsub.f32 0.0, %v412_v46 }
 0x10d   : > { %v1050_v21 = vpop.eup %1049  ;;  %1075 = vrcp.f32 %v619_v14  ;;  %v622_v22 = vadd.f32 1.0, %v1048_v17  ;;  %v422_v0 = vadd.f32 %v948_v42, %v1315_v48  ;;  %v534_v3 = vsub.f32 0.0, %v492_v50  ;;  %v496_v15 = vpop.f32.mrf.mxu1 }
 0x10e   : > { %v1052_v25 = vpop.eup %1051  ;;  %1077 = vrcp.f32 %v606_v18  ;;  %v605_v26 = vadd.f32 1.0, %v1050_v21  ;;  %v502_v4 = vadd.f32 %v972_v55, %v1315_v48  ;;  %v557_v6 = vmul.f32 1.442695, %v515_v53 }
 0x10f   : > { %v1054_v29 = vpop.eup %1053  ;;  %1079 = vrcp.f32 %v622_v22  ;;  %v621_v30 = vadd.f32 1.0, %v1052_v25  ;;  %v517_v7 = vsub.f32 0.0, %v407_v54  ;;  %v417_v8 = vadd.f32 %v1315_v48, %v416_v60 }
 0x110   : > { %v1056_v33 = vpop.eup %1055  ;;  %1081 = vrcp.f32 %v605_v26  ;;  %v608_v34 = vadd.f32 1.0, %v1054_v29  ;;  %v589_v10 = vmul.f32 1.442695, %v531_v58  ;;  %v533_v11 = vsub.f32 0.0, %v487_v59 }
 0x111   : > { %v1058_v38 = vpop.eup %1057  ;;  %1083 = vrcp.f32 %v621_v30  ;;  %v624_v39 = vadd.f32 1.0, %v1056_v33  ;;  %v563_v13 = vmul.f32 1.442695, %v518_v63  ;;  %v520_v14 = vsub.f32 0.0, %v422_v0 }
 0x112   : > { %v1060_v43 = vpop.eup %1059  ;;  %1085 = vrcp.f32 %v608_v34  ;;  %v607_v44 = vadd.f32 1.0, %v1058_v38  ;;  %v595_v17 = vmul.f32 1.442695, %v534_v3  ;;  %v536_v18 = vsub.f32 0.0, %v502_v4 }
 0x113   : > { %v1062_v47 = vpop.eup %1061  ;;  %698 = vst [vmem:[%s1344_s7 + $0x8] sm:$0xff] %v1060_v43  ;;  %1087 = vrcp.f32 %v624_v39  ;;  %v561_v20 = vmul.f32 1.442695, %v517_v7  ;;  %v519_v21 = vsub.f32 0.0, %v417_v8  ;;  %v593_v23 = vmul.f32 1.442695, %v533_v11 }
 0x114   : > { %v1064_v51 = vpop.eup %1063  ;;  %714 = vst [vmem:[%s1344_s7 + $0x88] sm:$0xff] %v1062_v47  ;;  %1089 = vrcp.f32 %v607_v44  ;;  %v497_v24 = vadd.f32 %v1315_v48, %v496_v15  ;;  %v567_v26 = vmul.f32 1.442695, %v520_v14  ;;  %v599_v28 = vmul.f32 1.442695, %v536_v18 }
 0x115   : > { %v1066_v56 = vpop.eup %1065  ;;  %697 = vst [vmem:[%s1344_s7] sm:$0xff] %v1064_v51  ;;  %1091 = vpow2.f32 %v555_v27  ;;  %v565_v30 = vmul.f32 1.442695, %v519_v21 }
 0x116   : > { %v1068_v61 = vpop.eup %1067  ;;  %713 = vst [vmem:[%s1344_s7 + $0x80] sm:$0xff] %v1066_v56  ;;  %1093 = vpow2.f32 %v587_v31  ;;  %v535_v32 = vsub.f32 0.0, %v497_v24 }
 0x117   : > { %v1070_v1 = vpop.eup %1069  ;;  %v623_v2 = vadd.f32 1.0, %v1068_v61  ;;  %1095 = vpow2.f32 %v553_v49 }
 0x118   : > { %v1072_v5 = vpop.eup %1071  ;;  %700 = vst [vmem:[%s1344_s7 + $0x18] sm:$0xff] %v1070_v1  ;;  %1097 = vpow2.f32 %v585_v52  ;;  %v597_v39 = vmul.f32 1.442695, %v535_v32 }
 0x119   : > { %v1074_v9 = vpop.eup %1073  ;;  %716 = vst [vmem:[%s1344_s7 + $0x98] sm:$0xff] %v1072_v5  ;;  %1099 = vrcp.f32 %v623_v2 }
 0x11a   : > { %v1076_v12 = vpop.eup %1075  ;;  %699 = vst [vmem:[%s1344_s7 + $0x10] sm:$0xff] %v1074_v9  ;;  %1101 = vpow2.f32 %v559_v57 }
 0x11b   : > { %v1078_v16 = vpop.eup %1077  ;;  %715 = vst [vmem:[%s1344_s7 + $0x90] sm:$0xff] %v1076_v12  ;;  %1103 = vpow2.f32 %v591_v62 }
 0x11c   : > { %v1080_v19 = vpop.eup %1079  ;;  %702 = vst [vmem:[%s1344_s7 + $0x28] sm:$0xff] %v1078_v16  ;;  %1105 = vpow2.f32 %v557_v6 }
 0x11d   : > { %v1082_v22 = vpop.eup %1081  ;;  %718 = vst [vmem:[%s1344_s7 + $0xa8] sm:$0xff] %v1080_v19  ;;  %1107 = vpow2.f32 %v589_v10 }
 0x11e   : > { %v1084_v25 = vpop.eup %1083  ;;  %701 = vst [vmem:[%s1344_s7 + $0x20] sm:$0xff] %v1082_v22  ;;  %1109 = vpow2.f32 %v563_v13 }
 0x11f   : > { %v1086_v27 = vpop.eup %1085  ;;  %717 = vst [vmem:[%s1344_s7 + $0xa0] sm:$0xff] %v1084_v25  ;;  %1111 = vpow2.f32 %v595_v17 }
 0x120   : > { %v1088_v29 = vpop.eup %1087  ;;  %704 = vst [vmem:[%s1344_s7 + $0x38] sm:$0xff] %v1086_v27  ;;  %1113 = vpow2.f32 %v561_v20 }
 0x121   : > { %v1090_v31 = vpop.eup %1089  ;;  %720 = vst [vmem:[%s1344_s7 + $0xb8] sm:$0xff] %v1088_v29  ;;  %1115 = vpow2.f32 %v593_v23 }
 0x122   : > { %v1092_v33 = vpop.eup %1091  ;;  %703 = vst [vmem:[%s1344_s7 + $0x30] sm:$0xff] %v1090_v31  ;;  %1117 = vpow2.f32 %v567_v26 }
 0x123   : > { %v1094_v48 = vpop.eup %1093  ;;  %v610_v34 = vadd.f32 1.0, %v1092_v33  ;;  %1119 = vpow2.f32 %v599_v28 }
 0x124   : > { %v1096_v35 = vpop.eup %1095  ;;  %v626_v36 = vadd.f32 1.0, %v1094_v48  ;;  %1121 = vpow2.f32 %v565_v30 }
 0x125   : > { %v1098_v37 = vpop.eup %1097  ;;  %1123 = vrcp.f32 %v610_v34  ;;  %v609_v38 = vadd.f32 1.0, %v1096_v35 }
 0x126   : > { %v1100_v40 = vpop.eup %1099  ;;  %1125 = vrcp.f32 %v626_v36  ;;  %v625_v41 = vadd.f32 1.0, %v1098_v37 }
 0x127   : > { %v1102_v42 = vpop.eup %1101  ;;  %719 = vst [vmem:[%s1344_s7 + $0xb0] sm:$0xff] %v1100_v40  ;;  %1127 = vrcp.f32 %v609_v38 }
 0x128   : > { %v1104_v43 = vpop.eup %1103  ;;  %1129 = vrcp.f32 %v625_v41  ;;  %v612_v44 = vadd.f32 1.0, %v1102_v42 }
 0x129   : > { %v1106_v45 = vpop.eup %1105  ;;  %v628_v46 = vadd.f32 1.0, %v1104_v43  ;;  %1131 = vpow2.f32 %v597_v39 }
 0x12a   : > { %v1108_v47 = vpop.eup %1107  ;;  %1133 = vrcp.f32 %v612_v44  ;;  %v611_v49 = vadd.f32 1.0, %v1106_v45 }
 0x12b   : > { %v1110_v50 = vpop.eup %1109  ;;  %1135 = vrcp.f32 %v628_v46  ;;  %v627_v51 = vadd.f32 1.0, %v1108_v47 }
 0x12c   : > { %v1112_v52 = vpop.eup %1111  ;;  %1137 = vrcp.f32 %v611_v49  ;;  %v614_v53 = vadd.f32 1.0, %v1110_v50 }
 0x12d   : > { %v1114_v54 = vpop.eup %1113  ;;  %1139 = vrcp.f32 %v627_v51  ;;  %v630_v55 = vadd.f32 1.0, %v1112_v52 }
 0x12e   : > { %v1116_v56 = vpop.eup %1115  ;;  %1141 = vrcp.f32 %v614_v53  ;;  %v613_v57 = vadd.f32 1.0, %v1114_v54 }
 0x12f   : > { %v1118_v58 = vpop.eup %1117  ;;  %1143 = vrcp.f32 %v630_v55  ;;  %v629_v59 = vadd.f32 1.0, %v1116_v56 }
 0x130   : > { %v1120_v60 = vpop.eup %1119  ;;  %1145 = vrcp.f32 %v613_v57  ;;  %v616_v61 = vadd.f32 1.0, %v1118_v58 }
 0x131   : > { %v1122_v62 = vpop.eup %1121  ;;  %1147 = vrcp.f32 %v629_v59  ;;  %v632_v63 = vadd.f32 1.0, %v1120_v60 }
 0x132   : > { %v1124_v0 = vpop.eup %1123  ;;  %1149 = vrcp.f32 %v616_v61  ;;  %v615_v1 = vadd.f32 1.0, %v1122_v62 }
 0x133   : > { %v1126_v2 = vpop.eup %1125  ;;  %706 = vst [vmem:[%s1344_s7 + $0x48] sm:$0xff] %v1124_v0  ;;  %1151 = vrcp.f32 %v632_v63 }
 0x134   : > { %v1128_v3 = vpop.eup %1127  ;;  %722 = vst [vmem:[%s1344_s7 + $0xc8] sm:$0xff] %v1126_v2  ;;  %1153 = vrcp.f32 %v615_v1 }
 0x135   : > { %v1130_v4 = vpop.eup %1129  ;;  %705 = vst [vmem:[%s1344_s7 + $0x40] sm:$0xff] %v1128_v3 }
 0x136   : > { %v1132_v5 = vpop.eup %1131  ;;  %721 = vst [vmem:[%s1344_s7 + $0xc0] sm:$0xff] %v1130_v4 }
 0x137   : > { %v1134_v6 = vpop.eup %1133  ;;  %v631_v7 = vadd.f32 1.0, %v1132_v5 }
 0x138   : > { %v1136_v8 = vpop.eup %1135  ;;  %708 = vst [vmem:[%s1344_s7 + $0x58] sm:$0xff] %v1134_v6 }
 0x139   : > { %v1138_v9 = vpop.eup %1137  ;;  %724 = vst [vmem:[%s1344_s7 + $0xd8] sm:$0xff] %v1136_v8  ;;  %1155 = vrcp.f32 %v631_v7 }
 0x13a   : > { %v1140_v10 = vpop.eup %1139  ;;  %707 = vst [vmem:[%s1344_s7 + $0x50] sm:$0xff] %v1138_v9 }
 0x13b   : > { %v1142_v11 = vpop.eup %1141  ;;  %723 = vst [vmem:[%s1344_s7 + $0xd0] sm:$0xff] %v1140_v10 }
 0x13c   : > { %v1144_v12 = vpop.eup %1143  ;;  %710 = vst [vmem:[%s1344_s7 + $0x68] sm:$0xff] %v1142_v11 }
 0x13d   : > { %v1146_v13 = vpop.eup %1145  ;;  %726 = vst [vmem:[%s1344_s7 + $0xe8] sm:$0xff] %v1144_v12 }
 0x13e   : > { %v1148_v14 = vpop.eup %1147  ;;  %709 = vst [vmem:[%s1344_s7 + $0x60] sm:$0xff] %v1146_v13 }
 0x13f   : > { %v1150_v15 = vpop.eup %1149  ;;  %725 = vst [vmem:[%s1344_s7 + $0xe0] sm:$0xff] %v1148_v14 }
 0x140   : > { %v1152_v16 = vpop.eup %1151  ;;  %712 = vst [vmem:[%s1344_s7 + $0x78] sm:$0xff] %v1150_v15 }
 0x141   : > { %v1154_v17 = vpop.eup %1153  ;;  %728 = vst [vmem:[%s1344_s7 + $0xf8] sm:$0xff] %v1152_v16 }
 0x142   : > { %711 = vst [vmem:[%s1344_s7 + $0x70] sm:$0xff] %v1154_v17 }
 0x146   : > { %v1156_v18 = vpop.eup %1155 }
 0x147   : > { %727 = vst [vmem:[%s1344_s7 + $0xf0] sm:$0xff] %v1156_v18 }
 0x148 PF: > { %s13_s14 = sadd.s32 1, %s1179_s14   ;;  %s1401_s12 = smov %s1175_s13 }
 0x149   : > { %p10_p5 = scmp.ge.s32.totalorder %s13_s14, 4   ;;  %s1402_s13 = smov %s1404_s15 }
 0x14b   :  { %12 = sbr.rel (!%p10_p5) target bundleno = 2 (0x2), region = 68 }

// kernel: run_pallas.71
= control target key start
LH: loop header
LB: loop body
LE: loop exit
PB: predicated region body
PF: predicated region fallthrough
CT: control target
= control target key end

     0   :  { %s881_s12 = smov 0   ;;  %s883_s13 = smov 0   ;;  %s1077_s0 = inlined_call_operand.vmem [shape: f32[512,128], index: 0, kind: input, shape index: {}]   ;;  %s1078_s1 = inlined_call_operand.vmem [shape: f32[128,128], index: 1, kind: input, shape index: {}]   ;;  %s1079_s2 = inlined_call_operand.vmem [shape: f32[1,128], index: 2, kind: input, shape index: {}]   ;;  %s1080_s3 = inlined_call_operand.vmem [shape: f32[512,128], index: 3, kind: output, shape index: {}]  }
   0x1   :  { %s885_s14 = smov 0  }
   0x2 LB: > { %s25_s15 = sadd.s32 1, %s855_s13  ;;  %p645_p0 = scmp.ge.s32.totalorder %s859_s14, 1  ;;  %s859_s14 = sphi %s885_s14, %s13_s14   ;;  %s855_s13 = sphi %s883_s13, %s1082_s13   ;;  %s851_s12 = sphi %s881_s12, %s1081_s12  }
   0x3   : > { %p27_p1 = scmp.ge.s32.totalorder %s25_s15, 2  ;;  %p169_p2 = scmp.lt.s32.totalorder %s859_s14, 3 }
   0x5   : > { %s1084_s15 = smov (%p27_p1, %s25_s15), 0  ;;  %p170_p3 = pnand %p645_p0, %p169_p2 }
   0x6   : > { %s646_s5 = sshll.u32 (!%p170_p3), %s851_s12, 5 }
   0x7   : > { %173 = sbr.rel (%p170_p3) target bundleno = 272 (0x110), region = 32  ;;  %p204_p4 = scmp.lt.s32.totalorder (!%p170_p3), %s646_s5, 63 }
   0xc   : > { %v272_v0 = vld [vmem:[%s1078_s1 + $0x78] sm:$0xff]  ;;  %v271_v1 = vld [vmem:[%s1078_s1 + $0x70] sm:$0xff]  ;;  %v270_v2 = vld [vmem:[%s1078_s1 + $0x68] sm:$0xff]  ;;  %s1086_s5 = smov (!%p204_p4, %s646_s5), 63 }
   0xd   : > { %701 = vmatprep.subr.mxu0 %v272_v0  ;;  %781 = vmatprep.subr.mxu1 %v272_v0  ;;  %v269_v3 = vld [vmem:[%s1078_s1 + $0x60] sm:$0xff]  ;;  %v268_v4 = vld [vmem:[%s1078_s1 + $0x58] sm:$0xff]  ;;  %v267_v5 = vld [vmem:[%s1078_s1 + $0x50] sm:$0xff]  ;;  %s647_s21 = sshll.u32 %s1086_s5, 3 }
   0xe   : > { %702 = vmatpush3.msra.mxu0 %v272_v0  ;;  %797 = vmatpush3.msra.mxu1 %v272_v0  ;;  %v266_v6 = vld [vmem:[%s1078_s1 + $0x48] sm:$0xff]  ;;  %v265_v7 = vld [vmem:[%s1078_s1 + $0x40] sm:$0xff]  ;;  %v264_v8 = vld [vmem:[%s1078_s1 + $0x38] sm:$0xff]  ;;  %s955_s26 = scalar_lea.vmem %s1077_s0, %s647_s21  ;;  %s1002_s7 = scalar_lea.vmem %s1080_s3, %s647_s21 }
   0xf   : > { %703 = vmatprep.subr.mxu0 %v271_v1  ;;  %782 = vmatprep.subr.mxu1 %v271_v1  ;;  %v263_v9 = vld [vmem:[%s1078_s1 + $0x30] sm:$0xff]  ;;  %v262_v10 = vld [vmem:[%s1078_s1 + $0x28] sm:$0xff]  ;;  %v261_v11 = vld [vmem:[%s1078_s1 + $0x20] sm:$0xff] }
  0x10   : > { %704 = vmatpush3.msra.mxu0 %v271_v1  ;;  %798 = vmatpush3.msra.mxu1 %v271_v1  ;;  %v260_v12 = vld [vmem:[%s1078_s1 + $0x18] sm:$0xff]  ;;  %v259_v13 = vld [vmem:[%s1078_s1 + $0x10] sm:$0xff]  ;;  %v258_v14 = vld [vmem:[%s1078_s1 + $0x8] sm:$0xff] }
  0x11   : > { %705 = vmatprep.subr.mxu0 %v270_v2  ;;  %783 = vmatprep.subr.mxu1 %v270_v2  ;;  %v257_v15 = vld [vmem:[%s1078_s1] sm:$0xff]  ;;  %v226_v18 = vld [vmem:[%s955_s26 + $0x8] sm:$0xff]  ;;  %v227_v20 = vld [vmem:[%s955_s26 + $0x10] sm:$0xff] }
  0x12   : > { %706 = vmatpush3.msra.mxu0 %v270_v2  ;;  %799 = vmatpush3.msra.mxu1 %v270_v2  ;;  %v225_v16 = vld [vmem:[%s955_s26] sm:$0xff]  ;;  %v242_v19 = vld [vmem:[%s955_s26 + $0x88] sm:$0xff]  ;;  %v243_v21 = vld [vmem:[%s955_s26 + $0x90] sm:$0xff] }
  0x13   : > { %707 = vmatprep.subr.mxu0 %v269_v3  ;;  %784 = vmatprep.subr.mxu1 %v269_v3  ;;  %v241_v17 = vld [vmem:[%s955_s26 + $0x80] sm:$0xff]  ;;  %v228_v22 = vld [vmem:[%s955_s26 + $0x18] sm:$0xff]  ;;  %v230_v26 = vld [vmem:[%s955_s26 + $0x28] sm:$0xff] }
  0x14   : > { %708 = vmatpush3.msra.mxu0 %v269_v3  ;;  %800 = vmatpush3.msra.mxu1 %v269_v3  ;;  %v244_v23 = vld [vmem:[%s955_s26 + $0x98] sm:$0xff]  ;;  %v229_v24 = vld [vmem:[%s955_s26 + $0x20] sm:$0xff]  ;;  %v246_v27 = vld [vmem:[%s955_s26 + $0xa8] sm:$0xff] }
  0x15   : > { %709 = vmatprep.subr.mxu0 %v268_v4  ;;  %785 = vmatprep.subr.mxu1 %v268_v4  ;;  %v245_v25 = vld [vmem:[%s955_s26 + $0xa0] sm:$0xff]  ;;  %v231_v28 = vld [vmem:[%s955_s26 + $0x30] sm:$0xff]  ;;  %v232_v30 = vld [vmem:[%s955_s26 + $0x38] sm:$0xff] }
  0x16   : > { %710 = vmatpush3.msra.mxu0 %v268_v4  ;;  %801 = vmatpush3.msra.mxu1 %v268_v4  ;;  %v247_v29 = vld [vmem:[%s955_s26 + $0xb0] sm:$0xff]  ;;  %v248_v31 = vld [vmem:[%s955_s26 + $0xb8] sm:$0xff]  ;;  %v233_v32 = vld [vmem:[%s955_s26 + $0x40] sm:$0xff] }
  0x17   : > { %711 = vmatprep.subr.mxu0 %v267_v5  ;;  %786 = vmatprep.subr.mxu1 %v267_v5  ;;  %v249_v33 = vld [vmem:[%s955_s26 + $0xc0] sm:$0xff]  ;;  %v234_v34 = vld [vmem:[%s955_s26 + $0x48] sm:$0xff]  ;;  %v235_v36 = vld [vmem:[%s955_s26 + $0x50] sm:$0xff] }
  0x18   : > { %712 = vmatpush3.msra.mxu0 %v267_v5  ;;  %802 = vmatpush3.msra.mxu1 %v267_v5  ;;  %v250_v35 = vld [vmem:[%s955_s26 + $0xc8] sm:$0xff]  ;;  %v251_v37 = vld [vmem:[%s955_s26 + $0xd0] sm:$0xff]  ;;  %v236_v38 = vld [vmem:[%s955_s26 + $0x58] sm:$0xff] }
  0x19   : > { %713 = vmatprep.subr.mxu0 %v266_v6  ;;  %787 = vmatprep.subr.mxu1 %v266_v6  ;;  %v252_v39 = vld [vmem:[%s955_s26 + $0xd8] sm:$0xff]  ;;  %v237_v40 = vld [vmem:[%s955_s26 + $0x60] sm:$0xff]  ;;  %v238_v42 = vld [vmem:[%s955_s26 + $0x68] sm:$0xff] }
  0x1a   : > { %714 = vmatpush3.msra.mxu0 %v266_v6  ;;  %803 = vmatpush3.msra.mxu1 %v266_v6  ;;  %v253_v41 = vld [vmem:[%s955_s26 + $0xe0] sm:$0xff]  ;;  %v254_v43 = vld [vmem:[%s955_s26 + $0xe8] sm:$0xff]  ;;  %v239_v44 = vld [vmem:[%s955_s26 + $0x70] sm:$0xff] }
  0x1b   : > { %715 = vmatprep.subr.mxu0 %v265_v7  ;;  %788 = vmatprep.subr.mxu1 %v265_v7  ;;  %v255_v45 = vld [vmem:[%s955_s26 + $0xf0] sm:$0xff]  ;;  %v240_v46 = vld [vmem:[%s955_s26 + $0x78] sm:$0xff]  ;;  %v995_v48 = vld [vmem:[%s1079_s2] ss:$0 sm:$0xff] }
  0x1c   : > { %716 = vmatpush3.msra.mxu0 %v265_v7  ;;  %804 = vmatpush3.msra.mxu1 %v265_v7  ;;  %v256_v47 = vld [vmem:[%s955_s26 + $0xf8] sm:$0xff] }
  0x1d   : > { %717 = vmatprep.subr.mxu0 %v264_v8  ;;  %789 = vmatprep.subr.mxu1 %v264_v8 }
  0x1e   : > { %718 = vmatpush3.msra.mxu0 %v264_v8  ;;  %805 = vmatpush3.msra.mxu1 %v264_v8 }
  0x1f   : > { %719 = vmatprep.subr.mxu0 %v263_v9  ;;  %790 = vmatprep.subr.mxu1 %v263_v9 }
  0x20   : > { %720 = vmatpush3.msra.mxu0 %v263_v9  ;;  %806 = vmatpush3.msra.mxu1 %v263_v9 }
  0x21   : > { %721 = vmatprep.subr.mxu0 %v262_v10  ;;  %791 = vmatprep.subr.mxu1 %v262_v10 }
  0x22   : > { %722 = vmatpush3.msra.mxu0 %v262_v10  ;;  %807 = vmatpush3.msra.mxu1 %v262_v10 }
  0x23   : > { %723 = vmatprep.subr.mxu0 %v261_v11  ;;  %792 = vmatprep.subr.mxu1 %v261_v11 }
  0x24   : > { %724 = vmatpush3.msra.mxu0 %v261_v11  ;;  %808 = vmatpush3.msra.mxu1 %v261_v11 }
  0x25   : > { %725 = vmatprep.subr.mxu0 %v260_v12  ;;  %793 = vmatprep.subr.mxu1 %v260_v12 }
  0x26   : > { %726 = vmatpush3.msra.mxu0 %v260_v12  ;;  %809 = vmatpush3.msra.mxu1 %v260_v12 }
  0x27   : > { %727 = vmatprep.subr.mxu0 %v259_v13  ;;  %794 = vmatprep.subr.mxu1 %v259_v13 }
  0x28   : > { %728 = vmatpush3.msra.mxu0 %v259_v13  ;;  %810 = vmatpush3.msra.mxu1 %v259_v13 }
  0x29   : > { %729 = vmatprep.subr.mxu0 %v258_v14  ;;  %795 = vmatprep.subr.mxu1 %v258_v14 }
  0x2a   : > { %730 = vmatpush3.msra.mxu0 %v258_v14  ;;  %811 = vmatpush3.msra.mxu1 %v258_v14 }
  0x2b   : > { %731 = vmatprep.subr.mxu0 %v257_v15  ;;  %796 = vmatprep.subr.mxu1 %v257_v15 }
  0x2c   : > { %732 = vmatpush3.msra.mxu0 %v257_v15  ;;  %812 = vmatpush3.msra.mxu1 %v257_v15 }
  0x2d   : > { %733 = vmatprep.mubr.f32.mxu0 %v225_v16  ;;  %757 = vmatprep.mubr.f32.mxu1 %v241_v17 }
  0x2e   : > { %734 = vmatmul.mubr.f32.vlgmr.msra.gmra.mxu0 %v226_v18  ;;  %758 = vmatmul.mubr.f32.vlgmr.msra.gmra.mxu1 %v242_v19 }
  0x2f   : > { %736 = vmatprep.mubr.f32.mxu0 %v227_v20  ;;  %760 = vmatprep.mubr.f32.mxu1 %v243_v21 }
  0x32   : > { %737 = vmatmul.mubr.f32.gmra.mxu0 %v228_v22  ;;  %761 = vmatmul.mubr.f32.gmra.mxu1 %v244_v23 }
  0x33   : > { %739 = vmatprep.mubr.f32.mxu0 %v229_v24  ;;  %763 = vmatprep.mubr.f32.mxu1 %v245_v25 }
  0x36   : > { %740 = vmatmul.mubr.f32.gmra.mxu0 %v230_v26  ;;  %764 = vmatmul.mubr.f32.gmra.mxu1 %v246_v27 }
  0x37   : > { %742 = vmatprep.mubr.f32.mxu0 %v231_v28  ;;  %766 = vmatprep.mubr.f32.mxu1 %v247_v29 }
  0x3a   : > { %743 = vmatmul.mubr.f32.gmra.mxu0 %v232_v30  ;;  %767 = vmatmul.mubr.f32.gmra.mxu1 %v248_v31 }
  0x3b   : > { %745 = vmatprep.mubr.f32.mxu0 %v233_v32  ;;  %769 = vmatprep.mubr.f32.mxu1 %v249_v33 }
  0x3e   : > { %746 = vmatmul.mubr.f32.gmra.mxu0 %v234_v34  ;;  %770 = vmatmul.mubr.f32.gmra.mxu1 %v250_v35 }
  0x3f   : > { %748 = vmatprep.mubr.f32.mxu0 %v235_v36  ;;  %772 = vmatprep.mubr.f32.mxu1 %v251_v37 }
  0x42   : > { %749 = vmatmul.mubr.f32.gmra.mxu0 %v236_v38  ;;  %773 = vmatmul.mubr.f32.gmra.mxu1 %v252_v39 }
  0x43   : > { %751 = vmatprep.mubr.f32.mxu0 %v237_v40  ;;  %775 = vmatprep.mubr.f32.mxu1 %v253_v41 }
  0x46   : > { %752 = vmatmul.mubr.f32.gmra.mxu0 %v238_v42  ;;  %776 = vmatmul.mubr.f32.gmra.mxu1 %v254_v43 }
  0x47   : > { %754 = vmatprep.mubr.f32.mxu0 %v239_v44  ;;  %778 = vmatprep.mubr.f32.mxu1 %v255_v45 }
  0x4a   : > { %755 = vmatmul.mubr.f32.gmra.mxu0 %v240_v46  ;;  %779 = vmatmul.mubr.f32.gmra.mxu1 %v256_v47 }
  0xee   : > { %v735_v49 = vpop.f32.mrf.mxu0  ;;  %v759_v50 = vpop.f32.mrf.mxu1 }
  0xef   : > { %v352_v51 = vadd.f32 %v735_v49, %v995_v48  ;;  %v432_v52 = vadd.f32 %v759_v50, %v995_v48 }
  0xf0   : > { %v346_v53 = vpop.f32.mrf.mxu0  ;;  %v426_v54 = vpop.f32.mrf.mxu1 }
  0xf1   : > { %506 = vst [vmem:[%s1002_s7 + $0x8] sm:$0xff] %v352_v51  ;;  %522 = vst [vmem:[%s1002_s7 + $0x88] sm:$0xff] %v432_v52  ;;  %v347_v55 = vadd.f32 %v995_v48, %v346_v53  ;;  %v427_v56 = vadd.f32 %v995_v48, %v426_v54 }
  0xf2   : > { %v738_v57 = vpop.f32.mrf.mxu0  ;;  %v762_v58 = vpop.f32.mrf.mxu1 }
  0xf3   : > { %505 = vst [vmem:[%s1002_s7] sm:$0xff] %v347_v55  ;;  %521 = vst [vmem:[%s1002_s7 + $0x80] sm:$0xff] %v427_v56  ;;  %v362_v59 = vadd.f32 %v738_v57, %v995_v48  ;;  %v442_v60 = vadd.f32 %v762_v58, %v995_v48 }
  0xf4   : > { %v356_v61 = vpop.f32.mrf.mxu0  ;;  %v436_v62 = vpop.f32.mrf.mxu1 }
  0xf5   : > { %508 = vst [vmem:[%s1002_s7 + $0x18] sm:$0xff] %v362_v59  ;;  %524 = vst [vmem:[%s1002_s7 + $0x98] sm:$0xff] %v442_v60  ;;  %v357_v63 = vadd.f32 %v995_v48, %v356_v61  ;;  %v437_v0 = vadd.f32 %v995_v48, %v436_v62 }
  0xf6   : > { %v741_v1 = vpop.f32.mrf.mxu0  ;;  %v765_v2 = vpop.f32.mrf.mxu1 }
  0xf7   : > { %507 = vst [vmem:[%s1002_s7 + $0x10] sm:$0xff] %v357_v63  ;;  %523 = vst [vmem:[%s1002_s7 + $0x90] sm:$0xff] %v437_v0  ;;  %v372_v3 = vadd.f32 %v741_v1, %v995_v48  ;;  %v452_v4 = vadd.f32 %v765_v2, %v995_v48 }
  0xf8   : > { %v366_v5 = vpop.f32.mrf.mxu0  ;;  %v446_v6 = vpop.f32.mrf.mxu1 }
  0xf9   : > { %510 = vst [vmem:[%s1002_s7 + $0x28] sm:$0xff] %v372_v3  ;;  %526 = vst [vmem:[%s1002_s7 + $0xa8] sm:$0xff] %v452_v4  ;;  %v367_v7 = vadd.f32 %v995_v48, %v366_v5  ;;  %v447_v8 = vadd.f32 %v995_v48, %v446_v6 }
  0xfa   : > { %v744_v9 = vpop.f32.mrf.mxu0  ;;  %v768_v10 = vpop.f32.mrf.mxu1 }
  0xfb   : > { %509 = vst [vmem:[%s1002_s7 + $0x20] sm:$0xff] %v367_v7  ;;  %525 = vst [vmem:[%s1002_s7 + $0xa0] sm:$0xff] %v447_v8  ;;  %v382_v11 = vadd.f32 %v744_v9, %v995_v48  ;;  %v462_v12 = vadd.f32 %v768_v10, %v995_v48 }
  0xfc   : > { %v376_v13 = vpop.f32.mrf.mxu0  ;;  %v456_v14 = vpop.f32.mrf.mxu1 }
  0xfd   : > { %512 = vst [vmem:[%s1002_s7 + $0x38] sm:$0xff] %v382_v11  ;;  %528 = vst [vmem:[%s1002_s7 + $0xb8] sm:$0xff] %v462_v12  ;;  %v377_v15 = vadd.f32 %v995_v48, %v376_v13  ;;  %v457_v16 = vadd.f32 %v995_v48, %v456_v14 }
  0xfe   : > { %v747_v17 = vpop.f32.mrf.mxu0  ;;  %v771_v18 = vpop.f32.mrf.mxu1 }
  0xff   : > { %511 = vst [vmem:[%s1002_s7 + $0x30] sm:$0xff] %v377_v15  ;;  %527 = vst [vmem:[%s1002_s7 + $0xb0] sm:$0xff] %v457_v16  ;;  %v392_v19 = vadd.f32 %v747_v17, %v995_v48  ;;  %v472_v20 = vadd.f32 %v771_v18, %v995_v48 }
 0x100   : > { %v386_v21 = vpop.f32.mrf.mxu0  ;;  %v466_v22 = vpop.f32.mrf.mxu1 }
 0x101   : > { %514 = vst [vmem:[%s1002_s7 + $0x48] sm:$0xff] %v392_v19  ;;  %530 = vst [vmem:[%s1002_s7 + $0xc8] sm:$0xff] %v472_v20  ;;  %v387_v23 = vadd.f32 %v995_v48, %v386_v21  ;;  %v467_v24 = vadd.f32 %v995_v48, %v466_v22 }
 0x102   : > { %v750_v25 = vpop.f32.mrf.mxu0  ;;  %v774_v26 = vpop.f32.mrf.mxu1 }
 0x103   : > { %513 = vst [vmem:[%s1002_s7 + $0x40] sm:$0xff] %v387_v23  ;;  %529 = vst [vmem:[%s1002_s7 + $0xc0] sm:$0xff] %v467_v24  ;;  %v402_v27 = vadd.f32 %v750_v25, %v995_v48  ;;  %v482_v28 = vadd.f32 %v774_v26, %v995_v48 }
 0x104   : > { %v396_v29 = vpop.f32.mrf.mxu0  ;;  %v476_v30 = vpop.f32.mrf.mxu1 }
 0x105   : > { %516 = vst [vmem:[%s1002_s7 + $0x58] sm:$0xff] %v402_v27  ;;  %532 = vst [vmem:[%s1002_s7 + $0xd8] sm:$0xff] %v482_v28  ;;  %v397_v31 = vadd.f32 %v995_v48, %v396_v29  ;;  %v477_v32 = vadd.f32 %v995_v48, %v476_v30 }
 0x106   : > { %v753_v33 = vpop.f32.mrf.mxu0  ;;  %v777_v34 = vpop.f32.mrf.mxu1 }
 0x107   : > { %515 = vst [vmem:[%s1002_s7 + $0x50] sm:$0xff] %v397_v31  ;;  %531 = vst [vmem:[%s1002_s7 + $0xd0] sm:$0xff] %v477_v32  ;;  %v412_v35 = vadd.f32 %v753_v33, %v995_v48  ;;  %v492_v36 = vadd.f32 %v777_v34, %v995_v48 }
 0x108   : > { %v406_v37 = vpop.f32.mrf.mxu0  ;;  %v486_v38 = vpop.f32.mrf.mxu1 }
 0x109   : > { %518 = vst [vmem:[%s1002_s7 + $0x68] sm:$0xff] %v412_v35  ;;  %534 = vst [vmem:[%s1002_s7 + $0xe8] sm:$0xff] %v492_v36  ;;  %v407_v39 = vadd.f32 %v995_v48, %v406_v37  ;;  %v487_v40 = vadd.f32 %v995_v48, %v486_v38 }
 0x10a   : > { %v756_v41 = vpop.f32.mrf.mxu0  ;;  %v780_v42 = vpop.f32.mrf.mxu1 }
 0x10b   : > { %517 = vst [vmem:[%s1002_s7 + $0x60] sm:$0xff] %v407_v39  ;;  %533 = vst [vmem:[%s1002_s7 + $0xe0] sm:$0xff] %v487_v40  ;;  %v422_v43 = vadd.f32 %v756_v41, %v995_v48  ;;  %v502_v44 = vadd.f32 %v780_v42, %v995_v48 }
 0x10c   : > { %v416_v45 = vpop.f32.mrf.mxu0  ;;  %v496_v46 = vpop.f32.mrf.mxu1 }
 0x10d   : > { %520 = vst [vmem:[%s1002_s7 + $0x78] sm:$0xff] %v422_v43  ;;  %536 = vst [vmem:[%s1002_s7 + $0xf8] sm:$0xff] %v502_v44  ;;  %v417_v47 = vadd.f32 %v995_v48, %v416_v45  ;;  %v497_v49 = vadd.f32 %v995_v48, %v496_v46 }
 0x10f   : > { %519 = vst [vmem:[%s1002_s7 + $0x70] sm:$0xff] %v417_v47  ;;  %535 = vst [vmem:[%s1002_s7 + $0xf0] sm:$0xff] %v497_v49 }
 0x110 PF: > { %s13_s14 = sadd.s32 1, %s859_s14   ;;  %s1081_s12 = smov %s855_s13 }
 0x111   : > { %p10_p5 = scmp.ge.s32.totalorder %s13_s14, 4   ;;  %s1082_s13 = smov %s1084_s15 }
 0x113   :  { %12 = sbr.rel (!%p10_p5) target bundleno = 2 (0x2), region = 68 }

// kernel: run_pallas.56
= control target key start
LH: loop header
LB: loop body
LE: loop exit
PB: predicated region body
PF: predicated region fallthrough
CT: control target
= control target key end

     0   :  { %s840_s12 = smov 0   ;;  %s842_s13 = smov 0   ;;  %s1177_s0 = inlined_call_operand.vmem [shape: f32[512,256], index: 0, kind: input, shape index: {}]   ;;  %s1178_s1 = inlined_call_operand.vmem [shape: f32[256,128], index: 1, kind: input, shape index: {}]   ;;  %s1179_s2 = inlined_call_operand.vmem [shape: f32[1,128], index: 2, kind: input, shape index: {}]   ;;  %s1180_s3 = inlined_call_operand.vmem [shape: f32[512,128], index: 3, kind: output, shape index: {}]  }
   0x1   :  { %s844_s14 = smov 0  }
   0x2 LB: > { %s25_s15 = sadd.s32 1, %s813_s13  ;;  %p696_p0 = scmp.ge.s32.totalorder %s817_s14, 1  ;;  %s817_s14 = sphi %s844_s14, %s13_s14   ;;  %s813_s13 = sphi %s842_s13, %s1182_s13   ;;  %s809_s12 = sphi %s840_s12, %s1181_s12  }
   0x3   : > { %p27_p1 = scmp.ge.s32.totalorder %s25_s15, 2  ;;  %p170_p2 = scmp.lt.s32.totalorder %s817_s14, 3 }
   0x5   : > { %s1184_s15 = smov (%p27_p1, %s25_s15), 0  ;;  %p171_p3 = pnand %p696_p0, %p170_p2 }
   0x6   : > { %s697_s18 = sshll.u32 (!%p171_p3), %s809_s12, 5 }
   0x7   : > { %174 = sbr.rel (%p171_p3) target bundleno = 334 (0x14e), region = 32  ;;  %p206_p4 = scmp.lt.s32.totalorder (!%p171_p3), %s697_s18, 63 }
   0xc   : > { %v307_v0 = vld [vmem:[%s1178_s1 + $0x78] sm:$0xff]  ;;  %v819_v1 = vmov 0.0   ;;  %v306_v2 = vld [vmem:[%s1178_s1 + $0x70] sm:$0xff]  ;;  %v305_v3 = vld [vmem:[%s1178_s1 + $0x68] sm:$0xff]  ;;  %s1186_s18 = smov (!%p206_p4, %s697_s18), 63 }
   0xd   : > { %331 = vmatprep.subr.mxu0 %v819_v1  ;;  %706 = vmatprep.subr.mxu1 %v819_v1  ;;  %v304_v4 = vld [vmem:[%s1178_s1 + $0x60] sm:$0xff]  ;;  %v303_v5 = vld [vmem:[%s1178_s1 + $0x58] sm:$0xff]  ;;  %v302_v6 = vld [vmem:[%s1178_s1 + $0x50] sm:$0xff]  ;;  %s705_s28 = sshll.u32 %s1186_s18, 4  ;;  %s701_s11 = sshll.u32 %s1186_s18, 3 }
   0xe   : > { %332 = vmatpush1.msra.mxu0 %v307_v0  ;;  %738 = vmatpush1.msra.mxu1 %v307_v0  ;;  %v301_v7 = vld [vmem:[%s1178_s1 + $0x48] sm:$0xff]  ;;  %v300_v8 = vld [vmem:[%s1178_s1 + $0x40] sm:$0xff]  ;;  %v299_v9 = vld [vmem:[%s1178_s1 + $0x38] sm:$0xff]  ;;  %s1020_s8 = scalar_lea.vmem %s1177_s0, %s705_s28  ;;  %s1102_s21 = scalar_lea.vmem %s1180_s3, %s701_s11 }
   0xf   : > { %333 = vmatprep.subr.mxu0 %v819_v1  ;;  %707 = vmatprep.subr.mxu1 %v819_v1  ;;  %v298_v10 = vld [vmem:[%s1178_s1 + $0x30] sm:$0xff]  ;;  %v297_v11 = vld [vmem:[%s1178_s1 + $0x28] sm:$0xff]  ;;  %v296_v12 = vld [vmem:[%s1178_s1 + $0x20] sm:$0xff] }
  0x10   : > { %334 = vmatpush1.msra.mxu0 %v306_v2  ;;  %739 = vmatpush1.msra.mxu1 %v306_v2  ;;  %v295_v13 = vld [vmem:[%s1178_s1 + $0x18] sm:$0xff]  ;;  %v294_v14 = vld [vmem:[%s1178_s1 + $0x10] sm:$0xff]  ;;  %v293_v15 = vld [vmem:[%s1178_s1 + $0x8] sm:$0xff] }
  0x11   : > { %335 = vmatprep.subr.mxu0 %v819_v1  ;;  %708 = vmatprep.subr.mxu1 %v819_v1  ;;  %v292_v16 = vld [vmem:[%s1178_s1] sm:$0xff]  ;;  %v323_v17 = vld [vmem:[%s1178_s1 + $0xf8] sm:$0xff]  ;;  %v322_v18 = vld [vmem:[%s1178_s1 + $0xf0] sm:$0xff] }
  0x12   : > { %336 = vmatpush1.msra.mxu0 %v305_v3  ;;  %740 = vmatpush1.msra.mxu1 %v305_v3  ;;  %v321_v19 = vld [vmem:[%s1178_s1 + $0xe8] sm:$0xff]  ;;  %v320_v20 = vld [vmem:[%s1178_s1 + $0xe0] sm:$0xff]  ;;  %v319_v21 = vld [vmem:[%s1178_s1 + $0xd8] sm:$0xff] }
  0x13   : > { %337 = vmatprep.subr.mxu0 %v819_v1  ;;  %709 = vmatprep.subr.mxu1 %v819_v1  ;;  %v318_v22 = vld [vmem:[%s1178_s1 + $0xd0] sm:$0xff]  ;;  %v317_v23 = vld [vmem:[%s1178_s1 + $0xc8] sm:$0xff]  ;;  %v316_v24 = vld [vmem:[%s1178_s1 + $0xc0] sm:$0xff] }
  0x14   : > { %338 = vmatpush1.msra.mxu0 %v304_v4  ;;  %741 = vmatpush1.msra.mxu1 %v304_v4  ;;  %v315_v25 = vld [vmem:[%s1178_s1 + $0xb8] sm:$0xff]  ;;  %v314_v26 = vld [vmem:[%s1178_s1 + $0xb0] sm:$0xff]  ;;  %v313_v27 = vld [vmem:[%s1178_s1 + $0xa8] sm:$0xff] }
  0x15   : > { %339 = vmatprep.subr.mxu0 %v819_v1  ;;  %710 = vmatprep.subr.mxu1 %v819_v1  ;;  %v312_v28 = vld [vmem:[%s1178_s1 + $0xa0] sm:$0xff]  ;;  %v311_v29 = vld [vmem:[%s1178_s1 + $0x98] sm:$0xff]  ;;  %v310_v30 = vld [vmem:[%s1178_s1 + $0x90] sm:$0xff] }
  0x16   : > { %340 = vmatpush1.msra.mxu0 %v303_v5  ;;  %742 = vmatpush1.msra.mxu1 %v303_v5  ;;  %v309_v31 = vld [vmem:[%s1178_s1 + $0x88] sm:$0xff]  ;;  %v308_v32 = vld [vmem:[%s1178_s1 + $0x80] sm:$0xff]  ;;  %v231_v37 = vld [vmem:[%s1020_s8 + $0x18] sm:$0xff] }
  0x17   : > { %341 = vmatprep.subr.mxu0 %v819_v1  ;;  %711 = vmatprep.subr.mxu1 %v819_v1  ;;  %v229_v33 = vld [vmem:[%s1020_s8 + $0x8] sm:$0xff]  ;;  %v228_v35 = vld [vmem:[%s1020_s8] sm:$0xff]  ;;  %v263_v38 = vld [vmem:[%s1020_s8 + $0x118] sm:$0xff] }
  0x18   : > { %342 = vmatpush1.msra.mxu0 %v302_v6  ;;  %743 = vmatpush1.msra.mxu1 %v302_v6  ;;  %v261_v34 = vld [vmem:[%s1020_s8 + $0x108] sm:$0xff]  ;;  %v260_v36 = vld [vmem:[%s1020_s8 + $0x100] sm:$0xff]  ;;  %v230_v39 = vld [vmem:[%s1020_s8 + $0x10] sm:$0xff] }
  0x19   : > { %343 = vmatprep.subr.mxu0 %v819_v1  ;;  %712 = vmatprep.subr.mxu1 %v819_v1  ;;  %v262_v40 = vld [vmem:[%s1020_s8 + $0x110] sm:$0xff]  ;;  %v233_v41 = vld [vmem:[%s1020_s8 + $0x28] sm:$0xff]  ;;  %v232_v43 = vld [vmem:[%s1020_s8 + $0x20] sm:$0xff] }
  0x1a   : > { %344 = vmatpush1.msra.mxu0 %v301_v7  ;;  %744 = vmatpush1.msra.mxu1 %v301_v7  ;;  %v265_v42 = vld [vmem:[%s1020_s8 + $0x128] sm:$0xff]  ;;  %v264_v44 = vld [vmem:[%s1020_s8 + $0x120] sm:$0xff]  ;;  %v235_v45 = vld [vmem:[%s1020_s8 + $0x38] sm:$0xff] }
  0x1b   : > { %345 = vmatprep.subr.mxu0 %v819_v1  ;;  %713 = vmatprep.subr.mxu1 %v819_v1  ;;  %v267_v46 = vld [vmem:[%s1020_s8 + $0x138] sm:$0xff]  ;;  %v234_v47 = vld [vmem:[%s1020_s8 + $0x30] sm:$0xff]  ;;  %v237_v49 = vld [vmem:[%s1020_s8 + $0x48] sm:$0xff] }
  0x1c   : > { %346 = vmatpush1.msra.mxu0 %v300_v8  ;;  %745 = vmatpush1.msra.mxu1 %v300_v8  ;;  %v266_v48 = vld [vmem:[%s1020_s8 + $0x130] sm:$0xff]  ;;  %v269_v50 = vld [vmem:[%s1020_s8 + $0x148] sm:$0xff]  ;;  %v236_v51 = vld [vmem:[%s1020_s8 + $0x40] sm:$0xff] }
  0x1d   : > { %347 = vmatprep.subr.mxu0 %v819_v1  ;;  %714 = vmatprep.subr.mxu1 %v819_v1  ;;  %v268_v52 = vld [vmem:[%s1020_s8 + $0x140] sm:$0xff]  ;;  %v239_v53 = vld [vmem:[%s1020_s8 + $0x58] sm:$0xff]  ;;  %v238_v55 = vld [vmem:[%s1020_s8 + $0x50] sm:$0xff] }
  0x1e   : > { %348 = vmatpush1.msra.mxu0 %v299_v9  ;;  %746 = vmatpush1.msra.mxu1 %v299_v9  ;;  %v271_v54 = vld [vmem:[%s1020_s8 + $0x158] sm:$0xff]  ;;  %v270_v56 = vld [vmem:[%s1020_s8 + $0x150] sm:$0xff]  ;;  %v241_v57 = vld [vmem:[%s1020_s8 + $0x68] sm:$0xff] }
  0x1f   : > { %349 = vmatprep.subr.mxu0 %v819_v1  ;;  %715 = vmatprep.subr.mxu1 %v819_v1  ;;  %v273_v58 = vld [vmem:[%s1020_s8 + $0x168] sm:$0xff]  ;;  %v240_v59 = vld [vmem:[%s1020_s8 + $0x60] sm:$0xff]  ;;  %v243_v61 = vld [vmem:[%s1020_s8 + $0x78] sm:$0xff] }
  0x20   : > { %350 = vmatpush1.msra.mxu0 %v298_v10  ;;  %747 = vmatpush1.msra.mxu1 %v298_v10  ;;  %v272_v60 = vld [vmem:[%s1020_s8 + $0x160] sm:$0xff]  ;;  %v275_v62 = vld [vmem:[%s1020_s8 + $0x178] sm:$0xff]  ;;  %v242_v63 = vld [vmem:[%s1020_s8 + $0x70] sm:$0xff] }
  0x21   : > { %351 = vmatprep.subr.mxu0 %v819_v1  ;;  %716 = vmatprep.subr.mxu1 %v819_v1  ;;  %v274_v0 = vld [vmem:[%s1020_s8 + $0x170] sm:$0xff]  ;;  %v277_v2 = vld [vmem:[%s1020_s8 + $0x188] sm:$0xff]  ;;  %v244_v3 = vld [vmem:[%s1020_s8 + $0x80] sm:$0xff] }
  0x22   : > { %352 = vmatpush1.msra.mxu0 %v297_v11  ;;  %748 = vmatpush1.msra.mxu1 %v297_v11  ;;  %v276_v4 = vld [vmem:[%s1020_s8 + $0x180] sm:$0xff]  ;;  %v247_v5 = vld [vmem:[%s1020_s8 + $0x98] sm:$0xff]  ;;  %v246_v7 = vld [vmem:[%s1020_s8 + $0x90] sm:$0xff] }
  0x23   : > { %353 = vmatprep.subr.mxu0 %v819_v1  ;;  %717 = vmatprep.subr.mxu1 %v819_v1  ;;  %v279_v6 = vld [vmem:[%s1020_s8 + $0x198] sm:$0xff]  ;;  %v278_v8 = vld [vmem:[%s1020_s8 + $0x190] sm:$0xff]  ;;  %v249_v9 = vld [vmem:[%s1020_s8 + $0xa8] sm:$0xff] }
  0x24   : > { %354 = vmatpush1.msra.mxu0 %v296_v12  ;;  %749 = vmatpush1.msra.mxu1 %v296_v12  ;;  %v281_v10 = vld [vmem:[%s1020_s8 + $0x1a8] sm:$0xff]  ;;  %v248_v11 = vld [vmem:[%s1020_s8 + $0xa0] sm:$0xff] }
  0x25   : > { %355 = vmatprep.subr.mxu0 %v819_v1  ;;  %718 = vmatprep.subr.mxu1 %v819_v1  ;;  %v280_v12 = vld [vmem:[%s1020_s8 + $0x1a0] sm:$0xff] }
  0x26   : > { %356 = vmatpush1.msra.mxu0 %v295_v13  ;;  %750 = vmatpush1.msra.mxu1 %v295_v13  ;;  %v251_v13 = vld [vmem:[%s1020_s8 + $0xb8] sm:$0xff] }
  0x27   : > { %357 = vmatprep.subr.mxu0 %v819_v1  ;;  %719 = vmatprep.subr.mxu1 %v819_v1 }
  0x28   : > { %358 = vmatpush1.msra.mxu0 %v294_v14  ;;  %751 = vmatpush1.msra.mxu1 %v294_v14  ;;  %v283_v14 = vld [vmem:[%s1020_s8 + $0x1b8] sm:$0xff] }
  0x29   : > { %359 = vmatprep.subr.mxu0 %v819_v1  ;;  %720 = vmatprep.subr.mxu1 %v819_v1 }
  0x2a   : > { %360 = vmatpush1.msra.mxu0 %v293_v15  ;;  %752 = vmatpush1.msra.mxu1 %v293_v15  ;;  %v250_v15 = vld [vmem:[%s1020_s8 + $0xb0] sm:$0xff] }
  0x2b   : > { %361 = vmatprep.subr.mxu0 %v819_v1  ;;  %721 = vmatprep.subr.mxu1 %v819_v1 }
  0x2c   : > { %362 = vmatpush1.msra.mxu0 %v292_v16  ;;  %753 = vmatpush1.msra.mxu1 %v292_v16  ;;  %v282_v16 = vld [vmem:[%s1020_s8 + $0x1b0] sm:$0xff] }
  0x2d   : > { %363 = vmatprep.subr.mxu0 %v819_v1  ;;  %722 = vmatprep.subr.mxu1 %v819_v1 }
  0x2e   : > { %364 = vmatpush2.msra.mxu0 %v323_v17  ;;  %754 = vmatpush2.msra.mxu1 %v323_v17  ;;  %v253_v17 = vld [vmem:[%s1020_s8 + $0xc8] sm:$0xff] }
  0x2f   : > { %365 = vmatprep.subr.mxu0 %v819_v1  ;;  %723 = vmatprep.subr.mxu1 %v819_v1 }
  0x30   : > { %366 = vmatpush2.msra.mxu0 %v322_v18  ;;  %755 = vmatpush2.msra.mxu1 %v322_v18  ;;  %v285_v18 = vld [vmem:[%s1020_s8 + $0x1c8] sm:$0xff] }
  0x31   : > { %367 = vmatprep.subr.mxu0 %v819_v1  ;;  %724 = vmatprep.subr.mxu1 %v819_v1 }
  0x32   : > { %368 = vmatpush2.msra.mxu0 %v321_v19  ;;  %756 = vmatpush2.msra.mxu1 %v321_v19  ;;  %v252_v19 = vld [vmem:[%s1020_s8 + $0xc0] sm:$0xff] }
  0x33   : > { %369 = vmatprep.subr.mxu0 %v819_v1  ;;  %725 = vmatprep.subr.mxu1 %v819_v1 }
  0x34   : > { %370 = vmatpush2.msra.mxu0 %v320_v20  ;;  %757 = vmatpush2.msra.mxu1 %v320_v20  ;;  %v284_v20 = vld [vmem:[%s1020_s8 + $0x1c0] sm:$0xff] }
  0x35   : > { %371 = vmatprep.subr.mxu0 %v819_v1  ;;  %726 = vmatprep.subr.mxu1 %v819_v1 }
  0x36   : > { %372 = vmatpush2.msra.mxu0 %v319_v21  ;;  %758 = vmatpush2.msra.mxu1 %v319_v21  ;;  %v255_v21 = vld [vmem:[%s1020_s8 + $0xd8] sm:$0xff] }
  0x37   : > { %373 = vmatprep.subr.mxu0 %v819_v1  ;;  %727 = vmatprep.subr.mxu1 %v819_v1 }
  0x38   : > { %374 = vmatpush2.msra.mxu0 %v318_v22  ;;  %759 = vmatpush2.msra.mxu1 %v318_v22  ;;  %v287_v22 = vld [vmem:[%s1020_s8 + $0x1d8] sm:$0xff] }
  0x39   : > { %375 = vmatprep.subr.mxu0 %v819_v1  ;;  %728 = vmatprep.subr.mxu1 %v819_v1 }
  0x3a   : > { %376 = vmatpush2.msra.mxu0 %v317_v23  ;;  %760 = vmatpush2.msra.mxu1 %v317_v23  ;;  %v254_v23 = vld [vmem:[%s1020_s8 + $0xd0] sm:$0xff] }
  0x3b   : > { %377 = vmatprep.subr.mxu0 %v819_v1  ;;  %729 = vmatprep.subr.mxu1 %v819_v1 }
  0x3c   : > { %378 = vmatpush2.msra.mxu0 %v316_v24  ;;  %761 = vmatpush2.msra.mxu1 %v316_v24  ;;  %v286_v24 = vld [vmem:[%s1020_s8 + $0x1d0] sm:$0xff] }
  0x3d   : > { %379 = vmatprep.subr.mxu0 %v819_v1  ;;  %730 = vmatprep.subr.mxu1 %v819_v1 }
  0x3e   : > { %380 = vmatpush2.msra.mxu0 %v315_v25  ;;  %762 = vmatpush2.msra.mxu1 %v315_v25  ;;  %v257_v25 = vld [vmem:[%s1020_s8 + $0xe8] sm:$0xff] }
  0x3f   : > { %381 = vmatprep.subr.mxu0 %v819_v1  ;;  %731 = vmatprep.subr.mxu1 %v819_v1 }
  0x40   : > { %382 = vmatpush2.msra.mxu0 %v314_v26  ;;  %763 = vmatpush2.msra.mxu1 %v314_v26  ;;  %v289_v26 = vld [vmem:[%s1020_s8 + $0x1e8] sm:$0xff] }
  0x41   : > { %383 = vmatprep.subr.mxu0 %v819_v1  ;;  %732 = vmatprep.subr.mxu1 %v819_v1 }
  0x42   : > { %384 = vmatpush2.msra.mxu0 %v313_v27  ;;  %764 = vmatpush2.msra.mxu1 %v313_v27  ;;  %v256_v27 = vld [vmem:[%s1020_s8 + $0xe0] sm:$0xff] }
  0x43   : > { %385 = vmatprep.subr.mxu0 %v819_v1  ;;  %733 = vmatprep.subr.mxu1 %v819_v1 }
  0x44   : > { %386 = vmatpush2.msra.mxu0 %v312_v28  ;;  %765 = vmatpush2.msra.mxu1 %v312_v28  ;;  %v288_v28 = vld [vmem:[%s1020_s8 + $0x1e0] sm:$0xff] }
  0x45   : > { %387 = vmatprep.subr.mxu0 %v819_v1  ;;  %734 = vmatprep.subr.mxu1 %v819_v1 }
  0x46   : > { %388 = vmatpush2.msra.mxu0 %v311_v29  ;;  %766 = vmatpush2.msra.mxu1 %v311_v29  ;;  %v259_v29 = vld [vmem:[%s1020_s8 + $0xf8] sm:$0xff] }
  0x47   : > { %389 = vmatprep.subr.mxu0 %v819_v1  ;;  %735 = vmatprep.subr.mxu1 %v819_v1 }
  0x48   : > { %390 = vmatpush2.msra.mxu0 %v310_v30  ;;  %767 = vmatpush2.msra.mxu1 %v310_v30  ;;  %v291_v30 = vld [vmem:[%s1020_s8 + $0x1f8] sm:$0xff] }
  0x49   : > { %391 = vmatprep.subr.mxu0 %v819_v1  ;;  %736 = vmatprep.subr.mxu1 %v819_v1 }
  0x4a   : > { %392 = vmatpush2.msra.mxu0 %v309_v31  ;;  %768 = vmatpush2.msra.mxu1 %v309_v31  ;;  %v258_v31 = vld [vmem:[%s1020_s8 + $0xf0] sm:$0xff] }
  0x4b   : > { %393 = vmatprep.subr.mxu0 %v819_v1  ;;  %737 = vmatprep.subr.mxu1 %v819_v1  ;;  %v245_v1 = vld [vmem:[%s1020_s8 + $0x88] sm:$0xff] }
  0x4c   : > { %394 = vmatpush2.msra.mxu0 %v308_v32  ;;  %769 = vmatpush2.msra.mxu1 %v308_v32  ;;  %v290_v32 = vld [vmem:[%s1020_s8 + $0x1f0] sm:$0xff] }
  0x4d   : > { %395 = vmatprep.mubr.f32.mxu0 %v229_v33  ;;  %475 = vmatprep.mubr.f32.mxu1 %v261_v34  ;;  %v1097_v33 = vld [vmem:[%s1179_s2] ss:$0 sm:$0xff] }
  0x4e   : > { %396 = vmatmul.mubr.f32.vlgmr.msra.gmra.mxu0 %v228_v35  ;;  %476 = vmatmul.mubr.f32.vlgmr.msra.gmra.mxu1 %v260_v36 }
  0x4f   : > { %400 = vmatprep.mubr.f32.mxu0 %v231_v37  ;;  %480 = vmatprep.mubr.f32.mxu1 %v263_v38 }
  0x52   : > { %401 = vmatmul.mubr.f32.gmra.mxu0 %v230_v39  ;;  %481 = vmatmul.mubr.f32.gmra.mxu1 %v262_v40 }
  0x53   : > { %405 = vmatprep.mubr.f32.mxu0 %v233_v41  ;;  %485 = vmatprep.mubr.f32.mxu1 %v265_v42 }
  0x56   : > { %406 = vmatmul.mubr.f32.gmra.mxu0 %v232_v43  ;;  %486 = vmatmul.mubr.f32.gmra.mxu1 %v264_v44 }
  0x57   : > { %410 = vmatprep.mubr.f32.mxu0 %v235_v45  ;;  %490 = vmatprep.mubr.f32.mxu1 %v267_v46 }
  0x5a   : > { %411 = vmatmul.mubr.f32.gmra.mxu0 %v234_v47  ;;  %491 = vmatmul.mubr.f32.gmra.mxu1 %v266_v48 }
  0x5b   : > { %415 = vmatprep.mubr.f32.mxu0 %v237_v49  ;;  %495 = vmatprep.mubr.f32.mxu1 %v269_v50 }
  0x5e   : > { %416 = vmatmul.mubr.f32.gmra.mxu0 %v236_v51  ;;  %496 = vmatmul.mubr.f32.gmra.mxu1 %v268_v52 }
  0x5f   : > { %420 = vmatprep.mubr.f32.mxu0 %v239_v53  ;;  %500 = vmatprep.mubr.f32.mxu1 %v271_v54 }
  0x62   : > { %421 = vmatmul.mubr.f32.gmra.mxu0 %v238_v55  ;;  %501 = vmatmul.mubr.f32.gmra.mxu1 %v270_v56 }
  0x63   : > { %425 = vmatprep.mubr.f32.mxu0 %v241_v57  ;;  %505 = vmatprep.mubr.f32.mxu1 %v273_v58 }
  0x66   : > { %426 = vmatmul.mubr.f32.gmra.mxu0 %v240_v59  ;;  %506 = vmatmul.mubr.f32.gmra.mxu1 %v272_v60 }
  0x67   : > { %430 = vmatprep.mubr.f32.mxu0 %v243_v61  ;;  %510 = vmatprep.mubr.f32.mxu1 %v275_v62 }
  0x6a   : > { %431 = vmatmul.mubr.f32.gmra.mxu0 %v242_v63  ;;  %511 = vmatmul.mubr.f32.gmra.mxu1 %v274_v0 }
  0x6b   : > { %435 = vmatprep.mubr.f32.mxu0 %v245_v1  ;;  %515 = vmatprep.mubr.f32.mxu1 %v277_v2 }
  0x6e   : > { %436 = vmatmul.mubr.f32.gmra.mxu0 %v244_v3  ;;  %516 = vmatmul.mubr.f32.gmra.mxu1 %v276_v4 }
  0x6f   : > { %440 = vmatprep.mubr.f32.mxu0 %v247_v5  ;;  %520 = vmatprep.mubr.f32.mxu1 %v279_v6 }
  0x72   : > { %441 = vmatmul.mubr.f32.gmra.mxu0 %v246_v7  ;;  %521 = vmatmul.mubr.f32.gmra.mxu1 %v278_v8 }
  0x73   : > { %445 = vmatprep.mubr.f32.mxu0 %v249_v9  ;;  %525 = vmatprep.mubr.f32.mxu1 %v281_v10 }
  0x76   : > { %446 = vmatmul.mubr.f32.gmra.mxu0 %v248_v11  ;;  %526 = vmatmul.mubr.f32.gmra.mxu1 %v280_v12 }
  0x77   : > { %450 = vmatprep.mubr.f32.mxu0 %v251_v13  ;;  %530 = vmatprep.mubr.f32.mxu1 %v283_v14 }
  0x7a   : > { %451 = vmatmul.mubr.f32.gmra.mxu0 %v250_v15  ;;  %531 = vmatmul.mubr.f32.gmra.mxu1 %v282_v16 }
  0x7b   : > { %455 = vmatprep.mubr.f32.mxu0 %v253_v17  ;;  %535 = vmatprep.mubr.f32.mxu1 %v285_v18 }
  0x7e   : > { %456 = vmatmul.mubr.f32.gmra.mxu0 %v252_v19  ;;  %536 = vmatmul.mubr.f32.gmra.mxu1 %v284_v20 }
  0x7f   : > { %460 = vmatprep.mubr.f32.mxu0 %v255_v21  ;;  %540 = vmatprep.mubr.f32.mxu1 %v287_v22 }
  0x82   : > { %461 = vmatmul.mubr.f32.gmra.mxu0 %v254_v23  ;;  %541 = vmatmul.mubr.f32.gmra.mxu1 %v286_v24 }
  0x83   : > { %465 = vmatprep.mubr.f32.mxu0 %v257_v25  ;;  %545 = vmatprep.mubr.f32.mxu1 %v289_v26 }
  0x86   : > { %466 = vmatmul.mubr.f32.gmra.mxu0 %v256_v27  ;;  %546 = vmatmul.mubr.f32.gmra.mxu1 %v288_v28 }
  0x87   : > { %470 = vmatprep.mubr.f32.mxu0 %v259_v29  ;;  %550 = vmatprep.mubr.f32.mxu1 %v291_v30 }
  0x8a   : > { %471 = vmatmul.mubr.f32.gmra.mxu0 %v258_v31  ;;  %551 = vmatmul.mubr.f32.gmra.mxu1 %v290_v32 }
 0x10e   : > { %v397_v34 = vpop.f32.mrf.mxu0  ;;  %v477_v35 = vpop.f32.mrf.mxu1 }
 0x10f   : > { %v398_v36 = vadd.f32 %v1097_v33, %v397_v34  ;;  %v478_v37 = vadd.f32 %v1097_v33, %v477_v35 }
 0x110   : > { %v399_v38 = vpop.f32.mrf.mxu0  ;;  %v479_v39 = vpop.f32.mrf.mxu1 }
 0x111   : > { %556 = vst [vmem:[%s1102_s21] sm:$0xff] %v398_v36  ;;  %572 = vst [vmem:[%s1102_s21 + $0x80] sm:$0xff] %v478_v37 }
 0x112   : > { %v402_v40 = vpop.f32.mrf.mxu0  ;;  %v482_v41 = vpop.f32.mrf.mxu1 }
 0x113   : > { %v403_v42 = vadd.f32 %v1097_v33, %v402_v40  ;;  %v483_v43 = vadd.f32 %v1097_v33, %v482_v41 }
 0x114   : > { %v404_v44 = vpop.f32.mrf.mxu0  ;;  %v484_v45 = vpop.f32.mrf.mxu1 }
 0x115   : > { %557 = vst [vmem:[%s1102_s21 + $0x8] sm:$0xff] %v403_v42  ;;  %573 = vst [vmem:[%s1102_s21 + $0x88] sm:$0xff] %v483_v43 }
 0x116   : > { %v407_v46 = vpop.f32.mrf.mxu0  ;;  %v487_v47 = vpop.f32.mrf.mxu1 }
 0x117   : > { %v408_v48 = vadd.f32 %v1097_v33, %v407_v46  ;;  %v488_v49 = vadd.f32 %v1097_v33, %v487_v47 }
 0x118   : > { %v409_v50 = vpop.f32.mrf.mxu0  ;;  %v489_v51 = vpop.f32.mrf.mxu1 }
 0x119   : > { %558 = vst [vmem:[%s1102_s21 + $0x10] sm:$0xff] %v408_v48  ;;  %574 = vst [vmem:[%s1102_s21 + $0x90] sm:$0xff] %v488_v49 }
 0x11a   : > { %v412_v52 = vpop.f32.mrf.mxu0  ;;  %v492_v53 = vpop.f32.mrf.mxu1 }
 0x11b   : > { %v413_v54 = vadd.f32 %v1097_v33, %v412_v52  ;;  %v493_v55 = vadd.f32 %v1097_v33, %v492_v53 }
 0x11c   : > { %v414_v56 = vpop.f32.mrf.mxu0  ;;  %v494_v57 = vpop.f32.mrf.mxu1 }
 0x11d   : > { %559 = vst [vmem:[%s1102_s21 + $0x18] sm:$0xff] %v413_v54  ;;  %575 = vst [vmem:[%s1102_s21 + $0x98] sm:$0xff] %v493_v55 }
 0x11e   : > { %v417_v58 = vpop.f32.mrf.mxu0  ;;  %v497_v59 = vpop.f32.mrf.mxu1 }
 0x11f   : > { %v418_v60 = vadd.f32 %v1097_v33, %v417_v58  ;;  %v498_v61 = vadd.f32 %v1097_v33, %v497_v59 }
 0x120   : > { %v419_v62 = vpop.f32.mrf.mxu0  ;;  %v499_v63 = vpop.f32.mrf.mxu1 }
 0x121   : > { %560 = vst [vmem:[%s1102_s21 + $0x20] sm:$0xff] %v418_v60  ;;  %576 = vst [vmem:[%s1102_s21 + $0xa0] sm:$0xff] %v498_v61 }
 0x122   : > { %v422_v0 = vpop.f32.mrf.mxu0  ;;  %v502_v1 = vpop.f32.mrf.mxu1 }
 0x123   : > { %v423_v2 = vadd.f32 %v1097_v33, %v422_v0  ;;  %v503_v3 = vadd.f32 %v1097_v33, %v502_v1 }
 0x124   : > { %v424_v4 = vpop.f32.mrf.mxu0  ;;  %v504_v5 = vpop.f32.mrf.mxu1 }
 0x125   : > { %561 = vst [vmem:[%s1102_s21 + $0x28] sm:$0xff] %v423_v2  ;;  %577 = vst [vmem:[%s1102_s21 + $0xa8] sm:$0xff] %v503_v3 }
 0x126   : > { %v427_v6 = vpop.f32.mrf.mxu0  ;;  %v507_v7 = vpop.f32.mrf.mxu1 }
 0x127   : > { %v428_v8 = vadd.f32 %v1097_v33, %v427_v6  ;;  %v508_v9 = vadd.f32 %v1097_v33, %v507_v7 }
 0x128   : > { %v429_v10 = vpop.f32.mrf.mxu0  ;;  %v509_v11 = vpop.f32.mrf.mxu1 }
 0x129   : > { %562 = vst [vmem:[%s1102_s21 + $0x30] sm:$0xff] %v428_v8  ;;  %578 = vst [vmem:[%s1102_s21 + $0xb0] sm:$0xff] %v508_v9 }
 0x12a   : > { %v432_v12 = vpop.f32.mrf.mxu0  ;;  %v512_v13 = vpop.f32.mrf.mxu1 }
 0x12b   : > { %v433_v14 = vadd.f32 %v1097_v33, %v432_v12  ;;  %v513_v15 = vadd.f32 %v1097_v33, %v512_v13 }
 0x12c   : > { %v434_v16 = vpop.f32.mrf.mxu0  ;;  %v514_v17 = vpop.f32.mrf.mxu1 }
 0x12d   : > { %563 = vst [vmem:[%s1102_s21 + $0x38] sm:$0xff] %v433_v14  ;;  %579 = vst [vmem:[%s1102_s21 + $0xb8] sm:$0xff] %v513_v15 }
 0x12e   : > { %v437_v18 = vpop.f32.mrf.mxu0  ;;  %v517_v19 = vpop.f32.mrf.mxu1 }
 0x12f   : > { %v438_v20 = vadd.f32 %v1097_v33, %v437_v18  ;;  %v518_v21 = vadd.f32 %v1097_v33, %v517_v19 }
 0x130   : > { %v439_v22 = vpop.f32.mrf.mxu0  ;;  %v519_v23 = vpop.f32.mrf.mxu1 }
 0x131   : > { %564 = vst [vmem:[%s1102_s21 + $0x40] sm:$0xff] %v438_v20  ;;  %580 = vst [vmem:[%s1102_s21 + $0xc0] sm:$0xff] %v518_v21 }
 0x132   : > { %v442_v24 = vpop.f32.mrf.mxu0  ;;  %v522_v25 = vpop.f32.mrf.mxu1 }
 0x133   : > { %v443_v26 = vadd.f32 %v1097_v33, %v442_v24  ;;  %v523_v27 = vadd.f32 %v1097_v33, %v522_v25 }
 0x134   : > { %v444_v28 = vpop.f32.mrf.mxu0  ;;  %v524_v29 = vpop.f32.mrf.mxu1 }
 0x135   : > { %565 = vst [vmem:[%s1102_s21 + $0x48] sm:$0xff] %v443_v26  ;;  %581 = vst [vmem:[%s1102_s21 + $0xc8] sm:$0xff] %v523_v27 }
 0x136   : > { %v447_v30 = vpop.f32.mrf.mxu0  ;;  %v527_v31 = vpop.f32.mrf.mxu1 }
 0x137   : > { %v448_v32 = vadd.f32 %v1097_v33, %v447_v30  ;;  %v528_v34 = vadd.f32 %v1097_v33, %v527_v31 }
 0x138   : > { %v449_v35 = vpop.f32.mrf.mxu0  ;;  %v529_v36 = vpop.f32.mrf.mxu1 }
 0x139   : > { %566 = vst [vmem:[%s1102_s21 + $0x50] sm:$0xff] %v448_v32  ;;  %582 = vst [vmem:[%s1102_s21 + $0xd0] sm:$0xff] %v528_v34 }
 0x13a   : > { %v452_v37 = vpop.f32.mrf.mxu0  ;;  %v532_v38 = vpop.f32.mrf.mxu1 }
 0x13b   : > { %v453_v39 = vadd.f32 %v1097_v33, %v452_v37  ;;  %v533_v40 = vadd.f32 %v1097_v33, %v532_v38 }
 0x13c   : > { %v454_v41 = vpop.f32.mrf.mxu0  ;;  %v534_v42 = vpop.f32.mrf.mxu1 }
 0x13d   : > { %567 = vst [vmem:[%s1102_s21 + $0x58] sm:$0xff] %v453_v39  ;;  %583 = vst [vmem:[%s1102_s21 + $0xd8] sm:$0xff] %v533_v40 }
 0x13e   : > { %v457_v43 = vpop.f32.mrf.mxu0  ;;  %v537_v44 = vpop.f32.mrf.mxu1 }
 0x13f   : > { %v458_v45 = vadd.f32 %v1097_v33, %v457_v43  ;;  %v538_v46 = vadd.f32 %v1097_v33, %v537_v44 }
 0x140   : > { %v459_v47 = vpop.f32.mrf.mxu0  ;;  %v539_v48 = vpop.f32.mrf.mxu1 }
 0x141   : > { %568 = vst [vmem:[%s1102_s21 + $0x60] sm:$0xff] %v458_v45  ;;  %584 = vst [vmem:[%s1102_s21 + $0xe0] sm:$0xff] %v538_v46 }
 0x142   : > { %v462_v49 = vpop.f32.mrf.mxu0  ;;  %v542_v50 = vpop.f32.mrf.mxu1 }
 0x143   : > { %v463_v51 = vadd.f32 %v1097_v33, %v462_v49  ;;  %v543_v52 = vadd.f32 %v1097_v33, %v542_v50 }
 0x144   : > { %v464_v53 = vpop.f32.mrf.mxu0  ;;  %v544_v54 = vpop.f32.mrf.mxu1 }
 0x145   : > { %569 = vst [vmem:[%s1102_s21 + $0x68] sm:$0xff] %v463_v51  ;;  %585 = vst [vmem:[%s1102_s21 + $0xe8] sm:$0xff] %v543_v52 }
 0x146   : > { %v467_v55 = vpop.f32.mrf.mxu0  ;;  %v547_v56 = vpop.f32.mrf.mxu1 }
 0x147   : > { %v468_v57 = vadd.f32 %v1097_v33, %v467_v55  ;;  %v548_v58 = vadd.f32 %v1097_v33, %v547_v56 }
 0x148   : > { %v469_v59 = vpop.f32.mrf.mxu0  ;;  %v549_v60 = vpop.f32.mrf.mxu1 }
 0x149   : > { %570 = vst [vmem:[%s1102_s21 + $0x70] sm:$0xff] %v468_v57  ;;  %586 = vst [vmem:[%s1102_s21 + $0xf0] sm:$0xff] %v548_v58 }
 0x14a   : > { %v472_v61 = vpop.f32.mrf.mxu0  ;;  %v552_v62 = vpop.f32.mrf.mxu1 }
 0x14b   : > { %v473_v63 = vadd.f32 %v1097_v33, %v472_v61  ;;  %v553_v0 = vadd.f32 %v1097_v33, %v552_v62 }
 0x14c   : > { %v474_v1 = vpop.f32.mrf.mxu0  ;;  %v554_v2 = vpop.f32.mrf.mxu1 }
 0x14d   : > { %571 = vst [vmem:[%s1102_s21 + $0x78] sm:$0xff] %v473_v63  ;;  %587 = vst [vmem:[%s1102_s21 + $0xf8] sm:$0xff] %v553_v0 }
 0x14e PF: > { %s13_s14 = sadd.s32 1, %s817_s14   ;;  %s1181_s12 = smov %s813_s13 }
 0x14f   : > { %p10_p5 = scmp.ge.s32.totalorder %s13_s14, 4   ;;  %s1182_s13 = smov %s1184_s15 }
 0x151   :  { %12 = sbr.rel (!%p10_p5) target bundleno = 2 (0x2), region = 68 }

// kernel: run_pallas.57
= control target key start
LH: loop header
LB: loop body
LE: loop exit
PB: predicated region body
PF: predicated region fallthrough
CT: control target
= control target key end

     0   :  { %vm284_vm0 = vcmask 195584   ;;  %s961_s0 = inlined_call_operand.vmem [shape: f32[512,24], index: 0, kind: input, shape index: {}]   ;;  %s962_s1 = inlined_call_operand.vmem [shape: f32[1,24], index: 1, kind: input, shape index: {}]   ;;  %s963_s2 = inlined_call_operand.vmem [shape: f32[1,24], index: 2, kind: input, shape index: {}]   ;;  %s964_s3 = inlined_call_operand.vmem [shape: f32[512,24], index: 3, kind: output, shape index: {}]  }
   0x1   :  { %v14_v0 = vld [vmem:[%s961_s0] sm:$0xff]  ;;  %v15_v4 = vld [vmem:[%s961_s0 + $0x8] sm:$0xff]  ;;  %v16_v5 = vld [vmem:[%s961_s0 + $0x10] sm:$0xff] }
   0x2   :  { %v381_v1 = vld [vmem:[%s962_s1] ss:$0 sm:$0xff]  ;;  %v17_v6 = vld [vmem:[%s961_s0 + $0x18] sm:$0xff]  ;;  %v19_v11 = vld [vmem:[%s961_s0 + $0x28] sm:$0xff] }
   0x3   :  { %v386_v2 = vld [vmem:[%s963_s2] ss:$0 sm:$0xff]  ;;  %v85_v3 = vmul.f32 %v381_v1, %v14_v0  ;;  %v86_v7 = vmul.f32 %v381_v1, %v15_v4  ;;  %v87_v8 = vmul.f32 %v381_v1, %v16_v5  ;;  %v88_v9 = vmul.f32 %v381_v1, %v17_v6  ;;  %v20_v12 = vld [vmem:[%s961_s0 + $0x30] sm:$0xff]  ;;  %v21_v17 = vld [vmem:[%s961_s0 + $0x38] sm:$0xff] }
   0x4   :  { %v18_v10 = vld [vmem:[%s961_s0 + $0x20] sm:$0xff]  ;;  %v90_v15 = vmul.f32 %v381_v1, %v19_v11  ;;  %v91_v16 = vmul.f32 %v381_v1, %v20_v12  ;;  %v92_v21 = vmul.f32 %v381_v1, %v21_v17  ;;  %v23_v27 = vld [vmem:[%s961_s0 + $0x48] sm:$0xff]  ;;  %v24_v28 = vld [vmem:[%s961_s0 + $0x50] sm:$0xff] }
   0x5   :  { %v156_v13 = vadd.f32 %v386_v2, %v85_v3  ;;  %v89_v14 = vmul.f32 %v381_v1, %v18_v10  ;;  %v157_v18 = vadd.f32 %v386_v2, %v86_v7  ;;  %v158_v19 = vadd.f32 %v386_v2, %v87_v8  ;;  %v22_v22 = vld [vmem:[%s961_s0 + $0x40] sm:$0xff]  ;;  %v25_v29 = vld [vmem:[%s961_s0 + $0x58] sm:$0xff]  ;;  %v27_v35 = vld [vmem:[%s961_s0 + $0x68] sm:$0xff] }
   0x6   :  { %v159_v20 = vadd.f32 %v386_v2, %v88_v9  ;;  %v161_v25 = vadd.f32 %v386_v2, %v90_v15  ;;  %v162_v26 = vadd.f32 %v386_v2, %v91_v16  ;;  %v163_v33 = vadd.f32 %v386_v2, %v92_v21  ;;  %v26_v34 = vld [vmem:[%s961_s0 + $0x60] sm:$0xff]  ;;  %v28_v36 = vld [vmem:[%s961_s0 + $0x70] sm:$0xff]  ;;  %v29_v41 = vld [vmem:[%s961_s0 + $0x78] sm:$0xff] }
   0x7   :  { %v220_v23 = vmax.f32 %v156_v13, 0.0  ;;  %v160_v24 = vadd.f32 %v386_v2, %v89_v14  ;;  %v221_v30 = vmax.f32 %v157_v18, 0.0  ;;  %v222_v31 = vmax.f32 %v158_v19, 0.0  ;;  %v30_v54 = vld [vmem:[%s961_s0 + $0x80] sm:$0xff]  ;;  %v31_v59 = vld [vmem:[%s961_s0 + $0x88] sm:$0xff]  ;;  %v32_v60 = vld [vmem:[%s961_s0 + $0x90] sm:$0xff] }
   0x8   :  { %v223_v32 = vmax.f32 %v159_v20, 0.0  ;;  %v225_v38 = vmax.f32 %v161_v25, 0.0  ;;  %v226_v39 = vmax.f32 %v162_v26, 0.0  ;;  %v93_v40 = vmul.f32 %v381_v1, %v22_v22  ;;  %v33_v61 = vld [vmem:[%s961_s0 + $0x98] sm:$0xff]  ;;  %v34_v4 = vld [vmem:[%s961_s0 + $0xa0] sm:$0xff]  ;;  %v35_v5 = vld [vmem:[%s961_s0 + $0xa8] sm:$0xff] }
   0x9   :  { %285 = vst.msk [vmem:[%s964_s3] sm:$0xff] %vm284_vm0, %v220_v23  ;;  %v224_v37 = vmax.f32 %v160_v24, 0.0  ;;  %286 = vst.msk [vmem:[%s964_s3 + $0x8] sm:$0xff] %vm284_vm0, %v221_v30  ;;  %v227_v42 = vmax.f32 %v163_v33, 0.0  ;;  %v94_v43 = vmul.f32 %v381_v1, %v23_v27  ;;  %v95_v44 = vmul.f32 %v381_v1, %v24_v28  ;;  %v36_v6 = vld [vmem:[%s961_s0 + $0xb0] sm:$0xff]  ;;  %v37_v11 = vld [vmem:[%s961_s0 + $0xb8] sm:$0xff] }
   0xa   :  { %287 = vst.msk [vmem:[%s964_s3 + $0x10] sm:$0xff] %vm284_vm0, %v222_v31  ;;  %288 = vst.msk [vmem:[%s964_s3 + $0x18] sm:$0xff] %vm284_vm0, %v223_v32  ;;  %v96_v45 = vmul.f32 %v381_v1, %v25_v29  ;;  %v164_v46 = vadd.f32 %v386_v2, %v93_v40  ;;  %v97_v47 = vmul.f32 %v381_v1, %v26_v34  ;;  %v38_v24 = vld [vmem:[%s961_s0 + $0xc0] sm:$0xff]  ;;  %v39_v29 = vld [vmem:[%s961_s0 + $0xc8] sm:$0xff] }
   0xb   :  { %289 = vst.msk [vmem:[%s964_s3 + $0x20] sm:$0xff] %vm284_vm0, %v224_v37  ;;  %290 = vst.msk [vmem:[%s964_s3 + $0x28] sm:$0xff] %vm284_vm0, %v225_v38  ;;  %v98_v48 = vmul.f32 %v381_v1, %v27_v35  ;;  %v99_v49 = vmul.f32 %v381_v1, %v28_v36  ;;  %v165_v50 = vadd.f32 %v386_v2, %v94_v43  ;;  %v40_v30 = vld [vmem:[%s961_s0 + $0xd0] sm:$0xff]  ;;  %v41_v31 = vld [vmem:[%s961_s0 + $0xd8] sm:$0xff] }
   0xc   :  { %291 = vst.msk [vmem:[%s964_s3 + $0x30] sm:$0xff] %vm284_vm0, %v226_v39  ;;  %292 = vst.msk [vmem:[%s964_s3 + $0x38] sm:$0xff] %vm284_vm0, %v227_v42  ;;  %v166_v51 = vadd.f32 %v386_v2, %v95_v44  ;;  %v167_v52 = vadd.f32 %v386_v2, %v96_v45  ;;  %v100_v53 = vmul.f32 %v381_v1, %v29_v41  ;;  %v228_v55 = vmax.f32 %v164_v46, 0.0  ;;  %v42_v36 = vld [vmem:[%s961_s0 + $0xe0] sm:$0xff]  ;;  %v43_v37 = vld [vmem:[%s961_s0 + $0xe8] sm:$0xff] }
   0xd   :  { %v168_v56 = vadd.f32 %v386_v2, %v97_v47  ;;  %v169_v57 = vadd.f32 %v386_v2, %v98_v48  ;;  %v170_v58 = vadd.f32 %v386_v2, %v99_v49  ;;  %v229_v62 = vmax.f32 %v165_v50, 0.0  ;;  %v44_v38 = vld [vmem:[%s961_s0 + $0xf0] sm:$0xff]  ;;  %v45_v43 = vld [vmem:[%s961_s0 + $0xf8] sm:$0xff] }
   0xe   :  { %v230_v63 = vmax.f32 %v166_v51, 0.0  ;;  %v231_v0 = vmax.f32 %v167_v52, 0.0  ;;  %v171_v3 = vadd.f32 %v386_v2, %v100_v53  ;;  %293 = vst.msk [vmem:[%s964_s3 + $0x40] sm:$0xff] %vm284_vm0, %v228_v55  ;;  %v101_v10 = vmul.f32 %v381_v1, %v30_v54 }
   0xf   :  { %v232_v7 = vmax.f32 %v168_v56, 0.0  ;;  %v233_v8 = vmax.f32 %v169_v57, 0.0  ;;  %v234_v9 = vmax.f32 %v170_v58, 0.0  ;;  %294 = vst.msk [vmem:[%s964_s3 + $0x48] sm:$0xff] %vm284_vm0, %v229_v62  ;;  %v102_v13 = vmul.f32 %v381_v1, %v31_v59  ;;  %v46_v56 = vld [vmem:[%s961_s0 + $0x100] sm:$0xff]  ;;  %v48_v62 = vld [vmem:[%s961_s0 + $0x110] sm:$0xff] }
  0x10   :  { %295 = vst.msk [vmem:[%s964_s3 + $0x50] sm:$0xff] %vm284_vm0, %v230_v63  ;;  %296 = vst.msk [vmem:[%s964_s3 + $0x58] sm:$0xff] %vm284_vm0, %v231_v0  ;;  %v235_v12 = vmax.f32 %v171_v3, 0.0  ;;  %v103_v14 = vmul.f32 %v381_v1, %v32_v60  ;;  %v104_v15 = vmul.f32 %v381_v1, %v33_v61  ;;  %v172_v16 = vadd.f32 %v386_v2, %v101_v10  ;;  %v47_v61 = vld [vmem:[%s961_s0 + $0x108] sm:$0xff]  ;;  %v49_v63 = vld [vmem:[%s961_s0 + $0x118] sm:$0xff] }
  0x11   :  { %297 = vst.msk [vmem:[%s964_s3 + $0x60] sm:$0xff] %vm284_vm0, %v232_v7  ;;  %298 = vst.msk [vmem:[%s964_s3 + $0x68] sm:$0xff] %vm284_vm0, %v233_v8  ;;  %v105_v17 = vmul.f32 %v381_v1, %v34_v4  ;;  %v106_v18 = vmul.f32 %v381_v1, %v35_v5  ;;  %v107_v19 = vmul.f32 %v381_v1, %v36_v6  ;;  %v50_v6 = vld [vmem:[%s961_s0 + $0x120] sm:$0xff]  ;;  %v51_v7 = vld [vmem:[%s961_s0 + $0x128] sm:$0xff] }
  0x12   :  { %299 = vst.msk [vmem:[%s964_s3 + $0x70] sm:$0xff] %vm284_vm0, %v234_v9  ;;  %300 = vst.msk [vmem:[%s964_s3 + $0x78] sm:$0xff] %vm284_vm0, %v235_v12  ;;  %v173_v20 = vadd.f32 %v386_v2, %v102_v13  ;;  %v174_v21 = vadd.f32 %v386_v2, %v103_v14  ;;  %v175_v22 = vadd.f32 %v386_v2, %v104_v15  ;;  %v236_v25 = vmax.f32 %v172_v16, 0.0  ;;  %v52_v8 = vld [vmem:[%s961_s0 + $0x130] sm:$0xff]  ;;  %v53_v13 = vld [vmem:[%s961_s0 + $0x138] sm:$0xff] }
  0x13   :  { %v108_v23 = vmul.f32 %v381_v1, %v37_v11  ;;  %v176_v26 = vadd.f32 %v386_v2, %v105_v17  ;;  %v177_v27 = vadd.f32 %v386_v2, %v106_v18  ;;  %v178_v28 = vadd.f32 %v386_v2, %v107_v19 }
  0x14   :  { %v237_v32 = vmax.f32 %v173_v20, 0.0  ;;  %v238_v33 = vmax.f32 %v174_v21, 0.0  ;;  %v239_v34 = vmax.f32 %v175_v22, 0.0  ;;  %301 = vst.msk [vmem:[%s964_s3 + $0x80] sm:$0xff] %vm284_vm0, %v236_v25  ;;  %v109_v42 = vmul.f32 %v381_v1, %v38_v24 }
  0x15   :  { %v179_v35 = vadd.f32 %v386_v2, %v108_v23  ;;  %v240_v39 = vmax.f32 %v176_v26, 0.0  ;;  %v241_v40 = vmax.f32 %v177_v27, 0.0  ;;  %v242_v41 = vmax.f32 %v178_v28, 0.0  ;;  %v54_v26 = vld [vmem:[%s961_s0 + $0x140] sm:$0xff] }
  0x16   :  { %302 = vst.msk [vmem:[%s964_s3 + $0x88] sm:$0xff] %vm284_vm0, %v237_v32  ;;  %303 = vst.msk [vmem:[%s964_s3 + $0x90] sm:$0xff] %vm284_vm0, %v238_v33  ;;  %v110_v45 = vmul.f32 %v381_v1, %v39_v29  ;;  %v111_v46 = vmul.f32 %v381_v1, %v40_v30  ;;  %v112_v47 = vmul.f32 %v381_v1, %v41_v31  ;;  %v55_v31 = vld [vmem:[%s961_s0 + $0x148] sm:$0xff]  ;;  %v56_v32 = vld [vmem:[%s961_s0 + $0x150] sm:$0xff] }
  0x17   :  { %304 = vst.msk [vmem:[%s964_s3 + $0x98] sm:$0xff] %vm284_vm0, %v239_v34  ;;  %v243_v44 = vmax.f32 %v179_v35, 0.0  ;;  %305 = vst.msk [vmem:[%s964_s3 + $0xa0] sm:$0xff] %vm284_vm0, %v240_v39  ;;  %v180_v48 = vadd.f32 %v386_v2, %v109_v42  ;;  %v113_v49 = vmul.f32 %v381_v1, %v42_v36  ;;  %v114_v50 = vmul.f32 %v381_v1, %v43_v37  ;;  %v57_v33 = vld [vmem:[%s961_s0 + $0x158] sm:$0xff]  ;;  %v59_v39 = vld [vmem:[%s961_s0 + $0x168] sm:$0xff] }
  0x18   :  { %306 = vst.msk [vmem:[%s964_s3 + $0xa8] sm:$0xff] %vm284_vm0, %v241_v40  ;;  %307 = vst.msk [vmem:[%s964_s3 + $0xb0] sm:$0xff] %vm284_vm0, %v242_v41  ;;  %v115_v51 = vmul.f32 %v381_v1, %v44_v38  ;;  %v181_v52 = vadd.f32 %v386_v2, %v110_v45  ;;  %v182_v53 = vadd.f32 %v386_v2, %v111_v46  ;;  %v58_v38 = vld [vmem:[%s961_s0 + $0x160] sm:$0xff]  ;;  %v60_v40 = vld [vmem:[%s961_s0 + $0x170] sm:$0xff] }
  0x19   :  { %308 = vst.msk [vmem:[%s964_s3 + $0xb8] sm:$0xff] %vm284_vm0, %v243_v44  ;;  %v183_v54 = vadd.f32 %v386_v2, %v112_v47  ;;  %v116_v55 = vmul.f32 %v381_v1, %v45_v43  ;;  %v244_v57 = vmax.f32 %v180_v48, 0.0  ;;  %v184_v58 = vadd.f32 %v386_v2, %v113_v49  ;;  %v61_v45 = vld [vmem:[%s961_s0 + $0x178] sm:$0xff] }
  0x1a   :  { %v185_v59 = vadd.f32 %v386_v2, %v114_v50  ;;  %v186_v60 = vadd.f32 %v386_v2, %v115_v51  ;;  %v245_v0 = vmax.f32 %v181_v52, 0.0  ;;  %v246_v3 = vmax.f32 %v182_v53, 0.0 }
  0x1b   :  { %v247_v4 = vmax.f32 %v183_v54, 0.0  ;;  %v187_v5 = vadd.f32 %v386_v2, %v116_v55  ;;  %309 = vst.msk [vmem:[%s964_s3 + $0xc0] sm:$0xff] %vm284_vm0, %v244_v57  ;;  %v248_v9 = vmax.f32 %v184_v58, 0.0  ;;  %v117_v12 = vmul.f32 %v381_v1, %v46_v56  ;;  %v62_v58 = vld [vmem:[%s961_s0 + $0x180] sm:$0xff] }
  0x1c   :  { %v249_v10 = vmax.f32 %v185_v59, 0.0  ;;  %v250_v11 = vmax.f32 %v186_v60, 0.0  ;;  %310 = vst.msk [vmem:[%s964_s3 + $0xc8] sm:$0xff] %vm284_vm0, %v245_v0  ;;  %311 = vst.msk [vmem:[%s964_s3 + $0xd0] sm:$0xff] %vm284_vm0, %v246_v3  ;;  %v118_v15 = vmul.f32 %v381_v1, %v47_v61  ;;  %v119_v16 = vmul.f32 %v381_v1, %v48_v62  ;;  %v64_v0 = vld [vmem:[%s961_s0 + $0x190] sm:$0xff]  ;;  %v65_v3 = vld [vmem:[%s961_s0 + $0x198] sm:$0xff] }
  0x1d   :  { %312 = vst.msk [vmem:[%s964_s3 + $0xd8] sm:$0xff] %vm284_vm0, %v247_v4  ;;  %v251_v14 = vmax.f32 %v187_v5, 0.0  ;;  %v120_v17 = vmul.f32 %v381_v1, %v49_v63  ;;  %313 = vst.msk [vmem:[%s964_s3 + $0xe0] sm:$0xff] %vm284_vm0, %v248_v9  ;;  %v188_v18 = vadd.f32 %v386_v2, %v117_v12  ;;  %v121_v19 = vmul.f32 %v381_v1, %v50_v6  ;;  %v63_v63 = vld [vmem:[%s961_s0 + $0x188] sm:$0xff] }
  0x1e   :  { %314 = vst.msk [vmem:[%s964_s3 + $0xe8] sm:$0xff] %vm284_vm0, %v249_v10  ;;  %315 = vst.msk [vmem:[%s964_s3 + $0xf0] sm:$0xff] %vm284_vm0, %v250_v11  ;;  %v122_v20 = vmul.f32 %v381_v1, %v51_v7  ;;  %v123_v21 = vmul.f32 %v381_v1, %v52_v8  ;;  %v189_v22 = vadd.f32 %v386_v2, %v118_v15  ;;  %v66_v8 = vld [vmem:[%s961_s0 + $0x1a0] sm:$0xff]  ;;  %v67_v9 = vld [vmem:[%s961_s0 + $0x1a8] sm:$0xff] }
  0x1f   :  { %316 = vst.msk [vmem:[%s964_s3 + $0xf8] sm:$0xff] %vm284_vm0, %v251_v14  ;;  %v190_v23 = vadd.f32 %v386_v2, %v119_v16  ;;  %v191_v24 = vadd.f32 %v386_v2, %v120_v17  ;;  %v124_v25 = vmul.f32 %v381_v1, %v53_v13  ;;  %v252_v27 = vmax.f32 %v188_v18, 0.0  ;;  %v68_v10 = vld [vmem:[%s961_s0 + $0x1b0] sm:$0xff]  ;;  %v69_v15 = vld [vmem:[%s961_s0 + $0x1b8] sm:$0xff] }
  0x20   :  { %v192_v28 = vadd.f32 %v386_v2, %v121_v19  ;;  %v193_v29 = vadd.f32 %v386_v2, %v122_v20  ;;  %v194_v30 = vadd.f32 %v386_v2, %v123_v21  ;;  %v253_v34 = vmax.f32 %v189_v22, 0.0 }
  0x21   :  { %v254_v35 = vmax.f32 %v190_v23, 0.0  ;;  %v255_v36 = vmax.f32 %v191_v24, 0.0  ;;  %v195_v37 = vadd.f32 %v386_v2, %v124_v25  ;;  %317 = vst.msk [vmem:[%s964_s3 + $0x100] sm:$0xff] %vm284_vm0, %v252_v27  ;;  %v125_v44 = vmul.f32 %v381_v1, %v54_v26 }
  0x22   :  { %v256_v41 = vmax.f32 %v192_v28, 0.0  ;;  %v257_v42 = vmax.f32 %v193_v29, 0.0  ;;  %v258_v43 = vmax.f32 %v194_v30, 0.0  ;;  %318 = vst.msk [vmem:[%s964_s3 + $0x108] sm:$0xff] %vm284_vm0, %v253_v34  ;;  %v126_v47 = vmul.f32 %v381_v1, %v55_v31  ;;  %v70_v28 = vld [vmem:[%s961_s0 + $0x1c0] sm:$0xff]  ;;  %v72_v34 = vld [vmem:[%s961_s0 + $0x1d0] sm:$0xff] }
  0x23   :  { %319 = vst.msk [vmem:[%s964_s3 + $0x110] sm:$0xff] %vm284_vm0, %v254_v35  ;;  %320 = vst.msk [vmem:[%s964_s3 + $0x118] sm:$0xff] %vm284_vm0, %v255_v36  ;;  %v259_v46 = vmax.f32 %v195_v37, 0.0  ;;  %v127_v48 = vmul.f32 %v381_v1, %v56_v32  ;;  %v128_v49 = vmul.f32 %v381_v1, %v57_v33  ;;  %v196_v50 = vadd.f32 %v386_v2, %v125_v44  ;;  %v71_v33 = vld [vmem:[%s961_s0 + $0x1c8] sm:$0xff]  ;;  %v73_v35 = vld [vmem:[%s961_s0 + $0x1d8] sm:$0xff] }
  0x24   :  { %321 = vst.msk [vmem:[%s964_s3 + $0x120] sm:$0xff] %vm284_vm0, %v256_v41  ;;  %322 = vst.msk [vmem:[%s964_s3 + $0x128] sm:$0xff] %vm284_vm0, %v257_v42  ;;  %v129_v51 = vmul.f32 %v381_v1, %v58_v38  ;;  %v130_v52 = vmul.f32 %v381_v1, %v59_v39  ;;  %v131_v53 = vmul.f32 %v381_v1, %v60_v40  ;;  %v74_v40 = vld [vmem:[%s961_s0 + $0x1e0] sm:$0xff]  ;;  %v75_v41 = vld [vmem:[%s961_s0 + $0x1e8] sm:$0xff] }
  0x25   :  { %323 = vst.msk [vmem:[%s964_s3 + $0x130] sm:$0xff] %vm284_vm0, %v258_v43  ;;  %324 = vst.msk [vmem:[%s964_s3 + $0x138] sm:$0xff] %vm284_vm0, %v259_v46  ;;  %v197_v54 = vadd.f32 %v386_v2, %v126_v47  ;;  %v198_v55 = vadd.f32 %v386_v2, %v127_v48  ;;  %v199_v56 = vadd.f32 %v386_v2, %v128_v49  ;;  %v260_v59 = vmax.f32 %v196_v50, 0.0  ;;  %v76_v42 = vld [vmem:[%s961_s0 + $0x1f0] sm:$0xff]  ;;  %v77_v47 = vld [vmem:[%s961_s0 + $0x1f8] sm:$0xff] }
  0x26   :  { %v132_v57 = vmul.f32 %v381_v1, %v61_v45  ;;  %v200_v60 = vadd.f32 %v386_v2, %v129_v51  ;;  %v201_v61 = vadd.f32 %v386_v2, %v130_v52  ;;  %v202_v62 = vadd.f32 %v386_v2, %v131_v53 }
  0x27   :  { %v261_v4 = vmax.f32 %v197_v54, 0.0  ;;  %v262_v5 = vmax.f32 %v198_v55, 0.0  ;;  %v263_v6 = vmax.f32 %v199_v56, 0.0  ;;  %325 = vst.msk [vmem:[%s964_s3 + $0x140] sm:$0xff] %vm284_vm0, %v260_v59  ;;  %v133_v14 = vmul.f32 %v381_v1, %v62_v58 }
  0x28   :  { %v203_v7 = vadd.f32 %v386_v2, %v132_v57  ;;  %v264_v11 = vmax.f32 %v200_v60, 0.0  ;;  %v265_v12 = vmax.f32 %v201_v61, 0.0  ;;  %v266_v13 = vmax.f32 %v202_v62, 0.0 }
  0x29   :  { %326 = vst.msk [vmem:[%s964_s3 + $0x148] sm:$0xff] %vm284_vm0, %v261_v4  ;;  %327 = vst.msk [vmem:[%s964_s3 + $0x150] sm:$0xff] %vm284_vm0, %v262_v5  ;;  %v134_v17 = vmul.f32 %v381_v1, %v63_v63  ;;  %v135_v18 = vmul.f32 %v381_v1, %v64_v0  ;;  %v136_v19 = vmul.f32 %v381_v1, %v65_v3 }
  0x2a   :  { %328 = vst.msk [vmem:[%s964_s3 + $0x158] sm:$0xff] %vm284_vm0, %v263_v6  ;;  %v267_v16 = vmax.f32 %v203_v7, 0.0  ;;  %329 = vst.msk [vmem:[%s964_s3 + $0x160] sm:$0xff] %vm284_vm0, %v264_v11  ;;  %v204_v20 = vadd.f32 %v386_v2, %v133_v14  ;;  %v137_v21 = vmul.f32 %v381_v1, %v66_v8  ;;  %v138_v22 = vmul.f32 %v381_v1, %v67_v9 }
  0x2b   :  { %330 = vst.msk [vmem:[%s964_s3 + $0x168] sm:$0xff] %vm284_vm0, %v265_v12  ;;  %331 = vst.msk [vmem:[%s964_s3 + $0x170] sm:$0xff] %vm284_vm0, %v266_v13  ;;  %v139_v23 = vmul.f32 %v381_v1, %v68_v10  ;;  %v205_v24 = vadd.f32 %v386_v2, %v134_v17  ;;  %v206_v25 = vadd.f32 %v386_v2, %v135_v18 }
  0x2c   :  { %332 = vst.msk [vmem:[%s964_s3 + $0x178] sm:$0xff] %vm284_vm0, %v267_v16  ;;  %v207_v26 = vadd.f32 %v386_v2, %v136_v19  ;;  %v140_v27 = vmul.f32 %v381_v1, %v69_v15  ;;  %v268_v29 = vmax.f32 %v204_v20, 0.0  ;;  %v208_v30 = vadd.f32 %v386_v2, %v137_v21 }
  0x2d   :  { %v209_v31 = vadd.f32 %v386_v2, %v138_v22  ;;  %v210_v32 = vadd.f32 %v386_v2, %v139_v23  ;;  %v269_v36 = vmax.f32 %v205_v24, 0.0  ;;  %v270_v37 = vmax.f32 %v206_v25, 0.0 }
  0x2e   :  { %v271_v38 = vmax.f32 %v207_v26, 0.0  ;;  %v211_v39 = vadd.f32 %v386_v2, %v140_v27  ;;  %333 = vst.msk [vmem:[%s964_s3 + $0x180] sm:$0xff] %vm284_vm0, %v268_v29  ;;  %v272_v43 = vmax.f32 %v208_v30, 0.0  ;;  %v141_v46 = vmul.f32 %v381_v1, %v70_v28 }
  0x2f   :  { %v273_v44 = vmax.f32 %v209_v31, 0.0  ;;  %v274_v45 = vmax.f32 %v210_v32, 0.0  ;;  %334 = vst.msk [vmem:[%s964_s3 + $0x188] sm:$0xff] %vm284_vm0, %v269_v36  ;;  %335 = vst.msk [vmem:[%s964_s3 + $0x190] sm:$0xff] %vm284_vm0, %v270_v37  ;;  %v142_v49 = vmul.f32 %v381_v1, %v71_v33  ;;  %v143_v50 = vmul.f32 %v381_v1, %v72_v34 }
  0x30   :  { %336 = vst.msk [vmem:[%s964_s3 + $0x198] sm:$0xff] %vm284_vm0, %v271_v38  ;;  %v275_v48 = vmax.f32 %v211_v39, 0.0  ;;  %v144_v51 = vmul.f32 %v381_v1, %v73_v35  ;;  %337 = vst.msk [vmem:[%s964_s3 + $0x1a0] sm:$0xff] %vm284_vm0, %v272_v43  ;;  %v212_v52 = vadd.f32 %v386_v2, %v141_v46  ;;  %v145_v53 = vmul.f32 %v381_v1, %v74_v40 }
  0x31   :  { %338 = vst.msk [vmem:[%s964_s3 + $0x1a8] sm:$0xff] %vm284_vm0, %v273_v44  ;;  %339 = vst.msk [vmem:[%s964_s3 + $0x1b0] sm:$0xff] %vm284_vm0, %v274_v45  ;;  %v146_v54 = vmul.f32 %v381_v1, %v75_v41  ;;  %v147_v55 = vmul.f32 %v381_v1, %v76_v42  ;;  %v213_v56 = vadd.f32 %v386_v2, %v142_v49 }
  0x32   :  { %340 = vst.msk [vmem:[%s964_s3 + $0x1b8] sm:$0xff] %vm284_vm0, %v275_v48  ;;  %v214_v57 = vadd.f32 %v386_v2, %v143_v50  ;;  %v215_v58 = vadd.f32 %v386_v2, %v144_v51  ;;  %v148_v59 = vmul.f32 %v381_v1, %v77_v47  ;;  %v276_v60 = vmax.f32 %v212_v52, 0.0 }
  0x33   :  { %v216_v61 = vadd.f32 %v386_v2, %v145_v53  ;;  %v217_v62 = vadd.f32 %v386_v2, %v146_v54  ;;  %v218_v63 = vadd.f32 %v386_v2, %v147_v55  ;;  %v277_v0 = vmax.f32 %v213_v56, 0.0 }
  0x34   :  { %v278_v3 = vmax.f32 %v214_v57, 0.0  ;;  %v279_v4 = vmax.f32 %v215_v58, 0.0  ;;  %v219_v5 = vadd.f32 %v386_v2, %v148_v59  ;;  %341 = vst.msk [vmem:[%s964_s3 + $0x1c0] sm:$0xff] %vm284_vm0, %v276_v60 }
  0x35   :  { %v280_v6 = vmax.f32 %v216_v61, 0.0  ;;  %v281_v7 = vmax.f32 %v217_v62, 0.0  ;;  %v282_v1 = vmax.f32 %v218_v63, 0.0  ;;  %342 = vst.msk [vmem:[%s964_s3 + $0x1c8] sm:$0xff] %vm284_vm0, %v277_v0 }
  0x36   :  { %343 = vst.msk [vmem:[%s964_s3 + $0x1d0] sm:$0xff] %vm284_vm0, %v278_v3  ;;  %344 = vst.msk [vmem:[%s964_s3 + $0x1d8] sm:$0xff] %vm284_vm0, %v279_v4  ;;  %v283_v2 = vmax.f32 %v219_v5, 0.0 }
  0x37   :  { %345 = vst.msk [vmem:[%s964_s3 + $0x1e0] sm:$0xff] %vm284_vm0, %v280_v6  ;;  %346 = vst.msk [vmem:[%s964_s3 + $0x1e8] sm:$0xff] %vm284_vm0, %v281_v7 }
  0x38   :  { %347 = vst.msk [vmem:[%s964_s3 + $0x1f0] sm:$0xff] %vm284_vm0, %v282_v1  ;;  %348 = vst.msk [vmem:[%s964_s3 + $0x1f8] sm:$0xff] %vm284_vm0, %v283_v2 }

// kernel: run_pallas.58
= control target key start
LH: loop header
LB: loop body
LE: loop exit
PB: predicated region body
PF: predicated region fallthrough
CT: control target
= control target key end

     0   :  { %s1097_s12 = smov 0   ;;  %s1099_s13 = smov 0   ;;  %s1594_s0 = inlined_call_operand.vmem [shape: f32[512,512], index: 0, kind: input, shape index: {}]   ;;  %s1595_s1 = inlined_call_operand.vmem [shape: f32[512,128], index: 1, kind: input, shape index: {}]   ;;  %s1596_s2 = inlined_call_operand.vmem [shape: f32[1,128], index: 2, kind: input, shape index: {}]   ;;  %s1597_s3 = inlined_call_operand.vmem [shape: f32[512,128], index: 3, kind: output, shape index: {}]  }
   0x1   :  { %s1101_s14 = smov 0  }
   0x2 LB: > { %s25_s15 = sadd.s32 1, %s1070_s13  ;;  %p1017_p0 = scmp.ge.s32.totalorder %s1074_s14, 1  ;;  %s1074_s14 = sphi %s1101_s14, %s13_s14   ;;  %s1070_s13 = sphi %s1099_s13, %s1599_s13   ;;  %s1066_s12 = sphi %s1097_s12, %s1598_s12  }
   0x3   : > { %p27_p1 = scmp.ge.s32.totalorder %s25_s15, 2  ;;  %p170_p2 = scmp.lt.s32.totalorder %s1074_s14, 3 }
   0x5   : > { %s1601_s15 = smov (%p27_p1, %s25_s15), 0  ;;  %p171_p3 = pnand %p1017_p0, %p170_p2 }
   0x6   : > { %s1018_s16 = sshll.u32 (!%p171_p3), %s1066_s12, 5 }
   0x7   : > { %174 = sbr.rel (%p171_p3) target bundleno = 400 (0x190), region = 32  ;;  %p206_p4 = scmp.lt.s32.totalorder (!%p171_p3), %s1018_s16, 63 }
   0xc   : > { %v371_v0 = vld [vmem:[%s1595_s1 + $0x78] sm:$0xff]  ;;  %v1076_v2 = vmov 0.0   ;;  %v370_v3 = vld [vmem:[%s1595_s1 + $0x70] sm:$0xff]  ;;  %v369_v5 = vld [vmem:[%s1595_s1 + $0x68] sm:$0xff]  ;;  %s1603_s16 = smov (!%p206_p4, %s1018_s16), 63 }
   0xd   : > { %v403_v1 = vld [vmem:[%s1595_s1 + $0x178] sm:$0xff]  ;;  %427 = vmatprep.subr.mxu0 %v1076_v2  ;;  %652 = vmatprep.subr.mxu1 %v1076_v2  ;;  %v402_v4 = vld [vmem:[%s1595_s1 + $0x170] sm:$0xff]  ;;  %v401_v6 = vld [vmem:[%s1595_s1 + $0x168] sm:$0xff]  ;;  %s1026_s18 = sshll.u32 %s1603_s16, 5  ;;  %s1022_s8 = sshll.u32 %s1603_s16, 3 }
   0xe   : > { %428 = vmatpush1.msra.mxu0 %v371_v0  ;;  %653 = vmatpush1.msra.mxu1 %v403_v1  ;;  %v368_v7 = vld [vmem:[%s1595_s1 + $0x60] sm:$0xff]  ;;  %v367_v9 = vld [vmem:[%s1595_s1 + $0x58] sm:$0xff]  ;;  %v366_v11 = vld [vmem:[%s1595_s1 + $0x50] sm:$0xff]  ;;  %s1362_s24 = scalar_lea.vmem %s1594_s0, %s1026_s18  ;;  %s1520_s11 = scalar_lea.vmem %s1597_s3, %s1022_s8 }
   0xf   : > { %429 = vmatprep.subr.mxu0 %v1076_v2  ;;  %654 = vmatprep.subr.mxu1 %v1076_v2  ;;  %v400_v8 = vld [vmem:[%s1595_s1 + $0x160] sm:$0xff]  ;;  %v399_v10 = vld [vmem:[%s1595_s1 + $0x158] sm:$0xff]  ;;  %v398_v12 = vld [vmem:[%s1595_s1 + $0x150] sm:$0xff] }
  0x10   : > { %430 = vmatpush1.msra.mxu0 %v370_v3  ;;  %655 = vmatpush1.msra.mxu1 %v402_v4  ;;  %v365_v13 = vld [vmem:[%s1595_s1 + $0x48] sm:$0xff]  ;;  %v364_v15 = vld [vmem:[%s1595_s1 + $0x40] sm:$0xff]  ;;  %v363_v17 = vld [vmem:[%s1595_s1 + $0x38] sm:$0xff] }
  0x11   : > { %431 = vmatprep.subr.mxu0 %v1076_v2  ;;  %656 = vmatprep.subr.mxu1 %v1076_v2  ;;  %v397_v14 = vld [vmem:[%s1595_s1 + $0x148] sm:$0xff]  ;;  %v396_v16 = vld [vmem:[%s1595_s1 + $0x140] sm:$0xff]  ;;  %v395_v18 = vld [vmem:[%s1595_s1 + $0x138] sm:$0xff] }
  0x12   : > { %432 = vmatpush1.msra.mxu0 %v369_v5  ;;  %657 = vmatpush1.msra.mxu1 %v401_v6  ;;  %v362_v19 = vld [vmem:[%s1595_s1 + $0x30] sm:$0xff]  ;;  %v361_v21 = vld [vmem:[%s1595_s1 + $0x28] sm:$0xff]  ;;  %v360_v23 = vld [vmem:[%s1595_s1 + $0x20] sm:$0xff] }
  0x13   : > { %433 = vmatprep.subr.mxu0 %v1076_v2  ;;  %658 = vmatprep.subr.mxu1 %v1076_v2  ;;  %v394_v20 = vld [vmem:[%s1595_s1 + $0x130] sm:$0xff]  ;;  %v393_v22 = vld [vmem:[%s1595_s1 + $0x128] sm:$0xff]  ;;  %v392_v24 = vld [vmem:[%s1595_s1 + $0x120] sm:$0xff] }
  0x14   : > { %434 = vmatpush1.msra.mxu0 %v368_v7  ;;  %659 = vmatpush1.msra.mxu1 %v400_v8  ;;  %v359_v25 = vld [vmem:[%s1595_s1 + $0x18] sm:$0xff]  ;;  %v358_v27 = vld [vmem:[%s1595_s1 + $0x10] sm:$0xff]  ;;  %v357_v29 = vld [vmem:[%s1595_s1 + $0x8] sm:$0xff] }
  0x15   : > { %435 = vmatprep.subr.mxu0 %v1076_v2  ;;  %660 = vmatprep.subr.mxu1 %v1076_v2  ;;  %v391_v26 = vld [vmem:[%s1595_s1 + $0x118] sm:$0xff]  ;;  %v390_v28 = vld [vmem:[%s1595_s1 + $0x110] sm:$0xff]  ;;  %v389_v30 = vld [vmem:[%s1595_s1 + $0x108] sm:$0xff] }
  0x16   : > { %436 = vmatpush1.msra.mxu0 %v367_v9  ;;  %661 = vmatpush1.msra.mxu1 %v399_v10  ;;  %v356_v31 = vld [vmem:[%s1595_s1] sm:$0xff]  ;;  %v387_v33 = vld [vmem:[%s1595_s1 + $0xf8] sm:$0xff]  ;;  %v386_v35 = vld [vmem:[%s1595_s1 + $0xf0] sm:$0xff] }
  0x17   : > { %437 = vmatprep.subr.mxu0 %v1076_v2  ;;  %662 = vmatprep.subr.mxu1 %v1076_v2  ;;  %v388_v32 = vld [vmem:[%s1595_s1 + $0x100] sm:$0xff]  ;;  %v419_v34 = vld [vmem:[%s1595_s1 + $0x1f8] sm:$0xff]  ;;  %v418_v36 = vld [vmem:[%s1595_s1 + $0x1f0] sm:$0xff] }
  0x18   : > { %438 = vmatpush1.msra.mxu0 %v366_v11  ;;  %663 = vmatpush1.msra.mxu1 %v398_v12  ;;  %v385_v37 = vld [vmem:[%s1595_s1 + $0xe8] sm:$0xff]  ;;  %v384_v39 = vld [vmem:[%s1595_s1 + $0xe0] sm:$0xff]  ;;  %v383_v41 = vld [vmem:[%s1595_s1 + $0xd8] sm:$0xff] }
  0x19   : > { %439 = vmatprep.subr.mxu0 %v1076_v2  ;;  %664 = vmatprep.subr.mxu1 %v1076_v2  ;;  %v417_v38 = vld [vmem:[%s1595_s1 + $0x1e8] sm:$0xff]  ;;  %v416_v40 = vld [vmem:[%s1595_s1 + $0x1e0] sm:$0xff]  ;;  %v415_v42 = vld [vmem:[%s1595_s1 + $0x1d8] sm:$0xff] }
  0x1a   : > { %440 = vmatpush1.msra.mxu0 %v365_v13  ;;  %665 = vmatpush1.msra.mxu1 %v397_v14  ;;  %v382_v43 = vld [vmem:[%s1595_s1 + $0xd0] sm:$0xff]  ;;  %v381_v45 = vld [vmem:[%s1595_s1 + $0xc8] sm:$0xff]  ;;  %v380_v47 = vld [vmem:[%s1595_s1 + $0xc0] sm:$0xff] }
  0x1b   : > { %441 = vmatprep.subr.mxu0 %v1076_v2  ;;  %666 = vmatprep.subr.mxu1 %v1076_v2  ;;  %v414_v44 = vld [vmem:[%s1595_s1 + $0x1d0] sm:$0xff]  ;;  %v413_v46 = vld [vmem:[%s1595_s1 + $0x1c8] sm:$0xff]  ;;  %v412_v48 = vld [vmem:[%s1595_s1 + $0x1c0] sm:$0xff] }
  0x1c   : > { %442 = vmatpush1.msra.mxu0 %v364_v15  ;;  %667 = vmatpush1.msra.mxu1 %v396_v16  ;;  %v379_v49 = vld [vmem:[%s1595_s1 + $0xb8] sm:$0xff]  ;;  %v378_v51 = vld [vmem:[%s1595_s1 + $0xb0] sm:$0xff]  ;;  %v377_v53 = vld [vmem:[%s1595_s1 + $0xa8] sm:$0xff] }
  0x1d   : > { %443 = vmatprep.subr.mxu0 %v1076_v2  ;;  %668 = vmatprep.subr.mxu1 %v1076_v2  ;;  %v411_v50 = vld [vmem:[%s1595_s1 + $0x1b8] sm:$0xff]  ;;  %v410_v52 = vld [vmem:[%s1595_s1 + $0x1b0] sm:$0xff]  ;;  %v409_v54 = vld [vmem:[%s1595_s1 + $0x1a8] sm:$0xff] }
  0x1e   : > { %444 = vmatpush1.msra.mxu0 %v363_v17  ;;  %669 = vmatpush1.msra.mxu1 %v395_v18  ;;  %v376_v55 = vld [vmem:[%s1595_s1 + $0xa0] sm:$0xff]  ;;  %v375_v57 = vld [vmem:[%s1595_s1 + $0x98] sm:$0xff]  ;;  %v374_v59 = vld [vmem:[%s1595_s1 + $0x90] sm:$0xff] }
  0x1f   : > { %445 = vmatprep.subr.mxu0 %v1076_v2  ;;  %670 = vmatprep.subr.mxu1 %v1076_v2  ;;  %v408_v56 = vld [vmem:[%s1595_s1 + $0x1a0] sm:$0xff]  ;;  %v407_v58 = vld [vmem:[%s1595_s1 + $0x198] sm:$0xff]  ;;  %v406_v60 = vld [vmem:[%s1595_s1 + $0x190] sm:$0xff] }
  0x20   : > { %446 = vmatpush1.msra.mxu0 %v362_v19  ;;  %671 = vmatpush1.msra.mxu1 %v394_v20  ;;  %v373_v61 = vld [vmem:[%s1595_s1 + $0x88] sm:$0xff]  ;;  %v372_v63 = vld [vmem:[%s1595_s1 + $0x80] sm:$0xff]  ;;  %v231_v3 = vld [vmem:[%s1362_s24 + $0x18] sm:$0xff] }
  0x21   : > { %447 = vmatprep.subr.mxu0 %v1076_v2  ;;  %672 = vmatprep.subr.mxu1 %v1076_v2  ;;  %v405_v62 = vld [vmem:[%s1595_s1 + $0x188] sm:$0xff]  ;;  %v404_v1 = vld [vmem:[%s1595_s1 + $0x180] sm:$0xff]  ;;  %v230_v5 = vld [vmem:[%s1362_s24 + $0x10] sm:$0xff] }
  0x22   : > { %448 = vmatpush1.msra.mxu0 %v361_v21  ;;  %673 = vmatpush1.msra.mxu1 %v393_v22  ;;  %v229_v0 = vld [vmem:[%s1362_s24 + $0x8] sm:$0xff]  ;;  %v228_v4 = vld [vmem:[%s1362_s24] sm:$0xff]  ;;  %v235_v7 = vld [vmem:[%s1362_s24 + $0x38] sm:$0xff] }
  0x23   : > { %449 = vmatprep.subr.mxu0 %v1076_v2  ;;  %674 = vmatprep.subr.mxu1 %v1076_v2  ;;  %v233_v6 = vld [vmem:[%s1362_s24 + $0x28] sm:$0xff]  ;;  %v232_v8 = vld [vmem:[%s1362_s24 + $0x20] sm:$0xff]  ;;  %v239_v10 = vld [vmem:[%s1362_s24 + $0x58] sm:$0xff] }
  0x24   : > { %450 = vmatpush1.msra.mxu0 %v360_v23  ;;  %675 = vmatpush1.msra.mxu1 %v392_v24  ;;  %v237_v9 = vld [vmem:[%s1362_s24 + $0x48] sm:$0xff]  ;;  %v236_v11 = vld [vmem:[%s1362_s24 + $0x40] sm:$0xff]  ;;  %v238_v12 = vld [vmem:[%s1362_s24 + $0x50] sm:$0xff] }
  0x25   : > { %451 = vmatprep.subr.mxu0 %v1076_v2  ;;  %676 = vmatprep.subr.mxu1 %v1076_v2  ;;  %v241_v13 = vld [vmem:[%s1362_s24 + $0x68] sm:$0xff]  ;;  %v243_v14 = vld [vmem:[%s1362_s24 + $0x78] sm:$0xff]  ;;  %v240_v15 = vld [vmem:[%s1362_s24 + $0x60] sm:$0xff] }
  0x26   : > { %452 = vmatpush1.msra.mxu0 %v359_v25  ;;  %677 = vmatpush1.msra.mxu1 %v391_v26  ;;  %v242_v16 = vld [vmem:[%s1362_s24 + $0x70] sm:$0xff]  ;;  %v245_v17 = vld [vmem:[%s1362_s24 + $0x88] sm:$0xff]  ;;  %v247_v18 = vld [vmem:[%s1362_s24 + $0x98] sm:$0xff] }
  0x27   : > { %453 = vmatprep.subr.mxu0 %v1076_v2  ;;  %678 = vmatprep.subr.mxu1 %v1076_v2  ;;  %v244_v19 = vld [vmem:[%s1362_s24 + $0x80] sm:$0xff]  ;;  %v246_v20 = vld [vmem:[%s1362_s24 + $0x90] sm:$0xff]  ;;  %v249_v21 = vld [vmem:[%s1362_s24 + $0xa8] sm:$0xff] }
  0x28   : > { %454 = vmatpush1.msra.mxu0 %v358_v27  ;;  %679 = vmatpush1.msra.mxu1 %v390_v28  ;;  %v251_v22 = vld [vmem:[%s1362_s24 + $0xb8] sm:$0xff]  ;;  %v248_v23 = vld [vmem:[%s1362_s24 + $0xa0] sm:$0xff]  ;;  %v250_v24 = vld [vmem:[%s1362_s24 + $0xb0] sm:$0xff] }
  0x29   : > { %455 = vmatprep.subr.mxu0 %v1076_v2  ;;  %680 = vmatprep.subr.mxu1 %v1076_v2  ;;  %v253_v25 = vld [vmem:[%s1362_s24 + $0xc8] sm:$0xff]  ;;  %v255_v26 = vld [vmem:[%s1362_s24 + $0xd8] sm:$0xff]  ;;  %v252_v27 = vld [vmem:[%s1362_s24 + $0xc0] sm:$0xff] }
  0x2a   : > { %456 = vmatpush1.msra.mxu0 %v357_v29  ;;  %681 = vmatpush1.msra.mxu1 %v389_v30  ;;  %v254_v28 = vld [vmem:[%s1362_s24 + $0xd0] sm:$0xff]  ;;  %v257_v29 = vld [vmem:[%s1362_s24 + $0xe8] sm:$0xff]  ;;  %v259_v30 = vld [vmem:[%s1362_s24 + $0xf8] sm:$0xff] }
  0x2b   : > { %457 = vmatprep.subr.mxu0 %v1076_v2  ;;  %682 = vmatprep.subr.mxu1 %v1076_v2 }
  0x2c   : > { %458 = vmatpush1.msra.mxu0 %v356_v31  ;;  %683 = vmatpush1.msra.mxu1 %v388_v32  ;;  %v256_v31 = vld [vmem:[%s1362_s24 + $0xe0] sm:$0xff]  ;;  %v258_v32 = vld [vmem:[%s1362_s24 + $0xf0] sm:$0xff] }
  0x2d   : > { %459 = vmatprep.subr.mxu0 %v1076_v2  ;;  %684 = vmatprep.subr.mxu1 %v1076_v2 }
  0x2e   : > { %460 = vmatpush2.msra.mxu0 %v387_v33  ;;  %685 = vmatpush2.msra.mxu1 %v419_v34  ;;  %v261_v33 = vld [vmem:[%s1362_s24 + $0x108] sm:$0xff]  ;;  %v263_v34 = vld [vmem:[%s1362_s24 + $0x118] sm:$0xff] }
  0x2f   : > { %461 = vmatprep.subr.mxu0 %v1076_v2  ;;  %686 = vmatprep.subr.mxu1 %v1076_v2 }
  0x30   : > { %462 = vmatpush2.msra.mxu0 %v386_v35  ;;  %687 = vmatpush2.msra.mxu1 %v418_v36  ;;  %v260_v35 = vld [vmem:[%s1362_s24 + $0x100] sm:$0xff]  ;;  %v262_v36 = vld [vmem:[%s1362_s24 + $0x110] sm:$0xff] }
  0x31   : > { %463 = vmatprep.subr.mxu0 %v1076_v2  ;;  %688 = vmatprep.subr.mxu1 %v1076_v2 }
  0x32   : > { %464 = vmatpush2.msra.mxu0 %v385_v37  ;;  %689 = vmatpush2.msra.mxu1 %v417_v38  ;;  %v265_v37 = vld [vmem:[%s1362_s24 + $0x128] sm:$0xff]  ;;  %v267_v38 = vld [vmem:[%s1362_s24 + $0x138] sm:$0xff] }
  0x33   : > { %465 = vmatprep.subr.mxu0 %v1076_v2  ;;  %690 = vmatprep.subr.mxu1 %v1076_v2 }
  0x34   : > { %466 = vmatpush2.msra.mxu0 %v384_v39  ;;  %691 = vmatpush2.msra.mxu1 %v416_v40  ;;  %v264_v39 = vld [vmem:[%s1362_s24 + $0x120] sm:$0xff]  ;;  %v266_v40 = vld [vmem:[%s1362_s24 + $0x130] sm:$0xff] }
  0x35   : > { %467 = vmatprep.subr.mxu0 %v1076_v2  ;;  %692 = vmatprep.subr.mxu1 %v1076_v2 }
  0x36   : > { %468 = vmatpush2.msra.mxu0 %v383_v41  ;;  %693 = vmatpush2.msra.mxu1 %v415_v42  ;;  %v269_v41 = vld [vmem:[%s1362_s24 + $0x148] sm:$0xff]  ;;  %v271_v42 = vld [vmem:[%s1362_s24 + $0x158] sm:$0xff] }
  0x37   : > { %469 = vmatprep.subr.mxu0 %v1076_v2  ;;  %694 = vmatprep.subr.mxu1 %v1076_v2 }
  0x38   : > { %470 = vmatpush2.msra.mxu0 %v382_v43  ;;  %695 = vmatpush2.msra.mxu1 %v414_v44  ;;  %v268_v43 = vld [vmem:[%s1362_s24 + $0x140] sm:$0xff]  ;;  %v270_v44 = vld [vmem:[%s1362_s24 + $0x150] sm:$0xff] }
  0x39   : > { %471 = vmatprep.subr.mxu0 %v1076_v2  ;;  %696 = vmatprep.subr.mxu1 %v1076_v2 }
  0x3a   : > { %472 = vmatpush2.msra.mxu0 %v381_v45  ;;  %697 = vmatpush2.msra.mxu1 %v413_v46  ;;  %v273_v45 = vld [vmem:[%s1362_s24 + $0x168] sm:$0xff]  ;;  %v275_v46 = vld [vmem:[%s1362_s24 + $0x178] sm:$0xff] }
  0x3b   : > { %473 = vmatprep.subr.mxu0 %v1076_v2  ;;  %698 = vmatprep.subr.mxu1 %v1076_v2 }
  0x3c   : > { %474 = vmatpush2.msra.mxu0 %v380_v47  ;;  %699 = vmatpush2.msra.mxu1 %v412_v48  ;;  %v272_v47 = vld [vmem:[%s1362_s24 + $0x160] sm:$0xff]  ;;  %v274_v48 = vld [vmem:[%s1362_s24 + $0x170] sm:$0xff] }
  0x3d   : > { %475 = vmatprep.subr.mxu0 %v1076_v2  ;;  %700 = vmatprep.subr.mxu1 %v1076_v2 }
  0x3e   : > { %476 = vmatpush2.msra.mxu0 %v379_v49  ;;  %701 = vmatpush2.msra.mxu1 %v411_v50  ;;  %v277_v49 = vld [vmem:[%s1362_s24 + $0x188] sm:$0xff]  ;;  %v279_v50 = vld [vmem:[%s1362_s24 + $0x198] sm:$0xff] }
  0x3f   : > { %477 = vmatprep.subr.mxu0 %v1076_v2  ;;  %702 = vmatprep.subr.mxu1 %v1076_v2 }
  0x40   : > { %478 = vmatpush2.msra.mxu0 %v378_v51  ;;  %703 = vmatpush2.msra.mxu1 %v410_v52  ;;  %v276_v51 = vld [vmem:[%s1362_s24 + $0x180] sm:$0xff]  ;;  %v278_v52 = vld [vmem:[%s1362_s24 + $0x190] sm:$0xff] }
  0x41   : > { %479 = vmatprep.subr.mxu0 %v1076_v2  ;;  %704 = vmatprep.subr.mxu1 %v1076_v2 }
  0x42   : > { %480 = vmatpush2.msra.mxu0 %v377_v53  ;;  %705 = vmatpush2.msra.mxu1 %v409_v54  ;;  %v281_v53 = vld [vmem:[%s1362_s24 + $0x1a8] sm:$0xff]  ;;  %v283_v54 = vld [vmem:[%s1362_s24 + $0x1b8] sm:$0xff] }
  0x43   : > { %481 = vmatprep.subr.mxu0 %v1076_v2  ;;  %706 = vmatprep.subr.mxu1 %v1076_v2 }
  0x44   : > { %482 = vmatpush2.msra.mxu0 %v376_v55  ;;  %707 = vmatpush2.msra.mxu1 %v408_v56  ;;  %v280_v55 = vld [vmem:[%s1362_s24 + $0x1a0] sm:$0xff]  ;;  %v282_v56 = vld [vmem:[%s1362_s24 + $0x1b0] sm:$0xff] }
  0x45   : > { %483 = vmatprep.subr.mxu0 %v1076_v2  ;;  %708 = vmatprep.subr.mxu1 %v1076_v2 }
  0x46   : > { %484 = vmatpush2.msra.mxu0 %v375_v57  ;;  %709 = vmatpush2.msra.mxu1 %v407_v58  ;;  %v285_v57 = vld [vmem:[%s1362_s24 + $0x1c8] sm:$0xff]  ;;  %v287_v58 = vld [vmem:[%s1362_s24 + $0x1d8] sm:$0xff] }
  0x47   : > { %485 = vmatprep.subr.mxu0 %v1076_v2  ;;  %710 = vmatprep.subr.mxu1 %v1076_v2 }
  0x48   : > { %486 = vmatpush2.msra.mxu0 %v374_v59  ;;  %711 = vmatpush2.msra.mxu1 %v406_v60  ;;  %v284_v59 = vld [vmem:[%s1362_s24 + $0x1c0] sm:$0xff]  ;;  %v286_v60 = vld [vmem:[%s1362_s24 + $0x1d0] sm:$0xff] }
  0x49   : > { %487 = vmatprep.subr.mxu0 %v1076_v2  ;;  %712 = vmatprep.subr.mxu1 %v1076_v2 }
  0x4a   : > { %488 = vmatpush2.msra.mxu0 %v373_v61  ;;  %713 = vmatpush2.msra.mxu1 %v405_v62  ;;  %v289_v61 = vld [vmem:[%s1362_s24 + $0x1e8] sm:$0xff]  ;;  %v291_v62 = vld [vmem:[%s1362_s24 + $0x1f8] sm:$0xff] }
  0x4b   : > { %489 = vmatprep.subr.mxu0 %v1076_v2  ;;  %714 = vmatprep.subr.mxu1 %v1076_v2  ;;  %v234_v2 = vld [vmem:[%s1362_s24 + $0x30] sm:$0xff] }
  0x4c   : > { %490 = vmatpush2.msra.mxu0 %v372_v63  ;;  %491 = vmatprep.mubr.f32.mxu0 %v229_v0  ;;  %v288_v63 = vld [vmem:[%s1362_s24 + $0x1e0] sm:$0xff]  ;;  %v290_v0 = vld [vmem:[%s1362_s24 + $0x1f0] sm:$0xff] }
  0x4d   : > { %715 = vmatpush2.msra.mxu1 %v404_v1  ;;  %716 = vmatprep.mubr.f32.mxu1 %v231_v3  ;;  %v293_v1 = vld [vmem:[%s1362_s24 + $0x208] sm:$0xff]  ;;  %v295_v3 = vld [vmem:[%s1362_s24 + $0x218] sm:$0xff] }
  0x4e   : > { %492 = vmatmul.mubr.f32.vlgmr.msra.gmra.mxu0 %v228_v4  ;;  %717 = vmatmul.mubr.f32.vlgmr.msra.gmra.mxu1 %v230_v5  ;;  %v292_v4 = vld [vmem:[%s1362_s24 + $0x200] sm:$0xff]  ;;  %v294_v5 = vld [vmem:[%s1362_s24 + $0x210] sm:$0xff] }
  0x4f   : > { %496 = vmatprep.mubr.f32.mxu0 %v233_v6  ;;  %721 = vmatprep.mubr.f32.mxu1 %v235_v7  ;;  %v297_v6 = vld [vmem:[%s1362_s24 + $0x228] sm:$0xff]  ;;  %v299_v7 = vld [vmem:[%s1362_s24 + $0x238] sm:$0xff] }
  0x52   : > { %497 = vmatmul.mubr.f32.gmra.mxu0 %v232_v8  ;;  %722 = vmatmul.mubr.f32.gmra.mxu1 %v234_v2  ;;  %v296_v8 = vld [vmem:[%s1362_s24 + $0x220] sm:$0xff]  ;;  %v298_v2 = vld [vmem:[%s1362_s24 + $0x230] sm:$0xff] }
  0x53   : > { %501 = vmatprep.mubr.f32.mxu0 %v237_v9  ;;  %726 = vmatprep.mubr.f32.mxu1 %v239_v10  ;;  %v301_v9 = vld [vmem:[%s1362_s24 + $0x248] sm:$0xff]  ;;  %v303_v10 = vld [vmem:[%s1362_s24 + $0x258] sm:$0xff] }
  0x56   : > { %502 = vmatmul.mubr.f32.gmra.mxu0 %v236_v11  ;;  %727 = vmatmul.mubr.f32.gmra.mxu1 %v238_v12  ;;  %v300_v11 = vld [vmem:[%s1362_s24 + $0x240] sm:$0xff]  ;;  %v302_v12 = vld [vmem:[%s1362_s24 + $0x250] sm:$0xff] }
  0x57   : > { %506 = vmatprep.mubr.f32.mxu0 %v241_v13  ;;  %731 = vmatprep.mubr.f32.mxu1 %v243_v14  ;;  %v305_v13 = vld [vmem:[%s1362_s24 + $0x268] sm:$0xff]  ;;  %v307_v14 = vld [vmem:[%s1362_s24 + $0x278] sm:$0xff] }
  0x5a   : > { %507 = vmatmul.mubr.f32.gmra.mxu0 %v240_v15  ;;  %732 = vmatmul.mubr.f32.gmra.mxu1 %v242_v16  ;;  %v304_v15 = vld [vmem:[%s1362_s24 + $0x260] sm:$0xff]  ;;  %v306_v16 = vld [vmem:[%s1362_s24 + $0x270] sm:$0xff] }
  0x5b   : > { %511 = vmatprep.mubr.f32.mxu0 %v245_v17  ;;  %736 = vmatprep.mubr.f32.mxu1 %v247_v18  ;;  %v309_v17 = vld [vmem:[%s1362_s24 + $0x288] sm:$0xff]  ;;  %v311_v18 = vld [vmem:[%s1362_s24 + $0x298] sm:$0xff] }
  0x5e   : > { %512 = vmatmul.mubr.f32.gmra.mxu0 %v244_v19  ;;  %737 = vmatmul.mubr.f32.gmra.mxu1 %v246_v20  ;;  %v308_v19 = vld [vmem:[%s1362_s24 + $0x280] sm:$0xff]  ;;  %v310_v20 = vld [vmem:[%s1362_s24 + $0x290] sm:$0xff] }
  0x5f   : > { %516 = vmatprep.mubr.f32.mxu0 %v249_v21  ;;  %741 = vmatprep.mubr.f32.mxu1 %v251_v22  ;;  %v313_v21 = vld [vmem:[%s1362_s24 + $0x2a8] sm:$0xff]  ;;  %v315_v22 = vld [vmem:[%s1362_s24 + $0x2b8] sm:$0xff] }
  0x62   : > { %517 = vmatmul.mubr.f32.gmra.mxu0 %v248_v23  ;;  %742 = vmatmul.mubr.f32.gmra.mxu1 %v250_v24  ;;  %v312_v23 = vld [vmem:[%s1362_s24 + $0x2a0] sm:$0xff]  ;;  %v314_v24 = vld [vmem:[%s1362_s24 + $0x2b0] sm:$0xff] }
  0x63   : > { %521 = vmatprep.mubr.f32.mxu0 %v253_v25  ;;  %746 = vmatprep.mubr.f32.mxu1 %v255_v26  ;;  %v317_v25 = vld [vmem:[%s1362_s24 + $0x2c8] sm:$0xff]  ;;  %v319_v26 = vld [vmem:[%s1362_s24 + $0x2d8] sm:$0xff] }
  0x66   : > { %522 = vmatmul.mubr.f32.gmra.mxu0 %v252_v27  ;;  %747 = vmatmul.mubr.f32.gmra.mxu1 %v254_v28  ;;  %v316_v27 = vld [vmem:[%s1362_s24 + $0x2c0] sm:$0xff]  ;;  %v318_v28 = vld [vmem:[%s1362_s24 + $0x2d0] sm:$0xff] }
  0x67   : > { %526 = vmatprep.mubr.f32.mxu0 %v257_v29  ;;  %751 = vmatprep.mubr.f32.mxu1 %v259_v30  ;;  %v321_v29 = vld [vmem:[%s1362_s24 + $0x2e8] sm:$0xff]  ;;  %v323_v30 = vld [vmem:[%s1362_s24 + $0x2f8] sm:$0xff] }
  0x6a   : > { %527 = vmatmul.mubr.f32.gmra.mxu0 %v256_v31  ;;  %752 = vmatmul.mubr.f32.gmra.mxu1 %v258_v32  ;;  %v320_v31 = vld [vmem:[%s1362_s24 + $0x2e0] sm:$0xff]  ;;  %v322_v32 = vld [vmem:[%s1362_s24 + $0x2f0] sm:$0xff] }
  0x6b   : > { %531 = vmatprep.mubr.f32.mxu0 %v261_v33  ;;  %756 = vmatprep.mubr.f32.mxu1 %v263_v34  ;;  %v325_v33 = vld [vmem:[%s1362_s24 + $0x308] sm:$0xff]  ;;  %v327_v34 = vld [vmem:[%s1362_s24 + $0x318] sm:$0xff] }
  0x6e   : > { %532 = vmatmul.mubr.f32.gmra.mxu0 %v260_v35  ;;  %757 = vmatmul.mubr.f32.gmra.mxu1 %v262_v36  ;;  %v324_v35 = vld [vmem:[%s1362_s24 + $0x300] sm:$0xff]  ;;  %v326_v36 = vld [vmem:[%s1362_s24 + $0x310] sm:$0xff] }
  0x6f   : > { %536 = vmatprep.mubr.f32.mxu0 %v265_v37  ;;  %761 = vmatprep.mubr.f32.mxu1 %v267_v38  ;;  %v329_v37 = vld [vmem:[%s1362_s24 + $0x328] sm:$0xff]  ;;  %v331_v38 = vld [vmem:[%s1362_s24 + $0x338] sm:$0xff] }
  0x72   : > { %537 = vmatmul.mubr.f32.gmra.mxu0 %v264_v39  ;;  %762 = vmatmul.mubr.f32.gmra.mxu1 %v266_v40  ;;  %v328_v39 = vld [vmem:[%s1362_s24 + $0x320] sm:$0xff]  ;;  %v330_v40 = vld [vmem:[%s1362_s24 + $0x330] sm:$0xff] }
  0x73   : > { %541 = vmatprep.mubr.f32.mxu0 %v269_v41  ;;  %766 = vmatprep.mubr.f32.mxu1 %v271_v42  ;;  %v333_v41 = vld [vmem:[%s1362_s24 + $0x348] sm:$0xff]  ;;  %v335_v42 = vld [vmem:[%s1362_s24 + $0x358] sm:$0xff] }
  0x76   : > { %542 = vmatmul.mubr.f32.gmra.mxu0 %v268_v43  ;;  %767 = vmatmul.mubr.f32.gmra.mxu1 %v270_v44  ;;  %v332_v43 = vld [vmem:[%s1362_s24 + $0x340] sm:$0xff]  ;;  %v334_v44 = vld [vmem:[%s1362_s24 + $0x350] sm:$0xff] }
  0x77   : > { %546 = vmatprep.mubr.f32.mxu0 %v273_v45  ;;  %771 = vmatprep.mubr.f32.mxu1 %v275_v46  ;;  %v337_v45 = vld [vmem:[%s1362_s24 + $0x368] sm:$0xff]  ;;  %v339_v46 = vld [vmem:[%s1362_s24 + $0x378] sm:$0xff] }
  0x7a   : > { %547 = vmatmul.mubr.f32.gmra.mxu0 %v272_v47  ;;  %772 = vmatmul.mubr.f32.gmra.mxu1 %v274_v48  ;;  %v336_v47 = vld [vmem:[%s1362_s24 + $0x360] sm:$0xff]  ;;  %v338_v48 = vld [vmem:[%s1362_s24 + $0x370] sm:$0xff] }
  0x7b   : > { %551 = vmatprep.mubr.f32.mxu0 %v277_v49  ;;  %776 = vmatprep.mubr.f32.mxu1 %v279_v50  ;;  %v341_v49 = vld [vmem:[%s1362_s24 + $0x388] sm:$0xff]  ;;  %v343_v50 = vld [vmem:[%s1362_s24 + $0x398] sm:$0xff] }
  0x7e   : > { %552 = vmatmul.mubr.f32.gmra.mxu0 %v276_v51  ;;  %777 = vmatmul.mubr.f32.gmra.mxu1 %v278_v52  ;;  %v340_v51 = vld [vmem:[%s1362_s24 + $0x380] sm:$0xff]  ;;  %v342_v52 = vld [vmem:[%s1362_s24 + $0x390] sm:$0xff] }
  0x7f   : > { %556 = vmatprep.mubr.f32.mxu0 %v281_v53  ;;  %781 = vmatprep.mubr.f32.mxu1 %v283_v54  ;;  %v345_v53 = vld [vmem:[%s1362_s24 + $0x3a8] sm:$0xff]  ;;  %v347_v54 = vld [vmem:[%s1362_s24 + $0x3b8] sm:$0xff] }
  0x82   : > { %557 = vmatmul.mubr.f32.gmra.mxu0 %v280_v55  ;;  %782 = vmatmul.mubr.f32.gmra.mxu1 %v282_v56  ;;  %v344_v55 = vld [vmem:[%s1362_s24 + $0x3a0] sm:$0xff]  ;;  %v346_v56 = vld [vmem:[%s1362_s24 + $0x3b0] sm:$0xff] }
  0x83   : > { %561 = vmatprep.mubr.f32.mxu0 %v285_v57  ;;  %786 = vmatprep.mubr.f32.mxu1 %v287_v58  ;;  %v349_v57 = vld [vmem:[%s1362_s24 + $0x3c8] sm:$0xff]  ;;  %v351_v58 = vld [vmem:[%s1362_s24 + $0x3d8] sm:$0xff] }
  0x86   : > { %562 = vmatmul.mubr.f32.gmra.mxu0 %v284_v59  ;;  %787 = vmatmul.mubr.f32.gmra.mxu1 %v286_v60  ;;  %v348_v59 = vld [vmem:[%s1362_s24 + $0x3c0] sm:$0xff]  ;;  %v350_v60 = vld [vmem:[%s1362_s24 + $0x3d0] sm:$0xff] }
  0x87   : > { %566 = vmatprep.mubr.f32.mxu0 %v289_v61  ;;  %791 = vmatprep.mubr.f32.mxu1 %v291_v62  ;;  %v353_v61 = vld [vmem:[%s1362_s24 + $0x3e8] sm:$0xff]  ;;  %v355_v62 = vld [vmem:[%s1362_s24 + $0x3f8] sm:$0xff] }
  0x8a   : > { %567 = vmatmul.mubr.f32.gmra.mxu0 %v288_v63  ;;  %792 = vmatmul.mubr.f32.gmra.mxu1 %v290_v0  ;;  %v352_v63 = vld [vmem:[%s1362_s24 + $0x3e0] sm:$0xff]  ;;  %v354_v0 = vld [vmem:[%s1362_s24 + $0x3f0] sm:$0xff] }
  0x8b   : > { %571 = vmatprep.mubr.f32.mxu0 %v293_v1  ;;  %796 = vmatprep.mubr.f32.mxu1 %v295_v3  ;;  %v1513_v1 = vld [vmem:[%s1596_s2] ss:$0 sm:$0xff] }
  0x8e   : > { %572 = vmatmul.mubr.f32.gmra.mxu0 %v292_v4  ;;  %797 = vmatmul.mubr.f32.gmra.mxu1 %v294_v5 }
  0x8f   : > { %576 = vmatprep.mubr.f32.mxu0 %v297_v6  ;;  %801 = vmatprep.mubr.f32.mxu1 %v299_v7 }
  0x92   : > { %577 = vmatmul.mubr.f32.gmra.mxu0 %v296_v8  ;;  %802 = vmatmul.mubr.f32.gmra.mxu1 %v298_v2 }
  0x93   : > { %581 = vmatprep.mubr.f32.mxu0 %v301_v9  ;;  %806 = vmatprep.mubr.f32.mxu1 %v303_v10 }
  0x96   : > { %582 = vmatmul.mubr.f32.gmra.mxu0 %v300_v11  ;;  %807 = vmatmul.mubr.f32.gmra.mxu1 %v302_v12 }
  0x97   : > { %586 = vmatprep.mubr.f32.mxu0 %v305_v13  ;;  %811 = vmatprep.mubr.f32.mxu1 %v307_v14 }
  0x9a   : > { %587 = vmatmul.mubr.f32.gmra.mxu0 %v304_v15  ;;  %812 = vmatmul.mubr.f32.gmra.mxu1 %v306_v16 }
  0x9b   : > { %591 = vmatprep.mubr.f32.mxu0 %v309_v17  ;;  %816 = vmatprep.mubr.f32.mxu1 %v311_v18 }
  0x9e   : > { %592 = vmatmul.mubr.f32.gmra.mxu0 %v308_v19  ;;  %817 = vmatmul.mubr.f32.gmra.mxu1 %v310_v20 }
  0x9f   : > { %596 = vmatprep.mubr.f32.mxu0 %v313_v21  ;;  %821 = vmatprep.mubr.f32.mxu1 %v315_v22 }
  0xa2   : > { %597 = vmatmul.mubr.f32.gmra.mxu0 %v312_v23  ;;  %822 = vmatmul.mubr.f32.gmra.mxu1 %v314_v24 }
  0xa3   : > { %601 = vmatprep.mubr.f32.mxu0 %v317_v25  ;;  %826 = vmatprep.mubr.f32.mxu1 %v319_v26 }
  0xa6   : > { %602 = vmatmul.mubr.f32.gmra.mxu0 %v316_v27  ;;  %827 = vmatmul.mubr.f32.gmra.mxu1 %v318_v28 }
  0xa7   : > { %606 = vmatprep.mubr.f32.mxu0 %v321_v29  ;;  %831 = vmatprep.mubr.f32.mxu1 %v323_v30 }
  0xaa   : > { %607 = vmatmul.mubr.f32.gmra.mxu0 %v320_v31  ;;  %832 = vmatmul.mubr.f32.gmra.mxu1 %v322_v32 }
  0xab   : > { %611 = vmatprep.mubr.f32.mxu0 %v325_v33  ;;  %836 = vmatprep.mubr.f32.mxu1 %v327_v34 }
  0xae   : > { %612 = vmatmul.mubr.f32.gmra.mxu0 %v324_v35  ;;  %837 = vmatmul.mubr.f32.gmra.mxu1 %v326_v36 }
  0xaf   : > { %616 = vmatprep.mubr.f32.mxu0 %v329_v37  ;;  %841 = vmatprep.mubr.f32.mxu1 %v331_v38 }
  0xb2   : > { %617 = vmatmul.mubr.f32.gmra.mxu0 %v328_v39  ;;  %842 = vmatmul.mubr.f32.gmra.mxu1 %v330_v40 }
  0xb3   : > { %621 = vmatprep.mubr.f32.mxu0 %v333_v41  ;;  %846 = vmatprep.mubr.f32.mxu1 %v335_v42 }
  0xb6   : > { %622 = vmatmul.mubr.f32.gmra.mxu0 %v332_v43  ;;  %847 = vmatmul.mubr.f32.gmra.mxu1 %v334_v44 }
  0xb7   : > { %626 = vmatprep.mubr.f32.mxu0 %v337_v45  ;;  %851 = vmatprep.mubr.f32.mxu1 %v339_v46 }
  0xba   : > { %627 = vmatmul.mubr.f32.gmra.mxu0 %v336_v47  ;;  %852 = vmatmul.mubr.f32.gmra.mxu1 %v338_v48 }
  0xbb   : > { %631 = vmatprep.mubr.f32.mxu0 %v341_v49  ;;  %856 = vmatprep.mubr.f32.mxu1 %v343_v50 }
  0xbe   : > { %632 = vmatmul.mubr.f32.gmra.mxu0 %v340_v51  ;;  %857 = vmatmul.mubr.f32.gmra.mxu1 %v342_v52 }
  0xbf   : > { %636 = vmatprep.mubr.f32.mxu0 %v345_v53  ;;  %861 = vmatprep.mubr.f32.mxu1 %v347_v54 }
  0xc2   : > { %637 = vmatmul.mubr.f32.gmra.mxu0 %v344_v55  ;;  %862 = vmatmul.mubr.f32.gmra.mxu1 %v346_v56 }
  0xc3   : > { %641 = vmatprep.mubr.f32.mxu0 %v349_v57  ;;  %866 = vmatprep.mubr.f32.mxu1 %v351_v58 }
  0xc6   : > { %642 = vmatmul.mubr.f32.gmra.mxu0 %v348_v59  ;;  %867 = vmatmul.mubr.f32.gmra.mxu1 %v350_v60 }
  0xc7   : > { %646 = vmatprep.mubr.f32.mxu0 %v353_v61  ;;  %871 = vmatprep.mubr.f32.mxu1 %v355_v62 }
  0xca   : > { %647 = vmatmul.mubr.f32.gmra.mxu0 %v352_v63  ;;  %872 = vmatmul.mubr.f32.gmra.mxu1 %v354_v0 }
 0x10e   : > { %v493_v3 = vpop.f32.mrf.mxu0  ;;  %v718_v4 = vpop.f32.mrf.mxu1 }
 0x10f   : > { %v494_v5 = vadd.f32 %v1513_v1, %v493_v3 }
 0x110   : > { %v495_v6 = vpop.f32.mrf.mxu0  ;;  %v720_v7 = vpop.f32.mrf.mxu1 }
 0x111   : > { %v719_v8 = vadd.f32 %v718_v4, %v494_v5 }
 0x112   : > { %v498_v2 = vpop.f32.mrf.mxu0  ;;  %v723_v9 = vpop.f32.mrf.mxu1 }
 0x113   : > { %877 = vst [vmem:[%s1520_s11] sm:$0xff] %v719_v8  ;;  %v499_v10 = vadd.f32 %v1513_v1, %v498_v2 }
 0x114   : > { %v500_v11 = vpop.f32.mrf.mxu0  ;;  %v725_v12 = vpop.f32.mrf.mxu1 }
 0x115   : > { %v724_v13 = vadd.f32 %v723_v9, %v499_v10 }
 0x116   : > { %v503_v14 = vpop.f32.mrf.mxu0  ;;  %v728_v15 = vpop.f32.mrf.mxu1 }
 0x117   : > { %878 = vst [vmem:[%s1520_s11 + $0x8] sm:$0xff] %v724_v13  ;;  %v504_v16 = vadd.f32 %v1513_v1, %v503_v14 }
 0x118   : > { %v505_v17 = vpop.f32.mrf.mxu0  ;;  %v730_v18 = vpop.f32.mrf.mxu1 }
 0x119   : > { %v729_v19 = vadd.f32 %v728_v15, %v504_v16 }
 0x11a   : > { %v508_v20 = vpop.f32.mrf.mxu0  ;;  %v733_v21 = vpop.f32.mrf.mxu1 }
 0x11b   : > { %879 = vst [vmem:[%s1520_s11 + $0x10] sm:$0xff] %v729_v19  ;;  %v509_v22 = vadd.f32 %v1513_v1, %v508_v20 }
 0x11c   : > { %v510_v23 = vpop.f32.mrf.mxu0  ;;  %v735_v24 = vpop.f32.mrf.mxu1 }
 0x11d   : > { %v734_v25 = vadd.f32 %v733_v21, %v509_v22 }
 0x11e   : > { %v513_v26 = vpop.f32.mrf.mxu0  ;;  %v738_v27 = vpop.f32.mrf.mxu1 }
 0x11f   : > { %880 = vst [vmem:[%s1520_s11 + $0x18] sm:$0xff] %v734_v25  ;;  %v514_v28 = vadd.f32 %v1513_v1, %v513_v26 }
 0x120   : > { %v515_v29 = vpop.f32.mrf.mxu0  ;;  %v740_v30 = vpop.f32.mrf.mxu1 }
 0x121   : > { %v739_v31 = vadd.f32 %v738_v27, %v514_v28 }
 0x122   : > { %v518_v32 = vpop.f32.mrf.mxu0  ;;  %v743_v33 = vpop.f32.mrf.mxu1 }
 0x123   : > { %881 = vst [vmem:[%s1520_s11 + $0x20] sm:$0xff] %v739_v31  ;;  %v519_v34 = vadd.f32 %v1513_v1, %v518_v32 }
 0x124   : > { %v520_v35 = vpop.f32.mrf.mxu0  ;;  %v745_v36 = vpop.f32.mrf.mxu1 }
 0x125   : > { %v744_v37 = vadd.f32 %v743_v33, %v519_v34 }
 0x126   : > { %v523_v38 = vpop.f32.mrf.mxu0  ;;  %v748_v39 = vpop.f32.mrf.mxu1 }
 0x127   : > { %882 = vst [vmem:[%s1520_s11 + $0x28] sm:$0xff] %v744_v37  ;;  %v524_v40 = vadd.f32 %v1513_v1, %v523_v38 }
 0x128   : > { %v525_v41 = vpop.f32.mrf.mxu0  ;;  %v750_v42 = vpop.f32.mrf.mxu1 }
 0x129   : > { %v749_v43 = vadd.f32 %v748_v39, %v524_v40 }
 0x12a   : > { %v528_v44 = vpop.f32.mrf.mxu0  ;;  %v753_v45 = vpop.f32.mrf.mxu1 }
 0x12b   : > { %883 = vst [vmem:[%s1520_s11 + $0x30] sm:$0xff] %v749_v43  ;;  %v529_v46 = vadd.f32 %v1513_v1, %v528_v44 }
 0x12c   : > { %v530_v47 = vpop.f32.mrf.mxu0  ;;  %v755_v48 = vpop.f32.mrf.mxu1 }
 0x12d   : > { %v754_v49 = vadd.f32 %v753_v45, %v529_v46 }
 0x12e   : > { %v533_v50 = vpop.f32.mrf.mxu0  ;;  %v758_v51 = vpop.f32.mrf.mxu1 }
 0x12f   : > { %884 = vst [vmem:[%s1520_s11 + $0x38] sm:$0xff] %v754_v49  ;;  %v534_v52 = vadd.f32 %v1513_v1, %v533_v50 }
 0x130   : > { %v535_v53 = vpop.f32.mrf.mxu0  ;;  %v760_v54 = vpop.f32.mrf.mxu1 }
 0x131   : > { %v759_v55 = vadd.f32 %v758_v51, %v534_v52 }
 0x132   : > { %v538_v56 = vpop.f32.mrf.mxu0  ;;  %v763_v57 = vpop.f32.mrf.mxu1 }
 0x133   : > { %885 = vst [vmem:[%s1520_s11 + $0x40] sm:$0xff] %v759_v55  ;;  %v539_v58 = vadd.f32 %v1513_v1, %v538_v56 }
 0x134   : > { %v540_v59 = vpop.f32.mrf.mxu0  ;;  %v765_v60 = vpop.f32.mrf.mxu1 }
 0x135   : > { %v764_v61 = vadd.f32 %v763_v57, %v539_v58 }
 0x136   : > { %v543_v62 = vpop.f32.mrf.mxu0  ;;  %v768_v63 = vpop.f32.mrf.mxu1 }
 0x137   : > { %886 = vst [vmem:[%s1520_s11 + $0x48] sm:$0xff] %v764_v61  ;;  %v544_v0 = vadd.f32 %v1513_v1, %v543_v62 }
 0x138   : > { %v545_v3 = vpop.f32.mrf.mxu0  ;;  %v770_v4 = vpop.f32.mrf.mxu1 }
 0x139   : > { %v769_v5 = vadd.f32 %v768_v63, %v544_v0 }
 0x13a   : > { %v548_v6 = vpop.f32.mrf.mxu0  ;;  %v773_v7 = vpop.f32.mrf.mxu1 }
 0x13b   : > { %887 = vst [vmem:[%s1520_s11 + $0x50] sm:$0xff] %v769_v5  ;;  %v549_v8 = vadd.f32 %v1513_v1, %v548_v6 }
 0x13c   : > { %v550_v2 = vpop.f32.mrf.mxu0  ;;  %v775_v9 = vpop.f32.mrf.mxu1 }
 0x13d   : > { %v774_v10 = vadd.f32 %v773_v7, %v549_v8 }
 0x13e   : > { %v553_v11 = vpop.f32.mrf.mxu0  ;;  %v778_v12 = vpop.f32.mrf.mxu1 }
 0x13f   : > { %888 = vst [vmem:[%s1520_s11 + $0x58] sm:$0xff] %v774_v10  ;;  %v554_v13 = vadd.f32 %v1513_v1, %v553_v11 }
 0x140   : > { %v555_v14 = vpop.f32.mrf.mxu0  ;;  %v780_v15 = vpop.f32.mrf.mxu1 }
 0x141   : > { %v779_v16 = vadd.f32 %v778_v12, %v554_v13 }
 0x142   : > { %v558_v17 = vpop.f32.mrf.mxu0  ;;  %v783_v18 = vpop.f32.mrf.mxu1 }
 0x143   : > { %889 = vst [vmem:[%s1520_s11 + $0x60] sm:$0xff] %v779_v16  ;;  %v559_v19 = vadd.f32 %v1513_v1, %v558_v17 }
 0x144   : > { %v560_v20 = vpop.f32.mrf.mxu0  ;;  %v785_v21 = vpop.f32.mrf.mxu1 }
 0x145   : > { %v784_v22 = vadd.f32 %v783_v18, %v559_v19 }
 0x146   : > { %v563_v23 = vpop.f32.mrf.mxu0  ;;  %v788_v24 = vpop.f32.mrf.mxu1 }
 0x147   : > { %890 = vst [vmem:[%s1520_s11 + $0x68] sm:$0xff] %v784_v22  ;;  %v564_v25 = vadd.f32 %v1513_v1, %v563_v23 }
 0x148   : > { %v565_v26 = vpop.f32.mrf.mxu0  ;;  %v790_v27 = vpop.f32.mrf.mxu1 }
 0x149   : > { %v789_v28 = vadd.f32 %v788_v24, %v564_v25 }
 0x14a   : > { %v568_v29 = vpop.f32.mrf.mxu0  ;;  %v793_v30 = vpop.f32.mrf.mxu1 }
 0x14b   : > { %891 = vst [vmem:[%s1520_s11 + $0x70] sm:$0xff] %v789_v28  ;;  %v569_v31 = vadd.f32 %v1513_v1, %v568_v29 }
 0x14c   : > { %v570_v32 = vpop.f32.mrf.mxu0  ;;  %v795_v33 = vpop.f32.mrf.mxu1 }
 0x14d   : > { %v794_v34 = vadd.f32 %v793_v30, %v569_v31 }
 0x14e   : > { %v573_v35 = vpop.f32.mrf.mxu0  ;;  %v798_v36 = vpop.f32.mrf.mxu1 }
 0x14f   : > { %892 = vst [vmem:[%s1520_s11 + $0x78] sm:$0xff] %v794_v34  ;;  %v574_v37 = vadd.f32 %v1513_v1, %v573_v35 }
 0x150   : > { %v575_v38 = vpop.f32.mrf.mxu0  ;;  %v800_v39 = vpop.f32.mrf.mxu1 }
 0x151   : > { %v799_v40 = vadd.f32 %v798_v36, %v574_v37 }
 0x152   : > { %v578_v41 = vpop.f32.mrf.mxu0  ;;  %v803_v42 = vpop.f32.mrf.mxu1 }
 0x153   : > { %893 = vst [vmem:[%s1520_s11 + $0x80] sm:$0xff] %v799_v40  ;;  %v579_v43 = vadd.f32 %v1513_v1, %v578_v41 }
 0x154   : > { %v580_v44 = vpop.f32.mrf.mxu0  ;;  %v805_v45 = vpop.f32.mrf.mxu1 }
 0x155   : > { %v804_v46 = vadd.f32 %v803_v42, %v579_v43 }
 0x156   : > { %v583_v47 = vpop.f32.mrf.mxu0  ;;  %v808_v48 = vpop.f32.mrf.mxu1 }
 0x157   : > { %894 = vst [vmem:[%s1520_s11 + $0x88] sm:$0xff] %v804_v46  ;;  %v584_v49 = vadd.f32 %v1513_v1, %v583_v47 }
 0x158   : > { %v585_v50 = vpop.f32.mrf.mxu0  ;;  %v810_v51 = vpop.f32.mrf.mxu1 }
 0x159   : > { %v809_v52 = vadd.f32 %v808_v48, %v584_v49 }
 0x15a   : > { %v588_v53 = vpop.f32.mrf.mxu0  ;;  %v813_v54 = vpop.f32.mrf.mxu1 }
 0x15b   : > { %895 = vst [vmem:[%s1520_s11 + $0x90] sm:$0xff] %v809_v52  ;;  %v589_v55 = vadd.f32 %v1513_v1, %v588_v53 }
 0x15c   : > { %v590_v56 = vpop.f32.mrf.mxu0  ;;  %v815_v57 = vpop.f32.mrf.mxu1 }
 0x15d   : > { %v814_v58 = vadd.f32 %v813_v54, %v589_v55 }
 0x15e   : > { %v593_v59 = vpop.f32.mrf.mxu0  ;;  %v818_v60 = vpop.f32.mrf.mxu1 }
 0x15f   : > { %896 = vst [vmem:[%s1520_s11 + $0x98] sm:$0xff] %v814_v58  ;;  %v594_v61 = vadd.f32 %v1513_v1, %v593_v59 }
 0x160   : > { %v595_v62 = vpop.f32.mrf.mxu0  ;;  %v820_v63 = vpop.f32.mrf.mxu1 }
 0x161   : > { %v819_v0 = vadd.f32 %v818_v60, %v594_v61 }
 0x162   : > { %v598_v3 = vpop.f32.mrf.mxu0  ;;  %v823_v4 = vpop.f32.mrf.mxu1 }
 0x163   : > { %897 = vst [vmem:[%s1520_s11 + $0xa0] sm:$0xff] %v819_v0  ;;  %v599_v5 = vadd.f32 %v1513_v1, %v598_v3 }
 0x164   : > { %v600_v6 = vpop.f32.mrf.mxu0  ;;  %v825_v7 = vpop.f32.mrf.mxu1 }
 0x165   : > { %v824_v8 = vadd.f32 %v823_v4, %v599_v5 }
 0x166   : > { %v603_v2 = vpop.f32.mrf.mxu0  ;;  %v828_v9 = vpop.f32.mrf.mxu1 }
 0x167   : > { %898 = vst [vmem:[%s1520_s11 + $0xa8] sm:$0xff] %v824_v8  ;;  %v604_v10 = vadd.f32 %v1513_v1, %v603_v2 }
 0x168   : > { %v605_v11 = vpop.f32.mrf.mxu0  ;;  %v830_v12 = vpop.f32.mrf.mxu1 }
 0x169   : > { %v829_v13 = vadd.f32 %v828_v9, %v604_v10 }
 0x16a   : > { %v608_v14 = vpop.f32.mrf.mxu0  ;;  %v833_v15 = vpop.f32.mrf.mxu1 }
 0x16b   : > { %899 = vst [vmem:[%s1520_s11 + $0xb0] sm:$0xff] %v829_v13  ;;  %v609_v16 = vadd.f32 %v1513_v1, %v608_v14 }
 0x16c   : > { %v610_v17 = vpop.f32.mrf.mxu0  ;;  %v835_v18 = vpop.f32.mrf.mxu1 }
 0x16d   : > { %v834_v19 = vadd.f32 %v833_v15, %v609_v16 }
 0x16e   : > { %v613_v20 = vpop.f32.mrf.mxu0  ;;  %v838_v21 = vpop.f32.mrf.mxu1 }
 0x16f   : > { %900 = vst [vmem:[%s1520_s11 + $0xb8] sm:$0xff] %v834_v19  ;;  %v614_v22 = vadd.f32 %v1513_v1, %v613_v20 }
 0x170   : > { %v615_v23 = vpop.f32.mrf.mxu0  ;;  %v840_v24 = vpop.f32.mrf.mxu1 }
 0x171   : > { %v839_v25 = vadd.f32 %v838_v21, %v614_v22 }
 0x172   : > { %v618_v26 = vpop.f32.mrf.mxu0  ;;  %v843_v27 = vpop.f32.mrf.mxu1 }
 0x173   : > { %901 = vst [vmem:[%s1520_s11 + $0xc0] sm:$0xff] %v839_v25  ;;  %v619_v28 = vadd.f32 %v1513_v1, %v618_v26 }
 0x174   : > { %v620_v29 = vpop.f32.mrf.mxu0  ;;  %v845_v30 = vpop.f32.mrf.mxu1 }
 0x175   : > { %v844_v31 = vadd.f32 %v843_v27, %v619_v28 }
 0x176   : > { %v623_v32 = vpop.f32.mrf.mxu0  ;;  %v848_v33 = vpop.f32.mrf.mxu1 }
 0x177   : > { %902 = vst [vmem:[%s1520_s11 + $0xc8] sm:$0xff] %v844_v31  ;;  %v624_v34 = vadd.f32 %v1513_v1, %v623_v32 }
 0x178   : > { %v625_v35 = vpop.f32.mrf.mxu0  ;;  %v850_v36 = vpop.f32.mrf.mxu1 }
 0x179   : > { %v849_v37 = vadd.f32 %v848_v33, %v624_v34 }
 0x17a   : > { %v628_v38 = vpop.f32.mrf.mxu0  ;;  %v853_v39 = vpop.f32.mrf.mxu1 }
 0x17b   : > { %903 = vst [vmem:[%s1520_s11 + $0xd0] sm:$0xff] %v849_v37  ;;  %v629_v40 = vadd.f32 %v1513_v1, %v628_v38 }
 0x17c   : > { %v630_v41 = vpop.f32.mrf.mxu0  ;;  %v855_v42 = vpop.f32.mrf.mxu1 }
 0x17d   : > { %v854_v43 = vadd.f32 %v853_v39, %v629_v40 }
 0x17e   : > { %v633_v44 = vpop.f32.mrf.mxu0  ;;  %v858_v45 = vpop.f32.mrf.mxu1 }
 0x17f   : > { %904 = vst [vmem:[%s1520_s11 + $0xd8] sm:$0xff] %v854_v43  ;;  %v634_v46 = vadd.f32 %v1513_v1, %v633_v44 }
 0x180   : > { %v635_v47 = vpop.f32.mrf.mxu0  ;;  %v860_v48 = vpop.f32.mrf.mxu1 }
 0x181   : > { %v859_v49 = vadd.f32 %v858_v45, %v634_v46 }
 0x182   : > { %v638_v50 = vpop.f32.mrf.mxu0  ;;  %v863_v51 = vpop.f32.mrf.mxu1 }
 0x183   : > { %905 = vst [vmem:[%s1520_s11 + $0xe0] sm:$0xff] %v859_v49  ;;  %v639_v52 = vadd.f32 %v1513_v1, %v638_v50 }
 0x184   : > { %v640_v53 = vpop.f32.mrf.mxu0  ;;  %v865_v54 = vpop.f32.mrf.mxu1 }
 0x185   : > { %v864_v55 = vadd.f32 %v863_v51, %v639_v52 }
 0x186   : > { %v643_v56 = vpop.f32.mrf.mxu0  ;;  %v868_v57 = vpop.f32.mrf.mxu1 }
 0x187   : > { %906 = vst [vmem:[%s1520_s11 + $0xe8] sm:$0xff] %v864_v55  ;;  %v644_v58 = vadd.f32 %v1513_v1, %v643_v56 }
 0x188   : > { %v645_v59 = vpop.f32.mrf.mxu0  ;;  %v870_v60 = vpop.f32.mrf.mxu1 }
 0x189   : > { %v869_v61 = vadd.f32 %v868_v57, %v644_v58 }
 0x18a   : > { %v648_v62 = vpop.f32.mrf.mxu0  ;;  %v873_v63 = vpop.f32.mrf.mxu1 }
 0x18b   : > { %907 = vst [vmem:[%s1520_s11 + $0xf0] sm:$0xff] %v869_v61  ;;  %v649_v0 = vadd.f32 %v1513_v1, %v648_v62 }
 0x18c   : > { %v650_v3 = vpop.f32.mrf.mxu0  ;;  %v875_v4 = vpop.f32.mrf.mxu1 }
 0x18d   : > { %v874_v5 = vadd.f32 %v873_v63, %v649_v0 }
 0x18f   : > { %908 = vst [vmem:[%s1520_s11 + $0xf8] sm:$0xff] %v874_v5 }
 0x190 PF: > { %s13_s14 = sadd.s32 1, %s1074_s14   ;;  %s1598_s12 = smov %s1070_s13 }
 0x191   : > { %p10_p5 = scmp.ge.s32.totalorder %s13_s14, 4   ;;  %s1599_s13 = smov %s1601_s15 }
 0x193   :  { %12 = sbr.rel (!%p10_p5) target bundleno = 2 (0x2), region = 68 }

// kernel: run_pallas.60
= control target key start
LH: loop header
LB: loop body
LE: loop exit
PB: predicated region body
PF: predicated region fallthrough
CT: control target
= control target key end

     0   :  { %s1481_s12 = smov 0   ;;  %s1483_s13 = smov 0   ;;  %s2298_s0 = inlined_call_operand.vmem [shape: f32[512,768], index: 0, kind: input, shape index: {}]   ;;  %s2299_s1 = inlined_call_operand.vmem [shape: f32[768,128], index: 1, kind: input, shape index: {}]   ;;  %s2300_s2 = inlined_call_operand.vmem [shape: f32[1,128], index: 2, kind: input, shape index: {}]   ;;  %s2301_s3 = inlined_call_operand.vmem [shape: f32[512,128], index: 3, kind: output, shape index: {}]  }
   0x1   :  { %s1485_s14 = smov 0  }
   0x2 LB: > { %s25_s15 = sadd.s32 1, %s1454_s13  ;;  %p1338_p0 = scmp.ge.s32.totalorder %s1458_s14, 1  ;;  %s1458_s14 = sphi %s1485_s14, %s13_s14   ;;  %s1454_s13 = sphi %s1483_s13, %s2303_s13   ;;  %s1450_s12 = sphi %s1481_s12, %s2302_s12  }
   0x3   : > { %p27_p1 = scmp.ge.s32.totalorder %s25_s15, 2  ;;  %p170_p2 = scmp.lt.s32.totalorder %s1458_s14, 3 }
   0x5   : > { %s2305_s15 = smov (%p27_p1, %s25_s15), 0  ;;  %p171_p3 = pnand %p1338_p0, %p170_p2 }
   0x6   : > { %s1339_s16 = sshll.u32 (!%p171_p3), %s1450_s12, 5 }
   0x7   : > { %174 = sbr.rel (%p171_p3) target bundleno = 495 (0x1ef), region = 32  ;;  %p206_p4 = scmp.lt.s32.totalorder (!%p171_p3), %s1339_s16, 63 }
   0xc   : > { %v435_v0 = vld [vmem:[%s2299_s1 + $0x78] sm:$0xff]  ;;  %v1460_v1 = vmov 0.0   ;;  %v434_v2 = vld [vmem:[%s2299_s1 + $0x70] sm:$0xff]  ;;  %v433_v3 = vld [vmem:[%s2299_s1 + $0x68] sm:$0xff]  ;;  %s2307_s16 = smov (!%p206_p4, %s1339_s16), 63 }
   0xd   : > { %1346 = vmatprep.subr.mxu1 %v1460_v1  ;;  %523 = vmatprep.subr.mxu0 %v1460_v1  ;;  %v432_v4 = vld [vmem:[%s2299_s1 + $0x60] sm:$0xff]  ;;  %v431_v5 = vld [vmem:[%s2299_s1 + $0x58] sm:$0xff]  ;;  %v430_v6 = vld [vmem:[%s2299_s1 + $0x50] sm:$0xff]  ;;  %s1410_s26 = smul.u32 48, %s2307_s16  ;;  %s1342_s8 = sshll.u32 %s2307_s16, 3 }
   0xe   : > { %1378 = vmatpush1.msra.mxu1 %v435_v0  ;;  %524 = vmatpush1.msra.mxu0 %v435_v0  ;;  %v429_v7 = vld [vmem:[%s2299_s1 + $0x48] sm:$0xff]  ;;  %v428_v8 = vld [vmem:[%s2299_s1 + $0x40] sm:$0xff]  ;;  %v427_v9 = vld [vmem:[%s2299_s1 + $0x38] sm:$0xff]  ;;  %s2193_s11 = scalar_lea.vmem %s2301_s3, %s1342_s8 }
   0xf   : > { %1347 = vmatprep.subr.mxu1 %v1460_v1  ;;  %525 = vmatprep.subr.mxu0 %v1460_v1  ;;  %v426_v10 = vld [vmem:[%s2299_s1 + $0x30] sm:$0xff]  ;;  %v425_v11 = vld [vmem:[%s2299_s1 + $0x28] sm:$0xff]  ;;  %v424_v12 = vld [vmem:[%s2299_s1 + $0x20] sm:$0xff]  ;;  %s1656_s6 = scalar_lea.vmem %s2298_s0, %s1410_s26 }
  0x10   : > { %1379 = vmatpush1.msra.mxu1 %v434_v2  ;;  %526 = vmatpush1.msra.mxu0 %v434_v2  ;;  %v423_v13 = vld [vmem:[%s2299_s1 + $0x18] sm:$0xff]  ;;  %v422_v14 = vld [vmem:[%s2299_s1 + $0x10] sm:$0xff]  ;;  %v421_v15 = vld [vmem:[%s2299_s1 + $0x8] sm:$0xff] }
  0x11   : > { %1348 = vmatprep.subr.mxu1 %v1460_v1  ;;  %527 = vmatprep.subr.mxu0 %v1460_v1  ;;  %v420_v16 = vld [vmem:[%s2299_s1] sm:$0xff]  ;;  %v451_v17 = vld [vmem:[%s2299_s1 + $0xf8] sm:$0xff]  ;;  %v450_v18 = vld [vmem:[%s2299_s1 + $0xf0] sm:$0xff] }
  0x12   : > { %1380 = vmatpush1.msra.mxu1 %v433_v3  ;;  %528 = vmatpush1.msra.mxu0 %v433_v3  ;;  %v449_v19 = vld [vmem:[%s2299_s1 + $0xe8] sm:$0xff]  ;;  %v448_v20 = vld [vmem:[%s2299_s1 + $0xe0] sm:$0xff]  ;;  %v447_v21 = vld [vmem:[%s2299_s1 + $0xd8] sm:$0xff] }
  0x13   : > { %1349 = vmatprep.subr.mxu1 %v1460_v1  ;;  %529 = vmatprep.subr.mxu0 %v1460_v1  ;;  %v446_v22 = vld [vmem:[%s2299_s1 + $0xd0] sm:$0xff]  ;;  %v445_v23 = vld [vmem:[%s2299_s1 + $0xc8] sm:$0xff]  ;;  %v444_v24 = vld [vmem:[%s2299_s1 + $0xc0] sm:$0xff] }
  0x14   : > { %1381 = vmatpush1.msra.mxu1 %v432_v4  ;;  %530 = vmatpush1.msra.mxu0 %v432_v4  ;;  %v443_v25 = vld [vmem:[%s2299_s1 + $0xb8] sm:$0xff]  ;;  %v442_v26 = vld [vmem:[%s2299_s1 + $0xb0] sm:$0xff]  ;;  %v441_v27 = vld [vmem:[%s2299_s1 + $0xa8] sm:$0xff] }
  0x15   : > { %1350 = vmatprep.subr.mxu1 %v1460_v1  ;;  %531 = vmatprep.subr.mxu0 %v1460_v1  ;;  %v440_v28 = vld [vmem:[%s2299_s1 + $0xa0] sm:$0xff]  ;;  %v439_v29 = vld [vmem:[%s2299_s1 + $0x98] sm:$0xff]  ;;  %v438_v30 = vld [vmem:[%s2299_s1 + $0x90] sm:$0xff] }
  0x16   : > { %1382 = vmatpush1.msra.mxu1 %v431_v5  ;;  %532 = vmatpush1.msra.mxu0 %v431_v5  ;;  %v437_v31 = vld [vmem:[%s2299_s1 + $0x88] sm:$0xff]  ;;  %v436_v32 = vld [vmem:[%s2299_s1 + $0x80] sm:$0xff]  ;;  %v467_v37 = vld [vmem:[%s2299_s1 + $0x178] sm:$0xff] }
  0x17   : > { %1351 = vmatprep.subr.mxu1 %v1460_v1  ;;  %533 = vmatprep.subr.mxu0 %v1460_v1  ;;  %v325_v33 = vld [vmem:[%s1656_s6 + $0x308] sm:$0xff]  ;;  %v324_v35 = vld [vmem:[%s1656_s6 + $0x300] sm:$0xff]  ;;  %v499_v38 = vld [vmem:[%s2299_s1 + $0x278] sm:$0xff] }
  0x18   : > { %1383 = vmatpush1.msra.mxu1 %v430_v6  ;;  %534 = vmatpush1.msra.mxu0 %v430_v6  ;;  %v229_v34 = vld [vmem:[%s1656_s6 + $0x8] sm:$0xff]  ;;  %v228_v36 = vld [vmem:[%s1656_s6] sm:$0xff]  ;;  %v331_v39 = vld [vmem:[%s1656_s6 + $0x338] sm:$0xff] }
  0x19   : > { %1352 = vmatprep.subr.mxu1 %v1460_v1  ;;  %535 = vmatprep.subr.mxu0 %v1460_v1  ;;  %v466_v40 = vld [vmem:[%s2299_s1 + $0x170] sm:$0xff]  ;;  %v235_v41 = vld [vmem:[%s1656_s6 + $0x38] sm:$0xff]  ;;  %v465_v45 = vld [vmem:[%s2299_s1 + $0x168] sm:$0xff] }
  0x1a   : > { %1384 = vmatpush1.msra.mxu1 %v429_v7  ;;  %536 = vmatpush1.msra.mxu0 %v429_v7  ;;  %v330_v42 = vld [vmem:[%s1656_s6 + $0x330] sm:$0xff]  ;;  %v497_v46 = vld [vmem:[%s2299_s1 + $0x268] sm:$0xff]  ;;  %v464_v48 = vld [vmem:[%s2299_s1 + $0x160] sm:$0xff] }
  0x1b   : > { %1353 = vmatprep.subr.mxu1 %v1460_v1  ;;  %537 = vmatprep.subr.mxu0 %v1460_v1  ;;  %v498_v43 = vld [vmem:[%s2299_s1 + $0x270] sm:$0xff]  ;;  %v337_v47 = vld [vmem:[%s1656_s6 + $0x368] sm:$0xff]  ;;  %v336_v50 = vld [vmem:[%s1656_s6 + $0x360] sm:$0xff] }
  0x1c   : > { %1385 = vmatpush1.msra.mxu1 %v428_v8  ;;  %538 = vmatpush1.msra.mxu0 %v428_v8  ;;  %v234_v44 = vld [vmem:[%s1656_s6 + $0x30] sm:$0xff]  ;;  %v241_v49 = vld [vmem:[%s1656_s6 + $0x68] sm:$0xff]  ;;  %v496_v51 = vld [vmem:[%s2299_s1 + $0x260] sm:$0xff] }
  0x1d   : > { %1354 = vmatprep.subr.mxu1 %v1460_v1  ;;  %539 = vmatprep.subr.mxu0 %v1460_v1  ;;  %v240_v52 = vld [vmem:[%s1656_s6 + $0x60] sm:$0xff]  ;;  %v463_v53 = vld [vmem:[%s2299_s1 + $0x158] sm:$0xff]  ;;  %v462_v56 = vld [vmem:[%s2299_s1 + $0x150] sm:$0xff] }
  0x1e   : > { %1386 = vmatpush1.msra.mxu1 %v427_v9  ;;  %540 = vmatpush1.msra.mxu0 %v427_v9  ;;  %v495_v54 = vld [vmem:[%s2299_s1 + $0x258] sm:$0xff]  ;;  %v342_v58 = vld [vmem:[%s1656_s6 + $0x390] sm:$0xff]  ;;  %v461_v61 = vld [vmem:[%s2299_s1 + $0x148] sm:$0xff] }
  0x1f   : > { %1355 = vmatprep.subr.mxu1 %v1460_v1  ;;  %541 = vmatprep.subr.mxu0 %v1460_v1  ;;  %v343_v55 = vld [vmem:[%s1656_s6 + $0x398] sm:$0xff]  ;;  %v494_v59 = vld [vmem:[%s2299_s1 + $0x250] sm:$0xff]  ;;  %v493_v62 = vld [vmem:[%s2299_s1 + $0x248] sm:$0xff] }
  0x20   : > { %1387 = vmatpush1.msra.mxu1 %v426_v10  ;;  %542 = vmatpush1.msra.mxu0 %v426_v10  ;;  %v247_v57 = vld [vmem:[%s1656_s6 + $0x98] sm:$0xff]  ;;  %v246_v60 = vld [vmem:[%s1656_s6 + $0x90] sm:$0xff]  ;;  %v349_v63 = vld [vmem:[%s1656_s6 + $0x3c8] sm:$0xff] }
  0x21   : > { %1356 = vmatprep.subr.mxu1 %v1460_v1  ;;  %543 = vmatprep.subr.mxu0 %v1460_v1  ;;  %v460_v0 = vld [vmem:[%s2299_s1 + $0x140] sm:$0xff]  ;;  %v253_v2 = vld [vmem:[%s1656_s6 + $0xc8] sm:$0xff]  ;;  %v459_v6 = vld [vmem:[%s2299_s1 + $0x138] sm:$0xff] }
  0x22   : > { %1388 = vmatpush1.msra.mxu1 %v425_v11  ;;  %544 = vmatpush1.msra.mxu0 %v425_v11  ;;  %v348_v3 = vld [vmem:[%s1656_s6 + $0x3c0] sm:$0xff]  ;;  %v491_v7 = vld [vmem:[%s2299_s1 + $0x238] sm:$0xff]  ;;  %v458_v9 = vld [vmem:[%s2299_s1 + $0x130] sm:$0xff] }
  0x23   : > { %1357 = vmatprep.subr.mxu1 %v1460_v1  ;;  %545 = vmatprep.subr.mxu0 %v1460_v1  ;;  %v492_v4 = vld [vmem:[%s2299_s1 + $0x240] sm:$0xff]  ;;  %v355_v8 = vld [vmem:[%s1656_s6 + $0x3f8] sm:$0xff]  ;;  %v354_v11 = vld [vmem:[%s1656_s6 + $0x3f0] sm:$0xff] }
  0x24   : > { %1389 = vmatpush1.msra.mxu1 %v424_v12  ;;  %546 = vmatpush1.msra.mxu0 %v424_v12  ;;  %v252_v5 = vld [vmem:[%s1656_s6 + $0xc0] sm:$0xff]  ;;  %v259_v10 = vld [vmem:[%s1656_s6 + $0xf8] sm:$0xff]  ;;  %v490_v12 = vld [vmem:[%s2299_s1 + $0x230] sm:$0xff] }
  0x25   : > { %1358 = vmatprep.subr.mxu1 %v1460_v1  ;;  %547 = vmatprep.subr.mxu0 %v1460_v1 }
  0x26   : > { %1390 = vmatpush1.msra.mxu1 %v423_v13  ;;  %548 = vmatpush1.msra.mxu0 %v423_v13  ;;  %v258_v13 = vld [vmem:[%s1656_s6 + $0xf0] sm:$0xff] }
  0x27   : > { %1359 = vmatprep.subr.mxu1 %v1460_v1  ;;  %549 = vmatprep.subr.mxu0 %v1460_v1 }
  0x28   : > { %1391 = vmatpush1.msra.mxu1 %v422_v14  ;;  %550 = vmatpush1.msra.mxu0 %v422_v14  ;;  %v457_v14 = vld [vmem:[%s2299_s1 + $0x128] sm:$0xff] }
  0x29   : > { %1360 = vmatprep.subr.mxu1 %v1460_v1  ;;  %551 = vmatprep.subr.mxu0 %v1460_v1 }
  0x2a   : > { %1392 = vmatpush1.msra.mxu1 %v421_v15  ;;  %552 = vmatpush1.msra.mxu0 %v421_v15  ;;  %v489_v15 = vld [vmem:[%s2299_s1 + $0x228] sm:$0xff] }
  0x2b   : > { %1361 = vmatprep.subr.mxu1 %v1460_v1  ;;  %553 = vmatprep.subr.mxu0 %v1460_v1 }
  0x2c   : > { %1393 = vmatpush1.msra.mxu1 %v420_v16  ;;  %554 = vmatpush1.msra.mxu0 %v420_v16  ;;  %v361_v16 = vld [vmem:[%s1656_s6 + $0x428] sm:$0xff] }
  0x2d   : > { %1362 = vmatprep.subr.mxu1 %v1460_v1  ;;  %555 = vmatprep.subr.mxu0 %v1460_v1 }
  0x2e   : > { %1394 = vmatpush2.msra.mxu1 %v451_v17  ;;  %556 = vmatpush2.msra.mxu0 %v451_v17  ;;  %v456_v17 = vld [vmem:[%s2299_s1 + $0x120] sm:$0xff] }
  0x2f   : > { %1363 = vmatprep.subr.mxu1 %v1460_v1  ;;  %557 = vmatprep.subr.mxu0 %v1460_v1 }
  0x30   : > { %1395 = vmatpush2.msra.mxu1 %v450_v18  ;;  %558 = vmatpush2.msra.mxu0 %v450_v18  ;;  %v265_v18 = vld [vmem:[%s1656_s6 + $0x128] sm:$0xff] }
  0x31   : > { %1364 = vmatprep.subr.mxu1 %v1460_v1  ;;  %559 = vmatprep.subr.mxu0 %v1460_v1 }
  0x32   : > { %1396 = vmatpush2.msra.mxu1 %v449_v19  ;;  %560 = vmatpush2.msra.mxu0 %v449_v19  ;;  %v360_v19 = vld [vmem:[%s1656_s6 + $0x420] sm:$0xff] }
  0x33   : > { %1365 = vmatprep.subr.mxu1 %v1460_v1  ;;  %561 = vmatprep.subr.mxu0 %v1460_v1 }
  0x34   : > { %1397 = vmatpush2.msra.mxu1 %v448_v20  ;;  %562 = vmatpush2.msra.mxu0 %v448_v20  ;;  %v488_v20 = vld [vmem:[%s2299_s1 + $0x220] sm:$0xff] }
  0x35   : > { %1366 = vmatprep.subr.mxu1 %v1460_v1  ;;  %563 = vmatprep.subr.mxu0 %v1460_v1 }
  0x36   : > { %1398 = vmatpush2.msra.mxu1 %v447_v21  ;;  %564 = vmatpush2.msra.mxu0 %v447_v21  ;;  %v264_v21 = vld [vmem:[%s1656_s6 + $0x120] sm:$0xff] }
  0x37   : > { %1367 = vmatprep.subr.mxu1 %v1460_v1  ;;  %565 = vmatprep.subr.mxu0 %v1460_v1 }
  0x38   : > { %1399 = vmatpush2.msra.mxu1 %v446_v22  ;;  %566 = vmatpush2.msra.mxu0 %v446_v22  ;;  %v455_v22 = vld [vmem:[%s2299_s1 + $0x118] sm:$0xff] }
  0x39   : > { %1368 = vmatprep.subr.mxu1 %v1460_v1  ;;  %567 = vmatprep.subr.mxu0 %v1460_v1 }
  0x3a   : > { %1400 = vmatpush2.msra.mxu1 %v445_v23  ;;  %568 = vmatpush2.msra.mxu0 %v445_v23  ;;  %v487_v23 = vld [vmem:[%s2299_s1 + $0x218] sm:$0xff] }
  0x3b   : > { %1369 = vmatprep.subr.mxu1 %v1460_v1  ;;  %569 = vmatprep.subr.mxu0 %v1460_v1 }
  0x3c   : > { %1401 = vmatpush2.msra.mxu1 %v444_v24  ;;  %570 = vmatpush2.msra.mxu0 %v444_v24  ;;  %v367_v24 = vld [vmem:[%s1656_s6 + $0x458] sm:$0xff] }
  0x3d   : > { %1370 = vmatprep.subr.mxu1 %v1460_v1  ;;  %571 = vmatprep.subr.mxu0 %v1460_v1 }
  0x3e   : > { %1402 = vmatpush2.msra.mxu1 %v443_v25  ;;  %572 = vmatpush2.msra.mxu0 %v443_v25  ;;  %v454_v25 = vld [vmem:[%s2299_s1 + $0x110] sm:$0xff] }
  0x3f   : > { %1371 = vmatprep.subr.mxu1 %v1460_v1  ;;  %573 = vmatprep.subr.mxu0 %v1460_v1 }
  0x40   : > { %1403 = vmatpush2.msra.mxu1 %v442_v26  ;;  %574 = vmatpush2.msra.mxu0 %v442_v26  ;;  %v271_v26 = vld [vmem:[%s1656_s6 + $0x158] sm:$0xff] }
  0x41   : > { %1372 = vmatprep.subr.mxu1 %v1460_v1  ;;  %575 = vmatprep.subr.mxu0 %v1460_v1 }
  0x42   : > { %1404 = vmatpush2.msra.mxu1 %v441_v27  ;;  %576 = vmatpush2.msra.mxu0 %v441_v27  ;;  %v366_v27 = vld [vmem:[%s1656_s6 + $0x450] sm:$0xff] }
  0x43   : > { %1373 = vmatprep.subr.mxu1 %v1460_v1  ;;  %577 = vmatprep.subr.mxu0 %v1460_v1 }
  0x44   : > { %1405 = vmatpush2.msra.mxu1 %v440_v28  ;;  %578 = vmatpush2.msra.mxu0 %v440_v28  ;;  %v486_v28 = vld [vmem:[%s2299_s1 + $0x210] sm:$0xff] }
  0x45   : > { %1374 = vmatprep.subr.mxu1 %v1460_v1  ;;  %579 = vmatprep.subr.mxu0 %v1460_v1 }
  0x46   : > { %1406 = vmatpush2.msra.mxu1 %v439_v29  ;;  %580 = vmatpush2.msra.mxu0 %v439_v29  ;;  %v270_v29 = vld [vmem:[%s1656_s6 + $0x150] sm:$0xff] }
  0x47   : > { %1375 = vmatprep.subr.mxu1 %v1460_v1  ;;  %581 = vmatprep.subr.mxu0 %v1460_v1 }
  0x48   : > { %1407 = vmatpush2.msra.mxu1 %v438_v30  ;;  %582 = vmatpush2.msra.mxu0 %v438_v30  ;;  %v453_v30 = vld [vmem:[%s2299_s1 + $0x108] sm:$0xff] }
  0x49   : > { %1376 = vmatprep.subr.mxu1 %v1460_v1  ;;  %583 = vmatprep.subr.mxu0 %v1460_v1 }
  0x4a   : > { %1408 = vmatpush2.msra.mxu1 %v437_v31  ;;  %584 = vmatpush2.msra.mxu0 %v437_v31  ;;  %v485_v31 = vld [vmem:[%s2299_s1 + $0x208] sm:$0xff] }
  0x4b   : > { %1377 = vmatprep.subr.mxu1 %v1460_v1  ;;  %585 = vmatprep.subr.mxu0 %v1460_v1 }
  0x4c   : > { %1409 = vmatpush2.msra.mxu1 %v436_v32  ;;  %667 = vmatprep.mubr.f32.mxu1 %v325_v33  ;;  %v452_v33 = vld [vmem:[%s2299_s1 + $0x100] sm:$0xff] }
  0x4d   : > { %586 = vmatpush2.msra.mxu0 %v436_v32  ;;  %587 = vmatprep.mubr.f32.mxu0 %v229_v34  ;;  %v373_v32 = vld [vmem:[%s1656_s6 + $0x488] sm:$0xff] }
  0x4e   : > { %668 = vmatmul.mubr.f32.vlgmr.msra.gmra.mxu1 %v324_v35  ;;  %748 = vmatprep.subr.mxu1 %v1460_v1  ;;  %v277_v34 = vld [vmem:[%s1656_s6 + $0x188] sm:$0xff]  ;;  %v372_v35 = vld [vmem:[%s1656_s6 + $0x480] sm:$0xff] }
  0x4f   : > { %588 = vmatmul.mubr.f32.vlgmr.msra.gmra.mxu0 %v228_v36  ;;  %749 = vmatpush1.msra.mxu1 %v467_v37  ;;  %v484_v36 = vld [vmem:[%s2299_s1 + $0x200] sm:$0xff] }
  0x50   : > { %973 = vmatprep.subr.mxu0 %v1460_v1  ;;  %750 = vmatprep.subr.mxu1 %v1460_v1  ;;  %v276_v37 = vld [vmem:[%s1656_s6 + $0x180] sm:$0xff] }
  0x51   : > { %974 = vmatpush1.msra.mxu0 %v499_v38  ;;  %672 = vmatprep.mubr.f32.mxu1 %v331_v39  ;;  %v483_v38 = vld [vmem:[%s2299_s1 + $0x1f8] sm:$0xff] }
  0x52   : > { %751 = vmatpush1.msra.mxu1 %v466_v40  ;;  %975 = vmatprep.subr.mxu0 %v1460_v1  ;;  %v515_v39 = vld [vmem:[%s2299_s1 + $0x2f8] sm:$0xff] }
  0x53   : > { %592 = vmatprep.mubr.f32.mxu0 %v235_v41  ;;  %673 = vmatmul.mubr.f32.gmra.mxu1 %v330_v42  ;;  %v379_v40 = vld [vmem:[%s1656_s6 + $0x4b8] sm:$0xff]  ;;  %v482_v41 = vld [vmem:[%s2299_s1 + $0x1f0] sm:$0xff] }
  0x54   : > { %752 = vmatprep.subr.mxu1 %v1460_v1  ;;  %976 = vmatpush1.msra.mxu0 %v498_v43  ;;  %v283_v42 = vld [vmem:[%s1656_s6 + $0x1b8] sm:$0xff]  ;;  %v378_v43 = vld [vmem:[%s1656_s6 + $0x4b0] sm:$0xff] }
  0x55   : > { %593 = vmatmul.mubr.f32.gmra.mxu0 %v234_v44  ;;  %753 = vmatpush1.msra.mxu1 %v465_v45  ;;  %v514_v44 = vld [vmem:[%s2299_s1 + $0x2f0] sm:$0xff] }
  0x56   : > { %977 = vmatprep.subr.mxu0 %v1460_v1  ;;  %754 = vmatprep.subr.mxu1 %v1460_v1  ;;  %v282_v45 = vld [vmem:[%s1656_s6 + $0x1b0] sm:$0xff] }
  0x57   : > { %978 = vmatpush1.msra.mxu0 %v497_v46  ;;  %677 = vmatprep.mubr.f32.mxu1 %v337_v47  ;;  %v481_v46 = vld [vmem:[%s2299_s1 + $0x1e8] sm:$0xff] }
  0x58   : > { %755 = vmatpush1.msra.mxu1 %v464_v48  ;;  %979 = vmatprep.subr.mxu0 %v1460_v1  ;;  %v513_v47 = vld [vmem:[%s2299_s1 + $0x2e8] sm:$0xff] }
  0x59   : > { %597 = vmatprep.mubr.f32.mxu0 %v241_v49  ;;  %678 = vmatmul.mubr.f32.gmra.mxu1 %v336_v50  ;;  %v385_v48 = vld [vmem:[%s1656_s6 + $0x4e8] sm:$0xff]  ;;  %v480_v49 = vld [vmem:[%s2299_s1 + $0x1e0] sm:$0xff] }
  0x5a   : > { %756 = vmatprep.subr.mxu1 %v1460_v1  ;;  %980 = vmatpush1.msra.mxu0 %v496_v51  ;;  %v289_v50 = vld [vmem:[%s1656_s6 + $0x1e8] sm:$0xff]  ;;  %v384_v51 = vld [vmem:[%s1656_s6 + $0x4e0] sm:$0xff] }
  0x5b   : > { %598 = vmatmul.mubr.f32.gmra.mxu0 %v240_v52  ;;  %757 = vmatpush1.msra.mxu1 %v463_v53  ;;  %v512_v52 = vld [vmem:[%s2299_s1 + $0x2e0] sm:$0xff] }
  0x5c   : > { %981 = vmatprep.subr.mxu0 %v1460_v1  ;;  %758 = vmatprep.subr.mxu1 %v1460_v1  ;;  %v288_v53 = vld [vmem:[%s1656_s6 + $0x1e0] sm:$0xff] }
  0x5d   : > { %982 = vmatpush1.msra.mxu0 %v495_v54  ;;  %682 = vmatprep.mubr.f32.mxu1 %v343_v55  ;;  %v479_v54 = vld [vmem:[%s2299_s1 + $0x1d8] sm:$0xff] }
  0x5e   : > { %759 = vmatpush1.msra.mxu1 %v462_v56  ;;  %983 = vmatprep.subr.mxu0 %v1460_v1  ;;  %v511_v55 = vld [vmem:[%s2299_s1 + $0x2d8] sm:$0xff] }
  0x5f   : > { %602 = vmatprep.mubr.f32.mxu0 %v247_v57  ;;  %683 = vmatmul.mubr.f32.gmra.mxu1 %v342_v58  ;;  %v391_v56 = vld [vmem:[%s1656_s6 + $0x518] sm:$0xff]  ;;  %v478_v57 = vld [vmem:[%s2299_s1 + $0x1d0] sm:$0xff] }
  0x60   : > { %760 = vmatprep.subr.mxu1 %v1460_v1  ;;  %984 = vmatpush1.msra.mxu0 %v494_v59  ;;  %v295_v58 = vld [vmem:[%s1656_s6 + $0x218] sm:$0xff]  ;;  %v390_v59 = vld [vmem:[%s1656_s6 + $0x510] sm:$0xff] }
  0x61   : > { %603 = vmatmul.mubr.f32.gmra.mxu0 %v246_v60  ;;  %761 = vmatpush1.msra.mxu1 %v461_v61  ;;  %v510_v60 = vld [vmem:[%s2299_s1 + $0x2d0] sm:$0xff] }
  0x62   : > { %985 = vmatprep.subr.mxu0 %v1460_v1  ;;  %762 = vmatprep.subr.mxu1 %v1460_v1  ;;  %v294_v61 = vld [vmem:[%s1656_s6 + $0x210] sm:$0xff] }
  0x63   : > { %986 = vmatpush1.msra.mxu0 %v493_v62  ;;  %687 = vmatprep.mubr.f32.mxu1 %v349_v63  ;;  %v477_v62 = vld [vmem:[%s2299_s1 + $0x1c8] sm:$0xff] }
  0x64   : > { %763 = vmatpush1.msra.mxu1 %v460_v0  ;;  %987 = vmatprep.subr.mxu0 %v1460_v1  ;;  %v509_v63 = vld [vmem:[%s2299_s1 + $0x2c8] sm:$0xff] }
  0x65   : > { %607 = vmatprep.mubr.f32.mxu0 %v253_v2  ;;  %688 = vmatmul.mubr.f32.gmra.mxu1 %v348_v3  ;;  %v397_v0 = vld [vmem:[%s1656_s6 + $0x548] sm:$0xff]  ;;  %v476_v2 = vld [vmem:[%s2299_s1 + $0x1c0] sm:$0xff] }
  0x66   : > { %764 = vmatprep.subr.mxu1 %v1460_v1  ;;  %988 = vmatpush1.msra.mxu0 %v492_v4  ;;  %v301_v3 = vld [vmem:[%s1656_s6 + $0x248] sm:$0xff]  ;;  %v396_v4 = vld [vmem:[%s1656_s6 + $0x540] sm:$0xff] }
  0x67   : > { %608 = vmatmul.mubr.f32.gmra.mxu0 %v252_v5  ;;  %765 = vmatpush1.msra.mxu1 %v459_v6  ;;  %v508_v5 = vld [vmem:[%s2299_s1 + $0x2c0] sm:$0xff] }
  0x68   : > { %989 = vmatprep.subr.mxu0 %v1460_v1  ;;  %766 = vmatprep.subr.mxu1 %v1460_v1  ;;  %v300_v6 = vld [vmem:[%s1656_s6 + $0x240] sm:$0xff] }
  0x69   : > { %990 = vmatpush1.msra.mxu0 %v491_v7  ;;  %692 = vmatprep.mubr.f32.mxu1 %v355_v8  ;;  %v475_v7 = vld [vmem:[%s2299_s1 + $0x1b8] sm:$0xff] }
  0x6a   : > { %767 = vmatpush1.msra.mxu1 %v458_v9  ;;  %991 = vmatprep.subr.mxu0 %v1460_v1  ;;  %v507_v8 = vld [vmem:[%s2299_s1 + $0x2b8] sm:$0xff] }
  0x6b   : > { %612 = vmatprep.mubr.f32.mxu0 %v259_v10  ;;  %693 = vmatmul.mubr.f32.gmra.mxu1 %v354_v11  ;;  %v403_v9 = vld [vmem:[%s1656_s6 + $0x578] sm:$0xff]  ;;  %v474_v10 = vld [vmem:[%s2299_s1 + $0x1b0] sm:$0xff] }
  0x6c   : > { %768 = vmatprep.subr.mxu1 %v1460_v1  ;;  %992 = vmatpush1.msra.mxu0 %v490_v12  ;;  %v307_v11 = vld [vmem:[%s1656_s6 + $0x278] sm:$0xff]  ;;  %v402_v12 = vld [vmem:[%s1656_s6 + $0x570] sm:$0xff] }
  0x6d   : > { %613 = vmatmul.mubr.f32.gmra.mxu0 %v258_v13  ;;  %769 = vmatpush1.msra.mxu1 %v457_v14  ;;  %v506_v13 = vld [vmem:[%s2299_s1 + $0x2b0] sm:$0xff] }
  0x6e   : > { %993 = vmatprep.subr.mxu0 %v1460_v1  ;;  %770 = vmatprep.subr.mxu1 %v1460_v1  ;;  %v306_v14 = vld [vmem:[%s1656_s6 + $0x270] sm:$0xff] }
  0x6f   : > { %994 = vmatpush1.msra.mxu0 %v489_v15  ;;  %697 = vmatprep.mubr.f32.mxu1 %v361_v16  ;;  %v473_v15 = vld [vmem:[%s2299_s1 + $0x1a8] sm:$0xff] }
  0x70   : > { %771 = vmatpush1.msra.mxu1 %v456_v17  ;;  %995 = vmatprep.subr.mxu0 %v1460_v1  ;;  %v505_v16 = vld [vmem:[%s2299_s1 + $0x2a8] sm:$0xff] }
  0x71   : > { %617 = vmatprep.mubr.f32.mxu0 %v265_v18  ;;  %698 = vmatmul.mubr.f32.gmra.mxu1 %v360_v19  ;;  %v409_v17 = vld [vmem:[%s1656_s6 + $0x5a8] sm:$0xff]  ;;  %v472_v18 = vld [vmem:[%s2299_s1 + $0x1a0] sm:$0xff] }
  0x72   : > { %772 = vmatprep.subr.mxu1 %v1460_v1  ;;  %996 = vmatpush1.msra.mxu0 %v488_v20  ;;  %v313_v19 = vld [vmem:[%s1656_s6 + $0x2a8] sm:$0xff]  ;;  %v408_v20 = vld [vmem:[%s1656_s6 + $0x5a0] sm:$0xff] }
  0x73   : > { %618 = vmatmul.mubr.f32.gmra.mxu0 %v264_v21  ;;  %773 = vmatpush1.msra.mxu1 %v455_v22  ;;  %v504_v21 = vld [vmem:[%s2299_s1 + $0x2a0] sm:$0xff] }
  0x74   : > { %997 = vmatprep.subr.mxu0 %v1460_v1  ;;  %774 = vmatprep.subr.mxu1 %v1460_v1  ;;  %v312_v22 = vld [vmem:[%s1656_s6 + $0x2a0] sm:$0xff] }
  0x75   : > { %998 = vmatpush1.msra.mxu0 %v487_v23  ;;  %702 = vmatprep.mubr.f32.mxu1 %v367_v24  ;;  %v471_v23 = vld [vmem:[%s2299_s1 + $0x198] sm:$0xff] }
  0x76   : > { %775 = vmatpush1.msra.mxu1 %v454_v25  ;;  %999 = vmatprep.subr.mxu0 %v1460_v1  ;;  %v503_v24 = vld [vmem:[%s2299_s1 + $0x298] sm:$0xff] }
  0x77   : > { %622 = vmatprep.mubr.f32.mxu0 %v271_v26  ;;  %703 = vmatmul.mubr.f32.gmra.mxu1 %v366_v27  ;;  %v415_v25 = vld [vmem:[%s1656_s6 + $0x5d8] sm:$0xff]  ;;  %v470_v26 = vld [vmem:[%s2299_s1 + $0x190] sm:$0xff] }
  0x78   : > { %776 = vmatprep.subr.mxu1 %v1460_v1  ;;  %1000 = vmatpush1.msra.mxu0 %v486_v28  ;;  %v319_v27 = vld [vmem:[%s1656_s6 + $0x2d8] sm:$0xff]  ;;  %v414_v28 = vld [vmem:[%s1656_s6 + $0x5d0] sm:$0xff] }
  0x79   : > { %623 = vmatmul.mubr.f32.gmra.mxu0 %v270_v29  ;;  %777 = vmatpush1.msra.mxu1 %v453_v30  ;;  %v502_v29 = vld [vmem:[%s2299_s1 + $0x290] sm:$0xff] }
  0x7a   : > { %1001 = vmatprep.subr.mxu0 %v1460_v1  ;;  %778 = vmatprep.subr.mxu1 %v1460_v1  ;;  %v318_v30 = vld [vmem:[%s1656_s6 + $0x2d0] sm:$0xff] }
  0x7b   : > { %1002 = vmatpush1.msra.mxu0 %v485_v31  ;;  %707 = vmatprep.mubr.f32.mxu1 %v373_v32  ;;  %v469_v31 = vld [vmem:[%s2299_s1 + $0x188] sm:$0xff] }
  0x7c   : > { %779 = vmatpush1.msra.mxu1 %v452_v33  ;;  %1003 = vmatprep.subr.mxu0 %v1460_v1  ;;  %v501_v32 = vld [vmem:[%s2299_s1 + $0x288] sm:$0xff]  ;;  %v468_v33 = vld [vmem:[%s2299_s1 + $0x180] sm:$0xff] }
  0x7d   : > { %627 = vmatprep.mubr.f32.mxu0 %v277_v34  ;;  %708 = vmatmul.mubr.f32.gmra.mxu1 %v372_v35  ;;  %v231_v34 = vld [vmem:[%s1656_s6 + $0x18] sm:$0xff]  ;;  %v230_v35 = vld [vmem:[%s1656_s6 + $0x10] sm:$0xff] }
  0x7e   : > { %780 = vmatprep.subr.mxu1 %v1460_v1  ;;  %1004 = vmatpush1.msra.mxu0 %v484_v36  ;;  %v500_v36 = vld [vmem:[%s2299_s1 + $0x280] sm:$0xff] }
  0x7f   : > { %628 = vmatmul.mubr.f32.gmra.mxu0 %v276_v37  ;;  %781 = vmatpush2.msra.mxu1 %v483_v38  ;;  %v233_v37 = vld [vmem:[%s1656_s6 + $0x28] sm:$0xff] }
  0x80   : > { %1005 = vmatprep.subr.mxu0 %v1460_v1  ;;  %782 = vmatprep.subr.mxu1 %v1460_v1  ;;  %v237_v38 = vld [vmem:[%s1656_s6 + $0x48] sm:$0xff] }
  0x81   : > { %1006 = vmatpush2.msra.mxu0 %v515_v39  ;;  %712 = vmatprep.mubr.f32.mxu1 %v379_v40  ;;  %v232_v39 = vld [vmem:[%s1656_s6 + $0x20] sm:$0xff]  ;;  %v239_v40 = vld [vmem:[%s1656_s6 + $0x58] sm:$0xff] }
  0x82   : > { %783 = vmatpush2.msra.mxu1 %v482_v41  ;;  %1007 = vmatprep.subr.mxu0 %v1460_v1  ;;  %v236_v41 = vld [vmem:[%s1656_s6 + $0x40] sm:$0xff] }
  0x83   : > { %632 = vmatprep.mubr.f32.mxu0 %v283_v42  ;;  %713 = vmatmul.mubr.f32.gmra.mxu1 %v378_v43  ;;  %v243_v42 = vld [vmem:[%s1656_s6 + $0x78] sm:$0xff]  ;;  %v238_v43 = vld [vmem:[%s1656_s6 + $0x50] sm:$0xff] }
  0x84   : > { %784 = vmatprep.subr.mxu1 %v1460_v1  ;;  %1008 = vmatpush2.msra.mxu0 %v514_v44  ;;  %v245_v44 = vld [vmem:[%s1656_s6 + $0x88] sm:$0xff] }
  0x85   : > { %633 = vmatmul.mubr.f32.gmra.mxu0 %v282_v45  ;;  %785 = vmatpush2.msra.mxu1 %v481_v46  ;;  %v249_v45 = vld [vmem:[%s1656_s6 + $0xa8] sm:$0xff]  ;;  %v244_v46 = vld [vmem:[%s1656_s6 + $0x80] sm:$0xff] }
  0x86   : > { %1009 = vmatprep.subr.mxu0 %v1460_v1  ;;  %786 = vmatprep.subr.mxu1 %v1460_v1 }
  0x87   : > { %1010 = vmatpush2.msra.mxu0 %v513_v47  ;;  %717 = vmatprep.mubr.f32.mxu1 %v385_v48  ;;  %v251_v47 = vld [vmem:[%s1656_s6 + $0xb8] sm:$0xff]  ;;  %v248_v48 = vld [vmem:[%s1656_s6 + $0xa0] sm:$0xff] }
  0x88   : > { %787 = vmatpush2.msra.mxu1 %v480_v49  ;;  %1011 = vmatprep.subr.mxu0 %v1460_v1  ;;  %v255_v49 = vld [vmem:[%s1656_s6 + $0xd8] sm:$0xff] }
  0x89   : > { %637 = vmatprep.mubr.f32.mxu0 %v289_v50  ;;  %718 = vmatmul.mubr.f32.gmra.mxu1 %v384_v51  ;;  %v250_v50 = vld [vmem:[%s1656_s6 + $0xb0] sm:$0xff]  ;;  %v257_v51 = vld [vmem:[%s1656_s6 + $0xe8] sm:$0xff] }
  0x8a   : > { %788 = vmatprep.subr.mxu1 %v1460_v1  ;;  %1012 = vmatpush2.msra.mxu0 %v512_v52  ;;  %v254_v52 = vld [vmem:[%s1656_s6 + $0xd0] sm:$0xff] }
  0x8b   : > { %638 = vmatmul.mubr.f32.gmra.mxu0 %v288_v53  ;;  %789 = vmatpush2.msra.mxu1 %v479_v54  ;;  %v261_v53 = vld [vmem:[%s1656_s6 + $0x108] sm:$0xff]  ;;  %v256_v54 = vld [vmem:[%s1656_s6 + $0xe0] sm:$0xff] }
  0x8c   : > { %1013 = vmatprep.subr.mxu0 %v1460_v1  ;;  %790 = vmatprep.subr.mxu1 %v1460_v1 }
  0x8d   : > { %1014 = vmatpush2.msra.mxu0 %v511_v55  ;;  %722 = vmatprep.mubr.f32.mxu1 %v391_v56  ;;  %v263_v55 = vld [vmem:[%s1656_s6 + $0x118] sm:$0xff]  ;;  %v260_v56 = vld [vmem:[%s1656_s6 + $0x100] sm:$0xff] }
  0x8e   : > { %791 = vmatpush2.msra.mxu1 %v478_v57  ;;  %1015 = vmatprep.subr.mxu0 %v1460_v1  ;;  %v267_v57 = vld [vmem:[%s1656_s6 + $0x138] sm:$0xff] }
  0x8f   : > { %642 = vmatprep.mubr.f32.mxu0 %v295_v58  ;;  %723 = vmatmul.mubr.f32.gmra.mxu1 %v390_v59  ;;  %v262_v58 = vld [vmem:[%s1656_s6 + $0x110] sm:$0xff]  ;;  %v269_v59 = vld [vmem:[%s1656_s6 + $0x148] sm:$0xff] }
  0x90   : > { %792 = vmatprep.subr.mxu1 %v1460_v1  ;;  %1016 = vmatpush2.msra.mxu0 %v510_v60  ;;  %v266_v60 = vld [vmem:[%s1656_s6 + $0x130] sm:$0xff] }
  0x91   : > { %643 = vmatmul.mubr.f32.gmra.mxu0 %v294_v61  ;;  %793 = vmatpush2.msra.mxu1 %v477_v62  ;;  %v273_v61 = vld [vmem:[%s1656_s6 + $0x168] sm:$0xff]  ;;  %v268_v62 = vld [vmem:[%s1656_s6 + $0x140] sm:$0xff] }
  0x92   : > { %1017 = vmatprep.subr.mxu0 %v1460_v1  ;;  %794 = vmatprep.subr.mxu1 %v1460_v1 }
  0x93   : > { %1018 = vmatpush2.msra.mxu0 %v509_v63  ;;  %727 = vmatprep.mubr.f32.mxu1 %v397_v0  ;;  %v275_v63 = vld [vmem:[%s1656_s6 + $0x178] sm:$0xff]  ;;  %v272_v0 = vld [vmem:[%s1656_s6 + $0x160] sm:$0xff] }
  0x94   : > { %795 = vmatpush2.msra.mxu1 %v476_v2  ;;  %1019 = vmatprep.subr.mxu0 %v1460_v1  ;;  %v279_v2 = vld [vmem:[%s1656_s6 + $0x198] sm:$0xff] }
  0x95   : > { %647 = vmatprep.mubr.f32.mxu0 %v301_v3  ;;  %728 = vmatmul.mubr.f32.gmra.mxu1 %v396_v4  ;;  %v274_v3 = vld [vmem:[%s1656_s6 + $0x170] sm:$0xff]  ;;  %v281_v4 = vld [vmem:[%s1656_s6 + $0x1a8] sm:$0xff] }
  0x96   : > { %796 = vmatprep.subr.mxu1 %v1460_v1  ;;  %1020 = vmatpush2.msra.mxu0 %v508_v5  ;;  %v278_v5 = vld [vmem:[%s1656_s6 + $0x190] sm:$0xff] }
  0x97   : > { %648 = vmatmul.mubr.f32.gmra.mxu0 %v300_v6  ;;  %797 = vmatpush2.msra.mxu1 %v475_v7  ;;  %v285_v6 = vld [vmem:[%s1656_s6 + $0x1c8] sm:$0xff]  ;;  %v280_v7 = vld [vmem:[%s1656_s6 + $0x1a0] sm:$0xff] }
  0x98   : > { %1021 = vmatprep.subr.mxu0 %v1460_v1  ;;  %798 = vmatprep.subr.mxu1 %v1460_v1 }
  0x99   : > { %1022 = vmatpush2.msra.mxu0 %v507_v8  ;;  %732 = vmatprep.mubr.f32.mxu1 %v403_v9  ;;  %v287_v8 = vld [vmem:[%s1656_s6 + $0x1d8] sm:$0xff]  ;;  %v284_v9 = vld [vmem:[%s1656_s6 + $0x1c0] sm:$0xff] }
  0x9a   : > { %799 = vmatpush2.msra.mxu1 %v474_v10  ;;  %1023 = vmatprep.subr.mxu0 %v1460_v1  ;;  %v291_v10 = vld [vmem:[%s1656_s6 + $0x1f8] sm:$0xff] }
  0x9b   : > { %652 = vmatprep.mubr.f32.mxu0 %v307_v11  ;;  %733 = vmatmul.mubr.f32.gmra.mxu1 %v402_v12  ;;  %v286_v11 = vld [vmem:[%s1656_s6 + $0x1d0] sm:$0xff]  ;;  %v293_v12 = vld [vmem:[%s1656_s6 + $0x208] sm:$0xff] }
  0x9c   : > { %800 = vmatprep.subr.mxu1 %v1460_v1  ;;  %1024 = vmatpush2.msra.mxu0 %v506_v13  ;;  %v290_v13 = vld [vmem:[%s1656_s6 + $0x1f0] sm:$0xff] }
  0x9d   : > { %653 = vmatmul.mubr.f32.gmra.mxu0 %v306_v14  ;;  %801 = vmatpush2.msra.mxu1 %v473_v15  ;;  %v297_v14 = vld [vmem:[%s1656_s6 + $0x228] sm:$0xff]  ;;  %v292_v15 = vld [vmem:[%s1656_s6 + $0x200] sm:$0xff] }
  0x9e   : > { %1025 = vmatprep.subr.mxu0 %v1460_v1  ;;  %802 = vmatprep.subr.mxu1 %v1460_v1 }
  0x9f   : > { %1026 = vmatpush2.msra.mxu0 %v505_v16  ;;  %737 = vmatprep.mubr.f32.mxu1 %v409_v17  ;;  %v299_v16 = vld [vmem:[%s1656_s6 + $0x238] sm:$0xff]  ;;  %v296_v17 = vld [vmem:[%s1656_s6 + $0x220] sm:$0xff] }
  0xa0   : > { %803 = vmatpush2.msra.mxu1 %v472_v18  ;;  %1027 = vmatprep.subr.mxu0 %v1460_v1  ;;  %v303_v18 = vld [vmem:[%s1656_s6 + $0x258] sm:$0xff] }
  0xa1   : > { %657 = vmatprep.mubr.f32.mxu0 %v313_v19  ;;  %738 = vmatmul.mubr.f32.gmra.mxu1 %v408_v20  ;;  %v298_v19 = vld [vmem:[%s1656_s6 + $0x230] sm:$0xff]  ;;  %v305_v20 = vld [vmem:[%s1656_s6 + $0x268] sm:$0xff] }
  0xa2   : > { %804 = vmatprep.subr.mxu1 %v1460_v1  ;;  %1028 = vmatpush2.msra.mxu0 %v504_v21  ;;  %v302_v21 = vld [vmem:[%s1656_s6 + $0x250] sm:$0xff] }
  0xa3   : > { %658 = vmatmul.mubr.f32.gmra.mxu0 %v312_v22  ;;  %805 = vmatpush2.msra.mxu1 %v471_v23  ;;  %v309_v22 = vld [vmem:[%s1656_s6 + $0x288] sm:$0xff]  ;;  %v304_v23 = vld [vmem:[%s1656_s6 + $0x260] sm:$0xff] }
  0xa4   : > { %1029 = vmatprep.subr.mxu0 %v1460_v1  ;;  %806 = vmatprep.subr.mxu1 %v1460_v1 }
  0xa5   : > { %1030 = vmatpush2.msra.mxu0 %v503_v24  ;;  %742 = vmatprep.mubr.f32.mxu1 %v415_v25  ;;  %v311_v24 = vld [vmem:[%s1656_s6 + $0x298] sm:$0xff]  ;;  %v308_v25 = vld [vmem:[%s1656_s6 + $0x280] sm:$0xff] }
  0xa6   : > { %807 = vmatpush2.msra.mxu1 %v470_v26  ;;  %1031 = vmatprep.subr.mxu0 %v1460_v1  ;;  %v315_v26 = vld [vmem:[%s1656_s6 + $0x2b8] sm:$0xff] }
  0xa7   : > { %662 = vmatprep.mubr.f32.mxu0 %v319_v27  ;;  %743 = vmatmul.mubr.f32.gmra.mxu1 %v414_v28  ;;  %v310_v27 = vld [vmem:[%s1656_s6 + $0x290] sm:$0xff]  ;;  %v317_v28 = vld [vmem:[%s1656_s6 + $0x2c8] sm:$0xff] }
  0xa8   : > { %808 = vmatprep.subr.mxu1 %v1460_v1  ;;  %1032 = vmatpush2.msra.mxu0 %v502_v29  ;;  %v314_v29 = vld [vmem:[%s1656_s6 + $0x2b0] sm:$0xff] }
  0xa9   : > { %663 = vmatmul.mubr.f32.gmra.mxu0 %v318_v30  ;;  %809 = vmatpush2.msra.mxu1 %v469_v31  ;;  %v321_v30 = vld [vmem:[%s1656_s6 + $0x2e8] sm:$0xff]  ;;  %v316_v31 = vld [vmem:[%s1656_s6 + $0x2c0] sm:$0xff] }
  0xaa   : > { %1033 = vmatprep.subr.mxu0 %v1460_v1  ;;  %810 = vmatprep.subr.mxu1 %v1460_v1 }
  0xab   : > { %1034 = vmatpush2.msra.mxu0 %v501_v32  ;;  %811 = vmatpush2.msra.mxu1 %v468_v33  ;;  %v323_v32 = vld [vmem:[%s1656_s6 + $0x2f8] sm:$0xff]  ;;  %v320_v33 = vld [vmem:[%s1656_s6 + $0x2e0] sm:$0xff] }
  0xac   : > { %812 = vmatprep.mubr.f32.mxu1 %v231_v34  ;;  %1035 = vmatprep.subr.mxu0 %v1460_v1  ;;  %v242_v1 = vld [vmem:[%s1656_s6 + $0x70] sm:$0xff]  ;;  %v327_v34 = vld [vmem:[%s1656_s6 + $0x318] sm:$0xff] }
  0xad   : > { %813 = vmatmul.mubr.f32.vlgmr.msra.gmra.mxu1 %v230_v35  ;;  %1036 = vmatpush2.msra.mxu0 %v500_v36  ;;  %v322_v35 = vld [vmem:[%s1656_s6 + $0x2f0] sm:$0xff]  ;;  %v329_v36 = vld [vmem:[%s1656_s6 + $0x328] sm:$0xff] }
  0xae   : > { %1037 = vmatprep.mubr.f32.mxu0 %v233_v37  ;;  %817 = vmatprep.mubr.f32.mxu1 %v237_v38  ;;  %v326_v37 = vld [vmem:[%s1656_s6 + $0x310] sm:$0xff]  ;;  %v333_v38 = vld [vmem:[%s1656_s6 + $0x348] sm:$0xff] }
  0xaf   : > { %1038 = vmatmul.mubr.f32.vlgmr.msra.gmra.mxu0 %v232_v39  ;;  %v328_v39 = vld [vmem:[%s1656_s6 + $0x320] sm:$0xff] }
  0xb0   : > { %1042 = vmatprep.mubr.f32.mxu0 %v239_v40  ;;  %v335_v40 = vld [vmem:[%s1656_s6 + $0x358] sm:$0xff] }
  0xb1   : > { %818 = vmatmul.mubr.f32.gmra.mxu1 %v236_v41  ;;  %v332_v41 = vld [vmem:[%s1656_s6 + $0x340] sm:$0xff] }
  0xb2   : > { %822 = vmatprep.mubr.f32.mxu1 %v243_v42  ;;  %v339_v42 = vld [vmem:[%s1656_s6 + $0x378] sm:$0xff] }
  0xb3   : > { %1043 = vmatmul.mubr.f32.gmra.mxu0 %v238_v43  ;;  %v334_v43 = vld [vmem:[%s1656_s6 + $0x350] sm:$0xff] }
  0xb4   : > { %1047 = vmatprep.mubr.f32.mxu0 %v245_v44  ;;  %v341_v44 = vld [vmem:[%s1656_s6 + $0x388] sm:$0xff] }
  0xb5   : > { %823 = vmatmul.mubr.f32.gmra.mxu1 %v242_v1  ;;  %v338_v1 = vld [vmem:[%s1656_s6 + $0x370] sm:$0xff] }
  0xb6   : > { %827 = vmatprep.mubr.f32.mxu1 %v249_v45  ;;  %v345_v45 = vld [vmem:[%s1656_s6 + $0x3a8] sm:$0xff] }
  0xb7   : > { %1048 = vmatmul.mubr.f32.gmra.mxu0 %v244_v46  ;;  %v340_v46 = vld [vmem:[%s1656_s6 + $0x380] sm:$0xff] }
  0xb8   : > { %1052 = vmatprep.mubr.f32.mxu0 %v251_v47  ;;  %v347_v47 = vld [vmem:[%s1656_s6 + $0x3b8] sm:$0xff] }
  0xb9   : > { %828 = vmatmul.mubr.f32.gmra.mxu1 %v248_v48  ;;  %v344_v48 = vld [vmem:[%s1656_s6 + $0x3a0] sm:$0xff] }
  0xba   : > { %832 = vmatprep.mubr.f32.mxu1 %v255_v49  ;;  %v351_v49 = vld [vmem:[%s1656_s6 + $0x3d8] sm:$0xff] }
  0xbb   : > { %1053 = vmatmul.mubr.f32.gmra.mxu0 %v250_v50  ;;  %v346_v50 = vld [vmem:[%s1656_s6 + $0x3b0] sm:$0xff] }
  0xbc   : > { %1057 = vmatprep.mubr.f32.mxu0 %v257_v51  ;;  %v353_v51 = vld [vmem:[%s1656_s6 + $0x3e8] sm:$0xff] }
  0xbd   : > { %833 = vmatmul.mubr.f32.gmra.mxu1 %v254_v52  ;;  %v350_v52 = vld [vmem:[%s1656_s6 + $0x3d0] sm:$0xff] }
  0xbe   : > { %837 = vmatprep.mubr.f32.mxu1 %v261_v53  ;;  %v357_v53 = vld [vmem:[%s1656_s6 + $0x408] sm:$0xff] }
  0xbf   : > { %1058 = vmatmul.mubr.f32.gmra.mxu0 %v256_v54  ;;  %v352_v54 = vld [vmem:[%s1656_s6 + $0x3e0] sm:$0xff] }
  0xc0   : > { %1062 = vmatprep.mubr.f32.mxu0 %v263_v55  ;;  %v359_v55 = vld [vmem:[%s1656_s6 + $0x418] sm:$0xff] }
  0xc1   : > { %838 = vmatmul.mubr.f32.gmra.mxu1 %v260_v56  ;;  %v356_v56 = vld [vmem:[%s1656_s6 + $0x400] sm:$0xff] }
  0xc2   : > { %842 = vmatprep.mubr.f32.mxu1 %v267_v57  ;;  %v363_v57 = vld [vmem:[%s1656_s6 + $0x438] sm:$0xff] }
  0xc3   : > { %1063 = vmatmul.mubr.f32.gmra.mxu0 %v262_v58  ;;  %v358_v58 = vld [vmem:[%s1656_s6 + $0x410] sm:$0xff] }
  0xc4   : > { %1067 = vmatprep.mubr.f32.mxu0 %v269_v59  ;;  %v365_v59 = vld [vmem:[%s1656_s6 + $0x448] sm:$0xff] }
  0xc5   : > { %843 = vmatmul.mubr.f32.gmra.mxu1 %v266_v60  ;;  %v362_v60 = vld [vmem:[%s1656_s6 + $0x430] sm:$0xff] }
  0xc6   : > { %847 = vmatprep.mubr.f32.mxu1 %v273_v61  ;;  %v369_v61 = vld [vmem:[%s1656_s6 + $0x468] sm:$0xff] }
  0xc7   : > { %1068 = vmatmul.mubr.f32.gmra.mxu0 %v268_v62  ;;  %v364_v62 = vld [vmem:[%s1656_s6 + $0x440] sm:$0xff] }
  0xc8   : > { %1072 = vmatprep.mubr.f32.mxu0 %v275_v63  ;;  %v371_v63 = vld [vmem:[%s1656_s6 + $0x478] sm:$0xff] }
  0xc9   : > { %848 = vmatmul.mubr.f32.gmra.mxu1 %v272_v0  ;;  %v368_v0 = vld [vmem:[%s1656_s6 + $0x460] sm:$0xff] }
  0xca   : > { %852 = vmatprep.mubr.f32.mxu1 %v279_v2  ;;  %v375_v2 = vld [vmem:[%s1656_s6 + $0x498] sm:$0xff] }
  0xcb   : > { %1073 = vmatmul.mubr.f32.gmra.mxu0 %v274_v3  ;;  %v370_v3 = vld [vmem:[%s1656_s6 + $0x470] sm:$0xff] }
  0xcc   : > { %1077 = vmatprep.mubr.f32.mxu0 %v281_v4  ;;  %v377_v4 = vld [vmem:[%s1656_s6 + $0x4a8] sm:$0xff] }
  0xcd   : > { %853 = vmatmul.mubr.f32.gmra.mxu1 %v278_v5  ;;  %v374_v5 = vld [vmem:[%s1656_s6 + $0x490] sm:$0xff] }
  0xce   : > { %857 = vmatprep.mubr.f32.mxu1 %v285_v6  ;;  %v381_v6 = vld [vmem:[%s1656_s6 + $0x4c8] sm:$0xff] }
  0xcf   : > { %1078 = vmatmul.mubr.f32.gmra.mxu0 %v280_v7  ;;  %v376_v7 = vld [vmem:[%s1656_s6 + $0x4a0] sm:$0xff] }
  0xd0   : > { %1082 = vmatprep.mubr.f32.mxu0 %v287_v8  ;;  %v383_v8 = vld [vmem:[%s1656_s6 + $0x4d8] sm:$0xff] }
  0xd1   : > { %858 = vmatmul.mubr.f32.gmra.mxu1 %v284_v9  ;;  %v380_v9 = vld [vmem:[%s1656_s6 + $0x4c0] sm:$0xff] }
  0xd2   : > { %862 = vmatprep.mubr.f32.mxu1 %v291_v10 }
  0xd3   : > { %1083 = vmatmul.mubr.f32.gmra.mxu0 %v286_v11  ;;  %v387_v11 = vld [vmem:[%s1656_s6 + $0x4f8] sm:$0xff] }
  0xd4   : > { %1087 = vmatprep.mubr.f32.mxu0 %v293_v12 }
  0xd5   : > { %863 = vmatmul.mubr.f32.gmra.mxu1 %v290_v13  ;;  %v382_v13 = vld [vmem:[%s1656_s6 + $0x4d0] sm:$0xff] }
  0xd6   : > { %867 = vmatprep.mubr.f32.mxu1 %v297_v14 }
  0xd7   : > { %1088 = vmatmul.mubr.f32.gmra.mxu0 %v292_v15  ;;  %v389_v15 = vld [vmem:[%s1656_s6 + $0x508] sm:$0xff] }
  0xd8   : > { %1092 = vmatprep.mubr.f32.mxu0 %v299_v16 }
  0xd9   : > { %868 = vmatmul.mubr.f32.gmra.mxu1 %v296_v17  ;;  %v386_v17 = vld [vmem:[%s1656_s6 + $0x4f0] sm:$0xff] }
  0xda   : > { %872 = vmatprep.mubr.f32.mxu1 %v303_v18  ;;  %v393_v18 = vld [vmem:[%s1656_s6 + $0x528] sm:$0xff] }
  0xdb   : > { %1093 = vmatmul.mubr.f32.gmra.mxu0 %v298_v19 }
  0xdc   : > { %1097 = vmatprep.mubr.f32.mxu0 %v305_v20  ;;  %v388_v20 = vld [vmem:[%s1656_s6 + $0x500] sm:$0xff] }
  0xdd   : > { %873 = vmatmul.mubr.f32.gmra.mxu1 %v302_v21  ;;  %v395_v21 = vld [vmem:[%s1656_s6 + $0x538] sm:$0xff] }
  0xde   : > { %877 = vmatprep.mubr.f32.mxu1 %v309_v22 }
  0xdf   : > { %1098 = vmatmul.mubr.f32.gmra.mxu0 %v304_v23 }
  0xe0   : > { %1102 = vmatprep.mubr.f32.mxu0 %v311_v24  ;;  %v392_v24 = vld [vmem:[%s1656_s6 + $0x520] sm:$0xff] }
  0xe1   : > { %878 = vmatmul.mubr.f32.gmra.mxu1 %v308_v25  ;;  %v399_v25 = vld [vmem:[%s1656_s6 + $0x558] sm:$0xff] }
  0xe2   : > { %882 = vmatprep.mubr.f32.mxu1 %v315_v26 }
  0xe3   : > { %1103 = vmatmul.mubr.f32.gmra.mxu0 %v310_v27  ;;  %v394_v27 = vld [vmem:[%s1656_s6 + $0x530] sm:$0xff] }
  0xe4   : > { %1107 = vmatprep.mubr.f32.mxu0 %v317_v28  ;;  %v401_v28 = vld [vmem:[%s1656_s6 + $0x568] sm:$0xff] }
  0xe5   : > { %883 = vmatmul.mubr.f32.gmra.mxu1 %v314_v29 }
  0xe6   : > { %887 = vmatprep.mubr.f32.mxu1 %v321_v30  ;;  %v398_v30 = vld [vmem:[%s1656_s6 + $0x550] sm:$0xff] }
  0xe7   : > { %1108 = vmatmul.mubr.f32.gmra.mxu0 %v316_v31  ;;  %v405_v31 = vld [vmem:[%s1656_s6 + $0x588] sm:$0xff] }
  0xe8   : > { %1112 = vmatprep.mubr.f32.mxu0 %v323_v32 }
  0xe9   : > { %888 = vmatmul.mubr.f32.gmra.mxu1 %v320_v33 }
  0xea   : > { %892 = vmatprep.mubr.f32.mxu1 %v327_v34  ;;  %v400_v34 = vld [vmem:[%s1656_s6 + $0x560] sm:$0xff] }
  0xeb   : > { %1113 = vmatmul.mubr.f32.gmra.mxu0 %v322_v35  ;;  %v407_v35 = vld [vmem:[%s1656_s6 + $0x598] sm:$0xff] }
  0xec   : > { %1117 = vmatprep.mubr.f32.mxu0 %v329_v36 }
  0xed   : > { %893 = vmatmul.mubr.f32.gmra.mxu1 %v326_v37  ;;  %v404_v37 = vld [vmem:[%s1656_s6 + $0x580] sm:$0xff] }
  0xee   : > { %897 = vmatprep.mubr.f32.mxu1 %v333_v38  ;;  %v411_v38 = vld [vmem:[%s1656_s6 + $0x5b8] sm:$0xff] }
  0xef   : > { %1118 = vmatmul.mubr.f32.gmra.mxu0 %v328_v39 }
  0xf0   : > { %1122 = vmatprep.mubr.f32.mxu0 %v335_v40  ;;  %v406_v40 = vld [vmem:[%s1656_s6 + $0x590] sm:$0xff] }
  0xf1   : > { %898 = vmatmul.mubr.f32.gmra.mxu1 %v332_v41  ;;  %v413_v41 = vld [vmem:[%s1656_s6 + $0x5c8] sm:$0xff] }
  0xf2   : > { %902 = vmatprep.mubr.f32.mxu1 %v339_v42 }
  0xf3   : > { %1123 = vmatmul.mubr.f32.gmra.mxu0 %v334_v43 }
  0xf4   : > { %1127 = vmatprep.mubr.f32.mxu0 %v341_v44  ;;  %v410_v44 = vld [vmem:[%s1656_s6 + $0x5b0] sm:$0xff] }
  0xf5   : > { %903 = vmatmul.mubr.f32.gmra.mxu1 %v338_v1  ;;  %v417_v1 = vld [vmem:[%s1656_s6 + $0x5e8] sm:$0xff] }
  0xf6   : > { %907 = vmatprep.mubr.f32.mxu1 %v345_v45 }
  0xf7   : > { %1128 = vmatmul.mubr.f32.gmra.mxu0 %v340_v46  ;;  %v412_v46 = vld [vmem:[%s1656_s6 + $0x5c0] sm:$0xff] }
  0xf8   : > { %1132 = vmatprep.mubr.f32.mxu0 %v347_v47  ;;  %v419_v47 = vld [vmem:[%s1656_s6 + $0x5f8] sm:$0xff] }
  0xf9   : > { %908 = vmatmul.mubr.f32.gmra.mxu1 %v344_v48 }
  0xfa   : > { %912 = vmatprep.mubr.f32.mxu1 %v351_v49  ;;  %v416_v49 = vld [vmem:[%s1656_s6 + $0x5e0] sm:$0xff] }
  0xfb   : > { %1133 = vmatmul.mubr.f32.gmra.mxu0 %v346_v50 }
  0xfc   : > { %1137 = vmatprep.mubr.f32.mxu0 %v353_v51 }
  0xfd   : > { %913 = vmatmul.mubr.f32.gmra.mxu1 %v350_v52  ;;  %v418_v52 = vld [vmem:[%s1656_s6 + $0x5f0] sm:$0xff] }
  0xfe   : > { %917 = vmatprep.mubr.f32.mxu1 %v357_v53 }
  0xff   : > { %1138 = vmatmul.mubr.f32.gmra.mxu0 %v352_v54 }
 0x100   : > { %1142 = vmatprep.mubr.f32.mxu0 %v359_v55 }
 0x101   : > { %918 = vmatmul.mubr.f32.gmra.mxu1 %v356_v56 }
 0x102   : > { %922 = vmatprep.mubr.f32.mxu1 %v363_v57 }
 0x103   : > { %1143 = vmatmul.mubr.f32.gmra.mxu0 %v358_v58 }
 0x104   : > { %1147 = vmatprep.mubr.f32.mxu0 %v365_v59 }
 0x105   : > { %923 = vmatmul.mubr.f32.gmra.mxu1 %v362_v60 }
 0x106   : > { %927 = vmatprep.mubr.f32.mxu1 %v369_v61 }
 0x107   : > { %1148 = vmatmul.mubr.f32.gmra.mxu0 %v364_v62 }
 0x108   : > { %1152 = vmatprep.mubr.f32.mxu0 %v371_v63 }
 0x109   : > { %928 = vmatmul.mubr.f32.gmra.mxu1 %v368_v0 }
 0x10a   : > { %932 = vmatprep.mubr.f32.mxu1 %v375_v2 }
 0x10b   : > { %1153 = vmatmul.mubr.f32.gmra.mxu0 %v370_v3 }
 0x10c   : > { %1157 = vmatprep.mubr.f32.mxu0 %v377_v4 }
 0x10d   : > { %933 = vmatmul.mubr.f32.gmra.mxu1 %v374_v5 }
 0x10e   : > { %937 = vmatprep.mubr.f32.mxu1 %v381_v6  ;;  %v2093_v10 = vpop.f32.mrf.mxu1 }
 0x10f   : > { %1158 = vmatmul.mubr.f32.gmra.mxu0 %v376_v7  ;;  %v2096_v12 = vpop.f32.mrf.mxu0 }
 0x110   : > { %1162 = vmatprep.mubr.f32.mxu0 %v383_v8  ;;  %v671_v14 = vpop.f32.mrf.mxu1 }
 0x111   : > { %938 = vmatmul.mubr.f32.gmra.mxu1 %v380_v9  ;;  %v591_v16 = vpop.f32.mrf.mxu0 }
 0x112   : > { %942 = vmatprep.mubr.f32.mxu1 %v387_v11 }
 0x113   : > { %1163 = vmatmul.mubr.f32.gmra.mxu0 %v382_v13  ;;  %v2102_v19 = vpop.f32.mrf.mxu1 }
 0x114   : > { %1167 = vmatprep.mubr.f32.mxu0 %v389_v15 }
 0x115   : > { %943 = vmatmul.mubr.f32.gmra.mxu1 %v386_v17  ;;  %v2106_v22 = vpop.f32.mrf.mxu0  ;;  %v676_v23 = vpop.f32.mrf.mxu1 }
 0x116   : > { %947 = vmatprep.mubr.f32.mxu1 %v393_v18 }
 0x117   : > { %1168 = vmatmul.mubr.f32.gmra.mxu0 %v388_v20  ;;  %v596_v26 = vpop.f32.mrf.mxu0 }
 0x118   : > { %1172 = vmatprep.mubr.f32.mxu0 %v395_v21 }
 0x119   : > { %948 = vmatmul.mubr.f32.gmra.mxu1 %v392_v24  ;;  %v2112_v29 = vpop.f32.mrf.mxu1 }
 0x11a   : > { %952 = vmatprep.mubr.f32.mxu1 %v399_v25 }
 0x11b   : > { %1173 = vmatmul.mubr.f32.gmra.mxu0 %v394_v27  ;;  %v2116_v32 = vpop.f32.mrf.mxu0  ;;  %v681_v33 = vpop.f32.mrf.mxu1 }
 0x11c   : > { %1177 = vmatprep.mubr.f32.mxu0 %v401_v28 }
 0x11d   : > { %953 = vmatmul.mubr.f32.gmra.mxu1 %v398_v30  ;;  %v601_v36 = vpop.f32.mrf.mxu0 }
 0x11e   : > { %957 = vmatprep.mubr.f32.mxu1 %v405_v31 }
 0x11f   : > { %1178 = vmatmul.mubr.f32.gmra.mxu0 %v400_v34  ;;  %v2122_v39 = vpop.f32.mrf.mxu1 }
 0x120   : > { %1182 = vmatprep.mubr.f32.mxu0 %v407_v35 }
 0x121   : > { %958 = vmatmul.mubr.f32.gmra.mxu1 %v404_v37  ;;  %v2126_v42 = vpop.f32.mrf.mxu0  ;;  %v686_v43 = vpop.f32.mrf.mxu1 }
 0x122   : > { %962 = vmatprep.mubr.f32.mxu1 %v411_v38 }
 0x123   : > { %1183 = vmatmul.mubr.f32.gmra.mxu0 %v406_v40  ;;  %v606_v45 = vpop.f32.mrf.mxu0 }
 0x124   : > { %1187 = vmatprep.mubr.f32.mxu0 %v413_v41  ;;  %v2185_v41 = vld [vmem:[%s2300_s2] ss:$0 sm:$0xff] }
 0x125   : > { %963 = vmatmul.mubr.f32.gmra.mxu1 %v410_v44  ;;  %v2132_v48 = vpop.f32.mrf.mxu1  ;;  %v590_v44 = vadd.f32 %v2185_v41, %v2096_v12 }
 0x126   : > { %967 = vmatprep.mubr.f32.mxu1 %v417_v1 }
 0x127   : > { %1188 = vmatmul.mubr.f32.gmra.mxu0 %v412_v46  ;;  %v2135_v50 = vpop.f32.mrf.mxu0  ;;  %v691_v51 = vpop.f32.mrf.mxu1 }
 0x128   : > { %1192 = vmatprep.mubr.f32.mxu0 %v419_v47 }
 0x129   : > { %968 = vmatmul.mubr.f32.gmra.mxu1 %v416_v49  ;;  %v611_v53 = vpop.f32.mrf.mxu0  ;;  %v595_v49 = vadd.f32 %v2185_v41, %v2106_v22  ;;  %v605_v22 = vadd.f32 %v2185_v41, %v2126_v42 }
 0x12b   : > { %1193 = vmatmul.mubr.f32.gmra.mxu0 %v418_v52  ;;  %v2138_v54 = vpop.f32.mrf.mxu1 }
 0x12d   : > { %v2140_v55 = vpop.f32.mrf.mxu0  ;;  %v696_v56 = vpop.f32.mrf.mxu1 }
 0x12e   : > { %v615_v42 = vadd.f32 %v2185_v41, %v2140_v55 }
 0x12f   : > { %v616_v57 = vpop.f32.mrf.mxu0 }
 0x131   : > { %v2142_v58 = vpop.f32.mrf.mxu1 }
 0x133   : > { %v2144_v59 = vpop.f32.mrf.mxu0  ;;  %v701_v60 = vpop.f32.mrf.mxu1 }
 0x134   : > { %v600_v60 = vadd.f32 %v2185_v41, %v2116_v32  ;;  %v610_v32 = vadd.f32 %v2185_v41, %v2135_v50  ;;  %v620_v50 = vadd.f32 %v2185_v41, %v2144_v59 }
 0x135   : > { %v621_v61 = vpop.f32.mrf.mxu0 }
 0x137   : > { %v2146_v62 = vpop.f32.mrf.mxu1 }
 0x139   : > { %v2148_v63 = vpop.f32.mrf.mxu0  ;;  %v706_v0 = vpop.f32.mrf.mxu1 }
 0x13a   : > { %v625_v55 = vadd.f32 %v2185_v41, %v2148_v63 }
 0x13b   : > { %v626_v2 = vpop.f32.mrf.mxu0 }
 0x13d   : > { %v2150_v3 = vpop.f32.mrf.mxu1 }
 0x13f   : > { %v2152_v4 = vpop.f32.mrf.mxu0  ;;  %v711_v5 = vpop.f32.mrf.mxu1 }
 0x140   : > { %v630_v59 = vadd.f32 %v2185_v41, %v2152_v4 }
 0x141   : > { %v631_v6 = vpop.f32.mrf.mxu0 }
 0x143   : > { %v2154_v7 = vpop.f32.mrf.mxu1 }
 0x145   : > { %v2156_v8 = vpop.f32.mrf.mxu0  ;;  %v716_v9 = vpop.f32.mrf.mxu1 }
 0x146   : > { %v635_v63 = vadd.f32 %v2185_v41, %v2156_v8 }
 0x147   : > { %v636_v11 = vpop.f32.mrf.mxu0 }
 0x149   : > { %v2158_v13 = vpop.f32.mrf.mxu1 }
 0x14b   : > { %v2160_v14 = vpop.f32.mrf.mxu0  ;;  %v721_v15 = vpop.f32.mrf.mxu1 }
 0x14c   : > { %v640_v4 = vadd.f32 %v2185_v41, %v2160_v14 }
 0x14d   : > { %v641_v16 = vpop.f32.mrf.mxu0 }
 0x14f   : > { %v2162_v17 = vpop.f32.mrf.mxu1 }
 0x151   : > { %v2164_v18 = vpop.f32.mrf.mxu0  ;;  %v726_v20 = vpop.f32.mrf.mxu1 }
 0x152   : > { %v645_v8 = vadd.f32 %v2185_v41, %v2164_v18 }
 0x153   : > { %v646_v21 = vpop.f32.mrf.mxu0 }
 0x155   : > { %v2166_v23 = vpop.f32.mrf.mxu1 }
 0x157   : > { %v2168_v24 = vpop.f32.mrf.mxu0  ;;  %v731_v25 = vpop.f32.mrf.mxu1 }
 0x158   : > { %v650_v14 = vadd.f32 %v2185_v41, %v2168_v24 }
 0x159   : > { %v651_v26 = vpop.f32.mrf.mxu0 }
 0x15b   : > { %v2170_v27 = vpop.f32.mrf.mxu1 }
 0x15d   : > { %v2172_v28 = vpop.f32.mrf.mxu0  ;;  %v736_v30 = vpop.f32.mrf.mxu1 }
 0x15e   : > { %v655_v18 = vadd.f32 %v2185_v41, %v2172_v28 }
 0x15f   : > { %v656_v31 = vpop.f32.mrf.mxu0 }
 0x161   : > { %v2174_v33 = vpop.f32.mrf.mxu1 }
 0x163   : > { %v2176_v34 = vpop.f32.mrf.mxu0  ;;  %v741_v35 = vpop.f32.mrf.mxu1 }
 0x164   : > { %v660_v24 = vadd.f32 %v2185_v41, %v2176_v34  ;;  %v670_v34 = vadd.f32 %v2185_v41, %v2093_v10  ;;  %v680_v10 = vadd.f32 %v2185_v41, %v2112_v29  ;;  %v690_v29 = vadd.f32 %v2185_v41, %v2132_v48 }
 0x165   : > { %v661_v36 = vpop.f32.mrf.mxu0  ;;  %v700_v48 = vadd.f32 %v2185_v41, %v2142_v58  ;;  %v710_v58 = vadd.f32 %v2185_v41, %v2150_v3  ;;  %v720_v3 = vadd.f32 %v2185_v41, %v2158_v13  ;;  %v730_v13 = vadd.f32 %v2185_v41, %v2166_v23 }
 0x166   : > { %v740_v23 = vadd.f32 %v2185_v41, %v2174_v33 }
 0x167   : > { %v2178_v37 = vpop.f32.mrf.mxu1 }
 0x169   : > { %v2180_v38 = vpop.f32.mrf.mxu0  ;;  %v746_v40 = vpop.f32.mrf.mxu1 }
 0x16a   : > { %v665_v28 = vadd.f32 %v2185_v41, %v2180_v38  ;;  %v675_v38 = vadd.f32 %v2185_v41, %v2102_v19  ;;  %v685_v19 = vadd.f32 %v2185_v41, %v2122_v39  ;;  %v695_v39 = vadd.f32 %v2185_v41, %v2138_v54 }
 0x16b   : > { %v666_v43 = vpop.f32.mrf.mxu0  ;;  %v705_v54 = vadd.f32 %v2185_v41, %v2146_v62  ;;  %v715_v62 = vadd.f32 %v2185_v41, %v2154_v7  ;;  %v725_v7 = vadd.f32 %v2185_v41, %v2162_v17  ;;  %v735_v17 = vadd.f32 %v2185_v41, %v2170_v27 }
 0x16c   : > { %v745_v27 = vadd.f32 %v2185_v41, %v2178_v37 }
 0x16d   : > { %v814_v1 = vpop.f32.mrf.mxu1 }
 0x16e   : > { %v815_v45 = vadd.f32 %v814_v1, %v590_v44 }
 0x16f   : > { %v1039_v46 = vpop.f32.mrf.mxu0  ;;  %v816_v47 = vpop.f32.mrf.mxu1 }
 0x170   : > { %v1040_v51 = vadd.f32 %v1039_v46, %v815_v45 }
 0x171   : > { %v1041_v52 = vpop.f32.mrf.mxu0  ;;  %v819_v53 = vpop.f32.mrf.mxu1 }
 0x172   : > { %1198 = vst [vmem:[%s2193_s11] sm:$0xff] %v1040_v51  ;;  %v820_v12 = vadd.f32 %v819_v53, %v595_v49 }
 0x173   : > { %v1044_v56 = vpop.f32.mrf.mxu0  ;;  %v821_v57 = vpop.f32.mrf.mxu1 }
 0x174   : > { %v1045_v61 = vadd.f32 %v1044_v56, %v820_v12 }
 0x175   : > { %v1046_v0 = vpop.f32.mrf.mxu0  ;;  %v824_v2 = vpop.f32.mrf.mxu1 }
 0x176   : > { %1199 = vst [vmem:[%s2193_s11 + $0x8] sm:$0xff] %v1045_v61  ;;  %v825_v5 = vadd.f32 %v824_v2, %v600_v60 }
 0x177   : > { %v1049_v6 = vpop.f32.mrf.mxu0  ;;  %v826_v9 = vpop.f32.mrf.mxu1 }
 0x178   : > { %v1050_v11 = vadd.f32 %v1049_v6, %v825_v5 }
 0x179   : > { %v1051_v15 = vpop.f32.mrf.mxu0  ;;  %v829_v16 = vpop.f32.mrf.mxu1 }
 0x17a   : > { %1200 = vst [vmem:[%s2193_s11 + $0x10] sm:$0xff] %v1050_v11  ;;  %v830_v20 = vadd.f32 %v829_v16, %v605_v22 }
 0x17b   : > { %v1054_v21 = vpop.f32.mrf.mxu0  ;;  %v831_v25 = vpop.f32.mrf.mxu1 }
 0x17c   : > { %v1055_v26 = vadd.f32 %v1054_v21, %v830_v20 }
 0x17d   : > { %v1056_v30 = vpop.f32.mrf.mxu0  ;;  %v834_v31 = vpop.f32.mrf.mxu1 }
 0x17e   : > { %1201 = vst [vmem:[%s2193_s11 + $0x18] sm:$0xff] %v1055_v26  ;;  %v835_v35 = vadd.f32 %v834_v31, %v610_v32 }
 0x17f   : > { %v1059_v36 = vpop.f32.mrf.mxu0  ;;  %v836_v40 = vpop.f32.mrf.mxu1 }
 0x180   : > { %v1060_v43 = vadd.f32 %v1059_v36, %v835_v35 }
 0x181   : > { %v1061_v44 = vpop.f32.mrf.mxu0  ;;  %v839_v1 = vpop.f32.mrf.mxu1 }
 0x182   : > { %1202 = vst [vmem:[%s2193_s11 + $0x20] sm:$0xff] %v1060_v43  ;;  %v840_v45 = vadd.f32 %v839_v1, %v615_v42 }
 0x183   : > { %v1064_v46 = vpop.f32.mrf.mxu0  ;;  %v841_v47 = vpop.f32.mrf.mxu1 }
 0x184   : > { %v1065_v49 = vadd.f32 %v1064_v46, %v840_v45 }
 0x185   : > { %v1066_v51 = vpop.f32.mrf.mxu0  ;;  %v844_v52 = vpop.f32.mrf.mxu1 }
 0x186   : > { %1203 = vst [vmem:[%s2193_s11 + $0x28] sm:$0xff] %v1065_v49  ;;  %v845_v53 = vadd.f32 %v844_v52, %v620_v50 }
 0x187   : > { %v1069_v12 = vpop.f32.mrf.mxu0  ;;  %v846_v56 = vpop.f32.mrf.mxu1 }
 0x188   : > { %v1070_v57 = vadd.f32 %v1069_v12, %v845_v53 }
 0x189   : > { %v1071_v60 = vpop.f32.mrf.mxu0  ;;  %v849_v61 = vpop.f32.mrf.mxu1 }
 0x18a   : > { %1204 = vst [vmem:[%s2193_s11 + $0x30] sm:$0xff] %v1070_v57  ;;  %v850_v0 = vadd.f32 %v849_v61, %v625_v55 }
 0x18b   : > { %v1074_v2 = vpop.f32.mrf.mxu0  ;;  %v851_v5 = vpop.f32.mrf.mxu1 }
 0x18c   : > { %v1075_v6 = vadd.f32 %v1074_v2, %v850_v0 }
 0x18d   : > { %v1076_v9 = vpop.f32.mrf.mxu0  ;;  %v854_v22 = vpop.f32.mrf.mxu1 }
 0x18e   : > { %1205 = vst [vmem:[%s2193_s11 + $0x38] sm:$0xff] %v1075_v6  ;;  %v855_v11 = vadd.f32 %v854_v22, %v630_v59 }
 0x18f   : > { %v1079_v15 = vpop.f32.mrf.mxu0  ;;  %v856_v16 = vpop.f32.mrf.mxu1 }
 0x190   : > { %v1080_v20 = vadd.f32 %v1079_v15, %v855_v11 }
 0x191   : > { %v1081_v21 = vpop.f32.mrf.mxu0  ;;  %v859_v25 = vpop.f32.mrf.mxu1 }
 0x192   : > { %1206 = vst [vmem:[%s2193_s11 + $0x40] sm:$0xff] %v1080_v20  ;;  %v860_v32 = vadd.f32 %v859_v25, %v635_v63 }
 0x193   : > { %v1084_v26 = vpop.f32.mrf.mxu0  ;;  %v861_v30 = vpop.f32.mrf.mxu1 }
 0x194   : > { %v1085_v31 = vadd.f32 %v1084_v26, %v860_v32 }
 0x195   : > { %v1086_v35 = vpop.f32.mrf.mxu0  ;;  %v864_v36 = vpop.f32.mrf.mxu1 }
 0x196   : > { %1207 = vst [vmem:[%s2193_s11 + $0x48] sm:$0xff] %v1085_v31  ;;  %v865_v40 = vadd.f32 %v864_v36, %v640_v4 }
 0x197   : > { %v1089_v42 = vpop.f32.mrf.mxu0  ;;  %v866_v43 = vpop.f32.mrf.mxu1 }
 0x198   : > { %v1090_v44 = vadd.f32 %v1089_v42, %v865_v40 }
 0x199   : > { %v1091_v1 = vpop.f32.mrf.mxu0  ;;  %v869_v45 = vpop.f32.mrf.mxu1 }
 0x19a   : > { %1208 = vst [vmem:[%s2193_s11 + $0x50] sm:$0xff] %v1090_v44  ;;  %v870_v46 = vadd.f32 %v869_v45, %v645_v8 }
 0x19b   : > { %v1094_v47 = vpop.f32.mrf.mxu0  ;;  %v871_v50 = vpop.f32.mrf.mxu1 }
 0x19c   : > { %v1095_v49 = vadd.f32 %v1094_v47, %v870_v46 }
 0x19d   : > { %v1096_v51 = vpop.f32.mrf.mxu0  ;;  %v874_v52 = vpop.f32.mrf.mxu1 }
 0x19e   : > { %1209 = vst [vmem:[%s2193_s11 + $0x58] sm:$0xff] %v1095_v49  ;;  %v875_v53 = vadd.f32 %v874_v52, %v650_v14 }
 0x19f   : > { %v1099_v12 = vpop.f32.mrf.mxu0  ;;  %v876_v56 = vpop.f32.mrf.mxu1 }
 0x1a0   : > { %v1100_v55 = vadd.f32 %v1099_v12, %v875_v53 }
 0x1a1   : > { %v1101_v57 = vpop.f32.mrf.mxu0  ;;  %v879_v60 = vpop.f32.mrf.mxu1 }
 0x1a2   : > { %1210 = vst [vmem:[%s2193_s11 + $0x60] sm:$0xff] %v1100_v55  ;;  %v880_v61 = vadd.f32 %v879_v60, %v655_v18 }
 0x1a3   : > { %v1104_v0 = vpop.f32.mrf.mxu0  ;;  %v881_v2 = vpop.f32.mrf.mxu1 }
 0x1a4   : > { %v1105_v5 = vadd.f32 %v1104_v0, %v880_v61 }
 0x1a5   : > { %v1106_v59 = vpop.f32.mrf.mxu0  ;;  %v884_v6 = vpop.f32.mrf.mxu1 }
 0x1a6   : > { %1211 = vst [vmem:[%s2193_s11 + $0x68] sm:$0xff] %v1105_v5  ;;  %v885_v9 = vadd.f32 %v884_v6, %v660_v24 }
 0x1a7   : > { %v1109_v22 = vpop.f32.mrf.mxu0  ;;  %v886_v11 = vpop.f32.mrf.mxu1 }
 0x1a8   : > { %v1110_v15 = vadd.f32 %v1109_v22, %v885_v9 }
 0x1a9   : > { %v1111_v16 = vpop.f32.mrf.mxu0  ;;  %v889_v63 = vpop.f32.mrf.mxu1 }
 0x1aa   : > { %1212 = vst [vmem:[%s2193_s11 + $0x70] sm:$0xff] %v1110_v15  ;;  %v890_v20 = vadd.f32 %v889_v63, %v665_v28 }
 0x1ab   : > { %v1114_v21 = vpop.f32.mrf.mxu0  ;;  %v891_v25 = vpop.f32.mrf.mxu1 }
 0x1ac   : > { %v1115_v32 = vadd.f32 %v1114_v21, %v890_v20 }
 0x1ad   : > { %v1116_v26 = vpop.f32.mrf.mxu0  ;;  %v894_v30 = vpop.f32.mrf.mxu1 }
 0x1ae   : > { %1213 = vst [vmem:[%s2193_s11 + $0x78] sm:$0xff] %v1115_v32  ;;  %v895_v4 = vadd.f32 %v894_v30, %v670_v34 }
 0x1af   : > { %v1119_v31 = vpop.f32.mrf.mxu0  ;;  %v896_v35 = vpop.f32.mrf.mxu1 }
 0x1b0   : > { %v1120_v36 = vadd.f32 %v1119_v31, %v895_v4 }
 0x1b1   : > { %v1121_v40 = vpop.f32.mrf.mxu0  ;;  %v899_v42 = vpop.f32.mrf.mxu1 }
 0x1b2   : > { %1214 = vst [vmem:[%s2193_s11 + $0x80] sm:$0xff] %v1120_v36  ;;  %v900_v43 = vadd.f32 %v899_v42, %v675_v38 }
 0x1b3   : > { %v1124_v8 = vpop.f32.mrf.mxu0  ;;  %v901_v44 = vpop.f32.mrf.mxu1 }
 0x1b4   : > { %v1125_v1 = vadd.f32 %v1124_v8, %v900_v43 }
 0x1b5   : > { %v1126_v45 = vpop.f32.mrf.mxu0  ;;  %v904_v46 = vpop.f32.mrf.mxu1 }
 0x1b6   : > { %1215 = vst [vmem:[%s2193_s11 + $0x88] sm:$0xff] %v1125_v1  ;;  %v905_v47 = vadd.f32 %v904_v46, %v680_v10 }
 0x1b7   : > { %v1129_v50 = vpop.f32.mrf.mxu0  ;;  %v906_v14 = vpop.f32.mrf.mxu1 }
 0x1b8   : > { %v1130_v49 = vadd.f32 %v1129_v50, %v905_v47 }
 0x1b9   : > { %v1131_v51 = vpop.f32.mrf.mxu0  ;;  %v909_v52 = vpop.f32.mrf.mxu1 }
 0x1ba   : > { %1216 = vst [vmem:[%s2193_s11 + $0x90] sm:$0xff] %v1130_v49  ;;  %v910_v53 = vadd.f32 %v909_v52, %v685_v19 }
 0x1bb   : > { %v1134_v12 = vpop.f32.mrf.mxu0  ;;  %v911_v56 = vpop.f32.mrf.mxu1 }
 0x1bc   : > { %v1135_v18 = vadd.f32 %v1134_v12, %v910_v53 }
 0x1bd   : > { %v1136_v55 = vpop.f32.mrf.mxu0  ;;  %v914_v57 = vpop.f32.mrf.mxu1 }
 0x1be   : > { %1217 = vst [vmem:[%s2193_s11 + $0x98] sm:$0xff] %v1135_v18  ;;  %v915_v60 = vadd.f32 %v914_v57, %v690_v29 }
 0x1bf   : > { %v1139_v61 = vpop.f32.mrf.mxu0  ;;  %v916_v0 = vpop.f32.mrf.mxu1 }
 0x1c0   : > { %v1140_v2 = vadd.f32 %v1139_v61, %v915_v60 }
 0x1c1   : > { %v1141_v24 = vpop.f32.mrf.mxu0  ;;  %v919_v5 = vpop.f32.mrf.mxu1 }
 0x1c2   : > { %1218 = vst [vmem:[%s2193_s11 + $0xa0] sm:$0xff] %v1140_v2  ;;  %v920_v59 = vadd.f32 %v919_v5, %v695_v39 }
 0x1c3   : > { %v1144_v6 = vpop.f32.mrf.mxu0  ;;  %v921_v9 = vpop.f32.mrf.mxu1 }
 0x1c4   : > { %v1145_v22 = vadd.f32 %v1144_v6, %v920_v59 }
 0x1c5   : > { %v1146_v11 = vpop.f32.mrf.mxu0  ;;  %v924_v28 = vpop.f32.mrf.mxu1 }
 0x1c6   : > { %1219 = vst [vmem:[%s2193_s11 + $0xa8] sm:$0xff] %v1145_v22  ;;  %v925_v15 = vadd.f32 %v924_v28, %v700_v48 }
 0x1c7   : > { %v1149_v16 = vpop.f32.mrf.mxu0  ;;  %v926_v63 = vpop.f32.mrf.mxu1 }
 0x1c8   : > { %v1150_v20 = vadd.f32 %v1149_v16, %v925_v15 }
 0x1c9   : > { %v1151_v21 = vpop.f32.mrf.mxu0  ;;  %v929_v25 = vpop.f32.mrf.mxu1 }
 0x1ca   : > { %1220 = vst [vmem:[%s2193_s11 + $0xb0] sm:$0xff] %v1150_v20  ;;  %v930_v34 = vadd.f32 %v929_v25, %v705_v54 }
 0x1cb   : > { %v1154_v32 = vpop.f32.mrf.mxu0  ;;  %v931_v26 = vpop.f32.mrf.mxu1 }
 0x1cc   : > { %v1155_v30 = vadd.f32 %v1154_v32, %v930_v34 }
 0x1cd   : > { %v1156_v4 = vpop.f32.mrf.mxu0  ;;  %v934_v31 = vpop.f32.mrf.mxu1 }
 0x1ce   : > { %1221 = vst [vmem:[%s2193_s11 + $0xb8] sm:$0xff] %v1155_v30  ;;  %v935_v35 = vadd.f32 %v934_v31, %v710_v58 }
 0x1cf   : > { %v1159_v38 = vpop.f32.mrf.mxu0  ;;  %v936_v36 = vpop.f32.mrf.mxu1 }
 0x1d0   : > { %v1160_v40 = vadd.f32 %v1159_v38, %v935_v35 }
 0x1d1   : > { %v1161_v42 = vpop.f32.mrf.mxu0  ;;  %v939_v43 = vpop.f32.mrf.mxu1 }
 0x1d2   : > { %1222 = vst [vmem:[%s2193_s11 + $0xc0] sm:$0xff] %v1160_v40  ;;  %v940_v8 = vadd.f32 %v939_v43, %v715_v62 }
 0x1d3   : > { %v1164_v44 = vpop.f32.mrf.mxu0  ;;  %v941_v10 = vpop.f32.mrf.mxu1 }
 0x1d4   : > { %v1165_v1 = vadd.f32 %v1164_v44, %v940_v8 }
 0x1d5   : > { %v1166_v45 = vpop.f32.mrf.mxu0  ;;  %v944_v46 = vpop.f32.mrf.mxu1 }
 0x1d6   : > { %1223 = vst [vmem:[%s2193_s11 + $0xc8] sm:$0xff] %v1165_v1  ;;  %v945_v47 = vadd.f32 %v944_v46, %v720_v3 }
 0x1d7   : > { %v1169_v50 = vpop.f32.mrf.mxu0  ;;  %v946_v14 = vpop.f32.mrf.mxu1 }
 0x1d8   : > { %v1170_v19 = vadd.f32 %v1169_v50, %v945_v47 }
 0x1d9   : > { %v1171_v49 = vpop.f32.mrf.mxu0  ;;  %v949_v51 = vpop.f32.mrf.mxu1 }
 0x1da   : > { %1224 = vst [vmem:[%s2193_s11 + $0xd0] sm:$0xff] %v1170_v19  ;;  %v950_v52 = vadd.f32 %v949_v51, %v725_v7 }
 0x1db   : > { %v1174_v53 = vpop.f32.mrf.mxu0  ;;  %v951_v12 = vpop.f32.mrf.mxu1 }
 0x1dc   : > { %v1175_v56 = vadd.f32 %v1174_v53, %v950_v52 }
 0x1dd   : > { %v1176_v29 = vpop.f32.mrf.mxu0  ;;  %v954_v18 = vpop.f32.mrf.mxu1 }
 0x1de   : > { %1225 = vst [vmem:[%s2193_s11 + $0xd8] sm:$0xff] %v1175_v56  ;;  %v955_v55 = vadd.f32 %v954_v18, %v730_v13 }
 0x1df   : > { %v1179_v57 = vpop.f32.mrf.mxu0  ;;  %v956_v60 = vpop.f32.mrf.mxu1 }
 0x1e0   : > { %v1180_v61 = vadd.f32 %v1179_v57, %v955_v55 }
 0x1e1   : > { %v1181_v0 = vpop.f32.mrf.mxu0  ;;  %v959_v39 = vpop.f32.mrf.mxu1 }
 0x1e2   : > { %1226 = vst [vmem:[%s2193_s11 + $0xe0] sm:$0xff] %v1180_v61  ;;  %v960_v2 = vadd.f32 %v959_v39, %v735_v17 }
 0x1e3   : > { %v1184_v24 = vpop.f32.mrf.mxu0  ;;  %v961_v5 = vpop.f32.mrf.mxu1 }
 0x1e4   : > { %v1185_v59 = vadd.f32 %v1184_v24, %v960_v2 }
 0x1e5   : > { %v1186_v6 = vpop.f32.mrf.mxu0  ;;  %v964_v9 = vpop.f32.mrf.mxu1 }
 0x1e6   : > { %1227 = vst [vmem:[%s2193_s11 + $0xe8] sm:$0xff] %v1185_v59  ;;  %v965_v48 = vadd.f32 %v964_v9, %v740_v23 }
 0x1e7   : > { %v1189_v22 = vpop.f32.mrf.mxu0  ;;  %v966_v11 = vpop.f32.mrf.mxu1 }
 0x1e8   : > { %v1190_v28 = vadd.f32 %v1189_v22, %v965_v48 }
 0x1e9   : > { %v1191_v15 = vpop.f32.mrf.mxu0  ;;  %v969_v16 = vpop.f32.mrf.mxu1 }
 0x1ea   : > { %1228 = vst [vmem:[%s2193_s11 + $0xf0] sm:$0xff] %v1190_v28  ;;  %v970_v63 = vadd.f32 %v969_v16, %v745_v27 }
 0x1eb   : > { %v1194_v54 = vpop.f32.mrf.mxu0  ;;  %v971_v20 = vpop.f32.mrf.mxu1 }
 0x1ec   : > { %v1195_v21 = vadd.f32 %v1194_v54, %v970_v63 }
 0x1ed   : > { %v1196_v33 = vpop.f32.mrf.mxu0 }
 0x1ee   : > { %1229 = vst [vmem:[%s2193_s11 + $0xf8] sm:$0xff] %v1195_v21 }
 0x1ef PF: > { %s13_s14 = sadd.s32 1, %s1458_s14   ;;  %s2302_s12 = smov %s1454_s13 }
 0x1f0   : > { %p10_p5 = scmp.ge.s32.totalorder %s13_s14, 4   ;;  %s2303_s13 = smov %s2305_s15 }
 0x1f2   :  { %12 = sbr.rel (!%p10_p5) target bundleno = 2 (0x2), region = 68 }

// kernel: run_pallas.62
= control target key start
LH: loop header
LB: loop body
LE: loop exit
PB: predicated region body
PF: predicated region fallthrough
CT: control target
= control target key end

     0   :  { %s1882_s12 = smov 0   ;;  %s1884_s13 = smov 0   ;;  %s2782_s0 = inlined_call_operand.vmem [shape: f32[512,896], index: 0, kind: input, shape index: {}]   ;;  %s2783_s1 = inlined_call_operand.vmem [shape: f32[896,128], index: 1, kind: input, shape index: {}]   ;;  %s2784_s2 = inlined_call_operand.vmem [shape: f32[1,128], index: 2, kind: input, shape index: {}]   ;;  %s2785_s3 = inlined_call_operand.vmem [shape: f32[512,128], index: 3, kind: output, shape index: {}]  }
   0x1   :  { %s1886_s14 = smov 0  }
   0x2 LB: > { %s25_s15 = sadd.s32 1, %s1855_s13  ;;  %p1611_p0 = scmp.ge.s32.totalorder %s1859_s14, 1  ;;  %s1859_s14 = sphi %s1886_s14, %s13_s14   ;;  %s1855_s13 = sphi %s1884_s13, %s2787_s13   ;;  %s1851_s12 = sphi %s1882_s12, %s2786_s12  }
   0x3   : > { %p27_p1 = scmp.ge.s32.totalorder %s25_s15, 2  ;;  %p170_p2 = scmp.lt.s32.totalorder %s1859_s14, 3 }
   0x5   : > { %s2789_s15 = smov (%p27_p1, %s25_s15), 0  ;;  %p171_p3 = pnand %p1611_p0, %p170_p2 }
   0x6   : > { %s1612_s16 = sshll.u32 (!%p171_p3), %s1851_s12, 5 }
   0x7   : > { %174 = sbr.rel (%p171_p3) target bundleno = 497 (0x1f1), region = 32  ;;  %p206_p4 = scmp.lt.s32.totalorder (!%p171_p3), %s1612_s16, 63 }
   0xc   : > { %v467_v0 = vld [vmem:[%s2783_s1 + $0x78] sm:$0xff]  ;;  %v1861_v2 = vmov 0.0   ;;  %v466_v3 = vld [vmem:[%s2783_s1 + $0x70] sm:$0xff]  ;;  %v465_v5 = vld [vmem:[%s2783_s1 + $0x68] sm:$0xff]  ;;  %s2791_s16 = smov (!%p206_p4, %s1612_s16), 63 }
   0xd   : > { %v499_v1 = vld [vmem:[%s2783_s1 + $0x178] sm:$0xff]  ;;  %571 = vmatprep.subr.mxu0 %v1861_v2  ;;  %796 = vmatprep.subr.mxu1 %v1861_v2  ;;  %v498_v4 = vld [vmem:[%s2783_s1 + $0x170] sm:$0xff]  ;;  %v497_v6 = vld [vmem:[%s2783_s1 + $0x168] sm:$0xff]  ;;  %s1811_s9 = smul.u32 56, %s2791_s16 }
   0xe   : > { %572 = vmatpush1.msra.mxu0 %v467_v0  ;;  %797 = vmatpush1.msra.mxu1 %v499_v1  ;;  %v464_v7 = vld [vmem:[%s2783_s1 + $0x60] sm:$0xff]  ;;  %v463_v9 = vld [vmem:[%s2783_s1 + $0x58] sm:$0xff]  ;;  %v462_v11 = vld [vmem:[%s2783_s1 + $0x50] sm:$0xff] }
   0xf   : > { %573 = vmatprep.subr.mxu0 %v1861_v2  ;;  %798 = vmatprep.subr.mxu1 %v1861_v2  ;;  %v496_v8 = vld [vmem:[%s2783_s1 + $0x160] sm:$0xff]  ;;  %v495_v10 = vld [vmem:[%s2783_s1 + $0x158] sm:$0xff]  ;;  %v494_v12 = vld [vmem:[%s2783_s1 + $0x150] sm:$0xff]  ;;  %s2147_s24 = scalar_lea.vmem %s2782_s0, %s1811_s9 }
  0x10   : > { %574 = vmatpush1.msra.mxu0 %v466_v3  ;;  %799 = vmatpush1.msra.mxu1 %v498_v4  ;;  %v461_v13 = vld [vmem:[%s2783_s1 + $0x48] sm:$0xff]  ;;  %v460_v15 = vld [vmem:[%s2783_s1 + $0x40] sm:$0xff]  ;;  %v459_v17 = vld [vmem:[%s2783_s1 + $0x38] sm:$0xff] }
  0x11   : > { %575 = vmatprep.subr.mxu0 %v1861_v2  ;;  %800 = vmatprep.subr.mxu1 %v1861_v2  ;;  %v493_v14 = vld [vmem:[%s2783_s1 + $0x148] sm:$0xff]  ;;  %v492_v16 = vld [vmem:[%s2783_s1 + $0x140] sm:$0xff]  ;;  %v491_v18 = vld [vmem:[%s2783_s1 + $0x138] sm:$0xff] }
  0x12   : > { %576 = vmatpush1.msra.mxu0 %v465_v5  ;;  %801 = vmatpush1.msra.mxu1 %v497_v6  ;;  %v458_v19 = vld [vmem:[%s2783_s1 + $0x30] sm:$0xff]  ;;  %v457_v21 = vld [vmem:[%s2783_s1 + $0x28] sm:$0xff]  ;;  %v456_v23 = vld [vmem:[%s2783_s1 + $0x20] sm:$0xff] }
  0x13   : > { %577 = vmatprep.subr.mxu0 %v1861_v2  ;;  %802 = vmatprep.subr.mxu1 %v1861_v2  ;;  %v490_v20 = vld [vmem:[%s2783_s1 + $0x130] sm:$0xff]  ;;  %v489_v22 = vld [vmem:[%s2783_s1 + $0x128] sm:$0xff]  ;;  %v488_v24 = vld [vmem:[%s2783_s1 + $0x120] sm:$0xff] }
  0x14   : > { %578 = vmatpush1.msra.mxu0 %v464_v7  ;;  %803 = vmatpush1.msra.mxu1 %v496_v8  ;;  %v455_v25 = vld [vmem:[%s2783_s1 + $0x18] sm:$0xff]  ;;  %v454_v27 = vld [vmem:[%s2783_s1 + $0x10] sm:$0xff]  ;;  %v453_v29 = vld [vmem:[%s2783_s1 + $0x8] sm:$0xff] }
  0x15   : > { %579 = vmatprep.subr.mxu0 %v1861_v2  ;;  %804 = vmatprep.subr.mxu1 %v1861_v2  ;;  %v487_v26 = vld [vmem:[%s2783_s1 + $0x118] sm:$0xff]  ;;  %v486_v28 = vld [vmem:[%s2783_s1 + $0x110] sm:$0xff]  ;;  %v485_v30 = vld [vmem:[%s2783_s1 + $0x108] sm:$0xff] }
  0x16   : > { %580 = vmatpush1.msra.mxu0 %v463_v9  ;;  %805 = vmatpush1.msra.mxu1 %v495_v10  ;;  %v452_v31 = vld [vmem:[%s2783_s1] sm:$0xff]  ;;  %v483_v33 = vld [vmem:[%s2783_s1 + $0xf8] sm:$0xff]  ;;  %v482_v35 = vld [vmem:[%s2783_s1 + $0xf0] sm:$0xff] }
  0x17   : > { %581 = vmatprep.subr.mxu0 %v1861_v2  ;;  %806 = vmatprep.subr.mxu1 %v1861_v2  ;;  %v484_v32 = vld [vmem:[%s2783_s1 + $0x100] sm:$0xff]  ;;  %v515_v34 = vld [vmem:[%s2783_s1 + $0x1f8] sm:$0xff]  ;;  %v514_v36 = vld [vmem:[%s2783_s1 + $0x1f0] sm:$0xff] }
  0x18   : > { %582 = vmatpush1.msra.mxu0 %v462_v11  ;;  %807 = vmatpush1.msra.mxu1 %v494_v12  ;;  %v481_v37 = vld [vmem:[%s2783_s1 + $0xe8] sm:$0xff]  ;;  %v480_v39 = vld [vmem:[%s2783_s1 + $0xe0] sm:$0xff]  ;;  %v479_v41 = vld [vmem:[%s2783_s1 + $0xd8] sm:$0xff] }
  0x19   : > { %583 = vmatprep.subr.mxu0 %v1861_v2  ;;  %808 = vmatprep.subr.mxu1 %v1861_v2  ;;  %v513_v38 = vld [vmem:[%s2783_s1 + $0x1e8] sm:$0xff]  ;;  %v512_v40 = vld [vmem:[%s2783_s1 + $0x1e0] sm:$0xff]  ;;  %v511_v42 = vld [vmem:[%s2783_s1 + $0x1d8] sm:$0xff] }
  0x1a   : > { %584 = vmatpush1.msra.mxu0 %v461_v13  ;;  %809 = vmatpush1.msra.mxu1 %v493_v14  ;;  %v478_v43 = vld [vmem:[%s2783_s1 + $0xd0] sm:$0xff]  ;;  %v477_v45 = vld [vmem:[%s2783_s1 + $0xc8] sm:$0xff]  ;;  %v476_v47 = vld [vmem:[%s2783_s1 + $0xc0] sm:$0xff] }
  0x1b   : > { %585 = vmatprep.subr.mxu0 %v1861_v2  ;;  %810 = vmatprep.subr.mxu1 %v1861_v2  ;;  %v510_v44 = vld [vmem:[%s2783_s1 + $0x1d0] sm:$0xff]  ;;  %v509_v46 = vld [vmem:[%s2783_s1 + $0x1c8] sm:$0xff]  ;;  %v508_v48 = vld [vmem:[%s2783_s1 + $0x1c0] sm:$0xff] }
  0x1c   : > { %586 = vmatpush1.msra.mxu0 %v460_v15  ;;  %811 = vmatpush1.msra.mxu1 %v492_v16  ;;  %v475_v49 = vld [vmem:[%s2783_s1 + $0xb8] sm:$0xff]  ;;  %v474_v51 = vld [vmem:[%s2783_s1 + $0xb0] sm:$0xff]  ;;  %v473_v53 = vld [vmem:[%s2783_s1 + $0xa8] sm:$0xff] }
  0x1d   : > { %587 = vmatprep.subr.mxu0 %v1861_v2  ;;  %812 = vmatprep.subr.mxu1 %v1861_v2  ;;  %v507_v50 = vld [vmem:[%s2783_s1 + $0x1b8] sm:$0xff]  ;;  %v506_v52 = vld [vmem:[%s2783_s1 + $0x1b0] sm:$0xff]  ;;  %v505_v54 = vld [vmem:[%s2783_s1 + $0x1a8] sm:$0xff] }
  0x1e   : > { %588 = vmatpush1.msra.mxu0 %v459_v17  ;;  %813 = vmatpush1.msra.mxu1 %v491_v18  ;;  %v472_v55 = vld [vmem:[%s2783_s1 + $0xa0] sm:$0xff]  ;;  %v471_v57 = vld [vmem:[%s2783_s1 + $0x98] sm:$0xff]  ;;  %v470_v59 = vld [vmem:[%s2783_s1 + $0x90] sm:$0xff] }
  0x1f   : > { %589 = vmatprep.subr.mxu0 %v1861_v2  ;;  %814 = vmatprep.subr.mxu1 %v1861_v2  ;;  %v504_v56 = vld [vmem:[%s2783_s1 + $0x1a0] sm:$0xff]  ;;  %v503_v58 = vld [vmem:[%s2783_s1 + $0x198] sm:$0xff]  ;;  %v502_v60 = vld [vmem:[%s2783_s1 + $0x190] sm:$0xff] }
  0x20   : > { %590 = vmatpush1.msra.mxu0 %v458_v19  ;;  %815 = vmatpush1.msra.mxu1 %v490_v20  ;;  %v469_v61 = vld [vmem:[%s2783_s1 + $0x88] sm:$0xff]  ;;  %v468_v63 = vld [vmem:[%s2783_s1 + $0x80] sm:$0xff]  ;;  %v231_v3 = vld [vmem:[%s2147_s24 + $0x18] sm:$0xff] }
  0x21   : > { %591 = vmatprep.subr.mxu0 %v1861_v2  ;;  %816 = vmatprep.subr.mxu1 %v1861_v2  ;;  %v501_v62 = vld [vmem:[%s2783_s1 + $0x188] sm:$0xff]  ;;  %v500_v1 = vld [vmem:[%s2783_s1 + $0x180] sm:$0xff]  ;;  %v230_v5 = vld [vmem:[%s2147_s24 + $0x10] sm:$0xff] }
  0x22   : > { %592 = vmatpush1.msra.mxu0 %v457_v21  ;;  %817 = vmatpush1.msra.mxu1 %v489_v22  ;;  %v229_v0 = vld [vmem:[%s2147_s24 + $0x8] sm:$0xff]  ;;  %v228_v4 = vld [vmem:[%s2147_s24] sm:$0xff]  ;;  %v531_v6 = vld [vmem:[%s2783_s1 + $0x278] sm:$0xff] }
  0x23   : > { %593 = vmatprep.subr.mxu0 %v1861_v2  ;;  %818 = vmatprep.subr.mxu1 %v1861_v2  ;;  %v236_v7 = vld [vmem:[%s2147_s24 + $0x40] sm:$0xff]  ;;  %v238_v8 = vld [vmem:[%s2147_s24 + $0x50] sm:$0xff]  ;;  %v235_v9 = vld [vmem:[%s2147_s24 + $0x38] sm:$0xff] }
  0x24   : > { %594 = vmatpush1.msra.mxu0 %v456_v23  ;;  %819 = vmatpush1.msra.mxu1 %v488_v24  ;;  %v237_v10 = vld [vmem:[%s2147_s24 + $0x48] sm:$0xff]  ;;  %v530_v11 = vld [vmem:[%s2783_s1 + $0x270] sm:$0xff]  ;;  %v243_v12 = vld [vmem:[%s2147_s24 + $0x78] sm:$0xff] }
  0x25   : > { %595 = vmatprep.subr.mxu0 %v1861_v2  ;;  %820 = vmatprep.subr.mxu1 %v1861_v2  ;;  %v245_v13 = vld [vmem:[%s2147_s24 + $0x88] sm:$0xff]  ;;  %v242_v14 = vld [vmem:[%s2147_s24 + $0x70] sm:$0xff]  ;;  %v244_v15 = vld [vmem:[%s2147_s24 + $0x80] sm:$0xff] }
  0x26   : > { %596 = vmatpush1.msra.mxu0 %v455_v25  ;;  %821 = vmatpush1.msra.mxu1 %v487_v26  ;;  %v529_v16 = vld [vmem:[%s2783_s1 + $0x268] sm:$0xff]  ;;  %v250_v17 = vld [vmem:[%s2147_s24 + $0xb0] sm:$0xff]  ;;  %v252_v18 = vld [vmem:[%s2147_s24 + $0xc0] sm:$0xff] }
  0x27   : > { %597 = vmatprep.subr.mxu0 %v1861_v2  ;;  %822 = vmatprep.subr.mxu1 %v1861_v2  ;;  %v249_v19 = vld [vmem:[%s2147_s24 + $0xa8] sm:$0xff]  ;;  %v251_v20 = vld [vmem:[%s2147_s24 + $0xb8] sm:$0xff]  ;;  %v528_v21 = vld [vmem:[%s2783_s1 + $0x260] sm:$0xff] }
  0x28   : > { %598 = vmatpush1.msra.mxu0 %v454_v27  ;;  %823 = vmatpush1.msra.mxu1 %v486_v28  ;;  %v257_v22 = vld [vmem:[%s2147_s24 + $0xe8] sm:$0xff]  ;;  %v259_v23 = vld [vmem:[%s2147_s24 + $0xf8] sm:$0xff]  ;;  %v256_v24 = vld [vmem:[%s2147_s24 + $0xe0] sm:$0xff] }
  0x29   : > { %599 = vmatprep.subr.mxu0 %v1861_v2  ;;  %824 = vmatprep.subr.mxu1 %v1861_v2  ;;  %v258_v25 = vld [vmem:[%s2147_s24 + $0xf0] sm:$0xff]  ;;  %v527_v26 = vld [vmem:[%s2783_s1 + $0x258] sm:$0xff]  ;;  %v264_v27 = vld [vmem:[%s2147_s24 + $0x120] sm:$0xff] }
  0x2a   : > { %600 = vmatpush1.msra.mxu0 %v453_v29  ;;  %825 = vmatpush1.msra.mxu1 %v485_v30  ;;  %v266_v28 = vld [vmem:[%s2147_s24 + $0x130] sm:$0xff]  ;;  %v263_v29 = vld [vmem:[%s2147_s24 + $0x118] sm:$0xff]  ;;  %v265_v30 = vld [vmem:[%s2147_s24 + $0x128] sm:$0xff] }
  0x2b   : > { %601 = vmatprep.subr.mxu0 %v1861_v2  ;;  %826 = vmatprep.subr.mxu1 %v1861_v2 }
  0x2c   : > { %602 = vmatpush1.msra.mxu0 %v452_v31  ;;  %827 = vmatpush1.msra.mxu1 %v484_v32  ;;  %v526_v31 = vld [vmem:[%s2783_s1 + $0x250] sm:$0xff]  ;;  %v271_v32 = vld [vmem:[%s2147_s24 + $0x158] sm:$0xff] }
  0x2d   : > { %603 = vmatprep.subr.mxu0 %v1861_v2  ;;  %828 = vmatprep.subr.mxu1 %v1861_v2 }
  0x2e   : > { %604 = vmatpush2.msra.mxu0 %v483_v33  ;;  %829 = vmatpush2.msra.mxu1 %v515_v34  ;;  %v273_v33 = vld [vmem:[%s2147_s24 + $0x168] sm:$0xff]  ;;  %v270_v34 = vld [vmem:[%s2147_s24 + $0x150] sm:$0xff] }
  0x2f   : > { %605 = vmatprep.subr.mxu0 %v1861_v2  ;;  %830 = vmatprep.subr.mxu1 %v1861_v2 }
  0x30   : > { %606 = vmatpush2.msra.mxu0 %v482_v35  ;;  %831 = vmatpush2.msra.mxu1 %v514_v36  ;;  %v272_v35 = vld [vmem:[%s2147_s24 + $0x160] sm:$0xff]  ;;  %v525_v36 = vld [vmem:[%s2783_s1 + $0x248] sm:$0xff] }
  0x31   : > { %607 = vmatprep.subr.mxu0 %v1861_v2  ;;  %832 = vmatprep.subr.mxu1 %v1861_v2 }
  0x32   : > { %608 = vmatpush2.msra.mxu0 %v481_v37  ;;  %833 = vmatpush2.msra.mxu1 %v513_v38  ;;  %v278_v37 = vld [vmem:[%s2147_s24 + $0x190] sm:$0xff]  ;;  %v280_v38 = vld [vmem:[%s2147_s24 + $0x1a0] sm:$0xff] }
  0x33   : > { %609 = vmatprep.subr.mxu0 %v1861_v2  ;;  %834 = vmatprep.subr.mxu1 %v1861_v2 }
  0x34   : > { %610 = vmatpush2.msra.mxu0 %v480_v39  ;;  %835 = vmatpush2.msra.mxu1 %v512_v40  ;;  %v277_v39 = vld [vmem:[%s2147_s24 + $0x188] sm:$0xff]  ;;  %v279_v40 = vld [vmem:[%s2147_s24 + $0x198] sm:$0xff] }
  0x35   : > { %611 = vmatprep.subr.mxu0 %v1861_v2  ;;  %836 = vmatprep.subr.mxu1 %v1861_v2 }
  0x36   : > { %612 = vmatpush2.msra.mxu0 %v479_v41  ;;  %837 = vmatpush2.msra.mxu1 %v511_v42  ;;  %v524_v41 = vld [vmem:[%s2783_s1 + $0x240] sm:$0xff]  ;;  %v285_v42 = vld [vmem:[%s2147_s24 + $0x1c8] sm:$0xff] }
  0x37   : > { %613 = vmatprep.subr.mxu0 %v1861_v2  ;;  %838 = vmatprep.subr.mxu1 %v1861_v2 }
  0x38   : > { %614 = vmatpush2.msra.mxu0 %v478_v43  ;;  %839 = vmatpush2.msra.mxu1 %v510_v44  ;;  %v287_v43 = vld [vmem:[%s2147_s24 + $0x1d8] sm:$0xff]  ;;  %v284_v44 = vld [vmem:[%s2147_s24 + $0x1c0] sm:$0xff] }
  0x39   : > { %615 = vmatprep.subr.mxu0 %v1861_v2  ;;  %840 = vmatprep.subr.mxu1 %v1861_v2 }
  0x3a   : > { %616 = vmatpush2.msra.mxu0 %v477_v45  ;;  %841 = vmatpush2.msra.mxu1 %v509_v46  ;;  %v286_v45 = vld [vmem:[%s2147_s24 + $0x1d0] sm:$0xff]  ;;  %v523_v46 = vld [vmem:[%s2783_s1 + $0x238] sm:$0xff] }
  0x3b   : > { %617 = vmatprep.subr.mxu0 %v1861_v2  ;;  %842 = vmatprep.subr.mxu1 %v1861_v2 }
  0x3c   : > { %618 = vmatpush2.msra.mxu0 %v476_v47  ;;  %843 = vmatpush2.msra.mxu1 %v508_v48  ;;  %v292_v47 = vld [vmem:[%s2147_s24 + $0x200] sm:$0xff]  ;;  %v294_v48 = vld [vmem:[%s2147_s24 + $0x210] sm:$0xff] }
  0x3d   : > { %619 = vmatprep.subr.mxu0 %v1861_v2  ;;  %844 = vmatprep.subr.mxu1 %v1861_v2 }
  0x3e   : > { %620 = vmatpush2.msra.mxu0 %v475_v49  ;;  %845 = vmatpush2.msra.mxu1 %v507_v50  ;;  %v291_v49 = vld [vmem:[%s2147_s24 + $0x1f8] sm:$0xff]  ;;  %v293_v50 = vld [vmem:[%s2147_s24 + $0x208] sm:$0xff] }
  0x3f   : > { %621 = vmatprep.subr.mxu0 %v1861_v2  ;;  %846 = vmatprep.subr.mxu1 %v1861_v2 }
  0x40   : > { %622 = vmatpush2.msra.mxu0 %v474_v51  ;;  %847 = vmatpush2.msra.mxu1 %v506_v52  ;;  %v522_v51 = vld [vmem:[%s2783_s1 + $0x230] sm:$0xff]  ;;  %v299_v52 = vld [vmem:[%s2147_s24 + $0x238] sm:$0xff] }
  0x41   : > { %623 = vmatprep.subr.mxu0 %v1861_v2  ;;  %848 = vmatprep.subr.mxu1 %v1861_v2 }
  0x42   : > { %624 = vmatpush2.msra.mxu0 %v473_v53  ;;  %849 = vmatpush2.msra.mxu1 %v505_v54  ;;  %v301_v53 = vld [vmem:[%s2147_s24 + $0x248] sm:$0xff]  ;;  %v298_v54 = vld [vmem:[%s2147_s24 + $0x230] sm:$0xff] }
  0x43   : > { %625 = vmatprep.subr.mxu0 %v1861_v2  ;;  %850 = vmatprep.subr.mxu1 %v1861_v2 }
  0x44   : > { %626 = vmatpush2.msra.mxu0 %v472_v55  ;;  %851 = vmatpush2.msra.mxu1 %v504_v56  ;;  %v300_v55 = vld [vmem:[%s2147_s24 + $0x240] sm:$0xff]  ;;  %v521_v56 = vld [vmem:[%s2783_s1 + $0x228] sm:$0xff] }
  0x45   : > { %627 = vmatprep.subr.mxu0 %v1861_v2  ;;  %852 = vmatprep.subr.mxu1 %v1861_v2 }
  0x46   : > { %628 = vmatpush2.msra.mxu0 %v471_v57  ;;  %853 = vmatpush2.msra.mxu1 %v503_v58  ;;  %v306_v57 = vld [vmem:[%s2147_s24 + $0x270] sm:$0xff]  ;;  %v308_v58 = vld [vmem:[%s2147_s24 + $0x280] sm:$0xff] }
  0x47   : > { %629 = vmatprep.subr.mxu0 %v1861_v2  ;;  %854 = vmatprep.subr.mxu1 %v1861_v2 }
  0x48   : > { %630 = vmatpush2.msra.mxu0 %v470_v59  ;;  %855 = vmatpush2.msra.mxu1 %v502_v60  ;;  %v305_v59 = vld [vmem:[%s2147_s24 + $0x268] sm:$0xff]  ;;  %v307_v60 = vld [vmem:[%s2147_s24 + $0x278] sm:$0xff] }
  0x49   : > { %631 = vmatprep.subr.mxu0 %v1861_v2  ;;  %856 = vmatprep.subr.mxu1 %v1861_v2 }
  0x4a   : > { %632 = vmatpush2.msra.mxu0 %v469_v61  ;;  %857 = vmatpush2.msra.mxu1 %v501_v62  ;;  %v520_v61 = vld [vmem:[%s2783_s1 + $0x220] sm:$0xff]  ;;  %v313_v62 = vld [vmem:[%s2147_s24 + $0x2a8] sm:$0xff] }
  0x4b   : > { %633 = vmatprep.subr.mxu0 %v1861_v2  ;;  %858 = vmatprep.subr.mxu1 %v1861_v2 }
  0x4c   : > { %634 = vmatpush2.msra.mxu0 %v468_v63  ;;  %635 = vmatprep.mubr.f32.mxu0 %v229_v0  ;;  %v315_v63 = vld [vmem:[%s2147_s24 + $0x2b8] sm:$0xff]  ;;  %v312_v0 = vld [vmem:[%s2147_s24 + $0x2a0] sm:$0xff] }
  0x4d   : > { %859 = vmatpush2.msra.mxu1 %v500_v1  ;;  %860 = vmatprep.mubr.f32.mxu1 %v231_v3  ;;  %v314_v1 = vld [vmem:[%s2147_s24 + $0x2b0] sm:$0xff]  ;;  %v519_v3 = vld [vmem:[%s2783_s1 + $0x218] sm:$0xff] }
  0x4e   : > { %636 = vmatmul.mubr.f32.vlgmr.msra.gmra.mxu0 %v228_v4  ;;  %861 = vmatmul.mubr.f32.vlgmr.msra.gmra.mxu1 %v230_v5  ;;  %v320_v4 = vld [vmem:[%s2147_s24 + $0x2e0] sm:$0xff]  ;;  %v322_v5 = vld [vmem:[%s2147_s24 + $0x2f0] sm:$0xff] }
  0x4f   : > { %1021 = vmatprep.subr.mxu0 %v1861_v2  ;;  %1747 = vmatprep.subr.mxu1 %v1861_v2 }
  0x50   : > { %1022 = vmatpush1.msra.mxu0 %v531_v6  ;;  %1779 = vmatpush1.msra.mxu1 %v531_v6  ;;  %v319_v6 = vld [vmem:[%s2147_s24 + $0x2d8] sm:$0xff] }
  0x51   : > { %640 = vmatprep.mubr.f32.mxu0 %v236_v7  ;;  %865 = vmatprep.mubr.f32.mxu1 %v238_v8  ;;  %v321_v7 = vld [vmem:[%s2147_s24 + $0x2e8] sm:$0xff]  ;;  %v518_v8 = vld [vmem:[%s2783_s1 + $0x210] sm:$0xff] }
  0x52   : > { %641 = vmatmul.mubr.f32.gmra.mxu0 %v235_v9  ;;  %866 = vmatmul.mubr.f32.gmra.mxu1 %v237_v10  ;;  %v327_v9 = vld [vmem:[%s2147_s24 + $0x318] sm:$0xff]  ;;  %v329_v10 = vld [vmem:[%s2147_s24 + $0x328] sm:$0xff] }
  0x53   : > { %1023 = vmatprep.subr.mxu0 %v1861_v2  ;;  %1748 = vmatprep.subr.mxu1 %v1861_v2 }
  0x54   : > { %1024 = vmatpush1.msra.mxu0 %v530_v11  ;;  %1780 = vmatpush1.msra.mxu1 %v530_v11  ;;  %v326_v11 = vld [vmem:[%s2147_s24 + $0x310] sm:$0xff] }
  0x55   : > { %645 = vmatprep.mubr.f32.mxu0 %v243_v12  ;;  %870 = vmatprep.mubr.f32.mxu1 %v245_v13  ;;  %v328_v12 = vld [vmem:[%s2147_s24 + $0x320] sm:$0xff]  ;;  %v517_v13 = vld [vmem:[%s2783_s1 + $0x208] sm:$0xff] }
  0x56   : > { %646 = vmatmul.mubr.f32.gmra.mxu0 %v242_v14  ;;  %871 = vmatmul.mubr.f32.gmra.mxu1 %v244_v15  ;;  %v334_v14 = vld [vmem:[%s2147_s24 + $0x350] sm:$0xff]  ;;  %v336_v15 = vld [vmem:[%s2147_s24 + $0x360] sm:$0xff] }
  0x57   : > { %1025 = vmatprep.subr.mxu0 %v1861_v2  ;;  %1749 = vmatprep.subr.mxu1 %v1861_v2 }
  0x58   : > { %1026 = vmatpush1.msra.mxu0 %v529_v16  ;;  %1781 = vmatpush1.msra.mxu1 %v529_v16  ;;  %v333_v16 = vld [vmem:[%s2147_s24 + $0x348] sm:$0xff] }
  0x59   : > { %650 = vmatprep.mubr.f32.mxu0 %v250_v17  ;;  %875 = vmatprep.mubr.f32.mxu1 %v252_v18  ;;  %v335_v17 = vld [vmem:[%s2147_s24 + $0x358] sm:$0xff]  ;;  %v516_v18 = vld [vmem:[%s2783_s1 + $0x200] sm:$0xff] }
  0x5a   : > { %651 = vmatmul.mubr.f32.gmra.mxu0 %v249_v19  ;;  %876 = vmatmul.mubr.f32.gmra.mxu1 %v251_v20  ;;  %v341_v19 = vld [vmem:[%s2147_s24 + $0x388] sm:$0xff]  ;;  %v343_v20 = vld [vmem:[%s2147_s24 + $0x398] sm:$0xff] }
  0x5b   : > { %1027 = vmatprep.subr.mxu0 %v1861_v2  ;;  %1750 = vmatprep.subr.mxu1 %v1861_v2 }
  0x5c   : > { %1028 = vmatpush1.msra.mxu0 %v528_v21  ;;  %1782 = vmatpush1.msra.mxu1 %v528_v21  ;;  %v340_v21 = vld [vmem:[%s2147_s24 + $0x380] sm:$0xff] }
  0x5d   : > { %655 = vmatprep.mubr.f32.mxu0 %v257_v22  ;;  %880 = vmatprep.mubr.f32.mxu1 %v259_v23  ;;  %v342_v22 = vld [vmem:[%s2147_s24 + $0x390] sm:$0xff]  ;;  %v547_v23 = vld [vmem:[%s2783_s1 + $0x2f8] sm:$0xff] }
  0x5e   : > { %656 = vmatmul.mubr.f32.gmra.mxu0 %v256_v24  ;;  %881 = vmatmul.mubr.f32.gmra.mxu1 %v258_v25  ;;  %v348_v24 = vld [vmem:[%s2147_s24 + $0x3c0] sm:$0xff]  ;;  %v350_v25 = vld [vmem:[%s2147_s24 + $0x3d0] sm:$0xff] }
  0x5f   : > { %1029 = vmatprep.subr.mxu0 %v1861_v2  ;;  %1751 = vmatprep.subr.mxu1 %v1861_v2 }
  0x60   : > { %1030 = vmatpush1.msra.mxu0 %v527_v26  ;;  %1783 = vmatpush1.msra.mxu1 %v527_v26  ;;  %v347_v26 = vld [vmem:[%s2147_s24 + $0x3b8] sm:$0xff] }
  0x61   : > { %660 = vmatprep.mubr.f32.mxu0 %v264_v27  ;;  %885 = vmatprep.mubr.f32.mxu1 %v266_v28  ;;  %v349_v27 = vld [vmem:[%s2147_s24 + $0x3c8] sm:$0xff]  ;;  %v546_v28 = vld [vmem:[%s2783_s1 + $0x2f0] sm:$0xff] }
  0x62   : > { %661 = vmatmul.mubr.f32.gmra.mxu0 %v263_v29  ;;  %886 = vmatmul.mubr.f32.gmra.mxu1 %v265_v30  ;;  %v355_v29 = vld [vmem:[%s2147_s24 + $0x3f8] sm:$0xff]  ;;  %v357_v30 = vld [vmem:[%s2147_s24 + $0x408] sm:$0xff] }
  0x63   : > { %1031 = vmatprep.subr.mxu0 %v1861_v2  ;;  %1752 = vmatprep.subr.mxu1 %v1861_v2 }
  0x64   : > { %1032 = vmatpush1.msra.mxu0 %v526_v31  ;;  %1784 = vmatpush1.msra.mxu1 %v526_v31  ;;  %v354_v31 = vld [vmem:[%s2147_s24 + $0x3f0] sm:$0xff] }
  0x65   : > { %665 = vmatprep.mubr.f32.mxu0 %v271_v32  ;;  %890 = vmatprep.mubr.f32.mxu1 %v273_v33  ;;  %v356_v32 = vld [vmem:[%s2147_s24 + $0x400] sm:$0xff]  ;;  %v545_v33 = vld [vmem:[%s2783_s1 + $0x2e8] sm:$0xff] }
  0x66   : > { %666 = vmatmul.mubr.f32.gmra.mxu0 %v270_v34  ;;  %891 = vmatmul.mubr.f32.gmra.mxu1 %v272_v35  ;;  %v362_v34 = vld [vmem:[%s2147_s24 + $0x430] sm:$0xff]  ;;  %v364_v35 = vld [vmem:[%s2147_s24 + $0x440] sm:$0xff] }
  0x67   : > { %1033 = vmatprep.subr.mxu0 %v1861_v2  ;;  %1753 = vmatprep.subr.mxu1 %v1861_v2 }
  0x68   : > { %1034 = vmatpush1.msra.mxu0 %v525_v36  ;;  %1785 = vmatpush1.msra.mxu1 %v525_v36  ;;  %v361_v36 = vld [vmem:[%s2147_s24 + $0x428] sm:$0xff] }
  0x69   : > { %670 = vmatprep.mubr.f32.mxu0 %v278_v37  ;;  %895 = vmatprep.mubr.f32.mxu1 %v280_v38  ;;  %v363_v37 = vld [vmem:[%s2147_s24 + $0x438] sm:$0xff]  ;;  %v544_v38 = vld [vmem:[%s2783_s1 + $0x2e0] sm:$0xff] }
  0x6a   : > { %671 = vmatmul.mubr.f32.gmra.mxu0 %v277_v39  ;;  %896 = vmatmul.mubr.f32.gmra.mxu1 %v279_v40  ;;  %v369_v39 = vld [vmem:[%s2147_s24 + $0x468] sm:$0xff]  ;;  %v371_v40 = vld [vmem:[%s2147_s24 + $0x478] sm:$0xff] }
  0x6b   : > { %1035 = vmatprep.subr.mxu0 %v1861_v2  ;;  %1754 = vmatprep.subr.mxu1 %v1861_v2 }
  0x6c   : > { %1036 = vmatpush1.msra.mxu0 %v524_v41  ;;  %1786 = vmatpush1.msra.mxu1 %v524_v41  ;;  %v368_v41 = vld [vmem:[%s2147_s24 + $0x460] sm:$0xff] }
  0x6d   : > { %675 = vmatprep.mubr.f32.mxu0 %v285_v42  ;;  %900 = vmatprep.mubr.f32.mxu1 %v287_v43  ;;  %v370_v42 = vld [vmem:[%s2147_s24 + $0x470] sm:$0xff]  ;;  %v543_v43 = vld [vmem:[%s2783_s1 + $0x2d8] sm:$0xff] }
  0x6e   : > { %676 = vmatmul.mubr.f32.gmra.mxu0 %v284_v44  ;;  %901 = vmatmul.mubr.f32.gmra.mxu1 %v286_v45  ;;  %v376_v44 = vld [vmem:[%s2147_s24 + $0x4a0] sm:$0xff]  ;;  %v378_v45 = vld [vmem:[%s2147_s24 + $0x4b0] sm:$0xff] }
  0x6f   : > { %1037 = vmatprep.subr.mxu0 %v1861_v2  ;;  %1755 = vmatprep.subr.mxu1 %v1861_v2 }
  0x70   : > { %1038 = vmatpush1.msra.mxu0 %v523_v46  ;;  %1787 = vmatpush1.msra.mxu1 %v523_v46  ;;  %v375_v46 = vld [vmem:[%s2147_s24 + $0x498] sm:$0xff] }
  0x71   : > { %680 = vmatprep.mubr.f32.mxu0 %v292_v47  ;;  %905 = vmatprep.mubr.f32.mxu1 %v294_v48  ;;  %v377_v47 = vld [vmem:[%s2147_s24 + $0x4a8] sm:$0xff]  ;;  %v542_v48 = vld [vmem:[%s2783_s1 + $0x2d0] sm:$0xff] }
  0x72   : > { %681 = vmatmul.mubr.f32.gmra.mxu0 %v291_v49  ;;  %906 = vmatmul.mubr.f32.gmra.mxu1 %v293_v50  ;;  %v383_v49 = vld [vmem:[%s2147_s24 + $0x4d8] sm:$0xff]  ;;  %v385_v50 = vld [vmem:[%s2147_s24 + $0x4e8] sm:$0xff] }
  0x73   : > { %1039 = vmatprep.subr.mxu0 %v1861_v2  ;;  %1756 = vmatprep.subr.mxu1 %v1861_v2 }
  0x74   : > { %1040 = vmatpush1.msra.mxu0 %v522_v51  ;;  %1788 = vmatpush1.msra.mxu1 %v522_v51  ;;  %v382_v51 = vld [vmem:[%s2147_s24 + $0x4d0] sm:$0xff] }
  0x75   : > { %685 = vmatprep.mubr.f32.mxu0 %v299_v52  ;;  %910 = vmatprep.mubr.f32.mxu1 %v301_v53  ;;  %v384_v52 = vld [vmem:[%s2147_s24 + $0x4e0] sm:$0xff]  ;;  %v541_v53 = vld [vmem:[%s2783_s1 + $0x2c8] sm:$0xff] }
  0x76   : > { %686 = vmatmul.mubr.f32.gmra.mxu0 %v298_v54  ;;  %911 = vmatmul.mubr.f32.gmra.mxu1 %v300_v55  ;;  %v390_v54 = vld [vmem:[%s2147_s24 + $0x510] sm:$0xff]  ;;  %v392_v55 = vld [vmem:[%s2147_s24 + $0x520] sm:$0xff] }
  0x77   : > { %1041 = vmatprep.subr.mxu0 %v1861_v2  ;;  %1757 = vmatprep.subr.mxu1 %v1861_v2 }
  0x78   : > { %1042 = vmatpush1.msra.mxu0 %v521_v56  ;;  %1789 = vmatpush1.msra.mxu1 %v521_v56  ;;  %v389_v56 = vld [vmem:[%s2147_s24 + $0x508] sm:$0xff] }
  0x79   : > { %690 = vmatprep.mubr.f32.mxu0 %v306_v57  ;;  %915 = vmatprep.mubr.f32.mxu1 %v308_v58  ;;  %v391_v57 = vld [vmem:[%s2147_s24 + $0x518] sm:$0xff]  ;;  %v540_v58 = vld [vmem:[%s2783_s1 + $0x2c0] sm:$0xff] }
  0x7a   : > { %691 = vmatmul.mubr.f32.gmra.mxu0 %v305_v59  ;;  %916 = vmatmul.mubr.f32.gmra.mxu1 %v307_v60  ;;  %v397_v59 = vld [vmem:[%s2147_s24 + $0x548] sm:$0xff]  ;;  %v399_v60 = vld [vmem:[%s2147_s24 + $0x558] sm:$0xff] }
  0x7b   : > { %1043 = vmatprep.subr.mxu0 %v1861_v2  ;;  %1758 = vmatprep.subr.mxu1 %v1861_v2 }
  0x7c   : > { %1044 = vmatpush1.msra.mxu0 %v520_v61  ;;  %1790 = vmatpush1.msra.mxu1 %v520_v61  ;;  %v396_v61 = vld [vmem:[%s2147_s24 + $0x540] sm:$0xff] }
  0x7d   : > { %695 = vmatprep.mubr.f32.mxu0 %v313_v62  ;;  %920 = vmatprep.mubr.f32.mxu1 %v315_v63  ;;  %v398_v62 = vld [vmem:[%s2147_s24 + $0x550] sm:$0xff]  ;;  %v539_v63 = vld [vmem:[%s2783_s1 + $0x2b8] sm:$0xff] }
  0x7e   : > { %696 = vmatmul.mubr.f32.gmra.mxu0 %v312_v0  ;;  %921 = vmatmul.mubr.f32.gmra.mxu1 %v314_v1  ;;  %v404_v0 = vld [vmem:[%s2147_s24 + $0x580] sm:$0xff]  ;;  %v406_v1 = vld [vmem:[%s2147_s24 + $0x590] sm:$0xff] }
  0x7f   : > { %1045 = vmatprep.subr.mxu0 %v1861_v2  ;;  %1759 = vmatprep.subr.mxu1 %v1861_v2 }
  0x80   : > { %1046 = vmatpush1.msra.mxu0 %v519_v3  ;;  %1791 = vmatpush1.msra.mxu1 %v519_v3  ;;  %v403_v3 = vld [vmem:[%s2147_s24 + $0x578] sm:$0xff] }
  0x81   : > { %700 = vmatprep.mubr.f32.mxu0 %v320_v4  ;;  %925 = vmatprep.mubr.f32.mxu1 %v322_v5  ;;  %v405_v4 = vld [vmem:[%s2147_s24 + $0x588] sm:$0xff]  ;;  %v538_v5 = vld [vmem:[%s2783_s1 + $0x2b0] sm:$0xff] }
  0x82   : > { %701 = vmatmul.mubr.f32.gmra.mxu0 %v319_v6  ;;  %926 = vmatmul.mubr.f32.gmra.mxu1 %v321_v7  ;;  %v411_v6 = vld [vmem:[%s2147_s24 + $0x5b8] sm:$0xff]  ;;  %v413_v7 = vld [vmem:[%s2147_s24 + $0x5c8] sm:$0xff] }
  0x83   : > { %1047 = vmatprep.subr.mxu0 %v1861_v2  ;;  %1760 = vmatprep.subr.mxu1 %v1861_v2 }
  0x84   : > { %1048 = vmatpush1.msra.mxu0 %v518_v8  ;;  %1792 = vmatpush1.msra.mxu1 %v518_v8  ;;  %v410_v8 = vld [vmem:[%s2147_s24 + $0x5b0] sm:$0xff] }
  0x85   : > { %705 = vmatprep.mubr.f32.mxu0 %v327_v9  ;;  %930 = vmatprep.mubr.f32.mxu1 %v329_v10  ;;  %v412_v9 = vld [vmem:[%s2147_s24 + $0x5c0] sm:$0xff]  ;;  %v537_v10 = vld [vmem:[%s2783_s1 + $0x2a8] sm:$0xff] }
  0x86   : > { %706 = vmatmul.mubr.f32.gmra.mxu0 %v326_v11  ;;  %931 = vmatmul.mubr.f32.gmra.mxu1 %v328_v12  ;;  %v418_v11 = vld [vmem:[%s2147_s24 + $0x5f0] sm:$0xff]  ;;  %v420_v12 = vld [vmem:[%s2147_s24 + $0x600] sm:$0xff] }
  0x87   : > { %1049 = vmatprep.subr.mxu0 %v1861_v2  ;;  %1761 = vmatprep.subr.mxu1 %v1861_v2 }
  0x88   : > { %1050 = vmatpush1.msra.mxu0 %v517_v13  ;;  %1793 = vmatpush1.msra.mxu1 %v517_v13  ;;  %v417_v13 = vld [vmem:[%s2147_s24 + $0x5e8] sm:$0xff] }
  0x89   : > { %710 = vmatprep.mubr.f32.mxu0 %v334_v14  ;;  %935 = vmatprep.mubr.f32.mxu1 %v336_v15  ;;  %v419_v14 = vld [vmem:[%s2147_s24 + $0x5f8] sm:$0xff]  ;;  %v536_v15 = vld [vmem:[%s2783_s1 + $0x2a0] sm:$0xff] }
  0x8a   : > { %711 = vmatmul.mubr.f32.gmra.mxu0 %v333_v16  ;;  %936 = vmatmul.mubr.f32.gmra.mxu1 %v335_v17  ;;  %v425_v16 = vld [vmem:[%s2147_s24 + $0x628] sm:$0xff]  ;;  %v427_v17 = vld [vmem:[%s2147_s24 + $0x638] sm:$0xff] }
  0x8b   : > { %1051 = vmatprep.subr.mxu0 %v1861_v2  ;;  %1762 = vmatprep.subr.mxu1 %v1861_v2 }
  0x8c   : > { %1052 = vmatpush1.msra.mxu0 %v516_v18  ;;  %1794 = vmatpush1.msra.mxu1 %v516_v18  ;;  %v424_v18 = vld [vmem:[%s2147_s24 + $0x620] sm:$0xff] }
  0x8d   : > { %715 = vmatprep.mubr.f32.mxu0 %v341_v19  ;;  %940 = vmatprep.mubr.f32.mxu1 %v343_v20  ;;  %v426_v19 = vld [vmem:[%s2147_s24 + $0x630] sm:$0xff]  ;;  %v535_v20 = vld [vmem:[%s2783_s1 + $0x298] sm:$0xff] }
  0x8e   : > { %716 = vmatmul.mubr.f32.gmra.mxu0 %v340_v21  ;;  %941 = vmatmul.mubr.f32.gmra.mxu1 %v342_v22  ;;  %v432_v21 = vld [vmem:[%s2147_s24 + $0x660] sm:$0xff]  ;;  %v434_v22 = vld [vmem:[%s2147_s24 + $0x670] sm:$0xff] }
  0x8f   : > { %1053 = vmatprep.subr.mxu0 %v1861_v2  ;;  %1763 = vmatprep.subr.mxu1 %v1861_v2 }
  0x90   : > { %1054 = vmatpush2.msra.mxu0 %v547_v23  ;;  %1795 = vmatpush2.msra.mxu1 %v547_v23  ;;  %v431_v23 = vld [vmem:[%s2147_s24 + $0x658] sm:$0xff] }
  0x91   : > { %720 = vmatprep.mubr.f32.mxu0 %v348_v24  ;;  %945 = vmatprep.mubr.f32.mxu1 %v350_v25  ;;  %v433_v24 = vld [vmem:[%s2147_s24 + $0x668] sm:$0xff]  ;;  %v534_v25 = vld [vmem:[%s2783_s1 + $0x290] sm:$0xff] }
  0x92   : > { %721 = vmatmul.mubr.f32.gmra.mxu0 %v347_v26  ;;  %946 = vmatmul.mubr.f32.gmra.mxu1 %v349_v27  ;;  %v439_v26 = vld [vmem:[%s2147_s24 + $0x698] sm:$0xff]  ;;  %v441_v27 = vld [vmem:[%s2147_s24 + $0x6a8] sm:$0xff] }
  0x93   : > { %1055 = vmatprep.subr.mxu0 %v1861_v2  ;;  %1764 = vmatprep.subr.mxu1 %v1861_v2 }
  0x94   : > { %1056 = vmatpush2.msra.mxu0 %v546_v28  ;;  %1796 = vmatpush2.msra.mxu1 %v546_v28  ;;  %v438_v28 = vld [vmem:[%s2147_s24 + $0x690] sm:$0xff] }
  0x95   : > { %725 = vmatprep.mubr.f32.mxu0 %v355_v29  ;;  %950 = vmatprep.mubr.f32.mxu1 %v357_v30  ;;  %v440_v29 = vld [vmem:[%s2147_s24 + $0x6a0] sm:$0xff]  ;;  %v533_v30 = vld [vmem:[%s2783_s1 + $0x288] sm:$0xff] }
  0x96   : > { %726 = vmatmul.mubr.f32.gmra.mxu0 %v354_v31  ;;  %951 = vmatmul.mubr.f32.gmra.mxu1 %v356_v32  ;;  %v446_v31 = vld [vmem:[%s2147_s24 + $0x6d0] sm:$0xff]  ;;  %v448_v32 = vld [vmem:[%s2147_s24 + $0x6e0] sm:$0xff] }
  0x97   : > { %1057 = vmatprep.subr.mxu0 %v1861_v2  ;;  %1765 = vmatprep.subr.mxu1 %v1861_v2 }
  0x98   : > { %1058 = vmatpush2.msra.mxu0 %v545_v33  ;;  %1797 = vmatpush2.msra.mxu1 %v545_v33  ;;  %v445_v33 = vld [vmem:[%s2147_s24 + $0x6c8] sm:$0xff] }
  0x99   : > { %730 = vmatprep.mubr.f32.mxu0 %v362_v34  ;;  %955 = vmatprep.mubr.f32.mxu1 %v364_v35  ;;  %v447_v34 = vld [vmem:[%s2147_s24 + $0x6d8] sm:$0xff]  ;;  %v532_v35 = vld [vmem:[%s2783_s1 + $0x280] sm:$0xff] }
  0x9a   : > { %731 = vmatmul.mubr.f32.gmra.mxu0 %v361_v36  ;;  %956 = vmatmul.mubr.f32.gmra.mxu1 %v363_v37  ;;  %v233_v36 = vld [vmem:[%s2147_s24 + $0x28] sm:$0xff] }
  0x9b   : > { %1059 = vmatprep.subr.mxu0 %v1861_v2  ;;  %1766 = vmatprep.subr.mxu1 %v1861_v2  ;;  %v401_v37 = vld [vmem:[%s2147_s24 + $0x568] sm:$0xff] }
  0x9c   : > { %1060 = vmatpush2.msra.mxu0 %v544_v38  ;;  %1798 = vmatpush2.msra.mxu1 %v544_v38  ;;  %v232_v38 = vld [vmem:[%s2147_s24 + $0x20] sm:$0xff] }
  0x9d   : > { %735 = vmatprep.mubr.f32.mxu0 %v369_v39  ;;  %960 = vmatprep.mubr.f32.mxu1 %v371_v40  ;;  %v400_v39 = vld [vmem:[%s2147_s24 + $0x560] sm:$0xff]  ;;  %v563_v40 = vld [vmem:[%s2783_s1 + $0x378] sm:$0xff] }
  0x9e   : > { %736 = vmatmul.mubr.f32.gmra.mxu0 %v368_v41  ;;  %961 = vmatmul.mubr.f32.gmra.mxu1 %v370_v42  ;;  %v240_v41 = vld [vmem:[%s2147_s24 + $0x60] sm:$0xff] }
  0x9f   : > { %1061 = vmatprep.subr.mxu0 %v1861_v2  ;;  %1767 = vmatprep.subr.mxu1 %v1861_v2  ;;  %v408_v42 = vld [vmem:[%s2147_s24 + $0x5a0] sm:$0xff] }
  0xa0   : > { %1062 = vmatpush2.msra.mxu0 %v543_v43  ;;  %1799 = vmatpush2.msra.mxu1 %v543_v43  ;;  %v239_v43 = vld [vmem:[%s2147_s24 + $0x58] sm:$0xff] }
  0xa1   : > { %740 = vmatprep.mubr.f32.mxu0 %v376_v44  ;;  %965 = vmatprep.mubr.f32.mxu1 %v378_v45  ;;  %v407_v44 = vld [vmem:[%s2147_s24 + $0x598] sm:$0xff]  ;;  %v561_v45 = vld [vmem:[%s2783_s1 + $0x368] sm:$0xff] }
  0xa2   : > { %741 = vmatmul.mubr.f32.gmra.mxu0 %v375_v46  ;;  %966 = vmatmul.mubr.f32.gmra.mxu1 %v377_v47  ;;  %v247_v46 = vld [vmem:[%s2147_s24 + $0x98] sm:$0xff]  ;;  %v560_v47 = vld [vmem:[%s2783_s1 + $0x360] sm:$0xff] }
  0xa3   : > { %1063 = vmatprep.subr.mxu0 %v1861_v2  ;;  %1768 = vmatprep.subr.mxu1 %v1861_v2 }
  0xa4   : > { %1064 = vmatpush2.msra.mxu0 %v542_v48  ;;  %1800 = vmatpush2.msra.mxu1 %v542_v48  ;;  %v415_v48 = vld [vmem:[%s2147_s24 + $0x5d8] sm:$0xff] }
  0xa5   : > { %745 = vmatprep.mubr.f32.mxu0 %v383_v49  ;;  %970 = vmatprep.mubr.f32.mxu1 %v385_v50  ;;  %v246_v49 = vld [vmem:[%s2147_s24 + $0x90] sm:$0xff] }
  0xa6   : > { %746 = vmatmul.mubr.f32.gmra.mxu0 %v382_v51  ;;  %971 = vmatmul.mubr.f32.gmra.mxu1 %v384_v52  ;;  %v414_v50 = vld [vmem:[%s2147_s24 + $0x5d0] sm:$0xff]  ;;  %v559_v51 = vld [vmem:[%s2783_s1 + $0x358] sm:$0xff] }
  0xa7   : > { %1065 = vmatprep.subr.mxu0 %v1861_v2  ;;  %1769 = vmatprep.subr.mxu1 %v1861_v2  ;;  %v254_v52 = vld [vmem:[%s2147_s24 + $0xd0] sm:$0xff] }
  0xa8   : > { %1066 = vmatpush2.msra.mxu0 %v541_v53  ;;  %1801 = vmatpush2.msra.mxu1 %v541_v53  ;;  %v558_v53 = vld [vmem:[%s2783_s1 + $0x350] sm:$0xff] }
  0xa9   : > { %750 = vmatprep.mubr.f32.mxu0 %v390_v54  ;;  %975 = vmatprep.mubr.f32.mxu1 %v392_v55  ;;  %v422_v54 = vld [vmem:[%s2147_s24 + $0x610] sm:$0xff]  ;;  %v253_v55 = vld [vmem:[%s2147_s24 + $0xc8] sm:$0xff] }
  0xaa   : > { %751 = vmatmul.mubr.f32.gmra.mxu0 %v389_v56  ;;  %976 = vmatmul.mubr.f32.gmra.mxu1 %v391_v57  ;;  %v421_v56 = vld [vmem:[%s2147_s24 + $0x608] sm:$0xff] }
  0xab   : > { %1067 = vmatprep.subr.mxu0 %v1861_v2  ;;  %1770 = vmatprep.subr.mxu1 %v1861_v2  ;;  %v557_v57 = vld [vmem:[%s2783_s1 + $0x348] sm:$0xff] }
  0xac   : > { %1068 = vmatpush2.msra.mxu0 %v540_v58  ;;  %1802 = vmatpush2.msra.mxu1 %v540_v58  ;;  %v261_v58 = vld [vmem:[%s2147_s24 + $0x108] sm:$0xff] }
  0xad   : > { %755 = vmatprep.mubr.f32.mxu0 %v397_v59  ;;  %980 = vmatprep.mubr.f32.mxu1 %v399_v60  ;;  %v556_v59 = vld [vmem:[%s2783_s1 + $0x340] sm:$0xff]  ;;  %v429_v60 = vld [vmem:[%s2147_s24 + $0x648] sm:$0xff] }
  0xae   : > { %756 = vmatmul.mubr.f32.gmra.mxu0 %v396_v61  ;;  %981 = vmatmul.mubr.f32.gmra.mxu1 %v398_v62  ;;  %v260_v61 = vld [vmem:[%s2147_s24 + $0x100] sm:$0xff] }
  0xaf   : > { %1069 = vmatprep.subr.mxu0 %v1861_v2  ;;  %1771 = vmatprep.subr.mxu1 %v1861_v2  ;;  %v428_v62 = vld [vmem:[%s2147_s24 + $0x640] sm:$0xff] }
  0xb0   : > { %1070 = vmatpush2.msra.mxu0 %v539_v63  ;;  %1803 = vmatpush2.msra.mxu1 %v539_v63  ;;  %v555_v63 = vld [vmem:[%s2783_s1 + $0x338] sm:$0xff] }
  0xb1   : > { %760 = vmatprep.mubr.f32.mxu0 %v404_v0  ;;  %985 = vmatprep.mubr.f32.mxu1 %v406_v1  ;;  %v268_v0 = vld [vmem:[%s2147_s24 + $0x140] sm:$0xff]  ;;  %v554_v1 = vld [vmem:[%s2783_s1 + $0x330] sm:$0xff] }
  0xb2   : > { %761 = vmatmul.mubr.f32.gmra.mxu0 %v403_v3  ;;  %986 = vmatmul.mubr.f32.gmra.mxu1 %v405_v4  ;;  %v436_v3 = vld [vmem:[%s2147_s24 + $0x680] sm:$0xff]  ;;  %v267_v4 = vld [vmem:[%s2147_s24 + $0x138] sm:$0xff] }
  0xb3   : > { %1071 = vmatprep.subr.mxu0 %v1861_v2  ;;  %1772 = vmatprep.subr.mxu1 %v1861_v2 }
  0xb4   : > { %1072 = vmatpush2.msra.mxu0 %v538_v5  ;;  %1804 = vmatpush2.msra.mxu1 %v538_v5  ;;  %v435_v5 = vld [vmem:[%s2147_s24 + $0x678] sm:$0xff] }
  0xb5   : > { %765 = vmatprep.mubr.f32.mxu0 %v411_v6  ;;  %990 = vmatprep.mubr.f32.mxu1 %v413_v7  ;;  %v553_v6 = vld [vmem:[%s2783_s1 + $0x328] sm:$0xff]  ;;  %v275_v7 = vld [vmem:[%s2147_s24 + $0x178] sm:$0xff] }
  0xb6   : > { %766 = vmatmul.mubr.f32.gmra.mxu0 %v410_v8  ;;  %991 = vmatmul.mubr.f32.gmra.mxu1 %v412_v9  ;;  %v552_v8 = vld [vmem:[%s2783_s1 + $0x320] sm:$0xff]  ;;  %v443_v9 = vld [vmem:[%s2147_s24 + $0x6b8] sm:$0xff] }
  0xb7   : > { %1073 = vmatprep.subr.mxu0 %v1861_v2  ;;  %1773 = vmatprep.subr.mxu1 %v1861_v2 }
  0xb8   : > { %1074 = vmatpush2.msra.mxu0 %v537_v10  ;;  %1805 = vmatpush2.msra.mxu1 %v537_v10  ;;  %v274_v10 = vld [vmem:[%s2147_s24 + $0x170] sm:$0xff] }
  0xb9   : > { %770 = vmatprep.mubr.f32.mxu0 %v418_v11  ;;  %995 = vmatprep.mubr.f32.mxu1 %v420_v12  ;;  %v442_v11 = vld [vmem:[%s2147_s24 + $0x6b0] sm:$0xff]  ;;  %v551_v12 = vld [vmem:[%s2783_s1 + $0x318] sm:$0xff] }
  0xba   : > { %771 = vmatmul.mubr.f32.gmra.mxu0 %v417_v13  ;;  %996 = vmatmul.mubr.f32.gmra.mxu1 %v419_v14  ;;  %v282_v13 = vld [vmem:[%s2147_s24 + $0x1b0] sm:$0xff] }
  0xbb   : > { %1075 = vmatprep.subr.mxu0 %v1861_v2  ;;  %1774 = vmatprep.subr.mxu1 %v1861_v2  ;;  %v550_v14 = vld [vmem:[%s2783_s1 + $0x310] sm:$0xff] }
  0xbc   : > { %1076 = vmatpush2.msra.mxu0 %v536_v15  ;;  %1806 = vmatpush2.msra.mxu1 %v536_v15  ;;  %v450_v15 = vld [vmem:[%s2147_s24 + $0x6f0] sm:$0xff] }
  0xbd   : > { %775 = vmatprep.mubr.f32.mxu0 %v425_v16  ;;  %1000 = vmatprep.mubr.f32.mxu1 %v427_v17  ;;  %v281_v16 = vld [vmem:[%s2147_s24 + $0x1a8] sm:$0xff] }
  0xbe   : > { %776 = vmatmul.mubr.f32.gmra.mxu0 %v424_v18  ;;  %1001 = vmatmul.mubr.f32.gmra.mxu1 %v426_v19  ;;  %v449_v17 = vld [vmem:[%s2147_s24 + $0x6e8] sm:$0xff] }
  0xbf   : > { %1077 = vmatprep.subr.mxu0 %v1861_v2  ;;  %1775 = vmatprep.subr.mxu1 %v1861_v2  ;;  %v549_v18 = vld [vmem:[%s2783_s1 + $0x308] sm:$0xff] }
  0xc0   : > { %1078 = vmatpush2.msra.mxu0 %v535_v20  ;;  %1807 = vmatpush2.msra.mxu1 %v535_v20  ;;  %v289_v19 = vld [vmem:[%s2147_s24 + $0x1e8] sm:$0xff]  ;;  %v548_v20 = vld [vmem:[%s2783_s1 + $0x300] sm:$0xff] }
  0xc1   : > { %780 = vmatprep.mubr.f32.mxu0 %v432_v21  ;;  %1005 = vmatprep.mubr.f32.mxu1 %v434_v22  ;;  %v234_v21 = vld [vmem:[%s2147_s24 + $0x30] sm:$0xff]  ;;  %v288_v22 = vld [vmem:[%s2147_s24 + $0x1e0] sm:$0xff] }
  0xc2   : > { %781 = vmatmul.mubr.f32.gmra.mxu0 %v431_v23  ;;  %1006 = vmatmul.mubr.f32.gmra.mxu1 %v433_v24  ;;  %v241_v23 = vld [vmem:[%s2147_s24 + $0x68] sm:$0xff]  ;;  %v296_v24 = vld [vmem:[%s2147_s24 + $0x220] sm:$0xff] }
  0xc3   : > { %1079 = vmatprep.subr.mxu0 %v1861_v2  ;;  %1776 = vmatprep.subr.mxu1 %v1861_v2 }
  0xc4   : > { %1080 = vmatpush2.msra.mxu0 %v534_v25  ;;  %1808 = vmatpush2.msra.mxu1 %v534_v25  ;;  %v248_v25 = vld [vmem:[%s2147_s24 + $0xa0] sm:$0xff] }
  0xc5   : > { %785 = vmatprep.mubr.f32.mxu0 %v439_v26  ;;  %1010 = vmatprep.mubr.f32.mxu1 %v441_v27  ;;  %v295_v26 = vld [vmem:[%s2147_s24 + $0x218] sm:$0xff] }
  0xc6   : > { %786 = vmatmul.mubr.f32.gmra.mxu0 %v438_v28  ;;  %1011 = vmatmul.mubr.f32.gmra.mxu1 %v440_v29  ;;  %v255_v27 = vld [vmem:[%s2147_s24 + $0xd8] sm:$0xff]  ;;  %v262_v29 = vld [vmem:[%s2147_s24 + $0x110] sm:$0xff] }
  0xc7   : > { %1081 = vmatprep.subr.mxu0 %v1861_v2  ;;  %1777 = vmatprep.subr.mxu1 %v1861_v2  ;;  %v303_v28 = vld [vmem:[%s2147_s24 + $0x258] sm:$0xff] }
  0xc8   : > { %1082 = vmatpush2.msra.mxu0 %v533_v30  ;;  %1809 = vmatpush2.msra.mxu1 %v533_v30  ;;  %v302_v30 = vld [vmem:[%s2147_s24 + $0x250] sm:$0xff] }
  0xc9   : > { %790 = vmatprep.mubr.f32.mxu0 %v446_v31  ;;  %1015 = vmatprep.mubr.f32.mxu1 %v448_v32  ;;  %v269_v31 = vld [vmem:[%s2147_s24 + $0x148] sm:$0xff]  ;;  %v310_v32 = vld [vmem:[%s2147_s24 + $0x290] sm:$0xff] }
  0xca   : > { %791 = vmatmul.mubr.f32.gmra.mxu0 %v445_v33  ;;  %1016 = vmatmul.mubr.f32.gmra.mxu1 %v447_v34  ;;  %v276_v33 = vld [vmem:[%s2147_s24 + $0x180] sm:$0xff]  ;;  %v309_v34 = vld [vmem:[%s2147_s24 + $0x288] sm:$0xff] }
  0xcb   : > { %1083 = vmatprep.subr.mxu0 %v1861_v2  ;;  %1778 = vmatprep.subr.mxu1 %v1861_v2  ;;  %v562_v2 = vld [vmem:[%s2783_s1 + $0x370] sm:$0xff] }
  0xcc   : > { %1084 = vmatpush2.msra.mxu0 %v532_v35  ;;  %1810 = vmatpush2.msra.mxu1 %v532_v35  ;;  %v283_v35 = vld [vmem:[%s2147_s24 + $0x1b8] sm:$0xff] }
  0xcd   : > { %1085 = vmatprep.mubr.f32.mxu0 %v233_v36  ;;  %1205 = vmatprep.mubr.f32.mxu1 %v401_v37  ;;  %v317_v36 = vld [vmem:[%s2147_s24 + $0x2c8] sm:$0xff]  ;;  %v290_v37 = vld [vmem:[%s2147_s24 + $0x1f0] sm:$0xff] }
  0xce   : > { %1086 = vmatmul.mubr.f32.vlgmr.msra.gmra.mxu0 %v232_v38  ;;  %1206 = vmatmul.mubr.f32.vlgmr.msra.gmra.mxu1 %v400_v39  ;;  %v316_v38 = vld [vmem:[%s2147_s24 + $0x2c0] sm:$0xff]  ;;  %v297_v39 = vld [vmem:[%s2147_s24 + $0x228] sm:$0xff] }
  0xcf   : > { %1667 = vmatprep.subr.mxu1 %v563_v40  ;;  %1090 = vmatprep.mubr.f32.mxu0 %v240_v41  ;;  %v304_v41 = vld [vmem:[%s2147_s24 + $0x260] sm:$0xff] }
  0xd0   : > { %1668 = vmatpush3.msra.mxu1 %v563_v40  ;;  %1210 = vmatprep.mubr.f32.mxu1 %v408_v42  ;;  %v324_v40 = vld [vmem:[%s2147_s24 + $0x300] sm:$0xff]  ;;  %v323_v42 = vld [vmem:[%s2147_s24 + $0x2f8] sm:$0xff] }
  0xd1   : > { %1669 = vmatprep.subr.mxu1 %v562_v2 }
  0xd2   : > { %1670 = vmatpush3.msra.mxu1 %v562_v2  ;;  %1091 = vmatmul.mubr.f32.gmra.mxu0 %v239_v43  ;;  %v311_v2 = vld [vmem:[%s2147_s24 + $0x298] sm:$0xff] }
  0xd3   : > { %1211 = vmatmul.mubr.f32.gmra.mxu1 %v407_v44  ;;  %1671 = vmatprep.subr.mxu1 %v561_v45  ;;  %v331_v43 = vld [vmem:[%s2147_s24 + $0x338] sm:$0xff]  ;;  %v318_v44 = vld [vmem:[%s2147_s24 + $0x2d0] sm:$0xff] }
  0xd4   : > { %1672 = vmatpush3.msra.mxu1 %v561_v45  ;;  %1095 = vmatprep.mubr.f32.mxu0 %v247_v46  ;;  %v330_v45 = vld [vmem:[%s2147_s24 + $0x330] sm:$0xff]  ;;  %v325_v46 = vld [vmem:[%s2147_s24 + $0x308] sm:$0xff] }
  0xd5   : > { %1673 = vmatprep.subr.mxu1 %v560_v47  ;;  %1215 = vmatprep.mubr.f32.mxu1 %v415_v48  ;;  %v332_v48 = vld [vmem:[%s2147_s24 + $0x340] sm:$0xff] }
  0xd6   : > { %1674 = vmatpush3.msra.mxu1 %v560_v47  ;;  %1096 = vmatmul.mubr.f32.gmra.mxu0 %v246_v49  ;;  %v338_v47 = vld [vmem:[%s2147_s24 + $0x370] sm:$0xff]  ;;  %v337_v49 = vld [vmem:[%s2147_s24 + $0x368] sm:$0xff] }
  0xd7   : > { %1216 = vmatmul.mubr.f32.gmra.mxu1 %v414_v50  ;;  %1675 = vmatprep.subr.mxu1 %v559_v51  ;;  %v339_v50 = vld [vmem:[%s2147_s24 + $0x378] sm:$0xff] }
  0xd8   : > { %1676 = vmatpush3.msra.mxu1 %v559_v51  ;;  %1100 = vmatprep.mubr.f32.mxu0 %v254_v52  ;;  %v345_v51 = vld [vmem:[%s2147_s24 + $0x3a8] sm:$0xff]  ;;  %v346_v52 = vld [vmem:[%s2147_s24 + $0x3b0] sm:$0xff] }
  0xd9   : > { %1677 = vmatprep.subr.mxu1 %v558_v53  ;;  %1220 = vmatprep.mubr.f32.mxu1 %v422_v54  ;;  %v2573_v54 = vld [vmem:[%s2784_s2] ss:$0 sm:$0xff] }
  0xda   : > { %1678 = vmatpush3.msra.mxu1 %v558_v53  ;;  %1101 = vmatmul.mubr.f32.gmra.mxu0 %v253_v55  ;;  %v344_v53 = vld [vmem:[%s2147_s24 + $0x3a0] sm:$0xff]  ;;  %v353_v55 = vld [vmem:[%s2147_s24 + $0x3e8] sm:$0xff] }
  0xdb   : > { %1221 = vmatmul.mubr.f32.gmra.mxu1 %v421_v56  ;;  %1679 = vmatprep.subr.mxu1 %v557_v57  ;;  %v352_v56 = vld [vmem:[%s2147_s24 + $0x3e0] sm:$0xff] }
  0xdc   : > { %1680 = vmatpush3.msra.mxu1 %v557_v57  ;;  %1105 = vmatprep.mubr.f32.mxu0 %v261_v58  ;;  %v360_v57 = vld [vmem:[%s2147_s24 + $0x420] sm:$0xff] }
  0xdd   : > { %1681 = vmatprep.subr.mxu1 %v556_v59  ;;  %1225 = vmatprep.mubr.f32.mxu1 %v429_v60 }
  0xde   : > { %1682 = vmatpush3.msra.mxu1 %v556_v59  ;;  %1106 = vmatmul.mubr.f32.gmra.mxu0 %v260_v61  ;;  %v351_v61 = vld [vmem:[%s2147_s24 + $0x3d8] sm:$0xff] }
  0xdf   : > { %1226 = vmatmul.mubr.f32.gmra.mxu1 %v428_v62  ;;  %1683 = vmatprep.subr.mxu1 %v555_v63 }
  0xe0   : > { %1684 = vmatpush3.msra.mxu1 %v555_v63  ;;  %1110 = vmatprep.mubr.f32.mxu0 %v268_v0  ;;  %v367_v0 = vld [vmem:[%s2147_s24 + $0x458] sm:$0xff] }
  0xe1   : > { %1685 = vmatprep.subr.mxu1 %v554_v1  ;;  %1230 = vmatprep.mubr.f32.mxu1 %v436_v3 }
  0xe2   : > { %1686 = vmatpush3.msra.mxu1 %v554_v1  ;;  %1111 = vmatmul.mubr.f32.gmra.mxu0 %v267_v4  ;;  %v359_v1 = vld [vmem:[%s2147_s24 + $0x418] sm:$0xff]  ;;  %v374_v4 = vld [vmem:[%s2147_s24 + $0x490] sm:$0xff] }
  0xe3   : > { %1231 = vmatmul.mubr.f32.gmra.mxu1 %v435_v5  ;;  %1687 = vmatprep.subr.mxu1 %v553_v6 }
  0xe4   : > { %1688 = vmatpush3.msra.mxu1 %v553_v6  ;;  %1115 = vmatprep.mubr.f32.mxu0 %v275_v7 }
  0xe5   : > { %1689 = vmatprep.subr.mxu1 %v552_v8  ;;  %1235 = vmatprep.mubr.f32.mxu1 %v443_v9 }
  0xe6   : > { %1690 = vmatpush3.msra.mxu1 %v552_v8  ;;  %1116 = vmatmul.mubr.f32.gmra.mxu0 %v274_v10  ;;  %v358_v8 = vld [vmem:[%s2147_s24 + $0x410] sm:$0xff] }
  0xe7   : > { %1236 = vmatmul.mubr.f32.gmra.mxu1 %v442_v11  ;;  %1691 = vmatprep.subr.mxu1 %v551_v12  ;;  %v381_v11 = vld [vmem:[%s2147_s24 + $0x4c8] sm:$0xff] }
  0xe8   : > { %1692 = vmatpush3.msra.mxu1 %v551_v12  ;;  %1120 = vmatprep.mubr.f32.mxu0 %v282_v13  ;;  %v366_v12 = vld [vmem:[%s2147_s24 + $0x450] sm:$0xff] }
  0xe9   : > { %1693 = vmatprep.subr.mxu1 %v550_v14  ;;  %1240 = vmatprep.mubr.f32.mxu1 %v450_v15 }
  0xea   : > { %1694 = vmatpush3.msra.mxu1 %v550_v14  ;;  %1121 = vmatmul.mubr.f32.gmra.mxu0 %v281_v16  ;;  %v388_v14 = vld [vmem:[%s2147_s24 + $0x500] sm:$0xff] }
  0xeb   : > { %1241 = vmatmul.mubr.f32.gmra.mxu1 %v449_v17  ;;  %1695 = vmatprep.subr.mxu1 %v549_v18 }
  0xec   : > { %1696 = vmatpush3.msra.mxu1 %v549_v18  ;;  %1125 = vmatprep.mubr.f32.mxu0 %v289_v19  ;;  %v365_v18 = vld [vmem:[%s2147_s24 + $0x448] sm:$0xff] }
  0xed   : > { %1697 = vmatprep.subr.mxu1 %v548_v20  ;;  %1699 = vmatprep.mubr.f32.mxu1 %v234_v21  ;;  %v395_v21 = vld [vmem:[%s2147_s24 + $0x538] sm:$0xff] }
  0xee   : > { %1698 = vmatpush3.msra.mxu1 %v548_v20  ;;  %1126 = vmatmul.mubr.f32.gmra.mxu0 %v288_v22  ;;  %v373_v22 = vld [vmem:[%s2147_s24 + $0x488] sm:$0xff] }
  0xef   : > { %1700 = vmatmul.mubr.f32.vlgmr.msra.gmra.mxu1 %v241_v23  ;;  %1130 = vmatprep.mubr.f32.mxu0 %v296_v24  ;;  %v402_v24 = vld [vmem:[%s2147_s24 + $0x570] sm:$0xff] }
  0xf0   : > { %1702 = vmatprep.mubr.f32.mxu1 %v248_v25 }
  0xf2   : > { %1131 = vmatmul.mubr.f32.gmra.mxu0 %v295_v26 }
  0xf3   : > { %1703 = vmatmul.mubr.f32.gmra.mxu1 %v255_v27  ;;  %1135 = vmatprep.mubr.f32.mxu0 %v303_v28  ;;  %v372_v28 = vld [vmem:[%s2147_s24 + $0x480] sm:$0xff] }
  0xf4   : > { %1705 = vmatprep.mubr.f32.mxu1 %v262_v29 }
  0xf6   : > { %1136 = vmatmul.mubr.f32.gmra.mxu0 %v302_v30 }
  0xf7   : > { %1706 = vmatmul.mubr.f32.gmra.mxu1 %v269_v31  ;;  %1140 = vmatprep.mubr.f32.mxu0 %v310_v32  ;;  %v409_v31 = vld [vmem:[%s2147_s24 + $0x5a8] sm:$0xff]  ;;  %v380_v32 = vld [vmem:[%s2147_s24 + $0x4c0] sm:$0xff] }
  0xf8   : > { %1708 = vmatprep.mubr.f32.mxu1 %v276_v33 }
  0xfa   : > { %1141 = vmatmul.mubr.f32.gmra.mxu0 %v309_v34  ;;  %v416_v34 = vld [vmem:[%s2147_s24 + $0x5e0] sm:$0xff] }
  0xfb   : > { %1709 = vmatmul.mubr.f32.gmra.mxu1 %v283_v35  ;;  %1145 = vmatprep.mubr.f32.mxu0 %v317_v36 }
  0xfc   : > { %1711 = vmatprep.mubr.f32.mxu1 %v290_v37 }
  0xfe   : > { %1146 = vmatmul.mubr.f32.gmra.mxu0 %v316_v38  ;;  %v379_v38 = vld [vmem:[%s2147_s24 + $0x4b8] sm:$0xff] }
  0xff   : > { %1712 = vmatmul.mubr.f32.gmra.mxu1 %v297_v39  ;;  %1150 = vmatprep.mubr.f32.mxu0 %v324_v40 }
 0x100   : > { %1714 = vmatprep.mubr.f32.mxu1 %v304_v41  ;;  %v423_v41 = vld [vmem:[%s2147_s24 + $0x618] sm:$0xff] }
 0x102   : > { %1151 = vmatmul.mubr.f32.gmra.mxu0 %v323_v42  ;;  %v387_v42 = vld [vmem:[%s2147_s24 + $0x4f8] sm:$0xff] }
 0x103   : > { %1715 = vmatmul.mubr.f32.gmra.mxu1 %v311_v2  ;;  %1155 = vmatprep.mubr.f32.mxu0 %v331_v43  ;;  %v430_v43 = vld [vmem:[%s2147_s24 + $0x650] sm:$0xff] }
 0x104   : > { %1717 = vmatprep.mubr.f32.mxu1 %v318_v44 }
 0x106   : > { %1156 = vmatmul.mubr.f32.gmra.mxu0 %v330_v45 }
 0x107   : > { %1718 = vmatmul.mubr.f32.gmra.mxu1 %v325_v46  ;;  %1160 = vmatprep.mubr.f32.mxu0 %v338_v47  ;;  %v386_v47 = vld [vmem:[%s2147_s24 + $0x4f0] sm:$0xff] }
 0x108   : > { %1720 = vmatprep.mubr.f32.mxu1 %v332_v48 }
 0x10a   : > { %1161 = vmatmul.mubr.f32.gmra.mxu0 %v337_v49 }
 0x10b   : > { %1721 = vmatmul.mubr.f32.gmra.mxu1 %v339_v50  ;;  %1165 = vmatprep.mubr.f32.mxu0 %v345_v51  ;;  %v437_v50 = vld [vmem:[%s2147_s24 + $0x688] sm:$0xff]  ;;  %v394_v51 = vld [vmem:[%s2147_s24 + $0x530] sm:$0xff] }
 0x10c   : > { %1723 = vmatprep.mubr.f32.mxu1 %v346_v52 }
 0x10e   : > { %v637_v58 = vpop.f32.mrf.mxu0  ;;  %v862_v59 = vpop.f32.mrf.mxu1  ;;  %1166 = vmatmul.mubr.f32.gmra.mxu0 %v344_v53  ;;  %v444_v53 = vld [vmem:[%s2147_s24 + $0x6c0] sm:$0xff] }
 0x10f   : > { %v638_v60 = vadd.f32 %v2573_v54, %v637_v58  ;;  %1724 = vmatmul.mubr.f32.gmra.mxu1 %v353_v55  ;;  %1170 = vmatprep.mubr.f32.mxu0 %v352_v56  ;;  %v393_v58 = vld [vmem:[%s2147_s24 + $0x528] sm:$0xff] }
 0x110   : > { %v639_v62 = vpop.f32.mrf.mxu0  ;;  %v864_v63 = vpop.f32.mrf.mxu1  ;;  %1726 = vmatprep.mubr.f32.mxu1 %v360_v57 }
 0x111   : > { %v2582_v3 = vadd.f32 %v862_v59, %v638_v60 }
 0x112   : > { %v642_v5 = vpop.f32.mrf.mxu0  ;;  %v867_v6 = vpop.f32.mrf.mxu1  ;;  %1171 = vmatmul.mubr.f32.gmra.mxu0 %v351_v61  ;;  %v451_v61 = vld [vmem:[%s2147_s24 + $0x6f8] sm:$0xff]  ;;  %s1615_s24 = sshll.u32 %s2791_s16, 3 }
 0x113   : > { %v643_v7 = vadd.f32 %v2573_v54, %v642_v5  ;;  %1727 = vmatmul.mubr.f32.gmra.mxu1 %v367_v0  ;;  %1175 = vmatprep.mubr.f32.mxu0 %v359_v1  ;;  %s2707_s22 = scalar_lea.vmem %s2785_s3, %s1615_s24 }
 0x114   : > { %v644_v9 = vpop.f32.mrf.mxu0  ;;  %v869_v10 = vpop.f32.mrf.mxu1  ;;  %1729 = vmatprep.mubr.f32.mxu1 %v374_v4 }
 0x115   : > { %v2589_v13 = vadd.f32 %v867_v6, %v643_v7 }
 0x116   : > { %v647_v15 = vpop.f32.mrf.mxu0  ;;  %v872_v16 = vpop.f32.mrf.mxu1  ;;  %1176 = vmatmul.mubr.f32.gmra.mxu0 %v358_v8 }
 0x117   : > { %v648_v17 = vadd.f32 %v2573_v54, %v647_v15  ;;  %1730 = vmatmul.mubr.f32.gmra.mxu1 %v381_v11  ;;  %1180 = vmatprep.mubr.f32.mxu0 %v366_v12 }
 0x118   : > { %v649_v19 = vpop.f32.mrf.mxu0  ;;  %v874_v20 = vpop.f32.mrf.mxu1  ;;  %1732 = vmatprep.mubr.f32.mxu1 %v388_v14 }
 0x119   : > { %v2596_v23 = vadd.f32 %v872_v16, %v648_v17 }
 0x11a   : > { %v652_v25 = vpop.f32.mrf.mxu0  ;;  %v877_v26 = vpop.f32.mrf.mxu1  ;;  %1181 = vmatmul.mubr.f32.gmra.mxu0 %v365_v18 }
 0x11b   : > { %v653_v27 = vadd.f32 %v2573_v54, %v652_v25  ;;  %1733 = vmatmul.mubr.f32.gmra.mxu1 %v395_v21  ;;  %1185 = vmatprep.mubr.f32.mxu0 %v373_v22 }
 0x11c   : > { %v654_v29 = vpop.f32.mrf.mxu0  ;;  %v879_v30 = vpop.f32.mrf.mxu1  ;;  %1735 = vmatprep.mubr.f32.mxu1 %v402_v24 }
 0x11d   : > { %v2603_v33 = vadd.f32 %v877_v26, %v653_v27 }
 0x11e   : > { %v657_v35 = vpop.f32.mrf.mxu0  ;;  %v882_v36 = vpop.f32.mrf.mxu1  ;;  %1186 = vmatmul.mubr.f32.gmra.mxu0 %v372_v28 }
 0x11f   : > { %v658_v37 = vadd.f32 %v2573_v54, %v657_v35  ;;  %1736 = vmatmul.mubr.f32.gmra.mxu1 %v409_v31  ;;  %1190 = vmatprep.mubr.f32.mxu0 %v380_v32 }
 0x120   : > { %v659_v39 = vpop.f32.mrf.mxu0  ;;  %v884_v40 = vpop.f32.mrf.mxu1  ;;  %1738 = vmatprep.mubr.f32.mxu1 %v416_v34 }
 0x121   : > { %v2610_v2 = vadd.f32 %v882_v36, %v658_v37 }
 0x122   : > { %v662_v44 = vpop.f32.mrf.mxu0  ;;  %v887_v45 = vpop.f32.mrf.mxu1  ;;  %1191 = vmatmul.mubr.f32.gmra.mxu0 %v379_v38 }
 0x123   : > { %v663_v46 = vadd.f32 %v2573_v54, %v662_v44  ;;  %1739 = vmatmul.mubr.f32.gmra.mxu1 %v423_v41  ;;  %1195 = vmatprep.mubr.f32.mxu0 %v387_v42 }
 0x124   : > { %v664_v48 = vpop.f32.mrf.mxu0  ;;  %v889_v49 = vpop.f32.mrf.mxu1  ;;  %1741 = vmatprep.mubr.f32.mxu1 %v430_v43 }
 0x125   : > { %v2617_v52 = vadd.f32 %v887_v45, %v663_v46 }
 0x126   : > { %v667_v55 = vpop.f32.mrf.mxu0  ;;  %v892_v56 = vpop.f32.mrf.mxu1  ;;  %1196 = vmatmul.mubr.f32.gmra.mxu0 %v386_v47 }
 0x127   : > { %v668_v57 = vadd.f32 %v2573_v54, %v667_v55  ;;  %1742 = vmatmul.mubr.f32.gmra.mxu1 %v437_v50  ;;  %1200 = vmatprep.mubr.f32.mxu0 %v394_v51 }
 0x128   : > { %v669_v59 = vpop.f32.mrf.mxu0  ;;  %v894_v60 = vpop.f32.mrf.mxu1  ;;  %1744 = vmatprep.mubr.f32.mxu1 %v444_v53 }
 0x129   : > { %v2623_v62 = vadd.f32 %v892_v56, %v668_v57 }
 0x12a   : > { %v672_v63 = vpop.f32.mrf.mxu0  ;;  %v897_v0 = vpop.f32.mrf.mxu1  ;;  %1201 = vmatmul.mubr.f32.gmra.mxu0 %v393_v58 }
 0x12b   : > { %v673_v1 = vadd.f32 %v2573_v54, %v672_v63  ;;  %1745 = vmatmul.mubr.f32.gmra.mxu1 %v451_v61 }
 0x12c   : > { %v674_v4 = vpop.f32.mrf.mxu0  ;;  %v899_v5 = vpop.f32.mrf.mxu1 }
 0x12d   : > { %v2626_v6 = vadd.f32 %v897_v0, %v673_v1 }
 0x12e   : > { %v677_v7 = vpop.f32.mrf.mxu0  ;;  %v902_v8 = vpop.f32.mrf.mxu1 }
 0x12f   : > { %v678_v9 = vadd.f32 %v2573_v54, %v677_v7 }
 0x130   : > { %v679_v10 = vpop.f32.mrf.mxu0  ;;  %v904_v11 = vpop.f32.mrf.mxu1 }
 0x131   : > { %v2629_v12 = vadd.f32 %v902_v8, %v678_v9 }
 0x132   : > { %v682_v14 = vpop.f32.mrf.mxu0  ;;  %v907_v15 = vpop.f32.mrf.mxu1 }
 0x133   : > { %v683_v16 = vadd.f32 %v2573_v54, %v682_v14 }
 0x134   : > { %v684_v17 = vpop.f32.mrf.mxu0  ;;  %v909_v18 = vpop.f32.mrf.mxu1 }
 0x135   : > { %v2632_v19 = vadd.f32 %v907_v15, %v683_v16 }
 0x136   : > { %v687_v20 = vpop.f32.mrf.mxu0  ;;  %v912_v21 = vpop.f32.mrf.mxu1 }
 0x137   : > { %v688_v22 = vadd.f32 %v2573_v54, %v687_v20 }
 0x138   : > { %v689_v24 = vpop.f32.mrf.mxu0  ;;  %v914_v25 = vpop.f32.mrf.mxu1 }
 0x139   : > { %v2635_v26 = vadd.f32 %v912_v21, %v688_v22 }
 0x13a   : > { %v692_v27 = vpop.f32.mrf.mxu0  ;;  %v917_v28 = vpop.f32.mrf.mxu1 }
 0x13b   : > { %v693_v29 = vadd.f32 %v2573_v54, %v692_v27 }
 0x13c   : > { %v694_v30 = vpop.f32.mrf.mxu0  ;;  %v919_v31 = vpop.f32.mrf.mxu1 }
 0x13d   : > { %v2638_v32 = vadd.f32 %v917_v28, %v693_v29 }
 0x13e   : > { %v697_v34 = vpop.f32.mrf.mxu0  ;;  %v922_v35 = vpop.f32.mrf.mxu1 }
 0x13f   : > { %v698_v36 = vadd.f32 %v2573_v54, %v697_v34 }
 0x140   : > { %v699_v37 = vpop.f32.mrf.mxu0  ;;  %v924_v38 = vpop.f32.mrf.mxu1 }
 0x141   : > { %v2641_v39 = vadd.f32 %v922_v35, %v698_v36 }
 0x142   : > { %v702_v40 = vpop.f32.mrf.mxu0  ;;  %v927_v41 = vpop.f32.mrf.mxu1 }
 0x143   : > { %v703_v42 = vadd.f32 %v2573_v54, %v702_v40 }
 0x144   : > { %v704_v43 = vpop.f32.mrf.mxu0  ;;  %v929_v44 = vpop.f32.mrf.mxu1 }
 0x145   : > { %v2644_v45 = vadd.f32 %v927_v41, %v703_v42 }
 0x146   : > { %v707_v46 = vpop.f32.mrf.mxu0  ;;  %v932_v47 = vpop.f32.mrf.mxu1 }
 0x147   : > { %v708_v48 = vadd.f32 %v2573_v54, %v707_v46 }
 0x148   : > { %v709_v49 = vpop.f32.mrf.mxu0  ;;  %v934_v50 = vpop.f32.mrf.mxu1 }
 0x149   : > { %v2647_v51 = vadd.f32 %v932_v47, %v708_v48 }
 0x14a   : > { %v712_v53 = vpop.f32.mrf.mxu0  ;;  %v937_v55 = vpop.f32.mrf.mxu1 }
 0x14b   : > { %v713_v56 = vadd.f32 %v2573_v54, %v712_v53 }
 0x14c   : > { %v714_v57 = vpop.f32.mrf.mxu0  ;;  %v939_v58 = vpop.f32.mrf.mxu1 }
 0x14d   : > { %v2650_v59 = vadd.f32 %v937_v55, %v713_v56 }
 0x14e   : > { %v717_v60 = vpop.f32.mrf.mxu0  ;;  %v942_v61 = vpop.f32.mrf.mxu1 }
 0x14f   : > { %v718_v63 = vadd.f32 %v2573_v54, %v717_v60 }
 0x150   : > { %v719_v0 = vpop.f32.mrf.mxu0  ;;  %v944_v1 = vpop.f32.mrf.mxu1 }
 0x151   : > { %v2653_v4 = vadd.f32 %v942_v61, %v718_v63 }
 0x152   : > { %v722_v5 = vpop.f32.mrf.mxu0  ;;  %v947_v7 = vpop.f32.mrf.mxu1 }
 0x153   : > { %v723_v8 = vadd.f32 %v2573_v54, %v722_v5 }
 0x154   : > { %v724_v9 = vpop.f32.mrf.mxu0  ;;  %v949_v10 = vpop.f32.mrf.mxu1 }
 0x155   : > { %v2656_v11 = vadd.f32 %v947_v7, %v723_v8 }
 0x156   : > { %v727_v14 = vpop.f32.mrf.mxu0  ;;  %v952_v15 = vpop.f32.mrf.mxu1 }
 0x157   : > { %v728_v16 = vadd.f32 %v2573_v54, %v727_v14 }
 0x158   : > { %v729_v17 = vpop.f32.mrf.mxu0  ;;  %v954_v18 = vpop.f32.mrf.mxu1 }
 0x159   : > { %v2659_v20 = vadd.f32 %v952_v15, %v728_v16 }
 0x15a   : > { %v732_v21 = vpop.f32.mrf.mxu0  ;;  %v957_v22 = vpop.f32.mrf.mxu1 }
 0x15b   : > { %v733_v24 = vadd.f32 %v2573_v54, %v732_v21 }
 0x15c   : > { %v734_v25 = vpop.f32.mrf.mxu0  ;;  %v959_v27 = vpop.f32.mrf.mxu1 }
 0x15d   : > { %v2662_v28 = vadd.f32 %v957_v22, %v733_v24 }
 0x15e   : > { %v737_v29 = vpop.f32.mrf.mxu0  ;;  %v962_v30 = vpop.f32.mrf.mxu1 }
 0x15f   : > { %v738_v31 = vadd.f32 %v2573_v54, %v737_v29 }
 0x160   : > { %v739_v34 = vpop.f32.mrf.mxu0  ;;  %v964_v35 = vpop.f32.mrf.mxu1 }
 0x161   : > { %v2665_v36 = vadd.f32 %v962_v30, %v738_v31 }
 0x162   : > { %v742_v37 = vpop.f32.mrf.mxu0  ;;  %v967_v38 = vpop.f32.mrf.mxu1 }
 0x163   : > { %v743_v40 = vadd.f32 %v2573_v54, %v742_v37 }
 0x164   : > { %v744_v41 = vpop.f32.mrf.mxu0  ;;  %v969_v42 = vpop.f32.mrf.mxu1 }
 0x165   : > { %v2668_v43 = vadd.f32 %v967_v38, %v743_v40 }
 0x166   : > { %v747_v44 = vpop.f32.mrf.mxu0  ;;  %v972_v46 = vpop.f32.mrf.mxu1 }
 0x167   : > { %v748_v47 = vadd.f32 %v2573_v54, %v747_v44 }
 0x168   : > { %v749_v48 = vpop.f32.mrf.mxu0  ;;  %v974_v49 = vpop.f32.mrf.mxu1 }
 0x169   : > { %v2671_v50 = vadd.f32 %v972_v46, %v748_v47 }
 0x16a   : > { %v752_v53 = vpop.f32.mrf.mxu0  ;;  %v977_v55 = vpop.f32.mrf.mxu1 }
 0x16b   : > { %v753_v56 = vadd.f32 %v2573_v54, %v752_v53 }
 0x16c   : > { %v754_v57 = vpop.f32.mrf.mxu0  ;;  %v979_v58 = vpop.f32.mrf.mxu1 }
 0x16d   : > { %v2674_v60 = vadd.f32 %v977_v55, %v753_v56 }
 0x16e   : > { %v757_v61 = vpop.f32.mrf.mxu0  ;;  %v982_v63 = vpop.f32.mrf.mxu1 }
 0x16f   : > { %v758_v0 = vadd.f32 %v2573_v54, %v757_v61 }
 0x170   : > { %v759_v1 = vpop.f32.mrf.mxu0  ;;  %v984_v5 = vpop.f32.mrf.mxu1 }
 0x171   : > { %v983_v7 = vadd.f32 %v982_v63, %v758_v0 }
 0x172   : > { %v762_v8 = vpop.f32.mrf.mxu0  ;;  %v987_v9 = vpop.f32.mrf.mxu1 }
 0x173   : > { %v763_v10 = vadd.f32 %v2573_v54, %v762_v8 }
 0x174   : > { %v764_v14 = vpop.f32.mrf.mxu0  ;;  %v989_v15 = vpop.f32.mrf.mxu1 }
 0x175   : > { %v988_v16 = vadd.f32 %v987_v9, %v763_v10 }
 0x176   : > { %v767_v17 = vpop.f32.mrf.mxu0  ;;  %v992_v18 = vpop.f32.mrf.mxu1 }
 0x177   : > { %v768_v21 = vadd.f32 %v2573_v54, %v767_v17 }
 0x178   : > { %v769_v22 = vpop.f32.mrf.mxu0  ;;  %v994_v24 = vpop.f32.mrf.mxu1 }
 0x179   : > { %v993_v25 = vadd.f32 %v992_v18, %v768_v21 }
 0x17a   : > { %v772_v27 = vpop.f32.mrf.mxu0  ;;  %v997_v29 = vpop.f32.mrf.mxu1 }
 0x17b   : > { %v773_v30 = vadd.f32 %v2573_v54, %v772_v27 }
 0x17c   : > { %v774_v31 = vpop.f32.mrf.mxu0  ;;  %v999_v34 = vpop.f32.mrf.mxu1 }
 0x17d   : > { %v998_v35 = vadd.f32 %v997_v29, %v773_v30 }
 0x17e   : > { %v777_v37 = vpop.f32.mrf.mxu0  ;;  %v1002_v38 = vpop.f32.mrf.mxu1 }
 0x17f   : > { %v778_v40 = vadd.f32 %v2573_v54, %v777_v37 }
 0x180   : > { %v779_v41 = vpop.f32.mrf.mxu0  ;;  %v1004_v42 = vpop.f32.mrf.mxu1 }
 0x181   : > { %v1003_v44 = vadd.f32 %v1002_v38, %v778_v40 }
 0x182   : > { %v782_v46 = vpop.f32.mrf.mxu0  ;;  %v1007_v47 = vpop.f32.mrf.mxu1 }
 0x183   : > { %v783_v48 = vadd.f32 %v2573_v54, %v782_v46 }
 0x184   : > { %v784_v49 = vpop.f32.mrf.mxu0  ;;  %v1009_v53 = vpop.f32.mrf.mxu1 }
 0x185   : > { %v1008_v55 = vadd.f32 %v1007_v47, %v783_v48 }
 0x186   : > { %v787_v56 = vpop.f32.mrf.mxu0  ;;  %v1012_v57 = vpop.f32.mrf.mxu1 }
 0x187   : > { %v788_v58 = vadd.f32 %v2573_v54, %v787_v56 }
 0x188   : > { %v789_v61 = vpop.f32.mrf.mxu0  ;;  %v1014_v63 = vpop.f32.mrf.mxu1 }
 0x189   : > { %v1013_v0 = vadd.f32 %v1012_v57, %v788_v58 }
 0x18a   : > { %v792_v1 = vpop.f32.mrf.mxu0  ;;  %v1017_v5 = vpop.f32.mrf.mxu1 }
 0x18b   : > { %v793_v8 = vadd.f32 %v2573_v54, %v792_v1 }
 0x18c   : > { %v794_v9 = vpop.f32.mrf.mxu0  ;;  %v1019_v10 = vpop.f32.mrf.mxu1 }
 0x18d   : > { %v2684_v14 = vadd.f32 %v1017_v5, %v793_v8 }
 0x18e   : > { %v1087_v15 = vpop.f32.mrf.mxu0  ;;  %v1207_v17 = vpop.f32.mrf.mxu1 }
 0x18f   : > { %v2686_v18 = vadd.f32 %v1207_v17, %v983_v7 }
 0x190   : > { %v1089_v21 = vpop.f32.mrf.mxu0  ;;  %v1209_v22 = vpop.f32.mrf.mxu1 }
 0x192   : > { %v1092_v24 = vpop.f32.mrf.mxu0 }
 0x193   : > { %v1212_v27 = vpop.f32.mrf.mxu1  ;;  %v1093_v22 = vadd.f32 %v1092_v24, %v2589_v13 }
 0x194   : > { %v2688_v29 = vadd.f32 %v1212_v27, %v988_v16  ;;  %v1094_v30 = vpop.f32.mrf.mxu0 }
 0x195   : > { %v1214_v31 = vpop.f32.mrf.mxu1 }
 0x196   : > { %v1097_v34 = vpop.f32.mrf.mxu0 }
 0x197   : > { %v1217_v37 = vpop.f32.mrf.mxu1 }
 0x198   : > { %v2690_v38 = vadd.f32 %v1217_v37, %v993_v25  ;;  %v1099_v54 = vpop.f32.mrf.mxu0 }
 0x199   : > { %v1219_v40 = vpop.f32.mrf.mxu1 }
 0x19a   : > { %v1102_v41 = vpop.f32.mrf.mxu0 }
 0x19b   : > { %v1222_v42 = vpop.f32.mrf.mxu1  ;;  %v1103_v54 = vadd.f32 %v1102_v41, %v2603_v33 }
 0x19c   : > { %v2692_v46 = vadd.f32 %v1222_v42, %v998_v35  ;;  %v1104_v7 = vpop.f32.mrf.mxu0  ;;  %v1098_v42 = vadd.f32 %v1097_v34, %v2596_v23 }
 0x19d   : > { %v1224_v47 = vpop.f32.mrf.mxu1 }
 0x19e   : > { %v1107_v48 = vpop.f32.mrf.mxu0 }
 0x19f   : > { %v1227_v49 = vpop.f32.mrf.mxu1  ;;  %v1108_v33 = vadd.f32 %v1107_v48, %v2610_v2 }
 0x1a0   : > { %v2694_v53 = vadd.f32 %v1227_v49, %v1003_v44  ;;  %v1109_v16 = vpop.f32.mrf.mxu0 }
 0x1a1   : > { %v1229_v56 = vpop.f32.mrf.mxu1 }
 0x1a2   : > { %v1112_v57 = vpop.f32.mrf.mxu0 }
 0x1a3   : > { %v1232_v58 = vpop.f32.mrf.mxu1  ;;  %v1113_v16 = vadd.f32 %v1112_v57, %v2617_v52 }
 0x1a4   : > { %v2696_v61 = vadd.f32 %v1232_v58, %v1008_v55  ;;  %v1114_v25 = vpop.f32.mrf.mxu0 }
 0x1a5   : > { %v1234_v63 = vpop.f32.mrf.mxu1 }
 0x1a6   : > { %v1117_v1 = vpop.f32.mrf.mxu0 }
 0x1a7   : > { %v1237_v5 = vpop.f32.mrf.mxu1  ;;  %v1118_v52 = vadd.f32 %v1117_v1, %v2623_v62 }
 0x1a8   : > { %v2698_v8 = vadd.f32 %v1237_v5, %v1013_v0  ;;  %v1119_v35 = vpop.f32.mrf.mxu0  ;;  %v1088_v0 = vadd.f32 %v1087_v15, %v2582_v3 }
 0x1a9   : > { %v1239_v9 = vpop.f32.mrf.mxu1 }
 0x1aa   : > { %v1122_v10 = vpop.f32.mrf.mxu0 }
 0x1ab   : > { %v2700_v17 = vpop.f32.mrf.mxu1  ;;  %v1123_v23 = vadd.f32 %v1122_v10, %v2626_v6 }
 0x1ac   : > { %v1124_v44 = vpop.f32.mrf.mxu0 }
 0x1ad   : > { %v1244_v21 = vpop.f32.mrf.mxu1 }
 0x1ae   : > { %v1127_v27 = vpop.f32.mrf.mxu0 }
 0x1af   : > { %v1701_v55 = vpop.f32.mrf.mxu1  ;;  %v1128_v6 = vadd.f32 %v1127_v27, %v2629_v12 }
 0x1b0   : > { %v1318_v30 = vadd.f32 %v1701_v55, %v1093_v22  ;;  %v1129_v31 = vpop.f32.mrf.mxu0 }
 0x1b1   : > { %v1312_v37 = vpop.f32.mrf.mxu1 }
 0x1b2   : > { %1472 = vst [vmem:[%s2707_s22 + $0x8] sm:$0xff] %v1318_v30  ;;  %v1313_v13 = vadd.f32 %v1312_v37, %v1088_v0  ;;  %v1132_v24 = vpop.f32.mrf.mxu0 }
 0x1b3   : > { %v1704_v40 = vpop.f32.mrf.mxu1  ;;  %v1133_v2 = vadd.f32 %v1132_v24, %v2632_v19 }
 0x1b4   : > { %1471 = vst [vmem:[%s2707_s22] sm:$0xff] %v1313_v13  ;;  %v1328_v7 = vadd.f32 %v1704_v40, %v1103_v54  ;;  %v1134_v47 = vpop.f32.mrf.mxu0 }
 0x1b5   : > { %v1322_v49 = vpop.f32.mrf.mxu1 }
 0x1b6   : > { %1474 = vst [vmem:[%s2707_s22 + $0x18] sm:$0xff] %v1328_v7  ;;  %v1323_v3 = vadd.f32 %v1322_v49, %v1098_v42  ;;  %v1137_v15 = vpop.f32.mrf.mxu0 }
 0x1b7   : > { %v1707_v56 = vpop.f32.mrf.mxu1  ;;  %v1138_v19 = vadd.f32 %v1137_v15, %v2635_v26 }
 0x1b8   : > { %1473 = vst [vmem:[%s2707_s22 + $0x10] sm:$0xff] %v1323_v3  ;;  %v1338_v41 = vadd.f32 %v1707_v56, %v1113_v16  ;;  %v1139_v58 = vpop.f32.mrf.mxu0 }
 0x1b9   : > { %v1332_v25 = vpop.f32.mrf.mxu1 }
 0x1ba   : > { %1476 = vst [vmem:[%s2707_s22 + $0x28] sm:$0xff] %v1338_v41  ;;  %v1333_v34 = vadd.f32 %v1332_v25, %v1108_v33  ;;  %v1142_v63 = vpop.f32.mrf.mxu0 }
 0x1bb   : > { %v1710_v5 = vpop.f32.mrf.mxu1  ;;  %v1143_v62 = vadd.f32 %v1142_v63, %v2638_v32 }
 0x1bc   : > { %1475 = vst [vmem:[%s2707_s22 + $0x20] sm:$0xff] %v1333_v34  ;;  %v1348_v57 = vadd.f32 %v1710_v5, %v1123_v23  ;;  %v1144_v35 = vpop.f32.mrf.mxu0 }
 0x1bd   : > { %v1342_v9 = vpop.f32.mrf.mxu1 }
 0x1be   : > { %1478 = vst [vmem:[%s2707_s22 + $0x38] sm:$0xff] %v1348_v57  ;;  %v1343_v48 = vadd.f32 %v1342_v9, %v1118_v52  ;;  %v1147_v44 = vpop.f32.mrf.mxu0 }
 0x1bf   : > { %v1713_v21 = vpop.f32.mrf.mxu1  ;;  %v1148_v32 = vadd.f32 %v1147_v44, %v2641_v39 }
 0x1c0   : > { %1477 = vst [vmem:[%s2707_s22 + $0x30] sm:$0xff] %v1343_v48  ;;  %v1358_v10 = vadd.f32 %v1713_v21, %v1133_v2  ;;  %v1149_v22 = vpop.f32.mrf.mxu0 }
 0x1c1   : > { %v1352_v55 = vpop.f32.mrf.mxu1 }
 0x1c2   : > { %1480 = vst [vmem:[%s2707_s22 + $0x48] sm:$0xff] %v1358_v10  ;;  %v1353_v1 = vadd.f32 %v1352_v55, %v1128_v6  ;;  %v1152_v0 = vpop.f32.mrf.mxu0 }
 0x1c3   : > { %v1716_v30 = vpop.f32.mrf.mxu1  ;;  %v1153_v12 = vadd.f32 %v1152_v0, %v2644_v45 }
 0x1c4   : > { %1479 = vst [vmem:[%s2707_s22 + $0x40] sm:$0xff] %v1353_v1  ;;  %v1368_v31 = vadd.f32 %v1716_v30, %v1143_v62  ;;  %v1154_v37 = vpop.f32.mrf.mxu0 }
 0x1c5   : > { %v1362_v54 = vpop.f32.mrf.mxu1 }
 0x1c6   : > { %1482 = vst [vmem:[%s2707_s22 + $0x58] sm:$0xff] %v1368_v31  ;;  %v1363_v27 = vadd.f32 %v1362_v54, %v1138_v19  ;;  %v1157_v13 = vpop.f32.mrf.mxu0 }
 0x1c7   : > { %v1719_v24 = vpop.f32.mrf.mxu1  ;;  %v1158_v45 = vadd.f32 %v1157_v13, %v2647_v51 }
 0x1c8   : > { %1481 = vst [vmem:[%s2707_s22 + $0x50] sm:$0xff] %v1363_v27  ;;  %v1378_v40 = vadd.f32 %v1719_v24, %v1153_v12  ;;  %v1159_v42 = vpop.f32.mrf.mxu0 }
 0x1c9   : > { %v1372_v7 = vpop.f32.mrf.mxu1 }
 0x1ca   : > { %1484 = vst [vmem:[%s2707_s22 + $0x68] sm:$0xff] %v1378_v40  ;;  %v1373_v26 = vadd.f32 %v1372_v7, %v1148_v32  ;;  %v1162_v47 = vpop.f32.mrf.mxu0 }
 0x1cb   : > { %v1163_v49 = vadd.f32 %v1162_v47, %v2650_v59  ;;  %v1722_v16 = vpop.f32.mrf.mxu1 }
 0x1cc   : > { %1483 = vst [vmem:[%s2707_s22 + $0x60] sm:$0xff] %v1373_v26  ;;  %v1164_v3 = vpop.f32.mrf.mxu0  ;;  %v1243_v26 = vadd.f32 %v2700_v17, %v2684_v14 }
 0x1cd   : > { %v1388_v15 = vadd.f32 %v1722_v16, %v1163_v49  ;;  %v1382_v56 = vpop.f32.mrf.mxu1 }
 0x1ce   : > { %v1383_v39 = vadd.f32 %v1382_v56, %v1158_v45  ;;  %v1167_v33 = vpop.f32.mrf.mxu0 }
 0x1cf   : > { %1486 = vst [vmem:[%s2707_s22 + $0x78] sm:$0xff] %v1388_v15  ;;  %v1168_v41 = vadd.f32 %v1167_v33, %v2653_v4  ;;  %v1725_v58 = vpop.f32.mrf.mxu1 }
 0x1d0   : > { %1485 = vst [vmem:[%s2707_s22 + $0x70] sm:$0xff] %v1383_v39  ;;  %v1169_v25 = vpop.f32.mrf.mxu0 }
 0x1d1   : > { %v1392_v23 = vpop.f32.mrf.mxu1 }
 0x1d2   : > { %v1393_v34 = vadd.f32 %v1392_v23, %v1168_v41  ;;  %v1172_v59 = vpop.f32.mrf.mxu0 }
 0x1d3   : > { %v1173_v51 = vadd.f32 %v1172_v59, %v2656_v11  ;;  %v1728_v63 = vpop.f32.mrf.mxu1 }
 0x1d4   : > { %1487 = vst [vmem:[%s2707_s22 + $0x80] sm:$0xff] %v1393_v34  ;;  %v1174_v5 = vpop.f32.mrf.mxu0 }
 0x1d5   : > { %v1398_v52 = vadd.f32 %v1725_v58, %v1173_v51  ;;  %v1402_v57 = vpop.f32.mrf.mxu1 }
 0x1d6   : > { %v1177_v35 = vpop.f32.mrf.mxu0 }
 0x1d7   : > { %1488 = vst [vmem:[%s2707_s22 + $0x88] sm:$0xff] %v1398_v52  ;;  %v1178_v9 = vadd.f32 %v1177_v35, %v2659_v20  ;;  %v1731_v4 = vpop.f32.mrf.mxu1 }
 0x1d8   : > { %v1179_v2 = vpop.f32.mrf.mxu0 }
 0x1d9   : > { %v1403_v48 = vadd.f32 %v1402_v57, %v1178_v9  ;;  %v1412_v44 = vpop.f32.mrf.mxu1 }
 0x1da   : > { %v1182_v21 = vpop.f32.mrf.mxu0 }
 0x1db   : > { %1489 = vst [vmem:[%s2707_s22 + $0x90] sm:$0xff] %v1403_v48  ;;  %v1183_v6 = vadd.f32 %v1182_v21, %v2662_v28  ;;  %v1734_v11 = vpop.f32.mrf.mxu1 }
 0x1dc   : > { %v1184_v10 = vpop.f32.mrf.mxu0 }
 0x1dd   : > { %v1408_v22 = vadd.f32 %v1728_v63, %v1183_v6  ;;  %v1422_v55 = vpop.f32.mrf.mxu1 }
 0x1de   : > { %v1187_v62 = vpop.f32.mrf.mxu0 }
 0x1df   : > { %1490 = vst [vmem:[%s2707_s22 + $0x98] sm:$0xff] %v1408_v22  ;;  %v1188_v1 = vadd.f32 %v1187_v62, %v2665_v36  ;;  %v1737_v20 = vpop.f32.mrf.mxu1 }
 0x1e0   : > { %v1438_v0 = vadd.f32 %v1737_v20, %v2688_v29  ;;  %v1189_v30 = vpop.f32.mrf.mxu0 }
 0x1e1   : > { %v1413_v19 = vadd.f32 %v1412_v44, %v1188_v1  ;;  %v1432_v31 = vpop.f32.mrf.mxu1 }
 0x1e2   : > { %1496 = vst [vmem:[%s2707_s22 + $0xc8] sm:$0xff] %v1438_v0  ;;  %v1433_v28 = vadd.f32 %v1432_v31, %v2686_v18  ;;  %v1192_v37 = vpop.f32.mrf.mxu0 }
 0x1e3   : > { %1491 = vst [vmem:[%s2707_s22 + $0xa0] sm:$0xff] %v1413_v19  ;;  %v1193_v54 = vadd.f32 %v1192_v37, %v2668_v43  ;;  %v1740_v12 = vpop.f32.mrf.mxu1 }
 0x1e4   : > { %1495 = vst [vmem:[%s2707_s22 + $0xc0] sm:$0xff] %v1433_v28  ;;  %v1448_v36 = vadd.f32 %v1740_v12, %v2692_v46  ;;  %v1194_v27 = vpop.f32.mrf.mxu0 }
 0x1e5   : > { %v1418_v13 = vadd.f32 %v1731_v4, %v1193_v54  ;;  %v1442_v29 = vpop.f32.mrf.mxu1 }
 0x1e6   : > { %1498 = vst [vmem:[%s2707_s22 + $0xd8] sm:$0xff] %v1448_v36  ;;  %v1443_v24 = vadd.f32 %v1442_v29, %v2690_v38  ;;  %v1197_v32 = vpop.f32.mrf.mxu0 }
 0x1e7   : > { %1492 = vst [vmem:[%s2707_s22 + $0xa8] sm:$0xff] %v1418_v13  ;;  %v1198_v18 = vadd.f32 %v1197_v32, %v2671_v50  ;;  %v1743_v40 = vpop.f32.mrf.mxu1 }
 0x1e8   : > { %1497 = vst [vmem:[%s2707_s22 + $0xd0] sm:$0xff] %v1443_v24  ;;  %v1458_v43 = vadd.f32 %v1743_v40, %v2696_v61  ;;  %v1199_v42 = vpop.f32.mrf.mxu0 }
 0x1e9   : > { %v1423_v46 = vadd.f32 %v1422_v55, %v1198_v18  ;;  %v1452_v7 = vpop.f32.mrf.mxu1 }
 0x1ea   : > { %1500 = vst [vmem:[%s2707_s22 + $0xe8] sm:$0xff] %v1458_v43  ;;  %v1453_v38 = vadd.f32 %v1452_v7, %v2694_v53  ;;  %v1202_v47 = vpop.f32.mrf.mxu0 }
 0x1eb   : > { %1493 = vst [vmem:[%s2707_s22 + $0xb0] sm:$0xff] %v1423_v46  ;;  %v1203_v50 = vadd.f32 %v1202_v47, %v2674_v60  ;;  %v1746_v49 = vpop.f32.mrf.mxu1 }
 0x1ec   : > { %1499 = vst [vmem:[%s2707_s22 + $0xe0] sm:$0xff] %v1453_v38  ;;  %v1468_v16 = vadd.f32 %v1746_v49, %v1243_v26  ;;  %v1204_v61 = vpop.f32.mrf.mxu0 }
 0x1ed   : > { %v1428_v45 = vadd.f32 %v1734_v11, %v1203_v50  ;;  %v1462_v3 = vpop.f32.mrf.mxu1 }
 0x1ee   : > { %1502 = vst [vmem:[%s2707_s22 + $0xf8] sm:$0xff] %v1468_v16  ;;  %v1463_v15 = vadd.f32 %v1462_v3, %v2698_v8 }
 0x1ef   : > { %1494 = vst [vmem:[%s2707_s22 + $0xb8] sm:$0xff] %v1428_v45 }
 0x1f0   : > { %1501 = vst [vmem:[%s2707_s22 + $0xf0] sm:$0xff] %v1463_v15 }
 0x1f1 PF: > { %s13_s14 = sadd.s32 1, %s1859_s14   ;;  %s2786_s12 = smov %s1855_s13 }
 0x1f2   : > { %p10_p5 = scmp.ge.s32.totalorder %s13_s14, 4   ;;  %s2787_s13 = smov %s2789_s15 }
 0x1f4   :  { %12 = sbr.rel (!%p10_p5) target bundleno = 2 (0x2), region = 68 }

</bundles_post_ra>
